<compile_context>
chip_gen: v5e
topology: v5e:2x2
jax: 0.10.0
libtpu: 0.0.40
codegen_flags: <defaults>
</compile_context>

<pallas_src>
import math
import functools

import jax
import jax.numpy as jnp
from jax.experimental import pallas as pl
from jax.experimental.pallas import tpu as pltpu

# Everything is tiny here, so each operand is a single whole-array VMEM block.
VMEM = pl.BlockSpec(memory_space=pltpu.MemorySpace.VMEM)

LN_EPS = 1e-5                # torch.nn.LayerNorm default
BF16 = jnp.bfloat16
F32 = jnp.float32


# ------------------------ packed-parameter layout ---------------------------

def _ru(x, m=128):
    """Round up to a multiple of m (lane-aligned column offsets)."""
    return ((x + m - 1) // m) * m


def _enc_layout(E, F):
    """Column offsets of [wqkv, wo, w1] in the packed encoder weight slab."""
    o_qkv = 0
    o_wo = o_qkv + _ru(3 * E)
    o_w1 = o_wo + _ru(E)
    return o_qkv, o_wo, o_w1, o_w1 + _ru(F)


def _dec_layout(E, F):
    """Column offsets of [wqkv, wo1, wq, wkv, wo2, w1] in the decoder slab."""
    o_qkv = 0
    o_wo1 = o_qkv + _ru(3 * E)
    o_wq = o_wo1 + _ru(E)
    o_wkv = o_wq + _ru(E)
    o_wo2 = o_wkv + _ru(2 * E)
    o_w1 = o_wo2 + _ru(E)
    return o_qkv, o_wo1, o_wq, o_wkv, o_wo2, o_w1, o_w1 + _ru(F)


# Row indices inside the coalesced per-layer vector slabs (biases + LN params).
(E_BQKV, E_BO, E_N1G, E_N1B, E_B1, E_B2, E_N2G, E_N2B) = range(8)
(D_BQKV, D_BO1, D_N1G, D_N1B, D_BQ, D_BKV, D_BO2, D_N2G, D_N2B,
 D_B1, D_B2, D_N3G, D_N3B) = range(13)


# --------------------------- in-kernel helpers ------------------------------

def _layer_norm(x, g, b):
    """LayerNorm over the last axis (f32).  x:(R,E), g/b:(1,E)."""
    mu = jnp.mean(x, axis=-1, keepdims=True)
    c = x - mu
    var = jnp.mean(c * c, axis=-1, keepdims=True)
    return c * jax.lax.rsqrt(var + LN_EPS) * g + b


def _dot(a_f32, w_bf16):
    """MXU matmul: bf16 operands, f32 accumulation."""
    return jnp.dot(a_f32.astype(BF16), w_bf16, preferred_element_type=F32)


def _attention(q, k, v, wo, bo, *, n, lq, lk, nhead):
    """Per-batch multi-head attention — no masks, no cross-batch scores.

    q: (n*lq, E) f32, k/v: (n*lk, E) f32 (already projected, batch-major rows).
    wo: (E, E) bf16 output-projection weight, bo: (1, E) f32 bias.
    """
    E = q.shape[-1]
    dh = E // nhead
    scale = 1.0 / math.sqrt(dh)
    q3 = q.reshape(n, lq, E)
    k3 = k.reshape(n, lk, E)
    v3 = v.reshape(n, lk, E)
    heads = []
    for h in range(nhead):     # static loop; TODO(synk): fold heads into batch
        lo = h * dh
        qh = q3[:, :, lo:lo + dh].astype(BF16)
        kh = k3[:, :, lo:lo + dh].astype(BF16)
        vh = v3[:, :, lo:lo + dh].astype(BF16)
        s = jnp.einsum('nqd,nkd->nqk', qh, kh,
                       preferred_element_type=F32) * scale
        m = jnp.max(s, axis=-1, keepdims=True)
        p = jnp.exp(s - m)                             # softmax stays f32
        # approx reciprocal on EUP; bf16 matmuls dominate any numeric delta.
        p = p * pl.reciprocal(jnp.sum(p, axis=-1, keepdims=True), approx=True)
        heads.append(jnp.einsum('nqk,nkd->nqd', p.astype(BF16), vh,
                                preferred_element_type=F32))
    ctx = jnp.concatenate(heads, axis=-1).reshape(n * lq, E)
    # Single full-width output projection (E-deep MXU contraction).
    return _dot(ctx, wo) + bo


# ------------------------------ fused kernel --------------------------------

def _transformer_kernel(src_ref, tgt_ref, pe_ref,
                        e_wA_ref, e_w2_ref, e_vec_ref,
                        d_wA_ref, d_w2_ref, d_vec_ref,
                        fin_ref, out_ref,
                        *, num_layers, nhead, N, S, T):
    E = src_ref.shape[-1]
    F = e_w2_ref.shape[1]
    eo_qkv, eo_wo, eo_w1, _ = _enc_layout(E, F)
    do_qkv, do_wo1, do_wq, do_wkv, do_wo2, do_w1, _ = _dec_layout(E, F)

    # src + pos_encoder(src) == 2*src + pe (PE indexed by the batch dim).
    x = 2.0 * src_ref[...] + pe_ref[...]

    # ------------------------------ encoder ------------------------------
    for l in range(num_layers):   # TODO(synk): lax.fori_loop once L >= ~6
        wA = e_wA_ref[l]          # (E, width) bf16, lane-aligned segments
        ev = e_vec_ref[l]         # (8, vw) f32 coalesced biases / LN params

        qkv = _dot(x, wA[:, eo_qkv:eo_qkv + 3 * E]) + ev[E_BQKV:E_BQKV + 1, :3 * E]
        sa = _attention(qkv[:, 0:E], qkv[:, E:2 * E], qkv[:, 2 * E:3 * E],
                        wA[:, eo_wo:eo_wo + E], ev[E_BO:E_BO + 1, :E],
                        n=N, lq=S, lk=S, nhead=nhead)
        x = _layer_norm(x + sa, ev[E_N1G:E_N1G + 1, :E], ev[E_N1B:E_N1B + 1, :E])

        h = jnp.maximum(
            _dot(x, wA[:, eo_w1:eo_w1 + F]) + ev[E_B1:E_B1 + 1, :F], 0.0)
        ff = _dot(h, e_w2_ref[l]) + ev[E_B2:E_B2 + 1, :E]
        x = _layer_norm(x + ff, ev[E_N2G:E_N2G + 1, :E], ev[E_N2B:E_N2B + 1, :E])

    mem = _layer_norm(x, fin_ref[0:1, :], fin_ref[1:2, :])

    # ------------------------------ decoder ------------------------------
    y = tgt_ref[...]
    for l in range(num_layers):
        wA = d_wA_ref[l]
        dv = d_vec_ref[l]

        qkv = _dot(y, wA[:, do_qkv:do_qkv + 3 * E]) + dv[D_BQKV:D_BQKV + 1, :3 * E]
        sa = _attention(qkv[:, 0:E], qkv[:, E:2 * E], qkv[:, 2 * E:3 * E],
                        wA[:, do_wo1:do_wo1 + E], dv[D_BO1:D_BO1 + 1, :E],
                        n=N, lq=T, lk=T, nhead=nhead)
        y = _layer_norm(y + sa, dv[D_N1G:D_N1G + 1, :E], dv[D_N1B:D_N1B + 1, :E])

        q = _dot(y, wA[:, do_wq:do_wq + E]) + dv[D_BQ:D_BQ + 1, :E]
        kv = _dot(mem, wA[:, do_wkv:do_wkv + 2 * E]) + dv[D_BKV:D_BKV + 1, :2 * E]
        ca = _attention(q, kv[:, 0:E], kv[:, E:2 * E],
                        wA[:, do_wo2:do_wo2 + E], dv[D_BO2:D_BO2 + 1, :E],
                        n=N, lq=T, lk=S, nhead=nhead)
        y = _layer_norm(y + ca, dv[D_N2G:D_N2G + 1, :E], dv[D_N2B:D_N2B + 1, :E])

        h = jnp.maximum(
            _dot(y, wA[:, do_w1:do_w1 + F]) + dv[D_B1:D_B1 + 1, :F], 0.0)
        ff = _dot(h, d_w2_ref[l]) + dv[D_B2:D_B2 + 1, :E]
        y = _layer_norm(y + ff, dv[D_N3G:D_N3G + 1, :E], dv[D_N3B:D_N3B + 1, :E])

    out_ref[...] = _layer_norm(y, fin_ref[2:3, :], fin_ref[3:4, :])


# ---------------- one-time parameter packing (load-time prep) ---------------

def pack_params(params):
    """bf16-cast matmul weights and pack them into lane-aligned per-layer
    slabs; coalesce the ~30 tiny bias / LayerNorm vectors into one f32 slab
    per stack.  Done once at weight-load time, not per forward call."""
    E = params['e_wo'].shape[-1]
    F = params['e_w1'].shape[-1]
    L = params['e_wqkv'].shape[0]

    eo_qkv, eo_wo, eo_w1, e_width = _enc_layout(E, F)
    e_wA = jnp.zeros((L, E, e_width), BF16)
    e_wA = e_wA.at[:, :, eo_qkv:eo_qkv + 3 * E].set(params['e_wqkv'].astype(BF16))
    e_wA = e_wA.at[:, :, eo_wo:eo_wo + E].set(params['e_wo'].astype(BF16))
    e_wA = e_wA.at[:, :, eo_w1:eo_w1 + F].set(params['e_w1'].astype(BF16))

    do_qkv, do_wo1, do_wq, do_wkv, do_wo2, do_w1, d_width = _dec_layout(E, F)
    d_wA = jnp.zeros((L, E, d_width), BF16)
    d_wA = d_wA.at[:, :, do_qkv:do_qkv + 3 * E].set(params['d_wqkv'].astype(BF16))
    d_wA = d_wA.at[:, :, do_wo1:do_wo1 + E].set(params['d_wo1'].astype(BF16))
    d_wA = d_wA.at[:, :, do_wq:do_wq + E].set(params['d_wq'].astype(BF16))
    d_wA = d_wA.at[:, :, do_wkv:do_wkv + 2 * E].set(params['d_wkv'].astype(BF16))
    d_wA = d_wA.at[:, :, do_wo2:do_wo2 + E].set(params['d_wo2'].astype(BF16))
    d_wA = d_wA.at[:, :, do_w1:do_w1 + F].set(params['d_w1'].astype(BF16))

    vw = max(3 * E, 2 * E, F)

    def put(slab, row, arr, width):
        return slab.at[:, row, :width].set(arr[:, 0, :])

    e_vec = jnp.zeros((L, 8, vw), F32)
    e_vec = put(e_vec, E_BQKV, params['e_bqkv'], 3 * E)
    e_vec = put(e_vec, E_BO, params['e_bo'], E)
    e_vec = put(e_vec, E_N1G, params['e_n1g'], E)
    e_vec = put(e_vec, E_N1B, params['e_n1b'], E)
    e_vec = put(e_vec, E_B1, params['e_b1'], F)
    e_vec = put(e_vec, E_B2, params['e_b2'], E)
    e_vec = put(e_vec, E_N2G, params['e_n2g'], E)
    e_vec = put(e_vec, E_N2B, params['e_n2b'], E)

    d_vec = jnp.zeros((L, 13, vw), F32)
    d_vec = put(d_vec, D_BQKV, params['d_bqkv'], 3 * E)
    d_vec = put(d_vec, D_BO1, params['d_bo1'], E)
    d_vec = put(d_vec, D_N1G, params['d_n1g'], E)
    d_vec = put(d_vec, D_N1B, params['d_n1b'], E)
    d_vec = put(d_vec, D_BQ, params['d_bq'], E)
    d_vec = put(d_vec, D_BKV, params['d_bkv'], 2 * E)
    d_vec = put(d_vec, D_BO2, params['d_bo2'], E)
    d_vec = put(d_vec, D_N2G, params['d_n2g'], E)
    d_vec = put(d_vec, D_N2B, params['d_n2b'], E)
    d_vec = put(d_vec, D_B1, params['d_b1'], F)
    d_vec = put(d_vec, D_B2, params['d_b2'], E)
    d_vec = put(d_vec, D_N3G, params['d_n3g'], E)
    d_vec = put(d_vec, D_N3B, params['d_n3b'], E)

    fin = jnp.stack([params['enc_ng'][0], params['enc_nb'][0],
                     params['dec_ng'][0], params['dec_nb'][0]], axis=0)  # (4,E)

    return dict(pe=params['pos_encoding'],
                e_wA=e_wA, e_w2=params['e_w2'].astype(BF16), e_vec=e_vec,
                d_wA=d_wA, d_w2=params['d_w2'].astype(BF16), d_vec=d_vec,
                fin=fin)


# ------------------------- wrapper (plain JAX glue) --------------------------

def transformer_forward(src, tgt, packed, *, nhead):
    """src: (S, N, E), tgt: (T, N, E) — PyTorch batch_first=False layout."""
    S, N, E = src.shape
    T = tgt.shape[0]
    L = packed['e_wA'].shape[0]

    # Layout plumbing (batch-major 2-D slabs + PE row expansion) lives out
    # here, once per call; all compute lives in the single fused pallas_call.
    src2 = jnp.transpose(src, (1, 0, 2)).reshape(N * S, E)
    tgt2 = jnp.transpose(tgt, (1, 0, 2)).reshape(N * T, E)

    # PositionalEncoding quirk: the table is sliced by x.size(1) == batch dim.
    pe_rows = jnp.repeat(packed['pe'][0, :N, :], S, axis=0)   # (N*S, E)

    inputs = (src2, tgt2, pe_rows,
              packed['e_wA'], packed['e_w2'], packed['e_vec'],
              packed['d_wA'], packed['d_w2'], packed['d_vec'], packed['fin'])

    # Scoped-VMEM limit sized from the real resident footprint (with headroom
    # for activations), clamped below every generation's physical VMEM.
    footprint = sum(a.size * a.dtype.itemsize for a in inputs) + N * T * E * 4
    vmem_limit = int(min(64 * 2 ** 20, max(32 * 2 ** 20, 6 * footprint)))

    out2 = pl.pallas_call(
        functools.partial(_transformer_kernel, num_layers=L, nhead=nhead,
                          N=N, S=S, T=T),
        out_shape=jax.ShapeDtypeStruct((N * T, E), jnp.float32),
        in_specs=[VMEM] * len(inputs),
        out_specs=VMEM,
        compiler_params=pltpu.CompilerParams(vmem_limit_bytes=vmem_limit),
    )(*inputs)

    return jnp.transpose(out2.reshape(N, T, E), (1, 0, 2))


# ------------------------- deterministic init ------------------------------

def timing_signal(max_len, d_model):
    pos = jnp.arange(max_len, dtype=jnp.float32)[:, None]
    div = jnp.exp(jnp.arange(0, d_model, 2, dtype=jnp.float32)
                  * (-(math.log(10000.0) / d_model)))
    pe = jnp.zeros((max_len, d_model), jnp.float32)
    pe = pe.at[:, 0::2].set(jnp.sin(pos * div))
    pe = pe.at[:, 1::2].set(jnp.cos(pos * div))
    return pe[None]  # (1, max_len, d_model)


def init_params(key, d_model, nhead, num_layers, dim_ff, max_len):
    E, F, L = d_model, dim_ff, num_layers
    keys = iter(jax.random.split(key, 64))

    def w(*shape, scale=0.05):
        return (scale * jax.random.normal(next(keys), shape)).astype(jnp.float32)

    def ones(*s):
        return jnp.ones(s, jnp.float32)

    def zeros(*s):
        return jnp.zeros(s, jnp.float32)

    return dict(
        pos_encoding=timing_signal(max_len, E),
        # encoder stacks (leading dim = num_layers)
        e_wqkv=w(L, E, 3 * E), e_bqkv=w(L, 1, 3 * E),
        e_wo=w(L, E, E), e_bo=w(L, 1, E),
        e_n1g=ones(L, 1, E), e_n1b=zeros(L, 1, E),
        e_w1=w(L, E, F), e_b1=w(L, 1, F),
        e_w2=w(L, F, E), e_b2=w(L, 1, E),
        e_n2g=ones(L, 1, E), e_n2b=zeros(L, 1, E),
        # decoder stacks
        d_wqkv=w(L, E, 3 * E), d_bqkv=w(L, 1, 3 * E),
        d_wo1=w(L, E, E), d_bo1=w(L, 1, E),
        d_n1g=ones(L, 1, E), d_n1b=zeros(L, 1, E),
        d_wq=w(L, E, E), d_bq=w(L, 1, E),
        d_wkv=w(L, E, 2 * E), d_bkv=w(L, 1, 2 * E),
        d_wo2=w(L, E, E), d_bo2=w(L, 1, E),
        d_n2g=ones(L, 1, E), d_n2b=zeros(L, 1, E),
        d_w1=w(L, E, F), d_b1=w(L, 1, F),
        d_w2=w(L, F, E), d_b2=w(L, 1, E),
        d_n3g=ones(L, 1, E), d_n3b=zeros(L, 1, E),
        # stack-final norms
        enc_ng=ones(1, E), enc_nb=zeros(1, E),
        dec_ng=ones(1, E), dec_nb=zeros(1, E),
    )


# --------------------------------- main -------------------------------------

if __name__ == "__main__":
    d_model, nhead, num_layers, dim_ff, max_len = 32, 4, 2, 64, 64
    S, T, N = 8, 8, 2  # src seq, tgt seq, batch

    key = jax.random.PRNGKey(0)
    k1, k2, k3 = jax.random.split(key, 3)
    src = jax.random.normal(k1, (S, N, d_model), dtype=jnp.float32)
    tgt = jax.random.normal(k2, (T, N, d_model), dtype=jnp.float32)
    params = init_params(k3, d_model, nhead, num_layers, dim_ff, max_len)

    packed = pack_params(params)   # one-time weight preprocessing

    fwd = jax.jit(transformer_forward, static_argnames=('nhead',))
    out = fwd(src, tgt, packed, nhead=nhead)
    out = jax.block_until_ready(out)
    assert out.shape == (T, N, d_model), out.shape
    assert bool(jnp.all(jnp.isfinite(out)))
    print("KERNEL_OK")
</pallas_src>

<mosaic_0001>
module attributes {stable_mosaic.version = 11 : i64} {
  func.func @_transformer_kernel(%arg0: memref<16x32xf32, #tpu.memory_space<vmem>>, %arg1: memref<16x32xf32, #tpu.memory_space<vmem>>, %arg2: memref<16x32xf32, #tpu.memory_space<vmem>>, %arg3: memref<2x32x384xbf16, #tpu.memory_space<vmem>>, %arg4: memref<2x64x32xbf16, #tpu.memory_space<vmem>>, %arg5: memref<2x8x96xf32, #tpu.memory_space<vmem>>, %arg6: memref<2x32x768xbf16, #tpu.memory_space<vmem>>, %arg7: memref<2x64x32xbf16, #tpu.memory_space<vmem>>, %arg8: memref<2x13x96xf32, #tpu.memory_space<vmem>>, %arg9: memref<4x32xf32, #tpu.memory_space<vmem>>, %arg10: memref<16x32xf32, #tpu.memory_space<vmem>>) attributes {dimension_semantics = [], scalar_prefetch = 0 : i64, scratch_operands = 0 : i64, tpu.core_type = #tpu.core_type<tc>} {
    %c0 = arith.constant 0 : index
    %c0_0 = arith.constant 0 : index
    %0 = vector.load %arg0[%c0, %c0_0] : memref<16x32xf32, #tpu.memory_space<vmem>>, vector<16x32xf32>
    %cst = arith.constant 2.000000e+00 : f32
    %1 = vector.broadcast %cst : f32 to vector<16x32xf32>
    %2 = arith.mulf %1, %0 : vector<16x32xf32>
    %c0_1 = arith.constant 0 : index
    %c0_2 = arith.constant 0 : index
    %3 = vector.load %arg2[%c0_1, %c0_2] : memref<16x32xf32, #tpu.memory_space<vmem>>, vector<16x32xf32>
    %4 = arith.addf %2, %3 : vector<16x32xf32>
    %c0_3 = arith.constant 0 : index
    %c0_4 = arith.constant 0 : index
    %c0_5 = arith.constant 0 : index
    %5 = vector.load %arg3[%c0_3, %c0_4, %c0_5] : memref<2x32x384xbf16, #tpu.memory_space<vmem>>, vector<1x32x384xbf16>
    %6 = vector.shape_cast %5 : vector<1x32x384xbf16> to vector<32x384xbf16>
    %c0_6 = arith.constant 0 : index
    %c0_7 = arith.constant 0 : index
    %c0_8 = arith.constant 0 : index
    %7 = vector.load %arg5[%c0_6, %c0_7, %c0_8] : memref<2x8x96xf32, #tpu.memory_space<vmem>>, vector<1x8x96xf32>
    %8 = vector.shape_cast %7 : vector<1x8x96xf32> to vector<8x96xf32>
    %9 = vector.extract_strided_slice %6 {offsets = [0, 0], sizes = [32, 96], strides = [1, 1]} : vector<32x384xbf16> to vector<32x96xbf16>
    %10 = arith.truncf %4 : vector<16x32xf32> to vector<16x32xbf16>
    %cst_9 = arith.constant dense<0.000000e+00> : vector<16x96xf32>
    %11 = tpu.matmul %10, %9, %cst_9 {dimension_numbers = #tpu.dot_dimension_numbers<[1], [0], [0], [1], [0, 0, 1, 1], [], []>} : vector<16x32xbf16>, vector<32x96xbf16>, vector<16x96xf32> -> vector<16x96xf32>
    %12 = vector.extract_strided_slice %8 {offsets = [0, 0], sizes = [1, 96], strides = [1, 1]} : vector<8x96xf32> to vector<1x96xf32>
    %13 = vector.broadcast %12 : vector<1x96xf32> to vector<16x96xf32>
    %14 = arith.addf %11, %13 : vector<16x96xf32>
    %15 = vector.extract_strided_slice %14 {offsets = [0, 0], sizes = [16, 32], strides = [1, 1]} : vector<16x96xf32> to vector<16x32xf32>
    %16 = vector.extract_strided_slice %14 {offsets = [0, 32], sizes = [16, 32], strides = [1, 1]} : vector<16x96xf32> to vector<16x32xf32>
    %17 = vector.extract_strided_slice %14 {offsets = [0, 64], sizes = [16, 32], strides = [1, 1]} : vector<16x96xf32> to vector<16x32xf32>
    %18 = vector.extract_strided_slice %6 {offsets = [0, 128], sizes = [32, 32], strides = [1, 1]} : vector<32x384xbf16> to vector<32x32xbf16>
    %19 = vector.extract_strided_slice %8 {offsets = [1, 0], sizes = [1, 32], strides = [1, 1]} : vector<8x96xf32> to vector<1x32xf32>
    %20 = vector.shape_cast %15 : vector<16x32xf32> to vector<2x8x32xf32>
    %21 = vector.shape_cast %16 : vector<16x32xf32> to vector<2x8x32xf32>
    %22 = vector.shape_cast %17 : vector<16x32xf32> to vector<2x8x32xf32>
    %23 = vector.extract_strided_slice %20 {offsets = [0, 0, 0], sizes = [2, 8, 8], strides = [1, 1, 1]} : vector<2x8x32xf32> to vector<2x8x8xf32>
    %24 = arith.truncf %23 : vector<2x8x8xf32> to vector<2x8x8xbf16>
    %25 = vector.extract_strided_slice %21 {offsets = [0, 0, 0], sizes = [2, 8, 8], strides = [1, 1, 1]} : vector<2x8x32xf32> to vector<2x8x8xf32>
    %26 = arith.truncf %25 : vector<2x8x8xf32> to vector<2x8x8xbf16>
    %27 = vector.extract_strided_slice %22 {offsets = [0, 0, 0], sizes = [2, 8, 8], strides = [1, 1, 1]} : vector<2x8x32xf32> to vector<2x8x8xf32>
    %28 = arith.truncf %27 : vector<2x8x8xf32> to vector<2x8x8xbf16>
    "tpu.trace_start"() <{level = 10 : i32, message = "nqd,nkd->nqk"}> : () -> ()
    %cst_10 = arith.constant dense<0.000000e+00> : vector<2x8x8xf32>
    %29 = tpu.matmul %24, %26, %cst_10 {dimension_numbers = #tpu.dot_dimension_numbers<[2], [2], [1], [1], [0, 0, 0, 1, 1, 1], [0], [0]>} : vector<2x8x8xbf16>, vector<2x8x8xbf16>, vector<2x8x8xf32> -> vector<2x8x8xf32>
    "tpu.trace_stop"() : () -> ()
    %cst_11 = arith.constant 0.353553385 : f32
    %30 = vector.broadcast %cst_11 : f32 to vector<2x8x8xf32>
    %31 = arith.mulf %29, %30 : vector<2x8x8xf32>
    %cst_12 = arith.constant dense<0xFF800000> : vector<2x8xf32>
    %32 = vector.multi_reduction <maximumf>, %31, %cst_12 [2] : vector<2x8x8xf32> to vector<2x8xf32>
    %33 = vector.shape_cast %32 : vector<2x8xf32> to vector<2x8x1xf32>
    %34 = vector.broadcast %33 : vector<2x8x1xf32> to vector<2x8x8xf32>
    %35 = arith.subf %31, %34 : vector<2x8x8xf32>
    %36 = math.exp %35 : vector<2x8x8xf32>
    %cst_13 = arith.constant dense<0.000000e+00> : vector<2x8xf32>
    %37 = vector.multi_reduction <add>, %36, %cst_13 [2] : vector<2x8x8xf32> to vector<2x8xf32>
    %38 = vector.shape_cast %37 : vector<2x8xf32> to vector<2x8x1xf32>
    %39 = tpu.reciprocal %38 {approx = true} : vector<2x8x1xf32> -> vector<2x8x1xf32>
    %40 = vector.broadcast %39 : vector<2x8x1xf32> to vector<2x8x8xf32>
    %41 = arith.mulf %36, %40 : vector<2x8x8xf32>
    %42 = arith.truncf %41 : vector<2x8x8xf32> to vector<2x8x8xbf16>
    "tpu.trace_start"() <{level = 10 : i32, message = "nqk,nkd->nqd"}> : () -> ()
    %cst_14 = arith.constant dense<0.000000e+00> : vector<2x8x8xf32>
    %43 = tpu.matmul %42, %28, %cst_14 {dimension_numbers = #tpu.dot_dimension_numbers<[2], [1], [1], [2], [0, 0, 0, 1, 1, 2], [0], [0]>} : vector<2x8x8xbf16>, vector<2x8x8xbf16>, vector<2x8x8xf32> -> vector<2x8x8xf32>
    "tpu.trace_stop"() : () -> ()
    %44 = vector.extract_strided_slice %20 {offsets = [0, 0, 8], sizes = [2, 8, 8], strides = [1, 1, 1]} : vector<2x8x32xf32> to vector<2x8x8xf32>
    %45 = arith.truncf %44 : vector<2x8x8xf32> to vector<2x8x8xbf16>
    %46 = vector.extract_strided_slice %21 {offsets = [0, 0, 8], sizes = [2, 8, 8], strides = [1, 1, 1]} : vector<2x8x32xf32> to vector<2x8x8xf32>
    %47 = arith.truncf %46 : vector<2x8x8xf32> to vector<2x8x8xbf16>
    %48 = vector.extract_strided_slice %22 {offsets = [0, 0, 8], sizes = [2, 8, 8], strides = [1, 1, 1]} : vector<2x8x32xf32> to vector<2x8x8xf32>
    %49 = arith.truncf %48 : vector<2x8x8xf32> to vector<2x8x8xbf16>
    "tpu.trace_start"() <{level = 10 : i32, message = "nqd,nkd->nqk"}> : () -> ()
    %cst_15 = arith.constant dense<0.000000e+00> : vector<2x8x8xf32>
    %50 = tpu.matmul %45, %47, %cst_15 {dimension_numbers = #tpu.dot_dimension_numbers<[2], [2], [1], [1], [0, 0, 0, 1, 1, 1], [0], [0]>} : vector<2x8x8xbf16>, vector<2x8x8xbf16>, vector<2x8x8xf32> -> vector<2x8x8xf32>
    "tpu.trace_stop"() : () -> ()
    %cst_16 = arith.constant 0.353553385 : f32
    %51 = vector.broadcast %cst_16 : f32 to vector<2x8x8xf32>
    %52 = arith.mulf %50, %51 : vector<2x8x8xf32>
    %cst_17 = arith.constant dense<0xFF800000> : vector<2x8xf32>
    %53 = vector.multi_reduction <maximumf>, %52, %cst_17 [2] : vector<2x8x8xf32> to vector<2x8xf32>
    %54 = vector.shape_cast %53 : vector<2x8xf32> to vector<2x8x1xf32>
    %55 = vector.broadcast %54 : vector<2x8x1xf32> to vector<2x8x8xf32>
    %56 = arith.subf %52, %55 : vector<2x8x8xf32>
    %57 = math.exp %56 : vector<2x8x8xf32>
    %cst_18 = arith.constant dense<0.000000e+00> : vector<2x8xf32>
    %58 = vector.multi_reduction <add>, %57, %cst_18 [2] : vector<2x8x8xf32> to vector<2x8xf32>
    %59 = vector.shape_cast %58 : vector<2x8xf32> to vector<2x8x1xf32>
    %60 = tpu.reciprocal %59 {approx = true} : vector<2x8x1xf32> -> vector<2x8x1xf32>
    %61 = vector.broadcast %60 : vector<2x8x1xf32> to vector<2x8x8xf32>
    %62 = arith.mulf %57, %61 : vector<2x8x8xf32>
    %63 = arith.truncf %62 : vector<2x8x8xf32> to vector<2x8x8xbf16>
    "tpu.trace_start"() <{level = 10 : i32, message = "nqk,nkd->nqd"}> : () -> ()
    %cst_19 = arith.constant dense<0.000000e+00> : vector<2x8x8xf32>
    %64 = tpu.matmul %63, %49, %cst_19 {dimension_numbers = #tpu.dot_dimension_numbers<[2], [1], [1], [2], [0, 0, 0, 1, 1, 2], [0], [0]>} : vector<2x8x8xbf16>, vector<2x8x8xbf16>, vector<2x8x8xf32> -> vector<2x8x8xf32>
    "tpu.trace_stop"() : () -> ()
    %65 = vector.extract_strided_slice %20 {offsets = [0, 0, 16], sizes = [2, 8, 8], strides = [1, 1, 1]} : vector<2x8x32xf32> to vector<2x8x8xf32>
    %66 = arith.truncf %65 : vector<2x8x8xf32> to vector<2x8x8xbf16>
    %67 = vector.extract_strided_slice %21 {offsets = [0, 0, 16], sizes = [2, 8, 8], strides = [1, 1, 1]} : vector<2x8x32xf32> to vector<2x8x8xf32>
    %68 = arith.truncf %67 : vector<2x8x8xf32> to vector<2x8x8xbf16>
    %69 = vector.extract_strided_slice %22 {offsets = [0, 0, 16], sizes = [2, 8, 8], strides = [1, 1, 1]} : vector<2x8x32xf32> to vector<2x8x8xf32>
    %70 = arith.truncf %69 : vector<2x8x8xf32> to vector<2x8x8xbf16>
    "tpu.trace_start"() <{level = 10 : i32, message = "nqd,nkd->nqk"}> : () -> ()
    %cst_20 = arith.constant dense<0.000000e+00> : vector<2x8x8xf32>
    %71 = tpu.matmul %66, %68, %cst_20 {dimension_numbers = #tpu.dot_dimension_numbers<[2], [2], [1], [1], [0, 0, 0, 1, 1, 1], [0], [0]>} : vector<2x8x8xbf16>, vector<2x8x8xbf16>, vector<2x8x8xf32> -> vector<2x8x8xf32>
    "tpu.trace_stop"() : () -> ()
    %cst_21 = arith.constant 0.353553385 : f32
    %72 = vector.broadcast %cst_21 : f32 to vector<2x8x8xf32>
    %73 = arith.mulf %71, %72 : vector<2x8x8xf32>
    %cst_22 = arith.constant dense<0xFF800000> : vector<2x8xf32>
    %74 = vector.multi_reduction <maximumf>, %73, %cst_22 [2] : vector<2x8x8xf32> to vector<2x8xf32>
    %75 = vector.shape_cast %74 : vector<2x8xf32> to vector<2x8x1xf32>
    %76 = vector.broadcast %75 : vector<2x8x1xf32> to vector<2x8x8xf32>
    %77 = arith.subf %73, %76 : vector<2x8x8xf32>
    %78 = math.exp %77 : vector<2x8x8xf32>
    %cst_23 = arith.constant dense<0.000000e+00> : vector<2x8xf32>
    %79 = vector.multi_reduction <add>, %78, %cst_23 [2] : vector<2x8x8xf32> to vector<2x8xf32>
    %80 = vector.shape_cast %79 : vector<2x8xf32> to vector<2x8x1xf32>
    %81 = tpu.reciprocal %80 {approx = true} : vector<2x8x1xf32> -> vector<2x8x1xf32>
    %82 = vector.broadcast %81 : vector<2x8x1xf32> to vector<2x8x8xf32>
    %83 = arith.mulf %78, %82 : vector<2x8x8xf32>
    %84 = arith.truncf %83 : vector<2x8x8xf32> to vector<2x8x8xbf16>
    "tpu.trace_start"() <{level = 10 : i32, message = "nqk,nkd->nqd"}> : () -> ()
    %cst_24 = arith.constant dense<0.000000e+00> : vector<2x8x8xf32>
    %85 = tpu.matmul %84, %70, %cst_24 {dimension_numbers = #tpu.dot_dimension_numbers<[2], [1], [1], [2], [0, 0, 0, 1, 1, 2], [0], [0]>} : vector<2x8x8xbf16>, vector<2x8x8xbf16>, vector<2x8x8xf32> -> vector<2x8x8xf32>
    "tpu.trace_stop"() : () -> ()
    %86 = vector.extract_strided_slice %20 {offsets = [0, 0, 24], sizes = [2, 8, 8], strides = [1, 1, 1]} : vector<2x8x32xf32> to vector<2x8x8xf32>
    %87 = arith.truncf %86 : vector<2x8x8xf32> to vector<2x8x8xbf16>
    %88 = vector.extract_strided_slice %21 {offsets = [0, 0, 24], sizes = [2, 8, 8], strides = [1, 1, 1]} : vector<2x8x32xf32> to vector<2x8x8xf32>
    %89 = arith.truncf %88 : vector<2x8x8xf32> to vector<2x8x8xbf16>
    %90 = vector.extract_strided_slice %22 {offsets = [0, 0, 24], sizes = [2, 8, 8], strides = [1, 1, 1]} : vector<2x8x32xf32> to vector<2x8x8xf32>
    %91 = arith.truncf %90 : vector<2x8x8xf32> to vector<2x8x8xbf16>
    "tpu.trace_start"() <{level = 10 : i32, message = "nqd,nkd->nqk"}> : () -> ()
    %cst_25 = arith.constant dense<0.000000e+00> : vector<2x8x8xf32>
    %92 = tpu.matmul %87, %89, %cst_25 {dimension_numbers = #tpu.dot_dimension_numbers<[2], [2], [1], [1], [0, 0, 0, 1, 1, 1], [0], [0]>} : vector<2x8x8xbf16>, vector<2x8x8xbf16>, vector<2x8x8xf32> -> vector<2x8x8xf32>
    "tpu.trace_stop"() : () -> ()
    %cst_26 = arith.constant 0.353553385 : f32
    %93 = vector.broadcast %cst_26 : f32 to vector<2x8x8xf32>
    %94 = arith.mulf %92, %93 : vector<2x8x8xf32>
    %cst_27 = arith.constant dense<0xFF800000> : vector<2x8xf32>
    %95 = vector.multi_reduction <maximumf>, %94, %cst_27 [2] : vector<2x8x8xf32> to vector<2x8xf32>
    %96 = vector.shape_cast %95 : vector<2x8xf32> to vector<2x8x1xf32>
    %97 = vector.broadcast %96 : vector<2x8x1xf32> to vector<2x8x8xf32>
    %98 = arith.subf %94, %97 : vector<2x8x8xf32>
    %99 = math.exp %98 : vector<2x8x8xf32>
    %cst_28 = arith.constant dense<0.000000e+00> : vector<2x8xf32>
    %100 = vector.multi_reduction <add>, %99, %cst_28 [2] : vector<2x8x8xf32> to vector<2x8xf32>
    %101 = vector.shape_cast %100 : vector<2x8xf32> to vector<2x8x1xf32>
    %102 = tpu.reciprocal %101 {approx = true} : vector<2x8x1xf32> -> vector<2x8x1xf32>
    %103 = vector.broadcast %102 : vector<2x8x1xf32> to vector<2x8x8xf32>
    %104 = arith.mulf %99, %103 : vector<2x8x8xf32>
    %105 = arith.truncf %104 : vector<2x8x8xf32> to vector<2x8x8xbf16>
    "tpu.trace_start"() <{level = 10 : i32, message = "nqk,nkd->nqd"}> : () -> ()
    %cst_29 = arith.constant dense<0.000000e+00> : vector<2x8x8xf32>
    %106 = tpu.matmul %105, %91, %cst_29 {dimension_numbers = #tpu.dot_dimension_numbers<[2], [1], [1], [2], [0, 0, 0, 1, 1, 2], [0], [0]>} : vector<2x8x8xbf16>, vector<2x8x8xbf16>, vector<2x8x8xf32> -> vector<2x8x8xf32>
    "tpu.trace_stop"() : () -> ()
    %107 = tpu.concatenate %43, %64, %85, %106 in 2 : vector<2x8x8xf32>, vector<2x8x8xf32>, vector<2x8x8xf32>, vector<2x8x8xf32> -> vector<2x8x32xf32>
    %108 = vector.shape_cast %107 : vector<2x8x32xf32> to vector<16x32xf32>
    %109 = arith.truncf %108 : vector<16x32xf32> to vector<16x32xbf16>
    %cst_30 = arith.constant dense<0.000000e+00> : vector<16x32xf32>
    %110 = tpu.matmul %109, %18, %cst_30 {dimension_numbers = #tpu.dot_dimension_numbers<[1], [0], [0], [1], [0, 0, 1, 1], [], []>} : vector<16x32xbf16>, vector<32x32xbf16>, vector<16x32xf32> -> vector<16x32xf32>
    %111 = vector.broadcast %19 : vector<1x32xf32> to vector<16x32xf32>
    %112 = arith.addf %110, %111 : vector<16x32xf32>
    %113 = arith.addf %4, %112 : vector<16x32xf32>
    %114 = vector.extract_strided_slice %8 {offsets = [2, 0], sizes = [1, 32], strides = [1, 1]} : vector<8x96xf32> to vector<1x32xf32>
    %115 = vector.extract_strided_slice %8 {offsets = [3, 0], sizes = [1, 32], strides = [1, 1]} : vector<8x96xf32> to vector<1x32xf32>
    %cst_31 = arith.constant dense<0.000000e+00> : vector<16xf32>
    %116 = vector.multi_reduction <add>, %113, %cst_31 [1] : vector<16x32xf32> to vector<16xf32>
    %117 = vector.shape_cast %116 : vector<16xf32> to vector<16x1xf32>
    %cst_32 = arith.constant 3.200000e+01 : f32
    %118 = vector.broadcast %cst_32 : f32 to vector<16x1xf32>
    %119 = arith.divf %117, %118 : vector<16x1xf32>
    %120 = vector.broadcast %119 : vector<16x1xf32> to vector<16x32xf32>
    %121 = arith.subf %113, %120 : vector<16x32xf32>
    %122 = arith.mulf %121, %121 : vector<16x32xf32>
    %cst_33 = arith.constant dense<0.000000e+00> : vector<16xf32>
    %123 = vector.multi_reduction <add>, %122, %cst_33 [1] : vector<16x32xf32> to vector<16xf32>
    %124 = vector.shape_cast %123 : vector<16xf32> to vector<16x1xf32>
    %cst_34 = arith.constant 3.200000e+01 : f32
    %125 = vector.broadcast %cst_34 : f32 to vector<16x1xf32>
    %126 = arith.divf %124, %125 : vector<16x1xf32>
    %cst_35 = arith.constant 9.99999974E-6 : f32
    %127 = vector.broadcast %cst_35 : f32 to vector<16x1xf32>
    %128 = arith.addf %126, %127 : vector<16x1xf32>
    %129 = math.rsqrt %128 : vector<16x1xf32>
    %130 = vector.broadcast %129 : vector<16x1xf32> to vector<16x32xf32>
    %131 = arith.mulf %121, %130 : vector<16x32xf32>
    %132 = vector.broadcast %114 : vector<1x32xf32> to vector<16x32xf32>
    %133 = arith.mulf %131, %132 : vector<16x32xf32>
    %134 = vector.broadcast %115 : vector<1x32xf32> to vector<16x32xf32>
    %135 = arith.addf %133, %134 : vector<16x32xf32>
    %136 = vector.extract_strided_slice %6 {offsets = [0, 256], sizes = [32, 64], strides = [1, 1]} : vector<32x384xbf16> to vector<32x64xbf16>
    %137 = arith.truncf %135 : vector<16x32xf32> to vector<16x32xbf16>
    %cst_36 = arith.constant dense<0.000000e+00> : vector<16x64xf32>
    %138 = tpu.matmul %137, %136, %cst_36 {dimension_numbers = #tpu.dot_dimension_numbers<[1], [0], [0], [1], [0, 0, 1, 1], [], []>} : vector<16x32xbf16>, vector<32x64xbf16>, vector<16x64xf32> -> vector<16x64xf32>
    %139 = vector.extract_strided_slice %8 {offsets = [4, 0], sizes = [1, 64], strides = [1, 1]} : vector<8x96xf32> to vector<1x64xf32>
    %140 = vector.broadcast %139 : vector<1x64xf32> to vector<16x64xf32>
    %141 = arith.addf %138, %140 : vector<16x64xf32>
    %cst_37 = arith.constant 0.000000e+00 : f32
    %142 = vector.broadcast %cst_37 : f32 to vector<16x64xf32>
    %143 = arith.maximumf %141, %142 : vector<16x64xf32>
    %c0_38 = arith.constant 0 : index
    %c0_39 = arith.constant 0 : index
    %c0_40 = arith.constant 0 : index
    %144 = vector.load %arg4[%c0_38, %c0_39, %c0_40] : memref<2x64x32xbf16, #tpu.memory_space<vmem>>, vector<1x64x32xbf16>
    %145 = vector.shape_cast %144 : vector<1x64x32xbf16> to vector<64x32xbf16>
    %146 = arith.truncf %143 : vector<16x64xf32> to vector<16x64xbf16>
    %cst_41 = arith.constant dense<0.000000e+00> : vector<16x32xf32>
    %147 = tpu.matmul %146, %145, %cst_41 {dimension_numbers = #tpu.dot_dimension_numbers<[1], [0], [0], [1], [0, 0, 1, 1], [], []>} : vector<16x64xbf16>, vector<64x32xbf16>, vector<16x32xf32> -> vector<16x32xf32>
    %148 = vector.extract_strided_slice %8 {offsets = [5, 0], sizes = [1, 32], strides = [1, 1]} : vector<8x96xf32> to vector<1x32xf32>
    %149 = vector.broadcast %148 : vector<1x32xf32> to vector<16x32xf32>
    %150 = arith.addf %147, %149 : vector<16x32xf32>
    %151 = arith.addf %135, %150 : vector<16x32xf32>
    %152 = vector.extract_strided_slice %8 {offsets = [6, 0], sizes = [1, 32], strides = [1, 1]} : vector<8x96xf32> to vector<1x32xf32>
    %153 = vector.extract_strided_slice %8 {offsets = [7, 0], sizes = [1, 32], strides = [1, 1]} : vector<8x96xf32> to vector<1x32xf32>
    %cst_42 = arith.constant dense<0.000000e+00> : vector<16xf32>
    %154 = vector.multi_reduction <add>, %151, %cst_42 [1] : vector<16x32xf32> to vector<16xf32>
    %155 = vector.shape_cast %154 : vector<16xf32> to vector<16x1xf32>
    %cst_43 = arith.constant 3.200000e+01 : f32
    %156 = vector.broadcast %cst_43 : f32 to vector<16x1xf32>
    %157 = arith.divf %155, %156 : vector<16x1xf32>
    %158 = vector.broadcast %157 : vector<16x1xf32> to vector<16x32xf32>
    %159 = arith.subf %151, %158 : vector<16x32xf32>
    %160 = arith.mulf %159, %159 : vector<16x32xf32>
    %cst_44 = arith.constant dense<0.000000e+00> : vector<16xf32>
    %161 = vector.multi_reduction <add>, %160, %cst_44 [1] : vector<16x32xf32> to vector<16xf32>
    %162 = vector.shape_cast %161 : vector<16xf32> to vector<16x1xf32>
    %cst_45 = arith.constant 3.200000e+01 : f32
    %163 = vector.broadcast %cst_45 : f32 to vector<16x1xf32>
    %164 = arith.divf %162, %163 : vector<16x1xf32>
    %cst_46 = arith.constant 9.99999974E-6 : f32
    %165 = vector.broadcast %cst_46 : f32 to vector<16x1xf32>
    %166 = arith.addf %164, %165 : vector<16x1xf32>
    %167 = math.rsqrt %166 : vector<16x1xf32>
    %168 = vector.broadcast %167 : vector<16x1xf32> to vector<16x32xf32>
    %169 = arith.mulf %159, %168 : vector<16x32xf32>
    %170 = vector.broadcast %152 : vector<1x32xf32> to vector<16x32xf32>
    %171 = arith.mulf %169, %170 : vector<16x32xf32>
    %172 = vector.broadcast %153 : vector<1x32xf32> to vector<16x32xf32>
    %173 = arith.addf %171, %172 : vector<16x32xf32>
    %c1 = arith.constant 1 : index
    %c0_47 = arith.constant 0 : index
    %c0_48 = arith.constant 0 : index
    %174 = vector.load %arg3[%c1, %c0_47, %c0_48] : memref<2x32x384xbf16, #tpu.memory_space<vmem>>, vector<1x32x384xbf16>
    %175 = vector.shape_cast %174 : vector<1x32x384xbf16> to vector<32x384xbf16>
    %c1_49 = arith.constant 1 : index
    %c0_50 = arith.constant 0 : index
    %c0_51 = arith.constant 0 : index
    %176 = vector.load %arg5[%c1_49, %c0_50, %c0_51] : memref<2x8x96xf32, #tpu.memory_space<vmem>>, vector<1x8x96xf32>
    %177 = vector.shape_cast %176 : vector<1x8x96xf32> to vector<8x96xf32>
    %178 = vector.extract_strided_slice %175 {offsets = [0, 0], sizes = [32, 96], strides = [1, 1]} : vector<32x384xbf16> to vector<32x96xbf16>
    %179 = arith.truncf %173 : vector<16x32xf32> to vector<16x32xbf16>
    %cst_52 = arith.constant dense<0.000000e+00> : vector<16x96xf32>
    %180 = tpu.matmul %179, %178, %cst_52 {dimension_numbers = #tpu.dot_dimension_numbers<[1], [0], [0], [1], [0, 0, 1, 1], [], []>} : vector<16x32xbf16>, vector<32x96xbf16>, vector<16x96xf32> -> vector<16x96xf32>
    %181 = vector.extract_strided_slice %177 {offsets = [0, 0], sizes = [1, 96], strides = [1, 1]} : vector<8x96xf32> to vector<1x96xf32>
    %182 = vector.broadcast %181 : vector<1x96xf32> to vector<16x96xf32>
    %183 = arith.addf %180, %182 : vector<16x96xf32>
    %184 = vector.extract_strided_slice %183 {offsets = [0, 0], sizes = [16, 32], strides = [1, 1]} : vector<16x96xf32> to vector<16x32xf32>
    %185 = vector.extract_strided_slice %183 {offsets = [0, 32], sizes = [16, 32], strides = [1, 1]} : vector<16x96xf32> to vector<16x32xf32>
    %186 = vector.extract_strided_slice %183 {offsets = [0, 64], sizes = [16, 32], strides = [1, 1]} : vector<16x96xf32> to vector<16x32xf32>
    %187 = vector.extract_strided_slice %175 {offsets = [0, 128], sizes = [32, 32], strides = [1, 1]} : vector<32x384xbf16> to vector<32x32xbf16>
    %188 = vector.extract_strided_slice %177 {offsets = [1, 0], sizes = [1, 32], strides = [1, 1]} : vector<8x96xf32> to vector<1x32xf32>
    %189 = vector.shape_cast %184 : vector<16x32xf32> to vector<2x8x32xf32>
    %190 = vector.shape_cast %185 : vector<16x32xf32> to vector<2x8x32xf32>
    %191 = vector.shape_cast %186 : vector<16x32xf32> to vector<2x8x32xf32>
    %192 = vector.extract_strided_slice %189 {offsets = [0, 0, 0], sizes = [2, 8, 8], strides = [1, 1, 1]} : vector<2x8x32xf32> to vector<2x8x8xf32>
    %193 = arith.truncf %192 : vector<2x8x8xf32> to vector<2x8x8xbf16>
    %194 = vector.extract_strided_slice %190 {offsets = [0, 0, 0], sizes = [2, 8, 8], strides = [1, 1, 1]} : vector<2x8x32xf32> to vector<2x8x8xf32>
    %195 = arith.truncf %194 : vector<2x8x8xf32> to vector<2x8x8xbf16>
    %196 = vector.extract_strided_slice %191 {offsets = [0, 0, 0], sizes = [2, 8, 8], strides = [1, 1, 1]} : vector<2x8x32xf32> to vector<2x8x8xf32>
    %197 = arith.truncf %196 : vector<2x8x8xf32> to vector<2x8x8xbf16>
    "tpu.trace_start"() <{level = 10 : i32, message = "nqd,nkd->nqk"}> : () -> ()
    %cst_53 = arith.constant dense<0.000000e+00> : vector<2x8x8xf32>
    %198 = tpu.matmul %193, %195, %cst_53 {dimension_numbers = #tpu.dot_dimension_numbers<[2], [2], [1], [1], [0, 0, 0, 1, 1, 1], [0], [0]>} : vector<2x8x8xbf16>, vector<2x8x8xbf16>, vector<2x8x8xf32> -> vector<2x8x8xf32>
    "tpu.trace_stop"() : () -> ()
    %cst_54 = arith.constant 0.353553385 : f32
    %199 = vector.broadcast %cst_54 : f32 to vector<2x8x8xf32>
    %200 = arith.mulf %198, %199 : vector<2x8x8xf32>
    %cst_55 = arith.constant dense<0xFF800000> : vector<2x8xf32>
    %201 = vector.multi_reduction <maximumf>, %200, %cst_55 [2] : vector<2x8x8xf32> to vector<2x8xf32>
    %202 = vector.shape_cast %201 : vector<2x8xf32> to vector<2x8x1xf32>
    %203 = vector.broadcast %202 : vector<2x8x1xf32> to vector<2x8x8xf32>
    %204 = arith.subf %200, %203 : vector<2x8x8xf32>
    %205 = math.exp %204 : vector<2x8x8xf32>
    %cst_56 = arith.constant dense<0.000000e+00> : vector<2x8xf32>
    %206 = vector.multi_reduction <add>, %205, %cst_56 [2] : vector<2x8x8xf32> to vector<2x8xf32>
    %207 = vector.shape_cast %206 : vector<2x8xf32> to vector<2x8x1xf32>
    %208 = tpu.reciprocal %207 {approx = true} : vector<2x8x1xf32> -> vector<2x8x1xf32>
    %209 = vector.broadcast %208 : vector<2x8x1xf32> to vector<2x8x8xf32>
    %210 = arith.mulf %205, %209 : vector<2x8x8xf32>
    %211 = arith.truncf %210 : vector<2x8x8xf32> to vector<2x8x8xbf16>
    "tpu.trace_start"() <{level = 10 : i32, message = "nqk,nkd->nqd"}> : () -> ()
    %cst_57 = arith.constant dense<0.000000e+00> : vector<2x8x8xf32>
    %212 = tpu.matmul %211, %197, %cst_57 {dimension_numbers = #tpu.dot_dimension_numbers<[2], [1], [1], [2], [0, 0, 0, 1, 1, 2], [0], [0]>} : vector<2x8x8xbf16>, vector<2x8x8xbf16>, vector<2x8x8xf32> -> vector<2x8x8xf32>
    "tpu.trace_stop"() : () -> ()
    %213 = vector.extract_strided_slice %189 {offsets = [0, 0, 8], sizes = [2, 8, 8], strides = [1, 1, 1]} : vector<2x8x32xf32> to vector<2x8x8xf32>
    %214 = arith.truncf %213 : vector<2x8x8xf32> to vector<2x8x8xbf16>
    %215 = vector.extract_strided_slice %190 {offsets = [0, 0, 8], sizes = [2, 8, 8], strides = [1, 1, 1]} : vector<2x8x32xf32> to vector<2x8x8xf32>
    %216 = arith.truncf %215 : vector<2x8x8xf32> to vector<2x8x8xbf16>
    %217 = vector.extract_strided_slice %191 {offsets = [0, 0, 8], sizes = [2, 8, 8], strides = [1, 1, 1]} : vector<2x8x32xf32> to vector<2x8x8xf32>
    %218 = arith.truncf %217 : vector<2x8x8xf32> to vector<2x8x8xbf16>
    "tpu.trace_start"() <{level = 10 : i32, message = "nqd,nkd->nqk"}> : () -> ()
    %cst_58 = arith.constant dense<0.000000e+00> : vector<2x8x8xf32>
    %219 = tpu.matmul %214, %216, %cst_58 {dimension_numbers = #tpu.dot_dimension_numbers<[2], [2], [1], [1], [0, 0, 0, 1, 1, 1], [0], [0]>} : vector<2x8x8xbf16>, vector<2x8x8xbf16>, vector<2x8x8xf32> -> vector<2x8x8xf32>
    "tpu.trace_stop"() : () -> ()
    %cst_59 = arith.constant 0.353553385 : f32
    %220 = vector.broadcast %cst_59 : f32 to vector<2x8x8xf32>
    %221 = arith.mulf %219, %220 : vector<2x8x8xf32>
    %cst_60 = arith.constant dense<0xFF800000> : vector<2x8xf32>
    %222 = vector.multi_reduction <maximumf>, %221, %cst_60 [2] : vector<2x8x8xf32> to vector<2x8xf32>
    %223 = vector.shape_cast %222 : vector<2x8xf32> to vector<2x8x1xf32>
    %224 = vector.broadcast %223 : vector<2x8x1xf32> to vector<2x8x8xf32>
    %225 = arith.subf %221, %224 : vector<2x8x8xf32>
    %226 = math.exp %225 : vector<2x8x8xf32>
    %cst_61 = arith.constant dense<0.000000e+00> : vector<2x8xf32>
    %227 = vector.multi_reduction <add>, %226, %cst_61 [2] : vector<2x8x8xf32> to vector<2x8xf32>
    %228 = vector.shape_cast %227 : vector<2x8xf32> to vector<2x8x1xf32>
    %229 = tpu.reciprocal %228 {approx = true} : vector<2x8x1xf32> -> vector<2x8x1xf32>
    %230 = vector.broadcast %229 : vector<2x8x1xf32> to vector<2x8x8xf32>
    %231 = arith.mulf %226, %230 : vector<2x8x8xf32>
    %232 = arith.truncf %231 : vector<2x8x8xf32> to vector<2x8x8xbf16>
    "tpu.trace_start"() <{level = 10 : i32, message = "nqk,nkd->nqd"}> : () -> ()
    %cst_62 = arith.constant dense<0.000000e+00> : vector<2x8x8xf32>
    %233 = tpu.matmul %232, %218, %cst_62 {dimension_numbers = #tpu.dot_dimension_numbers<[2], [1], [1], [2], [0, 0, 0, 1, 1, 2], [0], [0]>} : vector<2x8x8xbf16>, vector<2x8x8xbf16>, vector<2x8x8xf32> -> vector<2x8x8xf32>
    "tpu.trace_stop"() : () -> ()
    %234 = vector.extract_strided_slice %189 {offsets = [0, 0, 16], sizes = [2, 8, 8], strides = [1, 1, 1]} : vector<2x8x32xf32> to vector<2x8x8xf32>
    %235 = arith.truncf %234 : vector<2x8x8xf32> to vector<2x8x8xbf16>
    %236 = vector.extract_strided_slice %190 {offsets = [0, 0, 16], sizes = [2, 8, 8], strides = [1, 1, 1]} : vector<2x8x32xf32> to vector<2x8x8xf32>
    %237 = arith.truncf %236 : vector<2x8x8xf32> to vector<2x8x8xbf16>
    %238 = vector.extract_strided_slice %191 {offsets = [0, 0, 16], sizes = [2, 8, 8], strides = [1, 1, 1]} : vector<2x8x32xf32> to vector<2x8x8xf32>
    %239 = arith.truncf %238 : vector<2x8x8xf32> to vector<2x8x8xbf16>
    "tpu.trace_start"() <{level = 10 : i32, message = "nqd,nkd->nqk"}> : () -> ()
    %cst_63 = arith.constant dense<0.000000e+00> : vector<2x8x8xf32>
    %240 = tpu.matmul %235, %237, %cst_63 {dimension_numbers = #tpu.dot_dimension_numbers<[2], [2], [1], [1], [0, 0, 0, 1, 1, 1], [0], [0]>} : vector<2x8x8xbf16>, vector<2x8x8xbf16>, vector<2x8x8xf32> -> vector<2x8x8xf32>
    "tpu.trace_stop"() : () -> ()
    %cst_64 = arith.constant 0.353553385 : f32
    %241 = vector.broadcast %cst_64 : f32 to vector<2x8x8xf32>
    %242 = arith.mulf %240, %241 : vector<2x8x8xf32>
    %cst_65 = arith.constant dense<0xFF800000> : vector<2x8xf32>
    %243 = vector.multi_reduction <maximumf>, %242, %cst_65 [2] : vector<2x8x8xf32> to vector<2x8xf32>
    %244 = vector.shape_cast %243 : vector<2x8xf32> to vector<2x8x1xf32>
    %245 = vector.broadcast %244 : vector<2x8x1xf32> to vector<2x8x8xf32>
    %246 = arith.subf %242, %245 : vector<2x8x8xf32>
    %247 = math.exp %246 : vector<2x8x8xf32>
    %cst_66 = arith.constant dense<0.000000e+00> : vector<2x8xf32>
    %248 = vector.multi_reduction <add>, %247, %cst_66 [2] : vector<2x8x8xf32> to vector<2x8xf32>
    %249 = vector.shape_cast %248 : vector<2x8xf32> to vector<2x8x1xf32>
    %250 = tpu.reciprocal %249 {approx = true} : vector<2x8x1xf32> -> vector<2x8x1xf32>
    %251 = vector.broadcast %250 : vector<2x8x1xf32> to vector<2x8x8xf32>
    %252 = arith.mulf %247, %251 : vector<2x8x8xf32>
    %253 = arith.truncf %252 : vector<2x8x8xf32> to vector<2x8x8xbf16>
    "tpu.trace_start"() <{level = 10 : i32, message = "nqk,nkd->nqd"}> : () -> ()
    %cst_67 = arith.constant dense<0.000000e+00> : vector<2x8x8xf32>
    %254 = tpu.matmul %253, %239, %cst_67 {dimension_numbers = #tpu.dot_dimension_numbers<[2], [1], [1], [2], [0, 0, 0, 1, 1, 2], [0], [0]>} : vector<2x8x8xbf16>, vector<2x8x8xbf16>, vector<2x8x8xf32> -> vector<2x8x8xf32>
    "tpu.trace_stop"() : () -> ()
    %255 = vector.extract_strided_slice %189 {offsets = [0, 0, 24], sizes = [2, 8, 8], strides = [1, 1, 1]} : vector<2x8x32xf32> to vector<2x8x8xf32>
    %256 = arith.truncf %255 : vector<2x8x8xf32> to vector<2x8x8xbf16>
    %257 = vector.extract_strided_slice %190 {offsets = [0, 0, 24], sizes = [2, 8, 8], strides = [1, 1, 1]} : vector<2x8x32xf32> to vector<2x8x8xf32>
    %258 = arith.truncf %257 : vector<2x8x8xf32> to vector<2x8x8xbf16>
    %259 = vector.extract_strided_slice %191 {offsets = [0, 0, 24], sizes = [2, 8, 8], strides = [1, 1, 1]} : vector<2x8x32xf32> to vector<2x8x8xf32>
    %260 = arith.truncf %259 : vector<2x8x8xf32> to vector<2x8x8xbf16>
    "tpu.trace_start"() <{level = 10 : i32, message = "nqd,nkd->nqk"}> : () -> ()
    %cst_68 = arith.constant dense<0.000000e+00> : vector<2x8x8xf32>
    %261 = tpu.matmul %256, %258, %cst_68 {dimension_numbers = #tpu.dot_dimension_numbers<[2], [2], [1], [1], [0, 0, 0, 1, 1, 1], [0], [0]>} : vector<2x8x8xbf16>, vector<2x8x8xbf16>, vector<2x8x8xf32> -> vector<2x8x8xf32>
    "tpu.trace_stop"() : () -> ()
    %cst_69 = arith.constant 0.353553385 : f32
    %262 = vector.broadcast %cst_69 : f32 to vector<2x8x8xf32>
    %263 = arith.mulf %261, %262 : vector<2x8x8xf32>
    %cst_70 = arith.constant dense<0xFF800000> : vector<2x8xf32>
    %264 = vector.multi_reduction <maximumf>, %263, %cst_70 [2] : vector<2x8x8xf32> to vector<2x8xf32>
    %265 = vector.shape_cast %264 : vector<2x8xf32> to vector<2x8x1xf32>
    %266 = vector.broadcast %265 : vector<2x8x1xf32> to vector<2x8x8xf32>
    %267 = arith.subf %263, %266 : vector<2x8x8xf32>
    %268 = math.exp %267 : vector<2x8x8xf32>
    %cst_71 = arith.constant dense<0.000000e+00> : vector<2x8xf32>
    %269 = vector.multi_reduction <add>, %268, %cst_71 [2] : vector<2x8x8xf32> to vector<2x8xf32>
    %270 = vector.shape_cast %269 : vector<2x8xf32> to vector<2x8x1xf32>
    %271 = tpu.reciprocal %270 {approx = true} : vector<2x8x1xf32> -> vector<2x8x1xf32>
    %272 = vector.broadcast %271 : vector<2x8x1xf32> to vector<2x8x8xf32>
    %273 = arith.mulf %268, %272 : vector<2x8x8xf32>
    %274 = arith.truncf %273 : vector<2x8x8xf32> to vector<2x8x8xbf16>
    "tpu.trace_start"() <{level = 10 : i32, message = "nqk,nkd->nqd"}> : () -> ()
    %cst_72 = arith.constant dense<0.000000e+00> : vector<2x8x8xf32>
    %275 = tpu.matmul %274, %260, %cst_72 {dimension_numbers = #tpu.dot_dimension_numbers<[2], [1], [1], [2], [0, 0, 0, 1, 1, 2], [0], [0]>} : vector<2x8x8xbf16>, vector<2x8x8xbf16>, vector<2x8x8xf32> -> vector<2x8x8xf32>
    "tpu.trace_stop"() : () -> ()
    %276 = tpu.concatenate %212, %233, %254, %275 in 2 : vector<2x8x8xf32>, vector<2x8x8xf32>, vector<2x8x8xf32>, vector<2x8x8xf32> -> vector<2x8x32xf32>
    %277 = vector.shape_cast %276 : vector<2x8x32xf32> to vector<16x32xf32>
    %278 = arith.truncf %277 : vector<16x32xf32> to vector<16x32xbf16>
    %cst_73 = arith.constant dense<0.000000e+00> : vector<16x32xf32>
    %279 = tpu.matmul %278, %187, %cst_73 {dimension_numbers = #tpu.dot_dimension_numbers<[1], [0], [0], [1], [0, 0, 1, 1], [], []>} : vector<16x32xbf16>, vector<32x32xbf16>, vector<16x32xf32> -> vector<16x32xf32>
    %280 = vector.broadcast %188 : vector<1x32xf32> to vector<16x32xf32>
    %281 = arith.addf %279, %280 : vector<16x32xf32>
    %282 = arith.addf %173, %281 : vector<16x32xf32>
    %283 = vector.extract_strided_slice %177 {offsets = [2, 0], sizes = [1, 32], strides = [1, 1]} : vector<8x96xf32> to vector<1x32xf32>
    %284 = vector.extract_strided_slice %177 {offsets = [3, 0], sizes = [1, 32], strides = [1, 1]} : vector<8x96xf32> to vector<1x32xf32>
    %cst_74 = arith.constant dense<0.000000e+00> : vector<16xf32>
    %285 = vector.multi_reduction <add>, %282, %cst_74 [1] : vector<16x32xf32> to vector<16xf32>
    %286 = vector.shape_cast %285 : vector<16xf32> to vector<16x1xf32>
    %cst_75 = arith.constant 3.200000e+01 : f32
    %287 = vector.broadcast %cst_75 : f32 to vector<16x1xf32>
    %288 = arith.divf %286, %287 : vector<16x1xf32>
    %289 = vector.broadcast %288 : vector<16x1xf32> to vector<16x32xf32>
    %290 = arith.subf %282, %289 : vector<16x32xf32>
    %291 = arith.mulf %290, %290 : vector<16x32xf32>
    %cst_76 = arith.constant dense<0.000000e+00> : vector<16xf32>
    %292 = vector.multi_reduction <add>, %291, %cst_76 [1] : vector<16x32xf32> to vector<16xf32>
    %293 = vector.shape_cast %292 : vector<16xf32> to vector<16x1xf32>
    %cst_77 = arith.constant 3.200000e+01 : f32
    %294 = vector.broadcast %cst_77 : f32 to vector<16x1xf32>
    %295 = arith.divf %293, %294 : vector<16x1xf32>
    %cst_78 = arith.constant 9.99999974E-6 : f32
    %296 = vector.broadcast %cst_78 : f32 to vector<16x1xf32>
    %297 = arith.addf %295, %296 : vector<16x1xf32>
    %298 = math.rsqrt %297 : vector<16x1xf32>
    %299 = vector.broadcast %298 : vector<16x1xf32> to vector<16x32xf32>
    %300 = arith.mulf %290, %299 : vector<16x32xf32>
    %301 = vector.broadcast %283 : vector<1x32xf32> to vector<16x32xf32>
    %302 = arith.mulf %300, %301 : vector<16x32xf32>
    %303 = vector.broadcast %284 : vector<1x32xf32> to vector<16x32xf32>
    %304 = arith.addf %302, %303 : vector<16x32xf32>
    %305 = vector.extract_strided_slice %175 {offsets = [0, 256], sizes = [32, 64], strides = [1, 1]} : vector<32x384xbf16> to vector<32x64xbf16>
    %306 = arith.truncf %304 : vector<16x32xf32> to vector<16x32xbf16>
    %cst_79 = arith.constant dense<0.000000e+00> : vector<16x64xf32>
    %307 = tpu.matmul %306, %305, %cst_79 {dimension_numbers = #tpu.dot_dimension_numbers<[1], [0], [0], [1], [0, 0, 1, 1], [], []>} : vector<16x32xbf16>, vector<32x64xbf16>, vector<16x64xf32> -> vector<16x64xf32>
    %308 = vector.extract_strided_slice %177 {offsets = [4, 0], sizes = [1, 64], strides = [1, 1]} : vector<8x96xf32> to vector<1x64xf32>
    %309 = vector.broadcast %308 : vector<1x64xf32> to vector<16x64xf32>
    %310 = arith.addf %307, %309 : vector<16x64xf32>
    %cst_80 = arith.constant 0.000000e+00 : f32
    %311 = vector.broadcast %cst_80 : f32 to vector<16x64xf32>
    %312 = arith.maximumf %310, %311 : vector<16x64xf32>
    %c1_81 = arith.constant 1 : index
    %c0_82 = arith.constant 0 : index
    %c0_83 = arith.constant 0 : index
    %313 = vector.load %arg4[%c1_81, %c0_82, %c0_83] : memref<2x64x32xbf16, #tpu.memory_space<vmem>>, vector<1x64x32xbf16>
    %314 = vector.shape_cast %313 : vector<1x64x32xbf16> to vector<64x32xbf16>
    %315 = arith.truncf %312 : vector<16x64xf32> to vector<16x64xbf16>
    %cst_84 = arith.constant dense<0.000000e+00> : vector<16x32xf32>
    %316 = tpu.matmul %315, %314, %cst_84 {dimension_numbers = #tpu.dot_dimension_numbers<[1], [0], [0], [1], [0, 0, 1, 1], [], []>} : vector<16x64xbf16>, vector<64x32xbf16>, vector<16x32xf32> -> vector<16x32xf32>
    %317 = vector.extract_strided_slice %177 {offsets = [5, 0], sizes = [1, 32], strides = [1, 1]} : vector<8x96xf32> to vector<1x32xf32>
    %318 = vector.broadcast %317 : vector<1x32xf32> to vector<16x32xf32>
    %319 = arith.addf %316, %318 : vector<16x32xf32>
    %320 = arith.addf %304, %319 : vector<16x32xf32>
    %321 = vector.extract_strided_slice %177 {offsets = [6, 0], sizes = [1, 32], strides = [1, 1]} : vector<8x96xf32> to vector<1x32xf32>
    %322 = vector.extract_strided_slice %177 {offsets = [7, 0], sizes = [1, 32], strides = [1, 1]} : vector<8x96xf32> to vector<1x32xf32>
    %cst_85 = arith.constant dense<0.000000e+00> : vector<16xf32>
    %323 = vector.multi_reduction <add>, %320, %cst_85 [1] : vector<16x32xf32> to vector<16xf32>
    %324 = vector.shape_cast %323 : vector<16xf32> to vector<16x1xf32>
    %cst_86 = arith.constant 3.200000e+01 : f32
    %325 = vector.broadcast %cst_86 : f32 to vector<16x1xf32>
    %326 = arith.divf %324, %325 : vector<16x1xf32>
    %327 = vector.broadcast %326 : vector<16x1xf32> to vector<16x32xf32>
    %328 = arith.subf %320, %327 : vector<16x32xf32>
    %329 = arith.mulf %328, %328 : vector<16x32xf32>
    %cst_87 = arith.constant dense<0.000000e+00> : vector<16xf32>
    %330 = vector.multi_reduction <add>, %329, %cst_87 [1] : vector<16x32xf32> to vector<16xf32>
    %331 = vector.shape_cast %330 : vector<16xf32> to vector<16x1xf32>
    %cst_88 = arith.constant 3.200000e+01 : f32
    %332 = vector.broadcast %cst_88 : f32 to vector<16x1xf32>
    %333 = arith.divf %331, %332 : vector<16x1xf32>
    %cst_89 = arith.constant 9.99999974E-6 : f32
    %334 = vector.broadcast %cst_89 : f32 to vector<16x1xf32>
    %335 = arith.addf %333, %334 : vector<16x1xf32>
    %336 = math.rsqrt %335 : vector<16x1xf32>
    %337 = vector.broadcast %336 : vector<16x1xf32> to vector<16x32xf32>
    %338 = arith.mulf %328, %337 : vector<16x32xf32>
    %339 = vector.broadcast %321 : vector<1x32xf32> to vector<16x32xf32>
    %340 = arith.mulf %338, %339 : vector<16x32xf32>
    %341 = vector.broadcast %322 : vector<1x32xf32> to vector<16x32xf32>
    %342 = arith.addf %340, %341 : vector<16x32xf32>
    %c0_90 = arith.constant 0 : index
    %c0_91 = arith.constant 0 : index
    %343 = vector.load %arg9[%c0_90, %c0_91] : memref<4x32xf32, #tpu.memory_space<vmem>>, vector<1x32xf32>
    %c1_92 = arith.constant 1 : index
    %c0_93 = arith.constant 0 : index
    %344 = vector.load %arg9[%c1_92, %c0_93] : memref<4x32xf32, #tpu.memory_space<vmem>>, vector<1x32xf32>
    %cst_94 = arith.constant dense<0.000000e+00> : vector<16xf32>
    %345 = vector.multi_reduction <add>, %342, %cst_94 [1] : vector<16x32xf32> to vector<16xf32>
    %346 = vector.shape_cast %345 : vector<16xf32> to vector<16x1xf32>
    %cst_95 = arith.constant 3.200000e+01 : f32
    %347 = vector.broadcast %cst_95 : f32 to vector<16x1xf32>
    %348 = arith.divf %346, %347 : vector<16x1xf32>
    %349 = vector.broadcast %348 : vector<16x1xf32> to vector<16x32xf32>
    %350 = arith.subf %342, %349 : vector<16x32xf32>
    %351 = arith.mulf %350, %350 : vector<16x32xf32>
    %cst_96 = arith.constant dense<0.000000e+00> : vector<16xf32>
    %352 = vector.multi_reduction <add>, %351, %cst_96 [1] : vector<16x32xf32> to vector<16xf32>
    %353 = vector.shape_cast %352 : vector<16xf32> to vector<16x1xf32>
    %cst_97 = arith.constant 3.200000e+01 : f32
    %354 = vector.broadcast %cst_97 : f32 to vector<16x1xf32>
    %355 = arith.divf %353, %354 : vector<16x1xf32>
    %cst_98 = arith.constant 9.99999974E-6 : f32
    %356 = vector.broadcast %cst_98 : f32 to vector<16x1xf32>
    %357 = arith.addf %355, %356 : vector<16x1xf32>
    %358 = math.rsqrt %357 : vector<16x1xf32>
    %359 = vector.broadcast %358 : vector<16x1xf32> to vector<16x32xf32>
    %360 = arith.mulf %350, %359 : vector<16x32xf32>
    %361 = vector.broadcast %343 : vector<1x32xf32> to vector<16x32xf32>
    %362 = arith.mulf %360, %361 : vector<16x32xf32>
    %363 = vector.broadcast %344 : vector<1x32xf32> to vector<16x32xf32>
    %364 = arith.addf %362, %363 : vector<16x32xf32>
    %c0_99 = arith.constant 0 : index
    %c0_100 = arith.constant 0 : index
    %365 = vector.load %arg1[%c0_99, %c0_100] : memref<16x32xf32, #tpu.memory_space<vmem>>, vector<16x32xf32>
    %c0_101 = arith.constant 0 : index
    %c0_102 = arith.constant 0 : index
    %c0_103 = arith.constant 0 : index
    %366 = vector.load %arg6[%c0_101, %c0_102, %c0_103] : memref<2x32x768xbf16, #tpu.memory_space<vmem>>, vector<1x32x768xbf16>
    %367 = vector.shape_cast %366 : vector<1x32x768xbf16> to vector<32x768xbf16>
    %c0_104 = arith.constant 0 : index
    %c0_105 = arith.constant 0 : index
    %c0_106 = arith.constant 0 : index
    %368 = vector.load %arg8[%c0_104, %c0_105, %c0_106] : memref<2x13x96xf32, #tpu.memory_space<vmem>>, vector<1x13x96xf32>
    %369 = vector.shape_cast %368 : vector<1x13x96xf32> to vector<13x96xf32>
    %370 = vector.extract_strided_slice %367 {offsets = [0, 0], sizes = [32, 96], strides = [1, 1]} : vector<32x768xbf16> to vector<32x96xbf16>
    %371 = arith.truncf %365 : vector<16x32xf32> to vector<16x32xbf16>
    %cst_107 = arith.constant dense<0.000000e+00> : vector<16x96xf32>
    %372 = tpu.matmul %371, %370, %cst_107 {dimension_numbers = #tpu.dot_dimension_numbers<[1], [0], [0], [1], [0, 0, 1, 1], [], []>} : vector<16x32xbf16>, vector<32x96xbf16>, vector<16x96xf32> -> vector<16x96xf32>
    %373 = vector.extract_strided_slice %369 {offsets = [0, 0], sizes = [1, 96], strides = [1, 1]} : vector<13x96xf32> to vector<1x96xf32>
    %374 = vector.broadcast %373 : vector<1x96xf32> to vector<16x96xf32>
    %375 = arith.addf %372, %374 : vector<16x96xf32>
    %376 = vector.extract_strided_slice %375 {offsets = [0, 0], sizes = [16, 32], strides = [1, 1]} : vector<16x96xf32> to vector<16x32xf32>
    %377 = vector.extract_strided_slice %375 {offsets = [0, 32], sizes = [16, 32], strides = [1, 1]} : vector<16x96xf32> to vector<16x32xf32>
    %378 = vector.extract_strided_slice %375 {offsets = [0, 64], sizes = [16, 32], strides = [1, 1]} : vector<16x96xf32> to vector<16x32xf32>
    %379 = vector.extract_strided_slice %367 {offsets = [0, 128], sizes = [32, 32], strides = [1, 1]} : vector<32x768xbf16> to vector<32x32xbf16>
    %380 = vector.extract_strided_slice %369 {offsets = [1, 0], sizes = [1, 32], strides = [1, 1]} : vector<13x96xf32> to vector<1x32xf32>
    %381 = vector.shape_cast %376 : vector<16x32xf32> to vector<2x8x32xf32>
    %382 = vector.shape_cast %377 : vector<16x32xf32> to vector<2x8x32xf32>
    %383 = vector.shape_cast %378 : vector<16x32xf32> to vector<2x8x32xf32>
    %384 = vector.extract_strided_slice %381 {offsets = [0, 0, 0], sizes = [2, 8, 8], strides = [1, 1, 1]} : vector<2x8x32xf32> to vector<2x8x8xf32>
    %385 = arith.truncf %384 : vector<2x8x8xf32> to vector<2x8x8xbf16>
    %386 = vector.extract_strided_slice %382 {offsets = [0, 0, 0], sizes = [2, 8, 8], strides = [1, 1, 1]} : vector<2x8x32xf32> to vector<2x8x8xf32>
    %387 = arith.truncf %386 : vector<2x8x8xf32> to vector<2x8x8xbf16>
    %388 = vector.extract_strided_slice %383 {offsets = [0, 0, 0], sizes = [2, 8, 8], strides = [1, 1, 1]} : vector<2x8x32xf32> to vector<2x8x8xf32>
    %389 = arith.truncf %388 : vector<2x8x8xf32> to vector<2x8x8xbf16>
    "tpu.trace_start"() <{level = 10 : i32, message = "nqd,nkd->nqk"}> : () -> ()
    %cst_108 = arith.constant dense<0.000000e+00> : vector<2x8x8xf32>
    %390 = tpu.matmul %385, %387, %cst_108 {dimension_numbers = #tpu.dot_dimension_numbers<[2], [2], [1], [1], [0, 0, 0, 1, 1, 1], [0], [0]>} : vector<2x8x8xbf16>, vector<2x8x8xbf16>, vector<2x8x8xf32> -> vector<2x8x8xf32>
    "tpu.trace_stop"() : () -> ()
    %cst_109 = arith.constant 0.353553385 : f32
    %391 = vector.broadcast %cst_109 : f32 to vector<2x8x8xf32>
    %392 = arith.mulf %390, %391 : vector<2x8x8xf32>
    %cst_110 = arith.constant dense<0xFF800000> : vector<2x8xf32>
    %393 = vector.multi_reduction <maximumf>, %392, %cst_110 [2] : vector<2x8x8xf32> to vector<2x8xf32>
    %394 = vector.shape_cast %393 : vector<2x8xf32> to vector<2x8x1xf32>
    %395 = vector.broadcast %394 : vector<2x8x1xf32> to vector<2x8x8xf32>
    %396 = arith.subf %392, %395 : vector<2x8x8xf32>
    %397 = math.exp %396 : vector<2x8x8xf32>
    %cst_111 = arith.constant dense<0.000000e+00> : vector<2x8xf32>
    %398 = vector.multi_reduction <add>, %397, %cst_111 [2] : vector<2x8x8xf32> to vector<2x8xf32>
    %399 = vector.shape_cast %398 : vector<2x8xf32> to vector<2x8x1xf32>
    %400 = tpu.reciprocal %399 {approx = true} : vector<2x8x1xf32> -> vector<2x8x1xf32>
    %401 = vector.broadcast %400 : vector<2x8x1xf32> to vector<2x8x8xf32>
    %402 = arith.mulf %397, %401 : vector<2x8x8xf32>
    %403 = arith.truncf %402 : vector<2x8x8xf32> to vector<2x8x8xbf16>
    "tpu.trace_start"() <{level = 10 : i32, message = "nqk,nkd->nqd"}> : () -> ()
    %cst_112 = arith.constant dense<0.000000e+00> : vector<2x8x8xf32>
    %404 = tpu.matmul %403, %389, %cst_112 {dimension_numbers = #tpu.dot_dimension_numbers<[2], [1], [1], [2], [0, 0, 0, 1, 1, 2], [0], [0]>} : vector<2x8x8xbf16>, vector<2x8x8xbf16>, vector<2x8x8xf32> -> vector<2x8x8xf32>
    "tpu.trace_stop"() : () -> ()
    %405 = vector.extract_strided_slice %381 {offsets = [0, 0, 8], sizes = [2, 8, 8], strides = [1, 1, 1]} : vector<2x8x32xf32> to vector<2x8x8xf32>
    %406 = arith.truncf %405 : vector<2x8x8xf32> to vector<2x8x8xbf16>
    %407 = vector.extract_strided_slice %382 {offsets = [0, 0, 8], sizes = [2, 8, 8], strides = [1, 1, 1]} : vector<2x8x32xf32> to vector<2x8x8xf32>
    %408 = arith.truncf %407 : vector<2x8x8xf32> to vector<2x8x8xbf16>
    %409 = vector.extract_strided_slice %383 {offsets = [0, 0, 8], sizes = [2, 8, 8], strides = [1, 1, 1]} : vector<2x8x32xf32> to vector<2x8x8xf32>
    %410 = arith.truncf %409 : vector<2x8x8xf32> to vector<2x8x8xbf16>
    "tpu.trace_start"() <{level = 10 : i32, message = "nqd,nkd->nqk"}> : () -> ()
    %cst_113 = arith.constant dense<0.000000e+00> : vector<2x8x8xf32>
    %411 = tpu.matmul %406, %408, %cst_113 {dimension_numbers = #tpu.dot_dimension_numbers<[2], [2], [1], [1], [0, 0, 0, 1, 1, 1], [0], [0]>} : vector<2x8x8xbf16>, vector<2x8x8xbf16>, vector<2x8x8xf32> -> vector<2x8x8xf32>
    "tpu.trace_stop"() : () -> ()
    %cst_114 = arith.constant 0.353553385 : f32
    %412 = vector.broadcast %cst_114 : f32 to vector<2x8x8xf32>
    %413 = arith.mulf %411, %412 : vector<2x8x8xf32>
    %cst_115 = arith.constant dense<0xFF800000> : vector<2x8xf32>
    %414 = vector.multi_reduction <maximumf>, %413, %cst_115 [2] : vector<2x8x8xf32> to vector<2x8xf32>
    %415 = vector.shape_cast %414 : vector<2x8xf32> to vector<2x8x1xf32>
    %416 = vector.broadcast %415 : vector<2x8x1xf32> to vector<2x8x8xf32>
    %417 = arith.subf %413, %416 : vector<2x8x8xf32>
    %418 = math.exp %417 : vector<2x8x8xf32>
    %cst_116 = arith.constant dense<0.000000e+00> : vector<2x8xf32>
    %419 = vector.multi_reduction <add>, %418, %cst_116 [2] : vector<2x8x8xf32> to vector<2x8xf32>
    %420 = vector.shape_cast %419 : vector<2x8xf32> to vector<2x8x1xf32>
    %421 = tpu.reciprocal %420 {approx = true} : vector<2x8x1xf32> -> vector<2x8x1xf32>
    %422 = vector.broadcast %421 : vector<2x8x1xf32> to vector<2x8x8xf32>
    %423 = arith.mulf %418, %422 : vector<2x8x8xf32>
    %424 = arith.truncf %423 : vector<2x8x8xf32> to vector<2x8x8xbf16>
    "tpu.trace_start"() <{level = 10 : i32, message = "nqk,nkd->nqd"}> : () -> ()
    %cst_117 = arith.constant dense<0.000000e+00> : vector<2x8x8xf32>
    %425 = tpu.matmul %424, %410, %cst_117 {dimension_numbers = #tpu.dot_dimension_numbers<[2], [1], [1], [2], [0, 0, 0, 1, 1, 2], [0], [0]>} : vector<2x8x8xbf16>, vector<2x8x8xbf16>, vector<2x8x8xf32> -> vector<2x8x8xf32>
    "tpu.trace_stop"() : () -> ()
    %426 = vector.extract_strided_slice %381 {offsets = [0, 0, 16], sizes = [2, 8, 8], strides = [1, 1, 1]} : vector<2x8x32xf32> to vector<2x8x8xf32>
    %427 = arith.truncf %426 : vector<2x8x8xf32> to vector<2x8x8xbf16>
    %428 = vector.extract_strided_slice %382 {offsets = [0, 0, 16], sizes = [2, 8, 8], strides = [1, 1, 1]} : vector<2x8x32xf32> to vector<2x8x8xf32>
    %429 = arith.truncf %428 : vector<2x8x8xf32> to vector<2x8x8xbf16>
    %430 = vector.extract_strided_slice %383 {offsets = [0, 0, 16], sizes = [2, 8, 8], strides = [1, 1, 1]} : vector<2x8x32xf32> to vector<2x8x8xf32>
    %431 = arith.truncf %430 : vector<2x8x8xf32> to vector<2x8x8xbf16>
    "tpu.trace_start"() <{level = 10 : i32, message = "nqd,nkd->nqk"}> : () -> ()
    %cst_118 = arith.constant dense<0.000000e+00> : vector<2x8x8xf32>
    %432 = tpu.matmul %427, %429, %cst_118 {dimension_numbers = #tpu.dot_dimension_numbers<[2], [2], [1], [1], [0, 0, 0, 1, 1, 1], [0], [0]>} : vector<2x8x8xbf16>, vector<2x8x8xbf16>, vector<2x8x8xf32> -> vector<2x8x8xf32>
    "tpu.trace_stop"() : () -> ()
    %cst_119 = arith.constant 0.353553385 : f32
    %433 = vector.broadcast %cst_119 : f32 to vector<2x8x8xf32>
    %434 = arith.mulf %432, %433 : vector<2x8x8xf32>
    %cst_120 = arith.constant dense<0xFF800000> : vector<2x8xf32>
    %435 = vector.multi_reduction <maximumf>, %434, %cst_120 [2] : vector<2x8x8xf32> to vector<2x8xf32>
    %436 = vector.shape_cast %435 : vector<2x8xf32> to vector<2x8x1xf32>
    %437 = vector.broadcast %436 : vector<2x8x1xf32> to vector<2x8x8xf32>
    %438 = arith.subf %434, %437 : vector<2x8x8xf32>
    %439 = math.exp %438 : vector<2x8x8xf32>
    %cst_121 = arith.constant dense<0.000000e+00> : vector<2x8xf32>
    %440 = vector.multi_reduction <add>, %439, %cst_121 [2] : vector<2x8x8xf32> to vector<2x8xf32>
    %441 = vector.shape_cast %440 : vector<2x8xf32> to vector<2x8x1xf32>
    %442 = tpu.reciprocal %441 {approx = true} : vector<2x8x1xf32> -> vector<2x8x1xf32>
    %443 = vector.broadcast %442 : vector<2x8x1xf32> to vector<2x8x8xf32>
    %444 = arith.mulf %439, %443 : vector<2x8x8xf32>
    %445 = arith.truncf %444 : vector<2x8x8xf32> to vector<2x8x8xbf16>
    "tpu.trace_start"() <{level = 10 : i32, message = "nqk,nkd->nqd"}> : () -> ()
    %cst_122 = arith.constant dense<0.000000e+00> : vector<2x8x8xf32>
    %446 = tpu.matmul %445, %431, %cst_122 {dimension_numbers = #tpu.dot_dimension_numbers<[2], [1], [1], [2], [0, 0, 0, 1, 1, 2], [0], [0]>} : vector<2x8x8xbf16>, vector<2x8x8xbf16>, vector<2x8x8xf32> -> vector<2x8x8xf32>
    "tpu.trace_stop"() : () -> ()
    %447 = vector.extract_strided_slice %381 {offsets = [0, 0, 24], sizes = [2, 8, 8], strides = [1, 1, 1]} : vector<2x8x32xf32> to vector<2x8x8xf32>
    %448 = arith.truncf %447 : vector<2x8x8xf32> to vector<2x8x8xbf16>
    %449 = vector.extract_strided_slice %382 {offsets = [0, 0, 24], sizes = [2, 8, 8], strides = [1, 1, 1]} : vector<2x8x32xf32> to vector<2x8x8xf32>
    %450 = arith.truncf %449 : vector<2x8x8xf32> to vector<2x8x8xbf16>
    %451 = vector.extract_strided_slice %383 {offsets = [0, 0, 24], sizes = [2, 8, 8], strides = [1, 1, 1]} : vector<2x8x32xf32> to vector<2x8x8xf32>
    %452 = arith.truncf %451 : vector<2x8x8xf32> to vector<2x8x8xbf16>
    "tpu.trace_start"() <{level = 10 : i32, message = "nqd,nkd->nqk"}> : () -> ()
    %cst_123 = arith.constant dense<0.000000e+00> : vector<2x8x8xf32>
    %453 = tpu.matmul %448, %450, %cst_123 {dimension_numbers = #tpu.dot_dimension_numbers<[2], [2], [1], [1], [0, 0, 0, 1, 1, 1], [0], [0]>} : vector<2x8x8xbf16>, vector<2x8x8xbf16>, vector<2x8x8xf32> -> vector<2x8x8xf32>
    "tpu.trace_stop"() : () -> ()
    %cst_124 = arith.constant 0.353553385 : f32
    %454 = vector.broadcast %cst_124 : f32 to vector<2x8x8xf32>
    %455 = arith.mulf %453, %454 : vector<2x8x8xf32>
    %cst_125 = arith.constant dense<0xFF800000> : vector<2x8xf32>
    %456 = vector.multi_reduction <maximumf>, %455, %cst_125 [2] : vector<2x8x8xf32> to vector<2x8xf32>
    %457 = vector.shape_cast %456 : vector<2x8xf32> to vector<2x8x1xf32>
    %458 = vector.broadcast %457 : vector<2x8x1xf32> to vector<2x8x8xf32>
    %459 = arith.subf %455, %458 : vector<2x8x8xf32>
    %460 = math.exp %459 : vector<2x8x8xf32>
    %cst_126 = arith.constant dense<0.000000e+00> : vector<2x8xf32>
    %461 = vector.multi_reduction <add>, %460, %cst_126 [2] : vector<2x8x8xf32> to vector<2x8xf32>
    %462 = vector.shape_cast %461 : vector<2x8xf32> to vector<2x8x1xf32>
    %463 = tpu.reciprocal %462 {approx = true} : vector<2x8x1xf32> -> vector<2x8x1xf32>
    %464 = vector.broadcast %463 : vector<2x8x1xf32> to vector<2x8x8xf32>
    %465 = arith.mulf %460, %464 : vector<2x8x8xf32>
    %466 = arith.truncf %465 : vector<2x8x8xf32> to vector<2x8x8xbf16>
    "tpu.trace_start"() <{level = 10 : i32, message = "nqk,nkd->nqd"}> : () -> ()
    %cst_127 = arith.constant dense<0.000000e+00> : vector<2x8x8xf32>
    %467 = tpu.matmul %466, %452, %cst_127 {dimension_numbers = #tpu.dot_dimension_numbers<[2], [1], [1], [2], [0, 0, 0, 1, 1, 2], [0], [0]>} : vector<2x8x8xbf16>, vector<2x8x8xbf16>, vector<2x8x8xf32> -> vector<2x8x8xf32>
    "tpu.trace_stop"() : () -> ()
    %468 = tpu.concatenate %404, %425, %446, %467 in 2 : vector<2x8x8xf32>, vector<2x8x8xf32>, vector<2x8x8xf32>, vector<2x8x8xf32> -> vector<2x8x32xf32>
    %469 = vector.shape_cast %468 : vector<2x8x32xf32> to vector<16x32xf32>
    %470 = arith.truncf %469 : vector<16x32xf32> to vector<16x32xbf16>
    %cst_128 = arith.constant dense<0.000000e+00> : vector<16x32xf32>
    %471 = tpu.matmul %470, %379, %cst_128 {dimension_numbers = #tpu.dot_dimension_numbers<[1], [0], [0], [1], [0, 0, 1, 1], [], []>} : vector<16x32xbf16>, vector<32x32xbf16>, vector<16x32xf32> -> vector<16x32xf32>
    %472 = vector.broadcast %380 : vector<1x32xf32> to vector<16x32xf32>
    %473 = arith.addf %471, %472 : vector<16x32xf32>
    %474 = arith.addf %365, %473 : vector<16x32xf32>
    %475 = vector.extract_strided_slice %369 {offsets = [2, 0], sizes = [1, 32], strides = [1, 1]} : vector<13x96xf32> to vector<1x32xf32>
    %476 = vector.extract_strided_slice %369 {offsets = [3, 0], sizes = [1, 32], strides = [1, 1]} : vector<13x96xf32> to vector<1x32xf32>
    %cst_129 = arith.constant dense<0.000000e+00> : vector<16xf32>
    %477 = vector.multi_reduction <add>, %474, %cst_129 [1] : vector<16x32xf32> to vector<16xf32>
    %478 = vector.shape_cast %477 : vector<16xf32> to vector<16x1xf32>
    %cst_130 = arith.constant 3.200000e+01 : f32
    %479 = vector.broadcast %cst_130 : f32 to vector<16x1xf32>
    %480 = arith.divf %478, %479 : vector<16x1xf32>
    %481 = vector.broadcast %480 : vector<16x1xf32> to vector<16x32xf32>
    %482 = arith.subf %474, %481 : vector<16x32xf32>
    %483 = arith.mulf %482, %482 : vector<16x32xf32>
    %cst_131 = arith.constant dense<0.000000e+00> : vector<16xf32>
    %484 = vector.multi_reduction <add>, %483, %cst_131 [1] : vector<16x32xf32> to vector<16xf32>
    %485 = vector.shape_cast %484 : vector<16xf32> to vector<16x1xf32>
    %cst_132 = arith.constant 3.200000e+01 : f32
    %486 = vector.broadcast %cst_132 : f32 to vector<16x1xf32>
    %487 = arith.divf %485, %486 : vector<16x1xf32>
    %cst_133 = arith.constant 9.99999974E-6 : f32
    %488 = vector.broadcast %cst_133 : f32 to vector<16x1xf32>
    %489 = arith.addf %487, %488 : vector<16x1xf32>
    %490 = math.rsqrt %489 : vector<16x1xf32>
    %491 = vector.broadcast %490 : vector<16x1xf32> to vector<16x32xf32>
    %492 = arith.mulf %482, %491 : vector<16x32xf32>
    %493 = vector.broadcast %475 : vector<1x32xf32> to vector<16x32xf32>
    %494 = arith.mulf %492, %493 : vector<16x32xf32>
    %495 = vector.broadcast %476 : vector<1x32xf32> to vector<16x32xf32>
    %496 = arith.addf %494, %495 : vector<16x32xf32>
    %497 = vector.extract_strided_slice %367 {offsets = [0, 256], sizes = [32, 32], strides = [1, 1]} : vector<32x768xbf16> to vector<32x32xbf16>
    %498 = arith.truncf %496 : vector<16x32xf32> to vector<16x32xbf16>
    %cst_134 = arith.constant dense<0.000000e+00> : vector<16x32xf32>
    %499 = tpu.matmul %498, %497, %cst_134 {dimension_numbers = #tpu.dot_dimension_numbers<[1], [0], [0], [1], [0, 0, 1, 1], [], []>} : vector<16x32xbf16>, vector<32x32xbf16>, vector<16x32xf32> -> vector<16x32xf32>
    %500 = vector.extract_strided_slice %369 {offsets = [4, 0], sizes = [1, 32], strides = [1, 1]} : vector<13x96xf32> to vector<1x32xf32>
    %501 = vector.broadcast %500 : vector<1x32xf32> to vector<16x32xf32>
    %502 = arith.addf %499, %501 : vector<16x32xf32>
    %503 = vector.extract_strided_slice %367 {offsets = [0, 384], sizes = [32, 64], strides = [1, 1]} : vector<32x768xbf16> to vector<32x64xbf16>
    %504 = arith.truncf %364 : vector<16x32xf32> to vector<16x32xbf16>
    %cst_135 = arith.constant dense<0.000000e+00> : vector<16x64xf32>
    %505 = tpu.matmul %504, %503, %cst_135 {dimension_numbers = #tpu.dot_dimension_numbers<[1], [0], [0], [1], [0, 0, 1, 1], [], []>} : vector<16x32xbf16>, vector<32x64xbf16>, vector<16x64xf32> -> vector<16x64xf32>
    %506 = vector.extract_strided_slice %369 {offsets = [5, 0], sizes = [1, 64], strides = [1, 1]} : vector<13x96xf32> to vector<1x64xf32>
    %507 = vector.broadcast %506 : vector<1x64xf32> to vector<16x64xf32>
    %508 = arith.addf %505, %507 : vector<16x64xf32>
    %509 = vector.extract_strided_slice %508 {offsets = [0, 0], sizes = [16, 32], strides = [1, 1]} : vector<16x64xf32> to vector<16x32xf32>
    %510 = vector.extract_strided_slice %508 {offsets = [0, 32], sizes = [16, 32], strides = [1, 1]} : vector<16x64xf32> to vector<16x32xf32>
    %511 = vector.extract_strided_slice %367 {offsets = [0, 512], sizes = [32, 32], strides = [1, 1]} : vector<32x768xbf16> to vector<32x32xbf16>
    %512 = vector.extract_strided_slice %369 {offsets = [6, 0], sizes = [1, 32], strides = [1, 1]} : vector<13x96xf32> to vector<1x32xf32>
    %513 = vector.shape_cast %502 : vector<16x32xf32> to vector<2x8x32xf32>
    %514 = vector.shape_cast %509 : vector<16x32xf32> to vector<2x8x32xf32>
    %515 = vector.shape_cast %510 : vector<16x32xf32> to vector<2x8x32xf32>
    %516 = vector.extract_strided_slice %513 {offsets = [0, 0, 0], sizes = [2, 8, 8], strides = [1, 1, 1]} : vector<2x8x32xf32> to vector<2x8x8xf32>
    %517 = arith.truncf %516 : vector<2x8x8xf32> to vector<2x8x8xbf16>
    %518 = vector.extract_strided_slice %514 {offsets = [0, 0, 0], sizes = [2, 8, 8], strides = [1, 1, 1]} : vector<2x8x32xf32> to vector<2x8x8xf32>
    %519 = arith.truncf %518 : vector<2x8x8xf32> to vector<2x8x8xbf16>
    %520 = vector.extract_strided_slice %515 {offsets = [0, 0, 0], sizes = [2, 8, 8], strides = [1, 1, 1]} : vector<2x8x32xf32> to vector<2x8x8xf32>
    %521 = arith.truncf %520 : vector<2x8x8xf32> to vector<2x8x8xbf16>
    "tpu.trace_start"() <{level = 10 : i32, message = "nqd,nkd->nqk"}> : () -> ()
    %cst_136 = arith.constant dense<0.000000e+00> : vector<2x8x8xf32>
    %522 = tpu.matmul %517, %519, %cst_136 {dimension_numbers = #tpu.dot_dimension_numbers<[2], [2], [1], [1], [0, 0, 0, 1, 1, 1], [0], [0]>} : vector<2x8x8xbf16>, vector<2x8x8xbf16>, vector<2x8x8xf32> -> vector<2x8x8xf32>
    "tpu.trace_stop"() : () -> ()
    %cst_137 = arith.constant 0.353553385 : f32
    %523 = vector.broadcast %cst_137 : f32 to vector<2x8x8xf32>
    %524 = arith.mulf %522, %523 : vector<2x8x8xf32>
    %cst_138 = arith.constant dense<0xFF800000> : vector<2x8xf32>
    %525 = vector.multi_reduction <maximumf>, %524, %cst_138 [2] : vector<2x8x8xf32> to vector<2x8xf32>
    %526 = vector.shape_cast %525 : vector<2x8xf32> to vector<2x8x1xf32>
    %527 = vector.broadcast %526 : vector<2x8x1xf32> to vector<2x8x8xf32>
    %528 = arith.subf %524, %527 : vector<2x8x8xf32>
    %529 = math.exp %528 : vector<2x8x8xf32>
    %cst_139 = arith.constant dense<0.000000e+00> : vector<2x8xf32>
    %530 = vector.multi_reduction <add>, %529, %cst_139 [2] : vector<2x8x8xf32> to vector<2x8xf32>
    %531 = vector.shape_cast %530 : vector<2x8xf32> to vector<2x8x1xf32>
    %532 = tpu.reciprocal %531 {approx = true} : vector<2x8x1xf32> -> vector<2x8x1xf32>
    %533 = vector.broadcast %532 : vector<2x8x1xf32> to vector<2x8x8xf32>
    %534 = arith.mulf %529, %533 : vector<2x8x8xf32>
    %535 = arith.truncf %534 : vector<2x8x8xf32> to vector<2x8x8xbf16>
    "tpu.trace_start"() <{level = 10 : i32, message = "nqk,nkd->nqd"}> : () -> ()
    %cst_140 = arith.constant dense<0.000000e+00> : vector<2x8x8xf32>
    %536 = tpu.matmul %535, %521, %cst_140 {dimension_numbers = #tpu.dot_dimension_numbers<[2], [1], [1], [2], [0, 0, 0, 1, 1, 2], [0], [0]>} : vector<2x8x8xbf16>, vector<2x8x8xbf16>, vector<2x8x8xf32> -> vector<2x8x8xf32>
    "tpu.trace_stop"() : () -> ()
    %537 = vector.extract_strided_slice %513 {offsets = [0, 0, 8], sizes = [2, 8, 8], strides = [1, 1, 1]} : vector<2x8x32xf32> to vector<2x8x8xf32>
    %538 = arith.truncf %537 : vector<2x8x8xf32> to vector<2x8x8xbf16>
    %539 = vector.extract_strided_slice %514 {offsets = [0, 0, 8], sizes = [2, 8, 8], strides = [1, 1, 1]} : vector<2x8x32xf32> to vector<2x8x8xf32>
    %540 = arith.truncf %539 : vector<2x8x8xf32> to vector<2x8x8xbf16>
    %541 = vector.extract_strided_slice %515 {offsets = [0, 0, 8], sizes = [2, 8, 8], strides = [1, 1, 1]} : vector<2x8x32xf32> to vector<2x8x8xf32>
    %542 = arith.truncf %541 : vector<2x8x8xf32> to vector<2x8x8xbf16>
    "tpu.trace_start"() <{level = 10 : i32, message = "nqd,nkd->nqk"}> : () -> ()
    %cst_141 = arith.constant dense<0.000000e+00> : vector<2x8x8xf32>
    %543 = tpu.matmul %538, %540, %cst_141 {dimension_numbers = #tpu.dot_dimension_numbers<[2], [2], [1], [1], [0, 0, 0, 1, 1, 1], [0], [0]>} : vector<2x8x8xbf16>, vector<2x8x8xbf16>, vector<2x8x8xf32> -> vector<2x8x8xf32>
    "tpu.trace_stop"() : () -> ()
    %cst_142 = arith.constant 0.353553385 : f32
    %544 = vector.broadcast %cst_142 : f32 to vector<2x8x8xf32>
    %545 = arith.mulf %543, %544 : vector<2x8x8xf32>
    %cst_143 = arith.constant dense<0xFF800000> : vector<2x8xf32>
    %546 = vector.multi_reduction <maximumf>, %545, %cst_143 [2] : vector<2x8x8xf32> to vector<2x8xf32>
    %547 = vector.shape_cast %546 : vector<2x8xf32> to vector<2x8x1xf32>
    %548 = vector.broadcast %547 : vector<2x8x1xf32> to vector<2x8x8xf32>
    %549 = arith.subf %545, %548 : vector<2x8x8xf32>
    %550 = math.exp %549 : vector<2x8x8xf32>
    %cst_144 = arith.constant dense<0.000000e+00> : vector<2x8xf32>
    %551 = vector.multi_reduction <add>, %550, %cst_144 [2] : vector<2x8x8xf32> to vector<2x8xf32>
    %552 = vector.shape_cast %551 : vector<2x8xf32> to vector<2x8x1xf32>
    %553 = tpu.reciprocal %552 {approx = true} : vector<2x8x1xf32> -> vector<2x8x1xf32>
    %554 = vector.broadcast %553 : vector<2x8x1xf32> to vector<2x8x8xf32>
    %555 = arith.mulf %550, %554 : vector<2x8x8xf32>
    %556 = arith.truncf %555 : vector<2x8x8xf32> to vector<2x8x8xbf16>
    "tpu.trace_start"() <{level = 10 : i32, message = "nqk,nkd->nqd"}> : () -> ()
    %cst_145 = arith.constant dense<0.000000e+00> : vector<2x8x8xf32>
    %557 = tpu.matmul %556, %542, %cst_145 {dimension_numbers = #tpu.dot_dimension_numbers<[2], [1], [1], [2], [0, 0, 0, 1, 1, 2], [0], [0]>} : vector<2x8x8xbf16>, vector<2x8x8xbf16>, vector<2x8x8xf32> -> vector<2x8x8xf32>
    "tpu.trace_stop"() : () -> ()
    %558 = vector.extract_strided_slice %513 {offsets = [0, 0, 16], sizes = [2, 8, 8], strides = [1, 1, 1]} : vector<2x8x32xf32> to vector<2x8x8xf32>
    %559 = arith.truncf %558 : vector<2x8x8xf32> to vector<2x8x8xbf16>
    %560 = vector.extract_strided_slice %514 {offsets = [0, 0, 16], sizes = [2, 8, 8], strides = [1, 1, 1]} : vector<2x8x32xf32> to vector<2x8x8xf32>
    %561 = arith.truncf %560 : vector<2x8x8xf32> to vector<2x8x8xbf16>
    %562 = vector.extract_strided_slice %515 {offsets = [0, 0, 16], sizes = [2, 8, 8], strides = [1, 1, 1]} : vector<2x8x32xf32> to vector<2x8x8xf32>
    %563 = arith.truncf %562 : vector<2x8x8xf32> to vector<2x8x8xbf16>
    "tpu.trace_start"() <{level = 10 : i32, message = "nqd,nkd->nqk"}> : () -> ()
    %cst_146 = arith.constant dense<0.000000e+00> : vector<2x8x8xf32>
    %564 = tpu.matmul %559, %561, %cst_146 {dimension_numbers = #tpu.dot_dimension_numbers<[2], [2], [1], [1], [0, 0, 0, 1, 1, 1], [0], [0]>} : vector<2x8x8xbf16>, vector<2x8x8xbf16>, vector<2x8x8xf32> -> vector<2x8x8xf32>
    "tpu.trace_stop"() : () -> ()
    %cst_147 = arith.constant 0.353553385 : f32
    %565 = vector.broadcast %cst_147 : f32 to vector<2x8x8xf32>
    %566 = arith.mulf %564, %565 : vector<2x8x8xf32>
    %cst_148 = arith.constant dense<0xFF800000> : vector<2x8xf32>
    %567 = vector.multi_reduction <maximumf>, %566, %cst_148 [2] : vector<2x8x8xf32> to vector<2x8xf32>
    %568 = vector.shape_cast %567 : vector<2x8xf32> to vector<2x8x1xf32>
    %569 = vector.broadcast %568 : vector<2x8x1xf32> to vector<2x8x8xf32>
    %570 = arith.subf %566, %569 : vector<2x8x8xf32>
    %571 = math.exp %570 : vector<2x8x8xf32>
    %cst_149 = arith.constant dense<0.000000e+00> : vector<2x8xf32>
    %572 = vector.multi_reduction <add>, %571, %cst_149 [2] : vector<2x8x8xf32> to vector<2x8xf32>
    %573 = vector.shape_cast %572 : vector<2x8xf32> to vector<2x8x1xf32>
    %574 = tpu.reciprocal %573 {approx = true} : vector<2x8x1xf32> -> vector<2x8x1xf32>
    %575 = vector.broadcast %574 : vector<2x8x1xf32> to vector<2x8x8xf32>
    %576 = arith.mulf %571, %575 : vector<2x8x8xf32>
    %577 = arith.truncf %576 : vector<2x8x8xf32> to vector<2x8x8xbf16>
    "tpu.trace_start"() <{level = 10 : i32, message = "nqk,nkd->nqd"}> : () -> ()
    %cst_150 = arith.constant dense<0.000000e+00> : vector<2x8x8xf32>
    %578 = tpu.matmul %577, %563, %cst_150 {dimension_numbers = #tpu.dot_dimension_numbers<[2], [1], [1], [2], [0, 0, 0, 1, 1, 2], [0], [0]>} : vector<2x8x8xbf16>, vector<2x8x8xbf16>, vector<2x8x8xf32> -> vector<2x8x8xf32>
    "tpu.trace_stop"() : () -> ()
    %579 = vector.extract_strided_slice %513 {offsets = [0, 0, 24], sizes = [2, 8, 8], strides = [1, 1, 1]} : vector<2x8x32xf32> to vector<2x8x8xf32>
    %580 = arith.truncf %579 : vector<2x8x8xf32> to vector<2x8x8xbf16>
    %581 = vector.extract_strided_slice %514 {offsets = [0, 0, 24], sizes = [2, 8, 8], strides = [1, 1, 1]} : vector<2x8x32xf32> to vector<2x8x8xf32>
    %582 = arith.truncf %581 : vector<2x8x8xf32> to vector<2x8x8xbf16>
    %583 = vector.extract_strided_slice %515 {offsets = [0, 0, 24], sizes = [2, 8, 8], strides = [1, 1, 1]} : vector<2x8x32xf32> to vector<2x8x8xf32>
    %584 = arith.truncf %583 : vector<2x8x8xf32> to vector<2x8x8xbf16>
    "tpu.trace_start"() <{level = 10 : i32, message = "nqd,nkd->nqk"}> : () -> ()
    %cst_151 = arith.constant dense<0.000000e+00> : vector<2x8x8xf32>
    %585 = tpu.matmul %580, %582, %cst_151 {dimension_numbers = #tpu.dot_dimension_numbers<[2], [2], [1], [1], [0, 0, 0, 1, 1, 1], [0], [0]>} : vector<2x8x8xbf16>, vector<2x8x8xbf16>, vector<2x8x8xf32> -> vector<2x8x8xf32>
    "tpu.trace_stop"() : () -> ()
    %cst_152 = arith.constant 0.353553385 : f32
    %586 = vector.broadcast %cst_152 : f32 to vector<2x8x8xf32>
    %587 = arith.mulf %585, %586 : vector<2x8x8xf32>
    %cst_153 = arith.constant dense<0xFF800000> : vector<2x8xf32>
    %588 = vector.multi_reduction <maximumf>, %587, %cst_153 [2] : vector<2x8x8xf32> to vector<2x8xf32>
    %589 = vector.shape_cast %588 : vector<2x8xf32> to vector<2x8x1xf32>
    %590 = vector.broadcast %589 : vector<2x8x1xf32> to vector<2x8x8xf32>
    %591 = arith.subf %587, %590 : vector<2x8x8xf32>
    %592 = math.exp %591 : vector<2x8x8xf32>
    %cst_154 = arith.constant dense<0.000000e+00> : vector<2x8xf32>
    %593 = vector.multi_reduction <add>, %592, %cst_154 [2] : vector<2x8x8xf32> to vector<2x8xf32>
    %594 = vector.shape_cast %593 : vector<2x8xf32> to vector<2x8x1xf32>
    %595 = tpu.reciprocal %594 {approx = true} : vector<2x8x1xf32> -> vector<2x8x1xf32>
    %596 = vector.broadcast %595 : vector<2x8x1xf32> to vector<2x8x8xf32>
    %597 = arith.mulf %592, %596 : vector<2x8x8xf32>
    %598 = arith.truncf %597 : vector<2x8x8xf32> to vector<2x8x8xbf16>
    "tpu.trace_start"() <{level = 10 : i32, message = "nqk,nkd->nqd"}> : () -> ()
    %cst_155 = arith.constant dense<0.000000e+00> : vector<2x8x8xf32>
    %599 = tpu.matmul %598, %584, %cst_155 {dimension_numbers = #tpu.dot_dimension_numbers<[2], [1], [1], [2], [0, 0, 0, 1, 1, 2], [0], [0]>} : vector<2x8x8xbf16>, vector<2x8x8xbf16>, vector<2x8x8xf32> -> vector<2x8x8xf32>
    "tpu.trace_stop"() : () -> ()
    %600 = tpu.concatenate %536, %557, %578, %599 in 2 : vector<2x8x8xf32>, vector<2x8x8xf32>, vector<2x8x8xf32>, vector<2x8x8xf32> -> vector<2x8x32xf32>
    %601 = vector.shape_cast %600 : vector<2x8x32xf32> to vector<16x32xf32>
    %602 = arith.truncf %601 : vector<16x32xf32> to vector<16x32xbf16>
    %cst_156 = arith.constant dense<0.000000e+00> : vector<16x32xf32>
    %603 = tpu.matmul %602, %511, %cst_156 {dimension_numbers = #tpu.dot_dimension_numbers<[1], [0], [0], [1], [0, 0, 1, 1], [], []>} : vector<16x32xbf16>, vector<32x32xbf16>, vector<16x32xf32> -> vector<16x32xf32>
    %604 = vector.broadcast %512 : vector<1x32xf32> to vector<16x32xf32>
    %605 = arith.addf %603, %604 : vector<16x32xf32>
    %606 = arith.addf %496, %605 : vector<16x32xf32>
    %607 = vector.extract_strided_slice %369 {offsets = [7, 0], sizes = [1, 32], strides = [1, 1]} : vector<13x96xf32> to vector<1x32xf32>
    %608 = vector.extract_strided_slice %369 {offsets = [8, 0], sizes = [1, 32], strides = [1, 1]} : vector<13x96xf32> to vector<1x32xf32>
    %cst_157 = arith.constant dense<0.000000e+00> : vector<16xf32>
    %609 = vector.multi_reduction <add>, %606, %cst_157 [1] : vector<16x32xf32> to vector<16xf32>
    %610 = vector.shape_cast %609 : vector<16xf32> to vector<16x1xf32>
    %cst_158 = arith.constant 3.200000e+01 : f32
    %611 = vector.broadcast %cst_158 : f32 to vector<16x1xf32>
    %612 = arith.divf %610, %611 : vector<16x1xf32>
    %613 = vector.broadcast %612 : vector<16x1xf32> to vector<16x32xf32>
    %614 = arith.subf %606, %613 : vector<16x32xf32>
    %615 = arith.mulf %614, %614 : vector<16x32xf32>
    %cst_159 = arith.constant dense<0.000000e+00> : vector<16xf32>
    %616 = vector.multi_reduction <add>, %615, %cst_159 [1] : vector<16x32xf32> to vector<16xf32>
    %617 = vector.shape_cast %616 : vector<16xf32> to vector<16x1xf32>
    %cst_160 = arith.constant 3.200000e+01 : f32
    %618 = vector.broadcast %cst_160 : f32 to vector<16x1xf32>
    %619 = arith.divf %617, %618 : vector<16x1xf32>
    %cst_161 = arith.constant 9.99999974E-6 : f32
    %620 = vector.broadcast %cst_161 : f32 to vector<16x1xf32>
    %621 = arith.addf %619, %620 : vector<16x1xf32>
    %622 = math.rsqrt %621 : vector<16x1xf32>
    %623 = vector.broadcast %622 : vector<16x1xf32> to vector<16x32xf32>
    %624 = arith.mulf %614, %623 : vector<16x32xf32>
    %625 = vector.broadcast %607 : vector<1x32xf32> to vector<16x32xf32>
    %626 = arith.mulf %624, %625 : vector<16x32xf32>
    %627 = vector.broadcast %608 : vector<1x32xf32> to vector<16x32xf32>
    %628 = arith.addf %626, %627 : vector<16x32xf32>
    %629 = vector.extract_strided_slice %367 {offsets = [0, 640], sizes = [32, 64], strides = [1, 1]} : vector<32x768xbf16> to vector<32x64xbf16>
    %630 = arith.truncf %628 : vector<16x32xf32> to vector<16x32xbf16>
    %cst_162 = arith.constant dense<0.000000e+00> : vector<16x64xf32>
    %631 = tpu.matmul %630, %629, %cst_162 {dimension_numbers = #tpu.dot_dimension_numbers<[1], [0], [0], [1], [0, 0, 1, 1], [], []>} : vector<16x32xbf16>, vector<32x64xbf16>, vector<16x64xf32> -> vector<16x64xf32>
    %632 = vector.extract_strided_slice %369 {offsets = [9, 0], sizes = [1, 64], strides = [1, 1]} : vector<13x96xf32> to vector<1x64xf32>
    %633 = vector.broadcast %632 : vector<1x64xf32> to vector<16x64xf32>
    %634 = arith.addf %631, %633 : vector<16x64xf32>
    %cst_163 = arith.constant 0.000000e+00 : f32
    %635 = vector.broadcast %cst_163 : f32 to vector<16x64xf32>
    %636 = arith.maximumf %634, %635 : vector<16x64xf32>
    %c0_164 = arith.constant 0 : index
    %c0_165 = arith.constant 0 : index
    %c0_166 = arith.constant 0 : index
    %637 = vector.load %arg7[%c0_164, %c0_165, %c0_166] : memref<2x64x32xbf16, #tpu.memory_space<vmem>>, vector<1x64x32xbf16>
    %638 = vector.shape_cast %637 : vector<1x64x32xbf16> to vector<64x32xbf16>
    %639 = arith.truncf %636 : vector<16x64xf32> to vector<16x64xbf16>
    %cst_167 = arith.constant dense<0.000000e+00> : vector<16x32xf32>
    %640 = tpu.matmul %639, %638, %cst_167 {dimension_numbers = #tpu.dot_dimension_numbers<[1], [0], [0], [1], [0, 0, 1, 1], [], []>} : vector<16x64xbf16>, vector<64x32xbf16>, vector<16x32xf32> -> vector<16x32xf32>
    %641 = vector.extract_strided_slice %369 {offsets = [10, 0], sizes = [1, 32], strides = [1, 1]} : vector<13x96xf32> to vector<1x32xf32>
    %642 = vector.broadcast %641 : vector<1x32xf32> to vector<16x32xf32>
    %643 = arith.addf %640, %642 : vector<16x32xf32>
    %644 = arith.addf %628, %643 : vector<16x32xf32>
    %645 = vector.extract_strided_slice %369 {offsets = [11, 0], sizes = [1, 32], strides = [1, 1]} : vector<13x96xf32> to vector<1x32xf32>
    %646 = vector.extract_strided_slice %369 {offsets = [12, 0], sizes = [1, 32], strides = [1, 1]} : vector<13x96xf32> to vector<1x32xf32>
    %cst_168 = arith.constant dense<0.000000e+00> : vector<16xf32>
    %647 = vector.multi_reduction <add>, %644, %cst_168 [1] : vector<16x32xf32> to vector<16xf32>
    %648 = vector.shape_cast %647 : vector<16xf32> to vector<16x1xf32>
    %cst_169 = arith.constant 3.200000e+01 : f32
    %649 = vector.broadcast %cst_169 : f32 to vector<16x1xf32>
    %650 = arith.divf %648, %649 : vector<16x1xf32>
    %651 = vector.broadcast %650 : vector<16x1xf32> to vector<16x32xf32>
    %652 = arith.subf %644, %651 : vector<16x32xf32>
    %653 = arith.mulf %652, %652 : vector<16x32xf32>
    %cst_170 = arith.constant dense<0.000000e+00> : vector<16xf32>
    %654 = vector.multi_reduction <add>, %653, %cst_170 [1] : vector<16x32xf32> to vector<16xf32>
    %655 = vector.shape_cast %654 : vector<16xf32> to vector<16x1xf32>
    %cst_171 = arith.constant 3.200000e+01 : f32
    %656 = vector.broadcast %cst_171 : f32 to vector<16x1xf32>
    %657 = arith.divf %655, %656 : vector<16x1xf32>
    %cst_172 = arith.constant 9.99999974E-6 : f32
    %658 = vector.broadcast %cst_172 : f32 to vector<16x1xf32>
    %659 = arith.addf %657, %658 : vector<16x1xf32>
    %660 = math.rsqrt %659 : vector<16x1xf32>
    %661 = vector.broadcast %660 : vector<16x1xf32> to vector<16x32xf32>
    %662 = arith.mulf %652, %661 : vector<16x32xf32>
    %663 = vector.broadcast %645 : vector<1x32xf32> to vector<16x32xf32>
    %664 = arith.mulf %662, %663 : vector<16x32xf32>
    %665 = vector.broadcast %646 : vector<1x32xf32> to vector<16x32xf32>
    %666 = arith.addf %664, %665 : vector<16x32xf32>
    %c1_173 = arith.constant 1 : index
    %c0_174 = arith.constant 0 : index
    %c0_175 = arith.constant 0 : index
    %667 = vector.load %arg6[%c1_173, %c0_174, %c0_175] : memref<2x32x768xbf16, #tpu.memory_space<vmem>>, vector<1x32x768xbf16>
    %668 = vector.shape_cast %667 : vector<1x32x768xbf16> to vector<32x768xbf16>
    %c1_176 = arith.constant 1 : index
    %c0_177 = arith.constant 0 : index
    %c0_178 = arith.constant 0 : index
    %669 = vector.load %arg8[%c1_176, %c0_177, %c0_178] : memref<2x13x96xf32, #tpu.memory_space<vmem>>, vector<1x13x96xf32>
    %670 = vector.shape_cast %669 : vector<1x13x96xf32> to vector<13x96xf32>
    %671 = vector.extract_strided_slice %668 {offsets = [0, 0], sizes = [32, 96], strides = [1, 1]} : vector<32x768xbf16> to vector<32x96xbf16>
    %672 = arith.truncf %666 : vector<16x32xf32> to vector<16x32xbf16>
    %cst_179 = arith.constant dense<0.000000e+00> : vector<16x96xf32>
    %673 = tpu.matmul %672, %671, %cst_179 {dimension_numbers = #tpu.dot_dimension_numbers<[1], [0], [0], [1], [0, 0, 1, 1], [], []>} : vector<16x32xbf16>, vector<32x96xbf16>, vector<16x96xf32> -> vector<16x96xf32>
    %674 = vector.extract_strided_slice %670 {offsets = [0, 0], sizes = [1, 96], strides = [1, 1]} : vector<13x96xf32> to vector<1x96xf32>
    %675 = vector.broadcast %674 : vector<1x96xf32> to vector<16x96xf32>
    %676 = arith.addf %673, %675 : vector<16x96xf32>
    %677 = vector.extract_strided_slice %676 {offsets = [0, 0], sizes = [16, 32], strides = [1, 1]} : vector<16x96xf32> to vector<16x32xf32>
    %678 = vector.extract_strided_slice %676 {offsets = [0, 32], sizes = [16, 32], strides = [1, 1]} : vector<16x96xf32> to vector<16x32xf32>
    %679 = vector.extract_strided_slice %676 {offsets = [0, 64], sizes = [16, 32], strides = [1, 1]} : vector<16x96xf32> to vector<16x32xf32>
    %680 = vector.extract_strided_slice %668 {offsets = [0, 128], sizes = [32, 32], strides = [1, 1]} : vector<32x768xbf16> to vector<32x32xbf16>
    %681 = vector.extract_strided_slice %670 {offsets = [1, 0], sizes = [1, 32], strides = [1, 1]} : vector<13x96xf32> to vector<1x32xf32>
    %682 = vector.shape_cast %677 : vector<16x32xf32> to vector<2x8x32xf32>
    %683 = vector.shape_cast %678 : vector<16x32xf32> to vector<2x8x32xf32>
    %684 = vector.shape_cast %679 : vector<16x32xf32> to vector<2x8x32xf32>
    %685 = vector.extract_strided_slice %682 {offsets = [0, 0, 0], sizes = [2, 8, 8], strides = [1, 1, 1]} : vector<2x8x32xf32> to vector<2x8x8xf32>
    %686 = arith.truncf %685 : vector<2x8x8xf32> to vector<2x8x8xbf16>
    %687 = vector.extract_strided_slice %683 {offsets = [0, 0, 0], sizes = [2, 8, 8], strides = [1, 1, 1]} : vector<2x8x32xf32> to vector<2x8x8xf32>
    %688 = arith.truncf %687 : vector<2x8x8xf32> to vector<2x8x8xbf16>
    %689 = vector.extract_strided_slice %684 {offsets = [0, 0, 0], sizes = [2, 8, 8], strides = [1, 1, 1]} : vector<2x8x32xf32> to vector<2x8x8xf32>
    %690 = arith.truncf %689 : vector<2x8x8xf32> to vector<2x8x8xbf16>
    "tpu.trace_start"() <{level = 10 : i32, message = "nqd,nkd->nqk"}> : () -> ()
    %cst_180 = arith.constant dense<0.000000e+00> : vector<2x8x8xf32>
    %691 = tpu.matmul %686, %688, %cst_180 {dimension_numbers = #tpu.dot_dimension_numbers<[2], [2], [1], [1], [0, 0, 0, 1, 1, 1], [0], [0]>} : vector<2x8x8xbf16>, vector<2x8x8xbf16>, vector<2x8x8xf32> -> vector<2x8x8xf32>
    "tpu.trace_stop"() : () -> ()
    %cst_181 = arith.constant 0.353553385 : f32
    %692 = vector.broadcast %cst_181 : f32 to vector<2x8x8xf32>
    %693 = arith.mulf %691, %692 : vector<2x8x8xf32>
    %cst_182 = arith.constant dense<0xFF800000> : vector<2x8xf32>
    %694 = vector.multi_reduction <maximumf>, %693, %cst_182 [2] : vector<2x8x8xf32> to vector<2x8xf32>
    %695 = vector.shape_cast %694 : vector<2x8xf32> to vector<2x8x1xf32>
    %696 = vector.broadcast %695 : vector<2x8x1xf32> to vector<2x8x8xf32>
    %697 = arith.subf %693, %696 : vector<2x8x8xf32>
    %698 = math.exp %697 : vector<2x8x8xf32>
    %cst_183 = arith.constant dense<0.000000e+00> : vector<2x8xf32>
    %699 = vector.multi_reduction <add>, %698, %cst_183 [2] : vector<2x8x8xf32> to vector<2x8xf32>
    %700 = vector.shape_cast %699 : vector<2x8xf32> to vector<2x8x1xf32>
    %701 = tpu.reciprocal %700 {approx = true} : vector<2x8x1xf32> -> vector<2x8x1xf32>
    %702 = vector.broadcast %701 : vector<2x8x1xf32> to vector<2x8x8xf32>
    %703 = arith.mulf %698, %702 : vector<2x8x8xf32>
    %704 = arith.truncf %703 : vector<2x8x8xf32> to vector<2x8x8xbf16>
    "tpu.trace_start"() <{level = 10 : i32, message = "nqk,nkd->nqd"}> : () -> ()
    %cst_184 = arith.constant dense<0.000000e+00> : vector<2x8x8xf32>
    %705 = tpu.matmul %704, %690, %cst_184 {dimension_numbers = #tpu.dot_dimension_numbers<[2], [1], [1], [2], [0, 0, 0, 1, 1, 2], [0], [0]>} : vector<2x8x8xbf16>, vector<2x8x8xbf16>, vector<2x8x8xf32> -> vector<2x8x8xf32>
    "tpu.trace_stop"() : () -> ()
    %706 = vector.extract_strided_slice %682 {offsets = [0, 0, 8], sizes = [2, 8, 8], strides = [1, 1, 1]} : vector<2x8x32xf32> to vector<2x8x8xf32>
    %707 = arith.truncf %706 : vector<2x8x8xf32> to vector<2x8x8xbf16>
    %708 = vector.extract_strided_slice %683 {offsets = [0, 0, 8], sizes = [2, 8, 8], strides = [1, 1, 1]} : vector<2x8x32xf32> to vector<2x8x8xf32>
    %709 = arith.truncf %708 : vector<2x8x8xf32> to vector<2x8x8xbf16>
    %710 = vector.extract_strided_slice %684 {offsets = [0, 0, 8], sizes = [2, 8, 8], strides = [1, 1, 1]} : vector<2x8x32xf32> to vector<2x8x8xf32>
    %711 = arith.truncf %710 : vector<2x8x8xf32> to vector<2x8x8xbf16>
    "tpu.trace_start"() <{level = 10 : i32, message = "nqd,nkd->nqk"}> : () -> ()
    %cst_185 = arith.constant dense<0.000000e+00> : vector<2x8x8xf32>
    %712 = tpu.matmul %707, %709, %cst_185 {dimension_numbers = #tpu.dot_dimension_numbers<[2], [2], [1], [1], [0, 0, 0, 1, 1, 1], [0], [0]>} : vector<2x8x8xbf16>, vector<2x8x8xbf16>, vector<2x8x8xf32> -> vector<2x8x8xf32>
    "tpu.trace_stop"() : () -> ()
    %cst_186 = arith.constant 0.353553385 : f32
    %713 = vector.broadcast %cst_186 : f32 to vector<2x8x8xf32>
    %714 = arith.mulf %712, %713 : vector<2x8x8xf32>
    %cst_187 = arith.constant dense<0xFF800000> : vector<2x8xf32>
    %715 = vector.multi_reduction <maximumf>, %714, %cst_187 [2] : vector<2x8x8xf32> to vector<2x8xf32>
    %716 = vector.shape_cast %715 : vector<2x8xf32> to vector<2x8x1xf32>
    %717 = vector.broadcast %716 : vector<2x8x1xf32> to vector<2x8x8xf32>
    %718 = arith.subf %714, %717 : vector<2x8x8xf32>
    %719 = math.exp %718 : vector<2x8x8xf32>
    %cst_188 = arith.constant dense<0.000000e+00> : vector<2x8xf32>
    %720 = vector.multi_reduction <add>, %719, %cst_188 [2] : vector<2x8x8xf32> to vector<2x8xf32>
    %721 = vector.shape_cast %720 : vector<2x8xf32> to vector<2x8x1xf32>
    %722 = tpu.reciprocal %721 {approx = true} : vector<2x8x1xf32> -> vector<2x8x1xf32>
    %723 = vector.broadcast %722 : vector<2x8x1xf32> to vector<2x8x8xf32>
    %724 = arith.mulf %719, %723 : vector<2x8x8xf32>
    %725 = arith.truncf %724 : vector<2x8x8xf32> to vector<2x8x8xbf16>
    "tpu.trace_start"() <{level = 10 : i32, message = "nqk,nkd->nqd"}> : () -> ()
    %cst_189 = arith.constant dense<0.000000e+00> : vector<2x8x8xf32>
    %726 = tpu.matmul %725, %711, %cst_189 {dimension_numbers = #tpu.dot_dimension_numbers<[2], [1], [1], [2], [0, 0, 0, 1, 1, 2], [0], [0]>} : vector<2x8x8xbf16>, vector<2x8x8xbf16>, vector<2x8x8xf32> -> vector<2x8x8xf32>
    "tpu.trace_stop"() : () -> ()
    %727 = vector.extract_strided_slice %682 {offsets = [0, 0, 16], sizes = [2, 8, 8], strides = [1, 1, 1]} : vector<2x8x32xf32> to vector<2x8x8xf32>
    %728 = arith.truncf %727 : vector<2x8x8xf32> to vector<2x8x8xbf16>
    %729 = vector.extract_strided_slice %683 {offsets = [0, 0, 16], sizes = [2, 8, 8], strides = [1, 1, 1]} : vector<2x8x32xf32> to vector<2x8x8xf32>
    %730 = arith.truncf %729 : vector<2x8x8xf32> to vector<2x8x8xbf16>
    %731 = vector.extract_strided_slice %684 {offsets = [0, 0, 16], sizes = [2, 8, 8], strides = [1, 1, 1]} : vector<2x8x32xf32> to vector<2x8x8xf32>
    %732 = arith.truncf %731 : vector<2x8x8xf32> to vector<2x8x8xbf16>
    "tpu.trace_start"() <{level = 10 : i32, message = "nqd,nkd->nqk"}> : () -> ()
    %cst_190 = arith.constant dense<0.000000e+00> : vector<2x8x8xf32>
    %733 = tpu.matmul %728, %730, %cst_190 {dimension_numbers = #tpu.dot_dimension_numbers<[2], [2], [1], [1], [0, 0, 0, 1, 1, 1], [0], [0]>} : vector<2x8x8xbf16>, vector<2x8x8xbf16>, vector<2x8x8xf32> -> vector<2x8x8xf32>
    "tpu.trace_stop"() : () -> ()
    %cst_191 = arith.constant 0.353553385 : f32
    %734 = vector.broadcast %cst_191 : f32 to vector<2x8x8xf32>
    %735 = arith.mulf %733, %734 : vector<2x8x8xf32>
    %cst_192 = arith.constant dense<0xFF800000> : vector<2x8xf32>
    %736 = vector.multi_reduction <maximumf>, %735, %cst_192 [2] : vector<2x8x8xf32> to vector<2x8xf32>
    %737 = vector.shape_cast %736 : vector<2x8xf32> to vector<2x8x1xf32>
    %738 = vector.broadcast %737 : vector<2x8x1xf32> to vector<2x8x8xf32>
    %739 = arith.subf %735, %738 : vector<2x8x8xf32>
    %740 = math.exp %739 : vector<2x8x8xf32>
    %cst_193 = arith.constant dense<0.000000e+00> : vector<2x8xf32>
    %741 = vector.multi_reduction <add>, %740, %cst_193 [2] : vector<2x8x8xf32> to vector<2x8xf32>
    %742 = vector.shape_cast %741 : vector<2x8xf32> to vector<2x8x1xf32>
    %743 = tpu.reciprocal %742 {approx = true} : vector<2x8x1xf32> -> vector<2x8x1xf32>
    %744 = vector.broadcast %743 : vector<2x8x1xf32> to vector<2x8x8xf32>
    %745 = arith.mulf %740, %744 : vector<2x8x8xf32>
    %746 = arith.truncf %745 : vector<2x8x8xf32> to vector<2x8x8xbf16>
    "tpu.trace_start"() <{level = 10 : i32, message = "nqk,nkd->nqd"}> : () -> ()
    %cst_194 = arith.constant dense<0.000000e+00> : vector<2x8x8xf32>
    %747 = tpu.matmul %746, %732, %cst_194 {dimension_numbers = #tpu.dot_dimension_numbers<[2], [1], [1], [2], [0, 0, 0, 1, 1, 2], [0], [0]>} : vector<2x8x8xbf16>, vector<2x8x8xbf16>, vector<2x8x8xf32> -> vector<2x8x8xf32>
    "tpu.trace_stop"() : () -> ()
    %748 = vector.extract_strided_slice %682 {offsets = [0, 0, 24], sizes = [2, 8, 8], strides = [1, 1, 1]} : vector<2x8x32xf32> to vector<2x8x8xf32>
    %749 = arith.truncf %748 : vector<2x8x8xf32> to vector<2x8x8xbf16>
    %750 = vector.extract_strided_slice %683 {offsets = [0, 0, 24], sizes = [2, 8, 8], strides = [1, 1, 1]} : vector<2x8x32xf32> to vector<2x8x8xf32>
    %751 = arith.truncf %750 : vector<2x8x8xf32> to vector<2x8x8xbf16>
    %752 = vector.extract_strided_slice %684 {offsets = [0, 0, 24], sizes = [2, 8, 8], strides = [1, 1, 1]} : vector<2x8x32xf32> to vector<2x8x8xf32>
    %753 = arith.truncf %752 : vector<2x8x8xf32> to vector<2x8x8xbf16>
    "tpu.trace_start"() <{level = 10 : i32, message = "nqd,nkd->nqk"}> : () -> ()
    %cst_195 = arith.constant dense<0.000000e+00> : vector<2x8x8xf32>
    %754 = tpu.matmul %749, %751, %cst_195 {dimension_numbers = #tpu.dot_dimension_numbers<[2], [2], [1], [1], [0, 0, 0, 1, 1, 1], [0], [0]>} : vector<2x8x8xbf16>, vector<2x8x8xbf16>, vector<2x8x8xf32> -> vector<2x8x8xf32>
    "tpu.trace_stop"() : () -> ()
    %cst_196 = arith.constant 0.353553385 : f32
    %755 = vector.broadcast %cst_196 : f32 to vector<2x8x8xf32>
    %756 = arith.mulf %754, %755 : vector<2x8x8xf32>
    %cst_197 = arith.constant dense<0xFF800000> : vector<2x8xf32>
    %757 = vector.multi_reduction <maximumf>, %756, %cst_197 [2] : vector<2x8x8xf32> to vector<2x8xf32>
    %758 = vector.shape_cast %757 : vector<2x8xf32> to vector<2x8x1xf32>
    %759 = vector.broadcast %758 : vector<2x8x1xf32> to vector<2x8x8xf32>
    %760 = arith.subf %756, %759 : vector<2x8x8xf32>
    %761 = math.exp %760 : vector<2x8x8xf32>
    %cst_198 = arith.constant dense<0.000000e+00> : vector<2x8xf32>
    %762 = vector.multi_reduction <add>, %761, %cst_198 [2] : vector<2x8x8xf32> to vector<2x8xf32>
    %763 = vector.shape_cast %762 : vector<2x8xf32> to vector<2x8x1xf32>
    %764 = tpu.reciprocal %763 {approx = true} : vector<2x8x1xf32> -> vector<2x8x1xf32>
    %765 = vector.broadcast %764 : vector<2x8x1xf32> to vector<2x8x8xf32>
    %766 = arith.mulf %761, %765 : vector<2x8x8xf32>
    %767 = arith.truncf %766 : vector<2x8x8xf32> to vector<2x8x8xbf16>
    "tpu.trace_start"() <{level = 10 : i32, message = "nqk,nkd->nqd"}> : () -> ()
    %cst_199 = arith.constant dense<0.000000e+00> : vector<2x8x8xf32>
    %768 = tpu.matmul %767, %753, %cst_199 {dimension_numbers = #tpu.dot_dimension_numbers<[2], [1], [1], [2], [0, 0, 0, 1, 1, 2], [0], [0]>} : vector<2x8x8xbf16>, vector<2x8x8xbf16>, vector<2x8x8xf32> -> vector<2x8x8xf32>
    "tpu.trace_stop"() : () -> ()
    %769 = tpu.concatenate %705, %726, %747, %768 in 2 : vector<2x8x8xf32>, vector<2x8x8xf32>, vector<2x8x8xf32>, vector<2x8x8xf32> -> vector<2x8x32xf32>
    %770 = vector.shape_cast %769 : vector<2x8x32xf32> to vector<16x32xf32>
    %771 = arith.truncf %770 : vector<16x32xf32> to vector<16x32xbf16>
    %cst_200 = arith.constant dense<0.000000e+00> : vector<16x32xf32>
    %772 = tpu.matmul %771, %680, %cst_200 {dimension_numbers = #tpu.dot_dimension_numbers<[1], [0], [0], [1], [0, 0, 1, 1], [], []>} : vector<16x32xbf16>, vector<32x32xbf16>, vector<16x32xf32> -> vector<16x32xf32>
    %773 = vector.broadcast %681 : vector<1x32xf32> to vector<16x32xf32>
    %774 = arith.addf %772, %773 : vector<16x32xf32>
    %775 = arith.addf %666, %774 : vector<16x32xf32>
    %776 = vector.extract_strided_slice %670 {offsets = [2, 0], sizes = [1, 32], strides = [1, 1]} : vector<13x96xf32> to vector<1x32xf32>
    %777 = vector.extract_strided_slice %670 {offsets = [3, 0], sizes = [1, 32], strides = [1, 1]} : vector<13x96xf32> to vector<1x32xf32>
    %cst_201 = arith.constant dense<0.000000e+00> : vector<16xf32>
    %778 = vector.multi_reduction <add>, %775, %cst_201 [1] : vector<16x32xf32> to vector<16xf32>
    %779 = vector.shape_cast %778 : vector<16xf32> to vector<16x1xf32>
    %cst_202 = arith.constant 3.200000e+01 : f32
    %780 = vector.broadcast %cst_202 : f32 to vector<16x1xf32>
    %781 = arith.divf %779, %780 : vector<16x1xf32>
    %782 = vector.broadcast %781 : vector<16x1xf32> to vector<16x32xf32>
    %783 = arith.subf %775, %782 : vector<16x32xf32>
    %784 = arith.mulf %783, %783 : vector<16x32xf32>
    %cst_203 = arith.constant dense<0.000000e+00> : vector<16xf32>
    %785 = vector.multi_reduction <add>, %784, %cst_203 [1] : vector<16x32xf32> to vector<16xf32>
    %786 = vector.shape_cast %785 : vector<16xf32> to vector<16x1xf32>
    %cst_204 = arith.constant 3.200000e+01 : f32
    %787 = vector.broadcast %cst_204 : f32 to vector<16x1xf32>
    %788 = arith.divf %786, %787 : vector<16x1xf32>
    %cst_205 = arith.constant 9.99999974E-6 : f32
    %789 = vector.broadcast %cst_205 : f32 to vector<16x1xf32>
    %790 = arith.addf %788, %789 : vector<16x1xf32>
    %791 = math.rsqrt %790 : vector<16x1xf32>
    %792 = vector.broadcast %791 : vector<16x1xf32> to vector<16x32xf32>
    %793 = arith.mulf %783, %792 : vector<16x32xf32>
    %794 = vector.broadcast %776 : vector<1x32xf32> to vector<16x32xf32>
    %795 = arith.mulf %793, %794 : vector<16x32xf32>
    %796 = vector.broadcast %777 : vector<1x32xf32> to vector<16x32xf32>
    %797 = arith.addf %795, %796 : vector<16x32xf32>
    %798 = vector.extract_strided_slice %668 {offsets = [0, 256], sizes = [32, 32], strides = [1, 1]} : vector<32x768xbf16> to vector<32x32xbf16>
    %799 = arith.truncf %797 : vector<16x32xf32> to vector<16x32xbf16>
    %cst_206 = arith.constant dense<0.000000e+00> : vector<16x32xf32>
    %800 = tpu.matmul %799, %798, %cst_206 {dimension_numbers = #tpu.dot_dimension_numbers<[1], [0], [0], [1], [0, 0, 1, 1], [], []>} : vector<16x32xbf16>, vector<32x32xbf16>, vector<16x32xf32> -> vector<16x32xf32>
    %801 = vector.extract_strided_slice %670 {offsets = [4, 0], sizes = [1, 32], strides = [1, 1]} : vector<13x96xf32> to vector<1x32xf32>
    %802 = vector.broadcast %801 : vector<1x32xf32> to vector<16x32xf32>
    %803 = arith.addf %800, %802 : vector<16x32xf32>
    %804 = vector.extract_strided_slice %668 {offsets = [0, 384], sizes = [32, 64], strides = [1, 1]} : vector<32x768xbf16> to vector<32x64xbf16>
    %805 = arith.truncf %364 : vector<16x32xf32> to vector<16x32xbf16>
    %cst_207 = arith.constant dense<0.000000e+00> : vector<16x64xf32>
    %806 = tpu.matmul %805, %804, %cst_207 {dimension_numbers = #tpu.dot_dimension_numbers<[1], [0], [0], [1], [0, 0, 1, 1], [], []>} : vector<16x32xbf16>, vector<32x64xbf16>, vector<16x64xf32> -> vector<16x64xf32>
    %807 = vector.extract_strided_slice %670 {offsets = [5, 0], sizes = [1, 64], strides = [1, 1]} : vector<13x96xf32> to vector<1x64xf32>
    %808 = vector.broadcast %807 : vector<1x64xf32> to vector<16x64xf32>
    %809 = arith.addf %806, %808 : vector<16x64xf32>
    %810 = vector.extract_strided_slice %809 {offsets = [0, 0], sizes = [16, 32], strides = [1, 1]} : vector<16x64xf32> to vector<16x32xf32>
    %811 = vector.extract_strided_slice %809 {offsets = [0, 32], sizes = [16, 32], strides = [1, 1]} : vector<16x64xf32> to vector<16x32xf32>
    %812 = vector.extract_strided_slice %668 {offsets = [0, 512], sizes = [32, 32], strides = [1, 1]} : vector<32x768xbf16> to vector<32x32xbf16>
    %813 = vector.extract_strided_slice %670 {offsets = [6, 0], sizes = [1, 32], strides = [1, 1]} : vector<13x96xf32> to vector<1x32xf32>
    %814 = vector.shape_cast %803 : vector<16x32xf32> to vector<2x8x32xf32>
    %815 = vector.shape_cast %810 : vector<16x32xf32> to vector<2x8x32xf32>
    %816 = vector.shape_cast %811 : vector<16x32xf32> to vector<2x8x32xf32>
    %817 = vector.extract_strided_slice %814 {offsets = [0, 0, 0], sizes = [2, 8, 8], strides = [1, 1, 1]} : vector<2x8x32xf32> to vector<2x8x8xf32>
    %818 = arith.truncf %817 : vector<2x8x8xf32> to vector<2x8x8xbf16>
    %819 = vector.extract_strided_slice %815 {offsets = [0, 0, 0], sizes = [2, 8, 8], strides = [1, 1, 1]} : vector<2x8x32xf32> to vector<2x8x8xf32>
    %820 = arith.truncf %819 : vector<2x8x8xf32> to vector<2x8x8xbf16>
    %821 = vector.extract_strided_slice %816 {offsets = [0, 0, 0], sizes = [2, 8, 8], strides = [1, 1, 1]} : vector<2x8x32xf32> to vector<2x8x8xf32>
    %822 = arith.truncf %821 : vector<2x8x8xf32> to vector<2x8x8xbf16>
    "tpu.trace_start"() <{level = 10 : i32, message = "nqd,nkd->nqk"}> : () -> ()
    %cst_208 = arith.constant dense<0.000000e+00> : vector<2x8x8xf32>
    %823 = tpu.matmul %818, %820, %cst_208 {dimension_numbers = #tpu.dot_dimension_numbers<[2], [2], [1], [1], [0, 0, 0, 1, 1, 1], [0], [0]>} : vector<2x8x8xbf16>, vector<2x8x8xbf16>, vector<2x8x8xf32> -> vector<2x8x8xf32>
    "tpu.trace_stop"() : () -> ()
    %cst_209 = arith.constant 0.353553385 : f32
    %824 = vector.broadcast %cst_209 : f32 to vector<2x8x8xf32>
    %825 = arith.mulf %823, %824 : vector<2x8x8xf32>
    %cst_210 = arith.constant dense<0xFF800000> : vector<2x8xf32>
    %826 = vector.multi_reduction <maximumf>, %825, %cst_210 [2] : vector<2x8x8xf32> to vector<2x8xf32>
    %827 = vector.shape_cast %826 : vector<2x8xf32> to vector<2x8x1xf32>
    %828 = vector.broadcast %827 : vector<2x8x1xf32> to vector<2x8x8xf32>
    %829 = arith.subf %825, %828 : vector<2x8x8xf32>
    %830 = math.exp %829 : vector<2x8x8xf32>
    %cst_211 = arith.constant dense<0.000000e+00> : vector<2x8xf32>
    %831 = vector.multi_reduction <add>, %830, %cst_211 [2] : vector<2x8x8xf32> to vector<2x8xf32>
    %832 = vector.shape_cast %831 : vector<2x8xf32> to vector<2x8x1xf32>
    %833 = tpu.reciprocal %832 {approx = true} : vector<2x8x1xf32> -> vector<2x8x1xf32>
    %834 = vector.broadcast %833 : vector<2x8x1xf32> to vector<2x8x8xf32>
    %835 = arith.mulf %830, %834 : vector<2x8x8xf32>
    %836 = arith.truncf %835 : vector<2x8x8xf32> to vector<2x8x8xbf16>
    "tpu.trace_start"() <{level = 10 : i32, message = "nqk,nkd->nqd"}> : () -> ()
    %cst_212 = arith.constant dense<0.000000e+00> : vector<2x8x8xf32>
    %837 = tpu.matmul %836, %822, %cst_212 {dimension_numbers = #tpu.dot_dimension_numbers<[2], [1], [1], [2], [0, 0, 0, 1, 1, 2], [0], [0]>} : vector<2x8x8xbf16>, vector<2x8x8xbf16>, vector<2x8x8xf32> -> vector<2x8x8xf32>
    "tpu.trace_stop"() : () -> ()
    %838 = vector.extract_strided_slice %814 {offsets = [0, 0, 8], sizes = [2, 8, 8], strides = [1, 1, 1]} : vector<2x8x32xf32> to vector<2x8x8xf32>
    %839 = arith.truncf %838 : vector<2x8x8xf32> to vector<2x8x8xbf16>
    %840 = vector.extract_strided_slice %815 {offsets = [0, 0, 8], sizes = [2, 8, 8], strides = [1, 1, 1]} : vector<2x8x32xf32> to vector<2x8x8xf32>
    %841 = arith.truncf %840 : vector<2x8x8xf32> to vector<2x8x8xbf16>
    %842 = vector.extract_strided_slice %816 {offsets = [0, 0, 8], sizes = [2, 8, 8], strides = [1, 1, 1]} : vector<2x8x32xf32> to vector<2x8x8xf32>
    %843 = arith.truncf %842 : vector<2x8x8xf32> to vector<2x8x8xbf16>
    "tpu.trace_start"() <{level = 10 : i32, message = "nqd,nkd->nqk"}> : () -> ()
    %cst_213 = arith.constant dense<0.000000e+00> : vector<2x8x8xf32>
    %844 = tpu.matmul %839, %841, %cst_213 {dimension_numbers = #tpu.dot_dimension_numbers<[2], [2], [1], [1], [0, 0, 0, 1, 1, 1], [0], [0]>} : vector<2x8x8xbf16>, vector<2x8x8xbf16>, vector<2x8x8xf32> -> vector<2x8x8xf32>
    "tpu.trace_stop"() : () -> ()
    %cst_214 = arith.constant 0.353553385 : f32
    %845 = vector.broadcast %cst_214 : f32 to vector<2x8x8xf32>
    %846 = arith.mulf %844, %845 : vector<2x8x8xf32>
    %cst_215 = arith.constant dense<0xFF800000> : vector<2x8xf32>
    %847 = vector.multi_reduction <maximumf>, %846, %cst_215 [2] : vector<2x8x8xf32> to vector<2x8xf32>
    %848 = vector.shape_cast %847 : vector<2x8xf32> to vector<2x8x1xf32>
    %849 = vector.broadcast %848 : vector<2x8x1xf32> to vector<2x8x8xf32>
    %850 = arith.subf %846, %849 : vector<2x8x8xf32>
    %851 = math.exp %850 : vector<2x8x8xf32>
    %cst_216 = arith.constant dense<0.000000e+00> : vector<2x8xf32>
    %852 = vector.multi_reduction <add>, %851, %cst_216 [2] : vector<2x8x8xf32> to vector<2x8xf32>
    %853 = vector.shape_cast %852 : vector<2x8xf32> to vector<2x8x1xf32>
    %854 = tpu.reciprocal %853 {approx = true} : vector<2x8x1xf32> -> vector<2x8x1xf32>
    %855 = vector.broadcast %854 : vector<2x8x1xf32> to vector<2x8x8xf32>
    %856 = arith.mulf %851, %855 : vector<2x8x8xf32>
    %857 = arith.truncf %856 : vector<2x8x8xf32> to vector<2x8x8xbf16>
    "tpu.trace_start"() <{level = 10 : i32, message = "nqk,nkd->nqd"}> : () -> ()
    %cst_217 = arith.constant dense<0.000000e+00> : vector<2x8x8xf32>
    %858 = tpu.matmul %857, %843, %cst_217 {dimension_numbers = #tpu.dot_dimension_numbers<[2], [1], [1], [2], [0, 0, 0, 1, 1, 2], [0], [0]>} : vector<2x8x8xbf16>, vector<2x8x8xbf16>, vector<2x8x8xf32> -> vector<2x8x8xf32>
    "tpu.trace_stop"() : () -> ()
    %859 = vector.extract_strided_slice %814 {offsets = [0, 0, 16], sizes = [2, 8, 8], strides = [1, 1, 1]} : vector<2x8x32xf32> to vector<2x8x8xf32>
    %860 = arith.truncf %859 : vector<2x8x8xf32> to vector<2x8x8xbf16>
    %861 = vector.extract_strided_slice %815 {offsets = [0, 0, 16], sizes = [2, 8, 8], strides = [1, 1, 1]} : vector<2x8x32xf32> to vector<2x8x8xf32>
    %862 = arith.truncf %861 : vector<2x8x8xf32> to vector<2x8x8xbf16>
    %863 = vector.extract_strided_slice %816 {offsets = [0, 0, 16], sizes = [2, 8, 8], strides = [1, 1, 1]} : vector<2x8x32xf32> to vector<2x8x8xf32>
    %864 = arith.truncf %863 : vector<2x8x8xf32> to vector<2x8x8xbf16>
    "tpu.trace_start"() <{level = 10 : i32, message = "nqd,nkd->nqk"}> : () -> ()
    %cst_218 = arith.constant dense<0.000000e+00> : vector<2x8x8xf32>
    %865 = tpu.matmul %860, %862, %cst_218 {dimension_numbers = #tpu.dot_dimension_numbers<[2], [2], [1], [1], [0, 0, 0, 1, 1, 1], [0], [0]>} : vector<2x8x8xbf16>, vector<2x8x8xbf16>, vector<2x8x8xf32> -> vector<2x8x8xf32>
    "tpu.trace_stop"() : () -> ()
    %cst_219 = arith.constant 0.353553385 : f32
    %866 = vector.broadcast %cst_219 : f32 to vector<2x8x8xf32>
    %867 = arith.mulf %865, %866 : vector<2x8x8xf32>
    %cst_220 = arith.constant dense<0xFF800000> : vector<2x8xf32>
    %868 = vector.multi_reduction <maximumf>, %867, %cst_220 [2] : vector<2x8x8xf32> to vector<2x8xf32>
    %869 = vector.shape_cast %868 : vector<2x8xf32> to vector<2x8x1xf32>
    %870 = vector.broadcast %869 : vector<2x8x1xf32> to vector<2x8x8xf32>
    %871 = arith.subf %867, %870 : vector<2x8x8xf32>
    %872 = math.exp %871 : vector<2x8x8xf32>
    %cst_221 = arith.constant dense<0.000000e+00> : vector<2x8xf32>
    %873 = vector.multi_reduction <add>, %872, %cst_221 [2] : vector<2x8x8xf32> to vector<2x8xf32>
    %874 = vector.shape_cast %873 : vector<2x8xf32> to vector<2x8x1xf32>
    %875 = tpu.reciprocal %874 {approx = true} : vector<2x8x1xf32> -> vector<2x8x1xf32>
    %876 = vector.broadcast %875 : vector<2x8x1xf32> to vector<2x8x8xf32>
    %877 = arith.mulf %872, %876 : vector<2x8x8xf32>
    %878 = arith.truncf %877 : vector<2x8x8xf32> to vector<2x8x8xbf16>
    "tpu.trace_start"() <{level = 10 : i32, message = "nqk,nkd->nqd"}> : () -> ()
    %cst_222 = arith.constant dense<0.000000e+00> : vector<2x8x8xf32>
    %879 = tpu.matmul %878, %864, %cst_222 {dimension_numbers = #tpu.dot_dimension_numbers<[2], [1], [1], [2], [0, 0, 0, 1, 1, 2], [0], [0]>} : vector<2x8x8xbf16>, vector<2x8x8xbf16>, vector<2x8x8xf32> -> vector<2x8x8xf32>
    "tpu.trace_stop"() : () -> ()
    %880 = vector.extract_strided_slice %814 {offsets = [0, 0, 24], sizes = [2, 8, 8], strides = [1, 1, 1]} : vector<2x8x32xf32> to vector<2x8x8xf32>
    %881 = arith.truncf %880 : vector<2x8x8xf32> to vector<2x8x8xbf16>
    %882 = vector.extract_strided_slice %815 {offsets = [0, 0, 24], sizes = [2, 8, 8], strides = [1, 1, 1]} : vector<2x8x32xf32> to vector<2x8x8xf32>
    %883 = arith.truncf %882 : vector<2x8x8xf32> to vector<2x8x8xbf16>
    %884 = vector.extract_strided_slice %816 {offsets = [0, 0, 24], sizes = [2, 8, 8], strides = [1, 1, 1]} : vector<2x8x32xf32> to vector<2x8x8xf32>
    %885 = arith.truncf %884 : vector<2x8x8xf32> to vector<2x8x8xbf16>
    "tpu.trace_start"() <{level = 10 : i32, message = "nqd,nkd->nqk"}> : () -> ()
    %cst_223 = arith.constant dense<0.000000e+00> : vector<2x8x8xf32>
    %886 = tpu.matmul %881, %883, %cst_223 {dimension_numbers = #tpu.dot_dimension_numbers<[2], [2], [1], [1], [0, 0, 0, 1, 1, 1], [0], [0]>} : vector<2x8x8xbf16>, vector<2x8x8xbf16>, vector<2x8x8xf32> -> vector<2x8x8xf32>
    "tpu.trace_stop"() : () -> ()
    %cst_224 = arith.constant 0.353553385 : f32
    %887 = vector.broadcast %cst_224 : f32 to vector<2x8x8xf32>
    %888 = arith.mulf %886, %887 : vector<2x8x8xf32>
    %cst_225 = arith.constant dense<0xFF800000> : vector<2x8xf32>
    %889 = vector.multi_reduction <maximumf>, %888, %cst_225 [2] : vector<2x8x8xf32> to vector<2x8xf32>
    %890 = vector.shape_cast %889 : vector<2x8xf32> to vector<2x8x1xf32>
    %891 = vector.broadcast %890 : vector<2x8x1xf32> to vector<2x8x8xf32>
    %892 = arith.subf %888, %891 : vector<2x8x8xf32>
    %893 = math.exp %892 : vector<2x8x8xf32>
    %cst_226 = arith.constant dense<0.000000e+00> : vector<2x8xf32>
    %894 = vector.multi_reduction <add>, %893, %cst_226 [2] : vector<2x8x8xf32> to vector<2x8xf32>
    %895 = vector.shape_cast %894 : vector<2x8xf32> to vector<2x8x1xf32>
    %896 = tpu.reciprocal %895 {approx = true} : vector<2x8x1xf32> -> vector<2x8x1xf32>
    %897 = vector.broadcast %896 : vector<2x8x1xf32> to vector<2x8x8xf32>
    %898 = arith.mulf %893, %897 : vector<2x8x8xf32>
    %899 = arith.truncf %898 : vector<2x8x8xf32> to vector<2x8x8xbf16>
    "tpu.trace_start"() <{level = 10 : i32, message = "nqk,nkd->nqd"}> : () -> ()
    %cst_227 = arith.constant dense<0.000000e+00> : vector<2x8x8xf32>
    %900 = tpu.matmul %899, %885, %cst_227 {dimension_numbers = #tpu.dot_dimension_numbers<[2], [1], [1], [2], [0, 0, 0, 1, 1, 2], [0], [0]>} : vector<2x8x8xbf16>, vector<2x8x8xbf16>, vector<2x8x8xf32> -> vector<2x8x8xf32>
    "tpu.trace_stop"() : () -> ()
    %901 = tpu.concatenate %837, %858, %879, %900 in 2 : vector<2x8x8xf32>, vector<2x8x8xf32>, vector<2x8x8xf32>, vector<2x8x8xf32> -> vector<2x8x32xf32>
    %902 = vector.shape_cast %901 : vector<2x8x32xf32> to vector<16x32xf32>
    %903 = arith.truncf %902 : vector<16x32xf32> to vector<16x32xbf16>
    %cst_228 = arith.constant dense<0.000000e+00> : vector<16x32xf32>
    %904 = tpu.matmul %903, %812, %cst_228 {dimension_numbers = #tpu.dot_dimension_numbers<[1], [0], [0], [1], [0, 0, 1, 1], [], []>} : vector<16x32xbf16>, vector<32x32xbf16>, vector<16x32xf32> -> vector<16x32xf32>
    %905 = vector.broadcast %813 : vector<1x32xf32> to vector<16x32xf32>
    %906 = arith.addf %904, %905 : vector<16x32xf32>
    %907 = arith.addf %797, %906 : vector<16x32xf32>
    %908 = vector.extract_strided_slice %670 {offsets = [7, 0], sizes = [1, 32], strides = [1, 1]} : vector<13x96xf32> to vector<1x32xf32>
    %909 = vector.extract_strided_slice %670 {offsets = [8, 0], sizes = [1, 32], strides = [1, 1]} : vector<13x96xf32> to vector<1x32xf32>
    %cst_229 = arith.constant dense<0.000000e+00> : vector<16xf32>
    %910 = vector.multi_reduction <add>, %907, %cst_229 [1] : vector<16x32xf32> to vector<16xf32>
    %911 = vector.shape_cast %910 : vector<16xf32> to vector<16x1xf32>
    %cst_230 = arith.constant 3.200000e+01 : f32
    %912 = vector.broadcast %cst_230 : f32 to vector<16x1xf32>
    %913 = arith.divf %911, %912 : vector<16x1xf32>
    %914 = vector.broadcast %913 : vector<16x1xf32> to vector<16x32xf32>
    %915 = arith.subf %907, %914 : vector<16x32xf32>
    %916 = arith.mulf %915, %915 : vector<16x32xf32>
    %cst_231 = arith.constant dense<0.000000e+00> : vector<16xf32>
    %917 = vector.multi_reduction <add>, %916, %cst_231 [1] : vector<16x32xf32> to vector<16xf32>
    %918 = vector.shape_cast %917 : vector<16xf32> to vector<16x1xf32>
    %cst_232 = arith.constant 3.200000e+01 : f32
    %919 = vector.broadcast %cst_232 : f32 to vector<16x1xf32>
    %920 = arith.divf %918, %919 : vector<16x1xf32>
    %cst_233 = arith.constant 9.99999974E-6 : f32
    %921 = vector.broadcast %cst_233 : f32 to vector<16x1xf32>
    %922 = arith.addf %920, %921 : vector<16x1xf32>
    %923 = math.rsqrt %922 : vector<16x1xf32>
    %924 = vector.broadcast %923 : vector<16x1xf32> to vector<16x32xf32>
    %925 = arith.mulf %915, %924 : vector<16x32xf32>
    %926 = vector.broadcast %908 : vector<1x32xf32> to vector<16x32xf32>
    %927 = arith.mulf %925, %926 : vector<16x32xf32>
    %928 = vector.broadcast %909 : vector<1x32xf32> to vector<16x32xf32>
    %929 = arith.addf %927, %928 : vector<16x32xf32>
    %930 = vector.extract_strided_slice %668 {offsets = [0, 640], sizes = [32, 64], strides = [1, 1]} : vector<32x768xbf16> to vector<32x64xbf16>
    %931 = arith.truncf %929 : vector<16x32xf32> to vector<16x32xbf16>
    %cst_234 = arith.constant dense<0.000000e+00> : vector<16x64xf32>
    %932 = tpu.matmul %931, %930, %cst_234 {dimension_numbers = #tpu.dot_dimension_numbers<[1], [0], [0], [1], [0, 0, 1, 1], [], []>} : vector<16x32xbf16>, vector<32x64xbf16>, vector<16x64xf32> -> vector<16x64xf32>
    %933 = vector.extract_strided_slice %670 {offsets = [9, 0], sizes = [1, 64], strides = [1, 1]} : vector<13x96xf32> to vector<1x64xf32>
    %934 = vector.broadcast %933 : vector<1x64xf32> to vector<16x64xf32>
    %935 = arith.addf %932, %934 : vector<16x64xf32>
    %cst_235 = arith.constant 0.000000e+00 : f32
    %936 = vector.broadcast %cst_235 : f32 to vector<16x64xf32>
    %937 = arith.maximumf %935, %936 : vector<16x64xf32>
    %c1_236 = arith.constant 1 : index
    %c0_237 = arith.constant 0 : index
    %c0_238 = arith.constant 0 : index
    %938 = vector.load %arg7[%c1_236, %c0_237, %c0_238] : memref<2x64x32xbf16, #tpu.memory_space<vmem>>, vector<1x64x32xbf16>
    %939 = vector.shape_cast %938 : vector<1x64x32xbf16> to vector<64x32xbf16>
    %940 = arith.truncf %937 : vector<16x64xf32> to vector<16x64xbf16>
    %cst_239 = arith.constant dense<0.000000e+00> : vector<16x32xf32>
    %941 = tpu.matmul %940, %939, %cst_239 {dimension_numbers = #tpu.dot_dimension_numbers<[1], [0], [0], [1], [0, 0, 1, 1], [], []>} : vector<16x64xbf16>, vector<64x32xbf16>, vector<16x32xf32> -> vector<16x32xf32>
    %942 = vector.extract_strided_slice %670 {offsets = [10, 0], sizes = [1, 32], strides = [1, 1]} : vector<13x96xf32> to vector<1x32xf32>
    %943 = vector.broadcast %942 : vector<1x32xf32> to vector<16x32xf32>
    %944 = arith.addf %941, %943 : vector<16x32xf32>
    %945 = arith.addf %929, %944 : vector<16x32xf32>
    %946 = vector.extract_strided_slice %670 {offsets = [11, 0], sizes = [1, 32], strides = [1, 1]} : vector<13x96xf32> to vector<1x32xf32>
    %947 = vector.extract_strided_slice %670 {offsets = [12, 0], sizes = [1, 32], strides = [1, 1]} : vector<13x96xf32> to vector<1x32xf32>
    %cst_240 = arith.constant dense<0.000000e+00> : vector<16xf32>
    %948 = vector.multi_reduction <add>, %945, %cst_240 [1] : vector<16x32xf32> to vector<16xf32>
    %949 = vector.shape_cast %948 : vector<16xf32> to vector<16x1xf32>
    %cst_241 = arith.constant 3.200000e+01 : f32
    %950 = vector.broadcast %cst_241 : f32 to vector<16x1xf32>
    %951 = arith.divf %949, %950 : vector<16x1xf32>
    %952 = vector.broadcast %951 : vector<16x1xf32> to vector<16x32xf32>
    %953 = arith.subf %945, %952 : vector<16x32xf32>
    %954 = arith.mulf %953, %953 : vector<16x32xf32>
    %cst_242 = arith.constant dense<0.000000e+00> : vector<16xf32>
    %955 = vector.multi_reduction <add>, %954, %cst_242 [1] : vector<16x32xf32> to vector<16xf32>
    %956 = vector.shape_cast %955 : vector<16xf32> to vector<16x1xf32>
    %cst_243 = arith.constant 3.200000e+01 : f32
    %957 = vector.broadcast %cst_243 : f32 to vector<16x1xf32>
    %958 = arith.divf %956, %957 : vector<16x1xf32>
    %cst_244 = arith.constant 9.99999974E-6 : f32
    %959 = vector.broadcast %cst_244 : f32 to vector<16x1xf32>
    %960 = arith.addf %958, %959 : vector<16x1xf32>
    %961 = math.rsqrt %960 : vector<16x1xf32>
    %962 = vector.broadcast %961 : vector<16x1xf32> to vector<16x32xf32>
    %963 = arith.mulf %953, %962 : vector<16x32xf32>
    %964 = vector.broadcast %946 : vector<1x32xf32> to vector<16x32xf32>
    %965 = arith.mulf %963, %964 : vector<16x32xf32>
    %966 = vector.broadcast %947 : vector<1x32xf32> to vector<16x32xf32>
    %967 = arith.addf %965, %966 : vector<16x32xf32>
    %c2 = arith.constant 2 : index
    %c0_245 = arith.constant 0 : index
    %968 = vector.load %arg9[%c2, %c0_245] : memref<4x32xf32, #tpu.memory_space<vmem>>, vector<1x32xf32>
    %c3 = arith.constant 3 : index
    %c0_246 = arith.constant 0 : index
    %969 = vector.load %arg9[%c3, %c0_246] : memref<4x32xf32, #tpu.memory_space<vmem>>, vector<1x32xf32>
    %cst_247 = arith.constant dense<0.000000e+00> : vector<16xf32>
    %970 = vector.multi_reduction <add>, %967, %cst_247 [1] : vector<16x32xf32> to vector<16xf32>
    %971 = vector.shape_cast %970 : vector<16xf32> to vector<16x1xf32>
    %cst_248 = arith.constant 3.200000e+01 : f32
    %972 = vector.broadcast %cst_248 : f32 to vector<16x1xf32>
    %973 = arith.divf %971, %972 : vector<16x1xf32>
    %974 = vector.broadcast %973 : vector<16x1xf32> to vector<16x32xf32>
    %975 = arith.subf %967, %974 : vector<16x32xf32>
    %976 = arith.mulf %975, %975 : vector<16x32xf32>
    %cst_249 = arith.constant dense<0.000000e+00> : vector<16xf32>
    %977 = vector.multi_reduction <add>, %976, %cst_249 [1] : vector<16x32xf32> to vector<16xf32>
    %978 = vector.shape_cast %977 : vector<16xf32> to vector<16x1xf32>
    %cst_250 = arith.constant 3.200000e+01 : f32
    %979 = vector.broadcast %cst_250 : f32 to vector<16x1xf32>
    %980 = arith.divf %978, %979 : vector<16x1xf32>
    %cst_251 = arith.constant 9.99999974E-6 : f32
    %981 = vector.broadcast %cst_251 : f32 to vector<16x1xf32>
    %982 = arith.addf %980, %981 : vector<16x1xf32>
    %983 = math.rsqrt %982 : vector<16x1xf32>
    %984 = vector.broadcast %983 : vector<16x1xf32> to vector<16x32xf32>
    %985 = arith.mulf %975, %984 : vector<16x32xf32>
    %986 = vector.broadcast %968 : vector<1x32xf32> to vector<16x32xf32>
    %987 = arith.mulf %985, %986 : vector<16x32xf32>
    %988 = vector.broadcast %969 : vector<1x32xf32> to vector<16x32xf32>
    %989 = arith.addf %987, %988 : vector<16x32xf32>
    %c0_252 = arith.constant 0 : index
    %c0_253 = arith.constant 0 : index
    %990 = vector.load %arg10[%c0_252, %c0_253] : memref<16x32xf32, #tpu.memory_space<vmem>>, vector<16x32xf32>
    tpu.vector_store %arg10[%c0_252, %c0_253], %989 {strides = array<i32>} : memref<16x32xf32, #tpu.memory_space<vmem>>, vector<16x32xf32>,
    return
  }
}

</mosaic_0001>

<bundles_post_ra>
// kernel: transformer_forward.1
= control target key start
LH: loop header
LB: loop body
LE: loop exit
PB: predicated region body
PF: predicated region fallthrough
CT: control target
= control target key end

     0   :  { %15 = vsyncpa [#allocation3], 0  ;;  %s5227_s16 = smov [#allocation2]   ;;  %s5228_s18 = smov 384   ;;  %s6527_s0 = inlined_call_operand.vmem [shape: f32[16,32], index: 0, kind: input, shape index: {}]   ;;  %s6528_s1 = inlined_call_operand.vmem [shape: f32[16,32], index: 1, kind: input, shape index: {}]   ;;  %s6529_s2 = inlined_call_operand.vmem [shape: f32[16,32], index: 2, kind: input, shape index: {}]   ;;  %s6530_s3 = inlined_call_operand.vmem [shape: bf16[2,32,384], index: 3, kind: input, shape index: {}]   ;;  %s6531_s4 = inlined_call_operand.vmem [shape: bf16[2,64,32], index: 4, kind: input, shape index: {}]   ;;  %s6532_s5 = inlined_call_operand.vmem [shape: f32[2,8,96], index: 5, kind: input, shape index: {}]   ;;  %s6533_s6 = inlined_call_operand.hbm [shape: bf16[2,32,768], index: 6, kind: input, shape index: {}]   ;;  %s6534_s7 = inlined_call_operand.vmem [shape: bf16[2,64,32], index: 7, kind: input, shape index: {}]   ;;  %s6535_s8 = inlined_call_operand.vmem [shape: f32[2,13,96], index: 8, kind: input, shape index: {}]   ;;  %s6536_s9 = inlined_call_operand.vmem [shape: f32[4,32], index: 9, kind: input, shape index: {}]   ;;  %s6537_s10 = inlined_call_operand.vmem [shape: f32[16,32], index: 10, kind: output, shape index: {}]  }
   0x1   :  { %s32_s15 = sshll.u32 %s6533_s6, 4  ;;  %s34_s17 = sshll.u32 %s5227_s16, 4  ;;  %s33_s15 = int_to_ptr.hbm [resolvable:$true] %s32_s15  ;;  %s35_s17 = int_to_ptr.vmem [resolvable:$true] %s34_s17 }
   0x2   :  { %s5229_s19 = smov 24  }
   0x3   :  { %40 = dma.hbm_to_vmem [thread:$0]  %s33_s15, 3072, %s35_s17, [#allocation3], %s5228_s18, %s5228_s18, %s5229_s19  }
   0x4   :  { %5225 = dma.done.wait [#allocation3], 3072  }
   0x5   :  { %5226 = vsyncadd [#allocation3], 4294964224  ;;  %v4446_v0 = vld [vmem:[%s6530_s3 + $0x18] sm:$0xf]  ;;  %v4797_v1 = vld [vmem:[%s6530_s3 + $0x20] sm:$0xf0] }
   0x6   :  { %v4442_v2 = vld [vmem:[%s6530_s3] sm:$0xf]  ;;  %v4447_v3 = vor.u32 %v4797_v1, %v4446_v0  ;;  %v4794_v4 = vld [vmem:[%s6530_s3 + $0x8] sm:$0xf0]  ;;  %vm83_vm0 = vcmask 261120   ;;  %s5231_s16 = smov 88  }
   0x7   :  { %v52_v5 = vld [vmem:[%s6527_s0] sm:$0xff]  ;;  %v53_v6 = vld [vmem:[%s6527_s0 + $0x8] sm:$0xff]  ;;  %v4443_v11 = vor.u32 %v4794_v4, %v4442_v2  ;;  %s5232_s17 = smov 96   ;;  %s5233_s18 = smov 112   ;;  %vm108_vm1 = vcmask 64512   ;;  %vm183_vm2 = vcmask 1043456  }
   0x8   :  { %v54_v7 = vmul.f32 2.0, %v52_v5  ;;  %v55_v8 = vmul.f32 2.0, %v53_v6  ;;  %v56_v9 = vld [vmem:[%s6529_s2] sm:$0xff]  ;;  %v57_v10 = vld [vmem:[%s6529_s2 + $0x8] sm:$0xff]  ;;  %93 = vmatpush.bf16.msra.mxu0 %v4447_v3  ;;  %s5230_s2 = smov 120   ;;  %s5234_s20 = smov 80  }
   0x9   :  { %v5337_v15 = vld [vmem:[%s6532_s5] sm:$0xff]  ;;  %s5235_s21 = smov 72   ;;  %s5236_s22 = smov 104   ;;  %vm589_vm3 = vcmask 130048   ;;  %vm592_vm4 = vcmask 195584   ;;  %vm748_vm12 = vcmask 523264  }
   0xa   :  { %v5327_v12 = vadd.f32 %v56_v9, %v54_v7  ;;  %v5329_v13 = vadd.f32 %v57_v10, %v55_v8  ;;  %v70_v16 = vperm.slane %v5337_v15, 0  ;;  %s5237_s23 = smov 64   ;;  %s5238_s24 = smov 56  }
   0xb   :  { %s5239_s6 = smov 48   ;;  %s5240_s25 = smov 40  }
   0xc   :  { %v69_v14 = vpack.c.bf16 %v5329_v13, %v5327_v12  ;;  %94 = vmatpush.bf16.msra.mxu0 %v4443_v11  ;;  %s5241_s26 = smov 8   ;;  %s5242_s27 = smov 16  }
   0xf   :  { %4448 = vmatmul.msk.bf16.vlgmr.msra.gmra.mxu0 %vm83_vm0, %v69_v14 }
  0x8c   :  { %v96_v17 = vpop.f32.mrf.mxu0 }
  0x8d   :  { %v97_v18 = vadd.f32 %v96_v17, %v70_v16 }
  0x8f   :  { %v101_v19 = vpack.c.bf16 %v97_v18, %v97_v18 }
  0x91   :  { %v104_v20 = vunpack.c.l.b16 %v101_v19 }
  0x93   :  { %v5340_v21 = vpack.c.b16 %v104_v20, %v104_v20 }
  0x94   :  { %v98_v22 = vpop.f32.mrf.mxu0 }
  0x95   :  { %v99_v23 = vadd.f32 %v98_v22, %v70_v16  ;;  %221 = vrot.lane.b32.xlu2 %v5340_v21, %s5230_s2  ;;  %223 = vrot.lane.b32.xlu1 %v5340_v21, %s5231_s16 }
  0x96   :  { %106 = vrot.lane.b32.xlu0 %v5340_v21, %s5232_s17 }
  0x97   :  { %v102_v24 = vpack.c.bf16 %v99_v23, %v99_v23 }
  0x99   :  { %v129_v25 = vunpack.c.l.b16 %v102_v24 }
  0x9b   :  { %v5348_v26 = vpack.c.b16 %v129_v25, %v129_v25 }
  0x9d   :  { %244 = vrot.lane.b32.xlu2 %v5348_v26, %s5230_s2  ;;  %246 = vrot.lane.b32.xlu1 %v5348_v26, %s5231_s16 }
  0x9e   :  { %131 = vrot.lane.b32.xlu0 %v5348_v26, %s5232_s17 }
  0xa5   :  { %335 = vrot.lane.b32.xlu2 %v5340_v21, %s5233_s18  ;;  %360 = vrot.lane.b32.xlu1 %v5348_v26, %s5234_s20 }
  0xa6   :  { %337 = vrot.lane.b32.xlu0 %v5340_v21, %s5234_s20 }
  0xad   :  { %474 = vrot.lane.b32.xlu2 %v5348_v26, %s5235_s21  ;;  %451 = vrot.lane.b32.xlu1 %v5340_v21, %s5235_s21 }
  0xae   :  { %358 = vrot.lane.b32.xlu0 %v5348_v26, %s5233_s18 }
  0xb5   :  { %472 = vrot.lane.b32.xlu1 %v5348_v26, %s5236_s22 }
  0xb6   :  { %449 = vrot.lane.b32.xlu0 %v5340_v21, %s5236_s22 }
  0xef   :  { %v222_v27 = vpop.permute.xlu2 %221 }
  0xf7   :  { %v245_v32 = vpop.permute.xlu2 %244 }
  0xff   :  { %v336_v37 = vpop.permute.xlu2 %335 }
 0x107   :  { %v224_v28 = vpop.permute.xlu1 %223  ;;  %v475_v42 = vpop.permute.xlu2 %474 }
 0x108   :  { %v107_v29 = vpop.permute.xlu0 %106  ;;  %v229_v30 = vsel %vm108_vm1, %v224_v28, 0  ;;  %v480_v45 = vsel %vm108_vm1, %v475_v42, 0 }
 0x109   :  { %v113_v31 = vsel %vm108_vm1, %v107_v29, 0  ;;  %238 = vmatpush.bf16.xpose.msrb.mxu0 %v229_v30 }
 0x10a   :  { %122 = vmatpush.bf16.xpose.msra.mxu1 %v113_v31 }
 0x10f   :  { %v247_v33 = vpop.permute.xlu1 %246 }
 0x110   :  { %v132_v34 = vpop.permute.xlu0 %131  ;;  %4453 = vmatmul.msk.bf16.vlgmr.msrb.gmra.mxu0 %vm108_vm1, %v222_v27  ;;  %v252_v35 = vsel %vm108_vm1, %v247_v33, 0 }
 0x111   :  { %4449 = vmatmul.msk.bf16.vlgmr.msra.gmra.mxu1 %vm108_vm1, %v101_v19  ;;  %v137_v36 = vsel %vm108_vm1, %v132_v34, 0 }
 0x112   :  { %146 = vmatpush.bf16.xpose.msra.mxu2 %v137_v36  ;;  %261 = vmatpush.bf16.xpose.msrb.mxu1 %v252_v35 }
 0x117   :  { %v361_v38 = vpop.permute.xlu1 %360 }
 0x118   :  { %v366_v39 = vsel %vm108_vm1, %v361_v38, 0  ;;  %v338_v40 = vpop.permute.xlu0 %337 }
 0x119   :  { %v343_v41 = vsel %vm108_vm1, %v338_v40, 0  ;;  %4450 = vmatmul.msk.bf16.vlgmr.msra.gmra.mxu2 %vm108_vm1, %v102_v24 }
 0x11a   :  { %375 = vmatpush.bf16.xpose.msra.mxu1 %v366_v39  ;;  %352 = vmatpush.bf16.xpose.msra.mxu0 %v343_v41 }
 0x11f   :  { %v452_v43 = vpop.permute.xlu1 %451 }
 0x120   :  { %v457_v44 = vsel %vm108_vm1, %v452_v43, 0  ;;  %v359_v46 = vpop.permute.xlu0 %358 }
 0x121   :  { %4454 = vmatmul.msk.bf16.vlgmr.msrb.gmra.mxu1 %vm108_vm1, %v245_v32  ;;  %4457 = vmatmul.msk.bf16.vlgmr.msra.gmra.mxu0 %vm108_vm1, %v336_v37 }
 0x122   :  { %489 = vmatpush.bf16.xpose.msrb.mxu1 %v480_v45  ;;  %466 = vmatpush.bf16.xpose.msrb.mxu0 %v457_v44 }
 0x127   :  { %v473_v48 = vpop.permute.xlu1 %472 }
 0x128   :  { %v450_v47 = vpop.permute.xlu0 %449 }
 0x131   :  { %4458 = vmatmul.msk.bf16.vlgmr.msra.gmra.mxu1 %vm108_vm1, %v359_v46  ;;  %4461 = vmatmul.msk.bf16.vlgmr.msrb.gmra.mxu0 %vm108_vm1, %v450_v47 }
 0x141   :  { %4462 = vmatmul.msk.bf16.vlgmr.msrb.gmra.mxu1 %vm108_vm1, %v473_v48 }
 0x18d   :  { %v240_v49 = vpop.f32.mrf.mxu0 }
 0x18e   :  { %v124_v50 = vpop.f32.mrf.mxu1  ;;  %v267_v51 = vmul.f32 0.35355338, %v240_v49 }
 0x18f   :  { %v152_v52 = vmul.f32 0.35355338, %v124_v50 }
 0x190   :  { %v269_v53 = vsel %vm108_vm1, %v267_v51, -inf }
 0x191   :  { %270 = vmax.xlane.f32.xlu1 %v269_v53  ;;  %v154_v54 = vsel %vm108_vm1, %v152_v52, -inf }
 0x192   :  { %155 = vmax.xlane.f32.xlu2 %v154_v54 }
 0x195   :  { %v242_v55 = vpop.f32.mrf.mxu0 }
 0x196   :  { %v126_v56 = vpop.f32.mrf.mxu1 }
 0x19c   :  { %v148_v57 = vpop.f32.mrf.mxu2 }
 0x19d   :  { %v153_v58 = vmul.f32 0.35355338, %v148_v57 }
 0x19e   :  { %v263_v59 = vpop.f32.mrf.mxu1  ;;  %v354_v60 = vpop.f32.mrf.mxu0 }
 0x19f   :  { %v268_v61 = vmul.f32 0.35355338, %v263_v59  ;;  %v157_v62 = vsel %vm108_vm1, %v153_v58, -inf  ;;  %v381_v16 = vmul.f32 0.35355338, %v354_v60 }
 0x1a0   :  { %158 = vmax.xlane.f32.xlu0 %v157_v62 }
 0x1a1   :  { %v272_v63 = vsel %vm108_vm1, %v268_v61, -inf  ;;  %v383_v18 = vsel %vm108_vm1, %v381_v16, -inf }
 0x1a2   :  { %273 = vmax.xlane.f32.xlu2 %v272_v63 }
 0x1a4   :  { %v150_v0 = vpop.f32.mrf.mxu2 }
 0x1a6   :  { %v265_v1 = vpop.f32.mrf.mxu1  ;;  %v356_v2 = vpop.f32.mrf.mxu0 }
 0x1aa   :  { %200 = vrot.lane.b32.xlu1 %v5348_v26, %s5237_s23 }
 0x1ae   :  { %v377_v3 = vpop.f32.mrf.mxu1  ;;  %v468_v4 = vpop.f32.mrf.mxu0 }
 0x1af   :  { %v382_v10 = vmul.f32 0.35355338, %v377_v3  ;;  %v495_v17 = vmul.f32 0.35355338, %v468_v4 }
 0x1b1   :  { %v386_v14 = vsel %vm108_vm1, %v382_v10, -inf  ;;  %v497_v19 = vsel %vm108_vm1, %v495_v17, -inf }
 0x1b2   :  { %314 = vrot.lane.b32.xlu1 %v5348_v26, %s5238_s24 }
 0x1b4   :  { %293 = vrot.lane.b32.xlu0 %v5340_v21, %s5238_s24 }
 0x1b6   :  { %v379_v5 = vpop.f32.mrf.mxu1  ;;  %v470_v6 = vpop.f32.mrf.mxu0 }
 0x1ba   :  { %178 = vrot.lane.b32.xlu2 %v5340_v21, %s5237_s23 }
 0x1be   :  { %v491_v7 = vpop.f32.mrf.mxu1 }
 0x1bf   :  { %v496_v9 = vmul.f32 0.35355338, %v491_v7 }
 0x1c1   :  { %v500_v11 = vsel %vm108_vm1, %v496_v9, -inf }
 0x1c6   :  { %v493_v8 = vpop.f32.mrf.mxu1 }
 0x1dc   :  { %501 = vmax.xlane.f32.xlu1 %v500_v11 }
 0x1de   :  { %387 = vmax.xlane.f32.xlu0 %v386_v14 }
 0x1e3   :  { %384 = vmax.xlane.f32.xlu2 %v383_v18 }
 0x1e6   :  { %498 = vmax.xlane.f32.xlu0 %v497_v19 }
 0x204   :  { %v271_v20 = vpop.xlane.xlu1 %270 }
 0x205   :  { %v275_v22 = vsub.f32 %v267_v51, %v271_v20  ;;  %v156_v23 = vpop.xlane.xlu2 %155 }
 0x206   :  { %v160_v24 = vsub.f32 %v152_v52, %v156_v23 }
 0x207   :  { %v277_v25 = vmul.f32 1.442695, %v275_v22 }
 0x208   :  { %v162_v27 = vmul.f32 1.442695, %v160_v24 }
 0x209   :  { %4956 = vpow2.f32 %v277_v25 }
 0x20a   :  { %4958 = vpow2.f32 %v162_v27 }
 0x20f   :  { %v5404_v28 = vpop.eup %4956 }
 0x210   :  { %v5406_v29 = vpop.eup %4958  ;;  %v281_v30 = vsel %vm108_vm1, %v5404_v28, 0.0 }
 0x211   :  { %v166_v31 = vsel %vm108_vm1, %v5406_v29, 0.0  ;;  %282 = vadd.xlane.f32.xlu0 %v281_v30 }
 0x212   :  { %167 = vadd.xlane.f32.xlu1 %v166_v31 }
 0x213   :  { %v159_v32 = vpop.xlane.xlu0 %158 }
 0x214   :  { %v161_v33 = vsub.f32 %v153_v58, %v159_v32 }
 0x215   :  { %v274_v34 = vpop.xlane.xlu2 %273 }
 0x216   :  { %v164_v35 = vmul.f32 1.442695, %v161_v33  ;;  %v276_v36 = vsub.f32 %v268_v61, %v274_v34 }
 0x218   :  { %4960 = vpow2.f32 %v164_v35  ;;  %v279_v37 = vmul.f32 1.442695, %v276_v36 }
 0x21a   :  { %4962 = vpow2.f32 %v279_v37 }
 0x21c   :  { %v201_v38 = vpop.permute.xlu1 %200 }
 0x21d   :  { %v179_v39 = vpop.permute.xlu2 %178  ;;  %v206_v40 = vsel %vm183_vm2, %v201_v38, 0 }
 0x21e   :  { %v5413_v41 = vpop.eup %4960  ;;  %v185_v42 = vsel %vm183_vm2, %v179_v39, 0 }
 0x21f   :  { %194 = vmatpush.bf16.msra.mxu3 %v185_v42  ;;  %v169_v43 = vsel %vm108_vm1, %v5413_v41, 0.0 }
 0x220   :  { %v5418_v44 = vpop.eup %4962  ;;  %170 = vadd.xlane.f32.xlu0 %v169_v43 }
 0x221   :  { %v284_v45 = vsel %vm108_vm1, %v5418_v44, 0.0 }
 0x222   :  { %285 = vadd.xlane.f32.xlu2 %v284_v45 }
 0x223   :  { %215 = vmatpush.bf16.msrb.mxu3 %v206_v40 }
 0x224   :  { %v315_v48 = vpop.permute.xlu1 %314 }
 0x226   :  { %v294_v46 = vpop.permute.xlu0 %293 }
 0x227   :  { %v299_v47 = vsel %vm183_vm2, %v294_v46, 0 }
 0x228   :  { %308 = vmatpush.bf16.msrb.mxu2 %v299_v47 }
 0x22b   :  { %428 = vrot.lane.b32.xlu1 %v5348_v26, %s5239_s6 }
 0x23a   :  { %407 = vrot.lane.b32.xlu2 %v5340_v21, %s5239_s6 }
 0x24f   :  { %v502_v49 = vpop.xlane.xlu1 %501 }
 0x250   :  { %v504_v50 = vsub.f32 %v496_v9, %v502_v49 }
 0x251   :  { %v388_v51 = vpop.xlane.xlu0 %387 }
 0x252   :  { %v390_v52 = vsub.f32 %v382_v10, %v388_v51  ;;  %v507_v54 = vmul.f32 1.442695, %v504_v50 }
 0x254   :  { %v393_v53 = vmul.f32 1.442695, %v390_v52 }
 0x256   :  { %4964 = vpow2.f32 %v393_v53  ;;  %v385_v55 = vpop.xlane.xlu2 %384 }
 0x257   :  { %v389_v56 = vsub.f32 %v381_v16, %v385_v55  ;;  %4966 = vpow2.f32 %v507_v54  ;;  %v320_v16 = vsel %vm183_vm2, %v315_v48, 0 }
 0x259   :  { %v391_v57 = vmul.f32 1.442695, %v389_v56  ;;  %v499_v58 = vpop.xlane.xlu0 %498 }
 0x25a   :  { %v503_v59 = vsub.f32 %v495_v17, %v499_v58 }
 0x25b   :  { %4968 = vpow2.f32 %v391_v57 }
 0x25c   :  { %v4965_v60 = vpop.eup %4964  ;;  %v505_v61 = vmul.f32 1.442695, %v503_v59 }
 0x25d   :  { %v398_v62 = vsel %vm108_vm1, %v4965_v60, 0.0  ;;  %v5428_v63 = vpop.eup %4966 }
 0x25e   :  { %4970 = vpow2.f32 %v505_v61  ;;  %399 = vadd.xlane.f32.xlu0 %v398_v62  ;;  %v512_v2 = vsel %vm108_vm1, %v5428_v63, 0.0 }
 0x261   :  { %v4969_v0 = vpop.eup %4968 }
 0x262   :  { %v395_v1 = vsel %vm108_vm1, %v4969_v0, 0.0 }
 0x263   :  { %396 = vadd.xlane.f32.xlu1 %v395_v1  ;;  %513 = vadd.xlane.f32.xlu2 %v512_v2 }
 0x264   :  { %v4971_v3 = vpop.eup %4970 }
 0x265   :  { %v509_v4 = vsel %vm108_vm1, %v4971_v3, 0.0 }
 0x266   :  { %510 = vadd.xlane.f32.xlu0 %v509_v4  ;;  %v4796_v4 = vld [vmem:[%s6530_s3 + $0x1c] sm:$0xf] }
 0x27a   :  { %521 = vrot.lane.b32.xlu0 %v5340_v21, %s5240_s25 }
 0x27c   :  { %542 = vrot.lane.b32.xlu1 %v5348_v26, %s5240_s25 }
 0x284   :  { %v283_v5 = vpop.xlane.xlu0 %282 }
 0x285   :  { %v168_v6 = vpop.xlane.xlu1 %167  ;;  %4972 = vrcp.f32 %v283_v5  ;;  %v4469_v5 = vld [vmem:[%s6530_s3 + $0x24] sm:$0xf0] }
 0x286   :  { %4974 = vrcp.f32 %v168_v6  ;;  %v4472_v6 = vor.u32 %v4796_v4, %v4469_v5 }
 0x288   :  { %614 = vmatpush.bf16.msra.mxu0 %v4472_v6 }
 0x28b   :  { %v4973_v7 = vpop.eup %4972 }
 0x28c   :  { %v4975_v8 = vpop.eup %4974  ;;  %v289_v9 = vmul.f32 %v4973_v7, %v5404_v28  ;;  %v4793_v7 = vld [vmem:[%s6530_s3 + $0x4] sm:$0xf] }
 0x28d   :  { %v174_v10 = vmul.f32 %v4975_v8, %v5406_v29  ;;  %v4465_v8 = vld [vmem:[%s6530_s3 + $0xc] sm:$0xf0] }
 0x28e   :  { %v291_v11 = vpack.c.bf16 %v289_v9, %v289_v9  ;;  %v4468_v9 = vor.u32 %v4793_v7, %v4465_v8 }
 0x28f   :  { %v176_v14 = vpack.c.bf16 %v174_v10, %v174_v10 }
 0x290   :  { %4455 = vmatmul.msk.bf16.vlgmr.msrb.gmra.mxu2 %vm108_vm1, %v291_v11  ;;  %615 = vmatpush.bf16.msra.mxu0 %v4468_v9 }
 0x291   :  { %4451 = vmatmul.msk.bf16.vlgmr.msra.gmra.mxu3 %vm108_vm1, %v176_v14 }
 0x292   :  { %329 = vmatpush.bf16.msra.mxu3 %v320_v16 }
 0x293   :  { %v171_v21 = vpop.xlane.xlu0 %170 }
 0x294   :  { %4976 = vrcp.f32 %v171_v21 }
 0x295   :  { %v286_v26 = vpop.xlane.xlu2 %285 }
 0x296   :  { %4978 = vrcp.f32 %v286_v26 }
 0x29a   :  { %v4977_v17 = vpop.eup %4976 }
 0x29b   :  { %v175_v18 = vmul.f32 %v4977_v17, %v5413_v41 }
 0x29c   :  { %v4979_v25 = vpop.eup %4978 }
 0x29d   :  { %v408_v19 = vpop.permute.xlu2 %407  ;;  %v429_v22 = vpop.permute.xlu1 %428  ;;  %v177_v23 = vpack.c.bf16 %v175_v18, %v175_v18  ;;  %v290_v27 = vmul.f32 %v4979_v25, %v5418_v44 }
 0x29e   :  { %v413_v20 = vsel %vm183_vm2, %v408_v19, 0  ;;  %v434_v24 = vsel %vm183_vm2, %v429_v22, 0 }
 0x29f   :  { %422 = vmatpush.bf16.msra.mxu2 %v413_v20  ;;  %v292_v28 = vpack.c.bf16 %v290_v27, %v290_v27 }
 0x2a1   :  { %4452 = vmatmul.msk.bf16.vlgmr.msrb.gmra.mxu3 %vm108_vm1, %v177_v23 }
 0x2a2   :  { %443 = vmatpush.bf16.msrb.mxu3 %v434_v24 }
 0x2b1   :  { %4456 = vmatmul.msk.bf16.vlgmr.msra.gmra.mxu3 %vm108_vm1, %v292_v28 }
 0x2d1   :  { %v400_v29 = vpop.xlane.xlu0 %399 }
 0x2d2   :  { %4980 = vrcp.f32 %v400_v29  ;;  %v596_v29 = vperm.slane %v5337_v15, 1 }
 0x2d6   :  { %v397_v30 = vpop.xlane.xlu1 %396  ;;  %v514_v36 = vpop.xlane.xlu2 %513 }
 0x2d7   :  { %4982 = vrcp.f32 %v397_v30 }
 0x2d8   :  { %v4981_v31 = vpop.eup %4980  ;;  %4984 = vrcp.f32 %v514_v36 }
 0x2d9   :  { %v404_v32 = vmul.f32 %v4981_v31, %v4965_v60  ;;  %v511_v38 = vpop.xlane.xlu0 %510 }
 0x2da   :  { %4986 = vrcp.f32 %v511_v38  ;;  %v5243_v38 = vmov 32.0  }
 0x2db   :  { %v406_v33 = vpack.c.bf16 %v404_v32, %v404_v32  ;;  %4988 = vrcp.f32 %v5243_v38 }
 0x2dd   :  { %4460 = vmatmul.msk.bf16.vlgmr.msrb.gmra.mxu3 %vm108_vm1, %v406_v33  ;;  %v4983_v34 = vpop.eup %4982 }
 0x2de   :  { %v403_v35 = vmul.f32 %v4983_v34, %v4969_v0  ;;  %v4985_v39 = vpop.eup %4984 }
 0x2df   :  { %v518_v42 = vmul.f32 %v4985_v39, %v5428_v63 }
 0x2e0   :  { %v405_v37 = vpack.c.bf16 %v403_v35, %v403_v35  ;;  %v4987_v40 = vpop.eup %4986 }
 0x2e1   :  { %v517_v43 = vmul.f32 %v4987_v40, %v4971_v3  ;;  %v520_v47 = vpack.c.bf16 %v518_v42, %v518_v42  ;;  %v4989_v39 = vpop.eup %4988 }
 0x2e2   :  { %4459 = vmatmul.msk.bf16.vlgmr.msra.gmra.mxu2 %vm108_vm1, %v405_v37  ;;  %v631_v40 = vmul.f32 32.0, %v4989_v39  ;;  %vm635_vm5 = vweird.f32 %v4989_v39 }
 0x2e3   :  { %v519_v48 = vpack.c.bf16 %v517_v43, %v517_v43 }
 0x2ec   :  { %v522_v41 = vpop.permute.xlu0 %521 }
 0x2ed   :  { %v527_v44 = vsel %vm183_vm2, %v522_v41, 0  ;;  %v632_v41 = vsub.f32 1.0, %v631_v40 }
 0x2ee   :  { %v543_v45 = vpop.permute.xlu1 %542  ;;  %536 = vmatpush.bf16.msrb.mxu2 %v527_v44 }
 0x2ef   :  { %v548_v46 = vsel %vm183_vm2, %v543_v45, 0  ;;  %v633_v42 = vmul.f32 %v4989_v39, %v632_v41 }
 0x2f0   :  { %557 = vmatpush.bf16.msra.mxu3 %v548_v46 }
 0x2f1   :  { %v634_v43 = vadd.f32 %v4989_v39, %v633_v42 }
 0x2f2   :  { %4463 = vmatmul.msk.bf16.vlgmr.msrb.gmra.mxu2 %vm108_vm1, %v519_v48 }
 0x2f3   :  { %4464 = vmatmul.msk.bf16.vlgmr.msra.gmra.mxu3 %vm108_vm1, %v520_v47  ;;  %v5483_v44 = vsel %vm635_vm5, %v4989_v39, %v634_v43  ;;  %v723_v39 = vperm.slane %v5337_v15, 5 }
 0x313   :  { %v310_v49 = vpop.f32.mrf.mxu2 }
 0x314   :  { %v196_v50 = vpop.f32.mrf.mxu3 }
 0x31b   :  { %v312_v51 = vpop.f32.mrf.mxu2 }
 0x31c   :  { %v198_v52 = vpop.f32.mrf.mxu3 }
 0x324   :  { %v217_v53 = vpop.f32.mrf.mxu3 }
 0x32c   :  { %v219_v54 = vpop.f32.mrf.mxu3 }
 0x32d   :  { %v4798_v54 = vld [vmem:[%s6530_s3 + $0x28] sm:$0xf0] }
 0x334   :  { %v331_v55 = vpop.f32.mrf.mxu3 }
 0x335   :  { %v4862_v56 = vpack.i.bf16 %v331_v55, %v310_v49 }
 0x337   :  { %4863 = vrot.lane.b32.xlu0 %v4862_v56, %s5241_s26 }
 0x33c   :  { %v333_v57 = vpop.f32.mrf.mxu3 }
 0x360   :  { %v445_v58 = vpop.f32.mrf.mxu3 }
 0x365   :  { %v424_v59 = vpop.f32.mrf.mxu2 }
 0x366   :  { %v4867_v60 = vpack.i.bf16 %v445_v58, %v424_v59  ;;  %v4476_v58 = vld [vmem:[%s6530_s3 + $0x8] sm:$0xf]  ;;  %v4795_v59 = vld [vmem:[%s6530_s3 + $0x10] sm:$0xf0] }
 0x368   :  { %v447_v61 = vpop.f32.mrf.mxu3  ;;  %4868 = vrot.lane.b32.xlu1 %v4867_v60, %s5242_s27  ;;  %v4477_v60 = vor.u32 %v4795_v59, %v4476_v58  ;;  %v4807_v58 = vld [vmem:[%s6530_s3 + $0x50] sm:$0xf0] }
 0x36d   :  { %v426_v62 = vpop.f32.mrf.mxu2 }
 0x375   :  { %v538_v63 = vpop.f32.mrf.mxu2 }
 0x376   :  { %v559_v0 = vpop.f32.mrf.mxu3 }
 0x377   :  { %v4872_v1 = vpack.i.bf16 %v559_v0, %v538_v63 }
 0x379   :  { %4873 = vrot.lane.b32.xlu0 %v4872_v1, %s5229_s19 }
 0x37d   :  { %v540_v2 = vpop.f32.mrf.mxu2 }
 0x37e   :  { %v561_v3 = vpop.f32.mrf.mxu3 }
 0x3a9   :  { %v4864_v10 = vpop.permute.xlu0 %4863 }
 0x3aa   :  { %v4866_v14 = vunpack.i.h.bf16 %v4864_v10  ;;  %v4865_v16 = vunpack.i.l.bf16 %v4864_v10 }
 0x3ac   :  { %v588_v18 = vsel %vm108_vm1, %v217_v53, %v4866_v14  ;;  %v587_v19 = vsel %vm108_vm1, %v196_v50, %v4865_v16  ;;  %v4480_v53 = vld [vmem:[%s6530_s3 + $0x20] sm:$0xf]  ;;  %v675_v16 = vperm.slane %v5337_v15, 2 }
 0x3ad   :  { %v4481_v55 = vor.u32 %v4798_v54, %v4480_v53 }
 0x3af   :  { %704 = vmatpush.bf16.msra.mxu1 %v4481_v55 }
 0x3b3   :  { %705 = vmatpush.bf16.msra.mxu1 %v4477_v60 }
 0x3da   :  { %v4869_v11 = vpop.permute.xlu1 %4868 }
 0x3db   :  { %v4871_v21 = vunpack.i.h.bf16 %v4869_v11  ;;  %v4870_v26 = vunpack.i.l.bf16 %v4869_v11 }
 0x3dd   :  { %v590_v23 = vsel %vm589_vm3, %v587_v19, %v4870_v26  ;;  %v591_v24 = vsel %vm589_vm3, %v588_v18, %v4871_v21 }
 0x3eb   :  { %v4874_v17 = vpop.permute.xlu0 %4873 }
 0x3ec   :  { %v4876_v20 = vunpack.i.h.bf16 %v4874_v17  ;;  %v4875_v22 = vunpack.i.l.bf16 %v4874_v17 }
 0x3ee   :  { %v593_v25 = vsel %vm592_vm4, %v590_v23, %v4875_v22  ;;  %v594_v27 = vsel %vm592_vm4, %v591_v24, %v4876_v20  ;;  %v678_v20 = vperm.slane %v5337_v15, 3 }
 0x3ef   :  { %v595_v28 = vpack.c.bf16 %v594_v27, %v593_v25  ;;  %v4802_v27 = vld [vmem:[%s6531_s4 + $0x18] sm:$0xff] }
 0x3f0   :  { %756 = vmatpush.bf16.msra.mxu2 %v4802_v27 }
 0x3f1   :  { %4473 = vmatmul.msk.bf16.vlgmr.msra.gmra.mxu0 %vm83_vm0, %v595_v28  ;;  %v4801_v28 = vld [vmem:[%s6531_s4 + $0x10] sm:$0xff] }
 0x3f4   :  { %757 = vmatpush.bf16.msra.mxu2 %v4801_v28 }
 0x46e   :  { %v617_v30 = vpop.f32.mrf.mxu0 }
 0x46f   :  { %v618_v31 = vadd.f32 %v617_v30, %v596_v29  ;;  %v4799_v30 = vld [vmem:[%s6531_s4] sm:$0xff] }
 0x471   :  { %v622_v32 = vadd.f32 %v618_v31, %v5327_v12 }
 0x473   :  { %v624_v33 = vsel %vm83_vm0, %v622_v32, 0.0 }
 0x474   :  { %625 = vadd.xlane.f32.xlu1 %v624_v33 }
 0x476   :  { %v619_v34 = vpop.f32.mrf.mxu0 }
 0x477   :  { %v620_v35 = vadd.f32 %v619_v34, %v596_v29  ;;  %v4800_v29 = vld [vmem:[%s6531_s4 + $0x8] sm:$0xff] }
 0x478   :  { %758 = vmatpush.bf16.msra.mxu2 %v4800_v29 }
 0x479   :  { %v623_v36 = vadd.f32 %v620_v35, %v5329_v13 }
 0x47b   :  { %v627_v37 = vsel %vm83_vm0, %v623_v36, 0.0 }
 0x47c   :  { %628 = vadd.xlane.f32.xlu2 %v627_v37  ;;  %759 = vmatpush.bf16.msra.mxu2 %v4799_v30 }
 0x4e7   :  { %v626_v12 = vpop.xlane.xlu1 %625 }
 0x4e8   :  { %v637_v45 = vmul.f32 %v5483_v44, %v626_v12 }
 0x4ea   :  { %v639_v46 = vsub.f32 %v622_v32, %v637_v45  ;;  %v682_v32 = vperm.slane %v5337_v15, 4 }
 0x4ec   :  { %v641_v47 = vmul.f32 %v639_v46, %v639_v46 }
 0x4ee   :  { %v643_v13 = vsel %vm83_vm0, %v641_v47, 0.0 }
 0x4ef   :  { %v629_v48 = vpop.xlane.xlu2 %628  ;;  %644 = vadd.xlane.f32.xlu0 %v643_v13 }
 0x4f0   :  { %v638_v49 = vmul.f32 %v5483_v44, %v629_v48 }
 0x4f2   :  { %v640_v50 = vsub.f32 %v623_v36, %v638_v49 }
 0x4f4   :  { %v642_v51 = vmul.f32 %v640_v50, %v640_v50 }
 0x4f6   :  { %v646_v52 = vsel %vm83_vm0, %v642_v51, 0.0 }
 0x4f7   :  { %647 = vadd.xlane.f32.xlu2 %v646_v52 }
 0x562   :  { %v645_v56 = vpop.xlane.xlu0 %644 }
 0x563   :  { %v649_v57 = vmul.f32 %v645_v56, %v5483_v44 }
 0x565   :  { %v651_v61 = vadd.f32 1e-05, %v649_v57  ;;  %v4515_v57 = vld [vmem:[%s6530_s3 + $0x48] sm:$0xf] }
 0x566   :  { %v4516_v59 = vor.u32 %v4807_v58, %v4515_v57 }
 0x567   :  { %4990 = vrsqrt.f32 %v651_v61  ;;  %vm659_vm7 = vweird.f32 %v651_v61 }
 0x568   :  { %852 = vmatpush.bf16.msrb.mxu3 %v4516_v59 }
 0x56a   :  { %v648_v62 = vpop.xlane.xlu2 %647 }
 0x56b   :  { %v650_v63 = vmul.f32 %v648_v62, %v5483_v44  ;;  %v4511_v62 = vld [vmem:[%s6530_s3 + $0x30] sm:$0xf] }
 0x56d   :  { %v4991_v0 = vpop.eup %4990  ;;  %v652_v1 = vadd.f32 1e-05, %v650_v63  ;;  %v4804_v63 = vld [vmem:[%s6530_s3 + $0x38] sm:$0xf0] }
 0x56e   :  { %v654_v2 = vmul.f32 %v4991_v0, %v651_v61  ;;  %vm660_vm6 = vweird.f32 %v4991_v0 }
 0x56f   :  { %4992 = vrsqrt.f32 %v652_v1  ;;  %vm661_vm8 = vmor %vm659_vm7, %vm660_vm6  ;;  %vm669_vm10 = vweird.f32 %v652_v1 }
 0x570   :  { %v655_v3 = vmul.f32 %v4991_v0, %v654_v2 }
 0x572   :  { %v656_v4 = vmul.f32 0.5, %v655_v3 }
 0x574   :  { %v657_v5 = vsub.f32 1.5, %v656_v4 }
 0x575   :  { %v4993_v6 = vpop.eup %4992 }
 0x576   :  { %v658_v7 = vmul.f32 %v4991_v0, %v657_v5  ;;  %v664_v8 = vmul.f32 %v4993_v6, %v652_v1  ;;  %vm670_vm9 = vweird.f32 %v4993_v6 }
 0x577   :  { %vm671_vm11 = vmor %vm669_vm10, %vm670_vm9 }
 0x578   :  { %v665_v9 = vmul.f32 %v4993_v6, %v664_v8  ;;  %v662_v10 = vsel %vm661_vm8, %v4991_v0, %v658_v7  ;;  %v4512_v0 = vor.u32 %v4804_v63, %v4511_v62 }
 0x579   :  { %v673_v21 = vmul.f32 %v662_v10, %v639_v46 }
 0x57a   :  { %v666_v11 = vmul.f32 0.5, %v665_v9  ;;  %853 = vmatpush.bf16.msrb.mxu3 %v4512_v0 }
 0x57b   :  { %v676_v18 = vmul.f32 %v675_v16, %v673_v21 }
 0x57c   :  { %v667_v14 = vsub.f32 1.5, %v666_v11 }
 0x57d   :  { %v679_v23 = vadd.f32 %v678_v20, %v676_v18  ;;  %v812_v18 = vperm.slane %v5337_v15, 6 }
 0x57e   :  { %v668_v26 = vmul.f32 %v4993_v6, %v667_v14 }
 0x580   :  { %v672_v17 = vsel %vm671_vm11, %v4993_v6, %v668_v26 }
 0x581   :  { %v674_v19 = vmul.f32 %v672_v17, %v640_v50 }
 0x583   :  { %v677_v22 = vmul.f32 %v675_v16, %v674_v19 }
 0x585   :  { %v680_v24 = vadd.f32 %v678_v20, %v677_v22 }
 0x587   :  { %v681_v25 = vpack.c.bf16 %v680_v24, %v679_v23 }
 0x589   :  { %4482 = vmatmul.msk.bf16.vlgmr.msra.gmra.mxu1 %vm83_vm0, %v681_v25  ;;  %v815_v25 = vperm.slane %v5337_v15, 7 }
 0x606   :  { %v707_v31 = vpop.f32.mrf.mxu1 }
 0x607   :  { %v708_v33 = vadd.f32 %v707_v31, %v682_v32  ;;  %v5553_v31 = vld [vmem:[%s6532_s5 + $0x8] sm:$0xff] }
 0x609   :  { %v712_v36 = vmax.f32 %v708_v33, 0.0 }
 0x60e   :  { %v709_v34 = vpop.f32.mrf.mxu1 }
 0x60f   :  { %v710_v35 = vadd.f32 %v709_v34, %v682_v32  ;;  %v830_v32 = vperm.slane %v5553_v31, 0 }
 0x611   :  { %v713_v37 = vmax.f32 %v710_v35, 0.0 }
 0x613   :  { %v722_v38 = vpack.c.bf16 %v713_v37, %v712_v36 }
 0x615   :  { %4499 = vmatmul.msk.bf16.vlgmr.msra.gmra.mxu2 %vm748_vm12, %v722_v38 }
 0x698   :  { %v761_v40 = vpop.f32.mrf.mxu2 }
 0x699   :  { %v762_v41 = vadd.f32 %v761_v40, %v723_v39 }
 0x69b   :  { %v766_v42 = vadd.f32 %v762_v41, %v679_v23 }
 0x69d   :  { %v768_v43 = vsel %vm83_vm0, %v766_v42, 0.0 }
 0x69e   :  { %769 = vadd.xlane.f32.xlu2 %v768_v43 }
 0x6a0   :  { %v763_v12 = vpop.f32.mrf.mxu2 }
 0x6a1   :  { %v764_v45 = vadd.f32 %v763_v12, %v723_v39 }
 0x6a3   :  { %v767_v46 = vadd.f32 %v764_v45, %v680_v24 }
 0x6a5   :  { %v771_v47 = vsel %vm83_vm0, %v767_v46, 0.0 }
 0x6a6   :  { %772 = vadd.xlane.f32.xlu2 %v771_v47 }
 0x711   :  { %v770_v13 = vpop.xlane.xlu2 %769 }
 0x712   :  { %v774_v48 = vmul.f32 %v770_v13, %v5483_v44 }
 0x714   :  { %v776_v49 = vsub.f32 %v766_v42, %v774_v48 }
 0x716   :  { %v778_v50 = vmul.f32 %v776_v49, %v776_v49 }
 0x718   :  { %v780_v51 = vsel %vm83_vm0, %v778_v50, 0.0 }
 0x719   :  { %781 = vadd.xlane.f32.xlu2 %v780_v51  ;;  %v773_v52 = vpop.xlane.xlu2 %772 }
 0x71a   :  { %v775_v53 = vmul.f32 %v773_v52, %v5483_v44 }
 0x71c   :  { %v777_v54 = vsub.f32 %v767_v46, %v775_v53 }
 0x71e   :  { %v779_v55 = vmul.f32 %v777_v54, %v777_v54 }
 0x720   :  { %v783_v56 = vsel %vm83_vm0, %v779_v55, 0.0 }
 0x721   :  { %784 = vadd.xlane.f32.xlu1 %v783_v56 }
 0x78c   :  { %v782_v60 = vpop.xlane.xlu2 %781 }
 0x78d   :  { %v786_v61 = vmul.f32 %v782_v60, %v5483_v44 }
 0x78f   :  { %v788_v1 = vadd.f32 1e-05, %v786_v61 }
 0x791   :  { %4994 = vrsqrt.f32 %v788_v1  ;;  %vm796_vm14 = vweird.f32 %v788_v1 }
 0x794   :  { %v785_v2 = vpop.xlane.xlu1 %784 }
 0x795   :  { %v787_v3 = vmul.f32 %v785_v2, %v5483_v44 }
 0x797   :  { %v4995_v4 = vpop.eup %4994  ;;  %v789_v5 = vadd.f32 1e-05, %v787_v3 }
 0x798   :  { %v791_v6 = vmul.f32 %v4995_v4, %v788_v1  ;;  %vm797_vm13 = vweird.f32 %v4995_v4 }
 0x799   :  { %4996 = vrsqrt.f32 %v789_v5  ;;  %vm798_vm15 = vmor %vm796_vm14, %vm797_vm13  ;;  %vm806_vm6 = vweird.f32 %v789_v5 }
 0x79a   :  { %v792_v7 = vmul.f32 %v4995_v4, %v791_v6 }
 0x79c   :  { %v793_v8 = vmul.f32 0.5, %v792_v7 }
 0x79e   :  { %v794_v9 = vsub.f32 1.5, %v793_v8 }
 0x79f   :  { %v4997_v10 = vpop.eup %4996 }
 0x7a0   :  { %v795_v11 = vmul.f32 %v4995_v4, %v794_v9  ;;  %v801_v14 = vmul.f32 %v4997_v10, %v789_v5  ;;  %vm807_vm5 = vweird.f32 %v4997_v10 }
 0x7a1   :  { %vm808_vm7 = vmor %vm806_vm6, %vm807_vm5 }
 0x7a2   :  { %v802_v16 = vmul.f32 %v4997_v10, %v801_v14  ;;  %v799_v21 = vsel %vm798_vm15, %v4995_v4, %v795_v11 }
 0x7a3   :  { %v810_v19 = vmul.f32 %v799_v21, %v776_v49 }
 0x7a4   :  { %v803_v26 = vmul.f32 0.5, %v802_v16 }
 0x7a5   :  { %v813_v23 = vmul.f32 %v812_v18, %v810_v19 }
 0x7a6   :  { %v804_v17 = vsub.f32 1.5, %v803_v26 }
 0x7a7   :  { %v5543_v28 = vadd.f32 %v815_v25, %v813_v23 }
 0x7a8   :  { %v805_v20 = vmul.f32 %v4997_v10, %v804_v17 }
 0x7aa   :  { %v809_v22 = vsel %vm808_vm7, %v4997_v10, %v805_v20 }
 0x7ab   :  { %v811_v24 = vmul.f32 %v809_v22, %v777_v54 }
 0x7ad   :  { %v814_v27 = vmul.f32 %v812_v18, %v811_v24 }
 0x7af   :  { %v5545_v29 = vadd.f32 %v815_v25, %v814_v27 }
 0x7b1   :  { %v829_v30 = vpack.c.bf16 %v5545_v29, %v5543_v28 }
 0x7b3   :  { %4517 = vmatmul.msk.bf16.vlgmr.msrb.gmra.mxu3 %vm83_vm0, %v829_v30 }
 0x836   :  { %v855_v33 = vpop.f32.mrf.mxu3 }
 0x837   :  { %v856_v34 = vadd.f32 %v855_v33, %v830_v32 }
 0x839   :  { %v860_v15 = vpack.c.bf16 %v856_v34, %v856_v34 }
 0x83b   :  { %v863_v35 = vunpack.c.l.b16 %v860_v15 }
 0x83d   :  { %v5556_v36 = vpack.c.b16 %v863_v35, %v863_v35 }
 0x83e   :  { %v857_v37 = vpop.f32.mrf.mxu3 }
 0x83f   :  { %v858_v38 = vadd.f32 %v857_v37, %v830_v32  ;;  %980 = vrot.lane.b32.xlu1 %v5556_v36, %s5231_s16  ;;  %865 = vrot.lane.b32.xlu2 %v5556_v36, %s5232_s17 }
 0x841   :  { %v861_v39 = vpack.c.bf16 %v858_v38, %v858_v38 }
 0x843   :  { %v887_v40 = vunpack.c.l.b16 %v861_v39 }
 0x845   :  { %v5562_v41 = vpack.c.b16 %v887_v40, %v887_v40 }
 0x847   :  { %889 = vrot.lane.b32.xlu0 %v5562_v41, %s5232_s17  ;;  %1001 = vrot.lane.b32.xlu1 %v5562_v41, %s5230_s2 }
 0x848   :  { %978 = vrot.lane.b32.xlu2 %v5556_v36, %s5230_s2 }
 0x84f   :  { %1003 = vrot.lane.b32.xlu0 %v5562_v41, %s5231_s16  ;;  %1092 = vrot.lane.b32.xlu1 %v5556_v36, %s5233_s18 }
 0x850   :  { %1117 = vrot.lane.b32.xlu2 %v5562_v41, %s5234_s20 }
 0x857   :  { %1094 = vrot.lane.b32.xlu0 %v5556_v36, %s5234_s20  ;;  %1231 = vrot.lane.b32.xlu1 %v5562_v41, %s5235_s21 }
 0x858   :  { %1208 = vrot.lane.b32.xlu2 %v5556_v36, %s5235_s21 }
 0x85f   :  { %1115 = vrot.lane.b32.xlu0 %v5562_v41, %s5233_s18 }
 0x860   :  { %1229 = vrot.lane.b32.xlu2 %v5562_v41, %s5236_s22 }
 0x867   :  { %1206 = vrot.lane.b32.xlu0 %v5556_v36, %s5236_s22 }
 0x86f   :  { %936 = vrot.lane.b32.xlu0 %v5556_v36, %s5237_s23 }
 0x899   :  { %v866_v42 = vpop.permute.xlu2 %865 }
 0x89a   :  { %v871_v43 = vsel %vm108_vm1, %v866_v42, 0 }
 0x89b   :  { %880 = vmatpush.bf16.xpose.msrb.mxu0 %v871_v43 }
 0x8a2   :  { %4518 = vmatmul.msk.bf16.vlgmr.msrb.gmra.mxu0 %vm108_vm1, %v860_v15  ;;  %v979_v46 = vpop.permute.xlu2 %978 }
 0x8aa   :  { %v1118_v49 = vpop.permute.xlu2 %1117 }
 0x8ab   :  { %v1123_v52 = vsel %vm108_vm1, %v1118_v49, 0 }
 0x8b1   :  { %v981_v12 = vpop.permute.xlu1 %980 }
 0x8b2   :  { %v986_v45 = vsel %vm108_vm1, %v981_v12, 0  ;;  %v1209_v54 = vpop.permute.xlu2 %1208 }
 0x8b3   :  { %995 = vmatpush.bf16.xpose.msra.mxu0 %v986_v45  ;;  %v1214_v57 = vsel %vm108_vm1, %v1209_v54, 0 }
 0x8b9   :  { %v890_v47 = vpop.permute.xlu0 %889  ;;  %v1002_v48 = vpop.permute.xlu1 %1001 }
 0x8ba   :  { %v895_v13 = vsel %vm108_vm1, %v890_v47, 0  ;;  %4522 = vmatmul.msk.bf16.vlgmr.msra.gmra.mxu0 %vm108_vm1, %v979_v46  ;;  %v1230_v0 = vpop.permute.xlu2 %1229 }
 0x8bb   :  { %904 = vmatpush.bf16.xpose.msrb.mxu1 %v895_v13 }
 0x8c1   :  { %v1004_v50 = vpop.permute.xlu0 %1003  ;;  %v1093_v53 = vpop.permute.xlu1 %1092 }
 0x8c2   :  { %v1009_v51 = vsel %vm108_vm1, %v1004_v50, 0  ;;  %4519 = vmatmul.msk.bf16.vlgmr.msrb.gmra.mxu1 %vm108_vm1, %v861_v39 }
 0x8c3   :  { %1018 = vmatpush.bf16.xpose.msra.mxu1 %v1009_v51 }
 0x8c9   :  { %v1095_v55 = vpop.permute.xlu0 %1094  ;;  %v1232_v58 = vpop.permute.xlu1 %1231 }
 0x8ca   :  { %v1100_v56 = vsel %vm108_vm1, %v1095_v55, 0  ;;  %v1237_v60 = vsel %vm108_vm1, %v1232_v58, 0 }
 0x8cb   :  { %1132 = vmatpush.bf16.xpose.msrb.mxu1 %v1123_v52  ;;  %1109 = vmatpush.bf16.xpose.msrb.mxu0 %v1100_v56 }
 0x8d1   :  { %v1116_v59 = vpop.permute.xlu0 %1115 }
 0x8d2   :  { %4523 = vmatmul.msk.bf16.vlgmr.msra.gmra.mxu1 %vm108_vm1, %v1002_v48  ;;  %4526 = vmatmul.msk.bf16.vlgmr.msrb.gmra.mxu0 %vm108_vm1, %v1093_v53 }
 0x8d3   :  { %1223 = vmatpush.bf16.xpose.msra.mxu0 %v1214_v57  ;;  %1246 = vmatpush.bf16.xpose.msra.mxu1 %v1237_v60 }
 0x8d9   :  { %v1207_v61 = vpop.permute.xlu0 %1206 }
 0x8e1   :  { %v937_v62 = vpop.permute.xlu0 %936 }
 0x8e2   :  { %v942_v63 = vsel %vm183_vm2, %v937_v62, 0  ;;  %4527 = vmatmul.msk.bf16.vlgmr.msrb.gmra.mxu1 %vm108_vm1, %v1116_v59  ;;  %4530 = vmatmul.msk.bf16.vlgmr.msra.gmra.mxu0 %vm108_vm1, %v1207_v61 }
 0x8e3   :  { %951 = vmatpush.bf16.msrb.mxu2 %v942_v63 }
 0x8f2   :  { %4531 = vmatmul.msk.bf16.vlgmr.msra.gmra.mxu1 %vm108_vm1, %v1230_v0 }
 0x91f   :  { %v882_v1 = vpop.f32.mrf.mxu0 }
 0x920   :  { %v910_v2 = vmul.f32 0.35355338, %v882_v1 }
 0x922   :  { %v912_v3 = vsel %vm108_vm1, %v910_v2, -inf }
 0x923   :  { %913 = vmax.xlane.f32.xlu1 %v912_v3 }
 0x927   :  { %v884_v4 = vpop.f32.mrf.mxu0 }
 0x937   :  { %v997_v5 = vpop.f32.mrf.mxu0 }
 0x938   :  { %v1024_v6 = vmul.f32 0.35355338, %v997_v5 }
 0x93a   :  { %v1026_v7 = vsel %vm108_vm1, %v1024_v6, -inf }
 0x93b   :  { %1027 = vmax.xlane.f32.xlu2 %v1026_v7 }
 0x93f   :  { %v906_v8 = vpop.f32.mrf.mxu1  ;;  %v999_v9 = vpop.f32.mrf.mxu0 }
 0x940   :  { %v911_v10 = vmul.f32 0.35355338, %v906_v8 }
 0x942   :  { %v915_v11 = vsel %vm108_vm1, %v911_v10, -inf }
 0x943   :  { %916 = vmax.xlane.f32.xlu0 %v915_v11 }
 0x947   :  { %v908_v14 = vpop.f32.mrf.mxu1 }
 0x94f   :  { %v1020_v16 = vpop.f32.mrf.mxu1  ;;  %v1111_v21 = vpop.f32.mrf.mxu0 }
 0x950   :  { %v1025_v26 = vmul.f32 0.35355338, %v1020_v16  ;;  %v1138_v17 = vmul.f32 0.35355338, %v1111_v21 }
 0x952   :  { %v1029_v18 = vsel %vm108_vm1, %v1025_v26, -inf  ;;  %v1140_v19 = vsel %vm108_vm1, %v1138_v17, -inf }
 0x953   :  { %1030 = vmax.xlane.f32.xlu1 %v1029_v18  ;;  %1141 = vmax.xlane.f32.xlu0 %v1140_v19 }
 0x957   :  { %v1022_v20 = vpop.f32.mrf.mxu1  ;;  %v1113_v22 = vpop.f32.mrf.mxu0 }
 0x95f   :  { %v1134_v23 = vpop.f32.mrf.mxu1  ;;  %v1225_v24 = vpop.f32.mrf.mxu0 }
 0x960   :  { %v1139_v25 = vmul.f32 0.35355338, %v1134_v23  ;;  %v5612_v27 = vmul.f32 0.35355338, %v1225_v24 }
 0x962   :  { %v1143_v30 = vsel %vm108_vm1, %v1139_v25, -inf  ;;  %v1254_v32 = vsel %vm108_vm1, %v5612_v27, -inf }
 0x963   :  { %1144 = vmax.xlane.f32.xlu2 %v1143_v30  ;;  %1255 = vmax.xlane.f32.xlu1 %v1254_v32 }
 0x967   :  { %v1136_v33 = vpop.f32.mrf.mxu1  ;;  %v1227_v34 = vpop.f32.mrf.mxu0 }
 0x96f   :  { %v1248_v15 = vpop.f32.mrf.mxu1 }
 0x970   :  { %v1253_v35 = vmul.f32 0.35355338, %v1248_v15 }
 0x972   :  { %v1257_v37 = vsel %vm108_vm1, %v1253_v35, -inf }
 0x973   :  { %1258 = vmax.xlane.f32.xlu0 %v1257_v37 }
 0x977   :  { %v1250_v38 = vpop.f32.mrf.mxu1 }
 0x97b   :  { %957 = vrot.lane.b32.xlu2 %v5562_v41, %s5237_s23 }
 0x97c   :  { %1071 = vrot.lane.b32.xlu1 %v5562_v41, %s5238_s24 }
 0x984   :  { %1164 = vrot.lane.b32.xlu1 %v5556_v36, %s5239_s6 }
 0x987   :  { %1050 = vrot.lane.b32.xlu0 %v5556_v36, %s5238_s24 }
 0x996   :  { %v914_v39 = vpop.xlane.xlu1 %913 }
 0x997   :  { %v918_v40 = vsub.f32 %v910_v2, %v914_v39 }
 0x999   :  { %v920_v42 = vmul.f32 1.442695, %v918_v40 }
 0x99b   :  { %4998 = vpow2.f32 %v920_v42 }
 0x9a1   :  { %v5626_v43 = vpop.eup %4998 }
 0x9a2   :  { %v924_v12 = vsel %vm108_vm1, %v5626_v43, 0.0 }
 0x9a4   :  { %925 = vadd.xlane.f32.xlu2 %v924_v12 }
 0x9ae   :  { %v1028_v45 = vpop.xlane.xlu2 %1027 }
 0x9af   :  { %v1032_v13 = vsub.f32 %v1024_v6, %v1028_v45 }
 0x9b1   :  { %v1034_v49 = vmul.f32 1.442695, %v1032_v13 }
 0x9b6   :  { %v917_v46 = vpop.xlane.xlu0 %916 }
 0x9b7   :  { %v919_v47 = vsub.f32 %v911_v10, %v917_v46 }
 0x9b9   :  { %v922_v48 = vmul.f32 1.442695, %v919_v47 }
 0x9bb   :  { %5000 = vpow2.f32 %v922_v48 }
 0x9bc   :  { %5002 = vpow2.f32 %v1034_v49 }
 0x9c1   :  { %v5630_v50 = vpop.eup %5000 }
 0x9c2   :  { %v927_v51 = vsel %vm108_vm1, %v5630_v50, 0.0  ;;  %v5634_v54 = vpop.eup %5002 }
 0x9c3   :  { %928 = vadd.xlane.f32.xlu1 %v927_v51  ;;  %v1038_v59 = vsel %vm108_vm1, %v5634_v54, 0.0 }
 0x9c6   :  { %v1031_v52 = vpop.xlane.xlu1 %1030  ;;  %v1142_v53 = vpop.xlane.xlu0 %1141 }
 0x9c7   :  { %v1033_v55 = vsub.f32 %v1025_v26, %v1031_v52  ;;  %v1146_v56 = vsub.f32 %v1138_v17, %v1142_v53 }
 0x9c9   :  { %v1036_v57 = vmul.f32 1.442695, %v1033_v55  ;;  %v1148_v58 = vmul.f32 1.442695, %v1146_v56 }
 0x9cb   :  { %5004 = vpow2.f32 %v1036_v57  ;;  %1039 = vadd.xlane.f32.xlu1 %v1038_v59 }
 0x9cc   :  { %5006 = vpow2.f32 %v1148_v58 }
 0x9d1   :  { %v5638_v60 = vpop.eup %5004 }
 0x9d2   :  { %v5640_v61 = vpop.eup %5006  ;;  %v1041_v62 = vsel %vm108_vm1, %v5638_v60, 0.0 }
 0x9d3   :  { %v1152_v63 = vsel %vm108_vm1, %v5640_v61, 0.0  ;;  %1042 = vadd.xlane.f32.xlu1 %v1041_v62 }
 0x9d4   :  { %1153 = vadd.xlane.f32.xlu2 %v1152_v63 }
 0x9d6   :  { %v1145_v0 = vpop.xlane.xlu2 %1144  ;;  %v1256_v7 = vpop.xlane.xlu1 %1255 }
 0x9d7   :  { %v1147_v1 = vsub.f32 %v1139_v25, %v1145_v0  ;;  %v1260_v18 = vsub.f32 %v5612_v27, %v1256_v7 }
 0x9d9   :  { %v1150_v2 = vmul.f32 1.442695, %v1147_v1  ;;  %v1262_v19 = vmul.f32 1.442695, %v1260_v18 }
 0x9db   :  { %5008 = vpow2.f32 %v1150_v2 }
 0x9de   :  { %v958_v3 = vpop.permute.xlu2 %957 }
 0x9df   :  { %v963_v4 = vsel %vm183_vm2, %v958_v3, 0 }
 0x9e0   :  { %972 = vmatpush.bf16.msra.mxu3 %v963_v4 }
 0x9e1   :  { %v5647_v5 = vpop.eup %5008 }
 0x9e2   :  { %v1155_v6 = vsel %vm108_vm1, %v5647_v5, 0.0 }
 0x9e3   :  { %1156 = vadd.xlane.f32.xlu0 %v1155_v6 }
 0x9e6   :  { %v1259_v8 = vpop.xlane.xlu0 %1258 }
 0x9e7   :  { %v1261_v9 = vsub.f32 %v1253_v35, %v1259_v8 }
 0x9e9   :  { %v1264_v10 = vmul.f32 1.442695, %v1261_v9 }
 0x9eb   :  { %5010 = vpow2.f32 %v1264_v10 }
 0x9ec   :  { %1185 = vrot.lane.b32.xlu1 %v5562_v41, %s5239_s6  ;;  %5012 = vpow2.f32 %v1262_v19 }
 0x9ee   :  { %v1072_v11 = vpop.permute.xlu1 %1071 }
 0x9ef   :  { %v1077_v14 = vsel %vm183_vm2, %v1072_v11, 0 }
 0x9f0   :  { %1086 = vmatpush.bf16.msrb.mxu3 %v1077_v14 }
 0x9f1   :  { %v5011_v16 = vpop.eup %5010 }
 0x9f2   :  { %v1269_v21 = vsel %vm108_vm1, %v5011_v16, 0.0  ;;  %v5013_v20 = vpop.eup %5012 }
 0x9f3   :  { %1270 = vadd.xlane.f32.xlu2 %v1269_v21  ;;  %v1266_v22 = vsel %vm108_vm1, %v5013_v20, 0.0 }
 0x9f6   :  { %v1165_v25 = vpop.permute.xlu1 %1164 }
 0x9f7   :  { %1278 = vrot.lane.b32.xlu0 %v5556_v36, %s5240_s25  ;;  %v1170_v32 = vsel %vm183_vm2, %v1165_v25, 0  ;;  %v4534_v25 = vld [vmem:[%s6530_s3 + $0x3c] sm:$0xf0] }
 0x9f9   :  { %v1051_v26 = vpop.permute.xlu0 %1050 }
 0x9fa   :  { %v1056_v17 = vsel %vm183_vm2, %v1051_v26, 0 }
 0x9fb   :  { %1065 = vmatpush.bf16.msra.mxu2 %v1056_v17 }
 0xa0b   :  { %1299 = vrot.lane.b32.xlu2 %v5562_v41, %s5240_s25 }
 0xa16   :  { %1267 = vadd.xlane.f32.xlu1 %v1266_v22  ;;  %v4806_v22 = vld [vmem:[%s6530_s3 + $0x4c] sm:$0xf] }
 0xa17   :  { %v926_v23 = vpop.xlane.xlu2 %925 }
 0xa18   :  { %5014 = vrcp.f32 %v926_v23  ;;  %v4538_v23 = vld [vmem:[%s6530_s3 + $0x54] sm:$0xf0] }
 0xa1e   :  { %v5015_v24 = vpop.eup %5014 }
 0xa1f   :  { %v932_v36 = vmul.f32 %v5015_v24, %v5626_v43  ;;  %v4541_v24 = vor.u32 %v4806_v22, %v4538_v23  ;;  %v4549_v22 = vld [vmem:[%s6530_s3 + $0x50] sm:$0xf]  ;;  %v4808_v23 = vld [vmem:[%s6530_s3 + $0x58] sm:$0xf0] }
 0xa21   :  { %v934_v30 = vpack.c.bf16 %v932_v36, %v932_v36  ;;  %1369 = vmatpush.bf16.msrb.mxu0 %v4541_v24  ;;  %v4803_v36 = vld [vmem:[%s6530_s3 + $0x34] sm:$0xf]  ;;  %v4550_v24 = vor.u32 %v4808_v23, %v4549_v22  ;;  %v4812_v22 = vld [vmem:[%s6531_s4 + $0x38] sm:$0xff] }
 0xa22   :  { %v4811_v23 = vld [vmem:[%s6531_s4 + $0x30] sm:$0xff] }
 0xa23   :  { %4520 = vmatmul.msk.bf16.vlgmr.msrb.gmra.mxu2 %vm108_vm1, %v934_v30  ;;  %v4537_v30 = vor.u32 %v4803_v36, %v4534_v25  ;;  %1452 = vmatpush.bf16.msrb.mxu1 %v4550_v24  ;;  %v4545_v25 = vld [vmem:[%s6530_s3 + $0x38] sm:$0xf]  ;;  %v4810_v24 = vld [vmem:[%s6531_s4 + $0x28] sm:$0xff] }
 0xa24   :  { %1179 = vmatpush.bf16.msrb.mxu2 %v1170_v32  ;;  %v4583_v32 = vld [vmem:[#allocation2 + $0x30] sm:$0xf] }
 0xa25   :  { %1370 = vmatpush.bf16.msrb.mxu0 %v4537_v30  ;;  %v4805_v30 = vld [vmem:[%s6530_s3 + $0x40] sm:$0xf0] }
 0xa36   :  { %v929_v27 = vpop.xlane.xlu1 %928 }
 0xa37   :  { %5016 = vrcp.f32 %v929_v27  ;;  %v4822_v27 = vld [vmem:[#allocation2 + $0x44] sm:$0xf0] }
 0xa3d   :  { %v5017_v41 = vpop.eup %5016 }
 0xa3e   :  { %v933_v33 = vmul.f32 %v5017_v41, %v5630_v50  ;;  %v1040_v34 = vpop.xlane.xlu1 %1039  ;;  %v4579_v41 = vld [vmem:[#allocation2] sm:$0xf] }
 0xa3f   :  { %5018 = vrcp.f32 %v1040_v34  ;;  %v4816_v34 = vld [vmem:[#allocation2 + $0x14] sm:$0xf0] }
 0xa40   :  { %v935_v15 = vpack.c.bf16 %v933_v33, %v933_v33  ;;  %v4584_v33 = vor.u32 %v4822_v27, %v4583_v32  ;;  %v4546_v27 = vor.u32 %v4805_v30, %v4545_v25 }
 0xa42   :  { %4521 = vmatmul.msk.bf16.vlgmr.msra.gmra.mxu3 %vm108_vm1, %v935_v15  ;;  %v4580_v15 = vor.u32 %v4816_v34, %v4579_v41  ;;  %1453 = vmatpush.bf16.msrb.mxu1 %v4546_v27 }
 0xa45   :  { %v5019_v35 = vpop.eup %5018 }
 0xa46   :  { %v1046_v37 = vmul.f32 %v5019_v35, %v5634_v54  ;;  %v1043_v38 = vpop.xlane.xlu1 %1042  ;;  %v5698_v35 = vld [vmem:[%s6528_s1] sm:$0xff] }
 0xa47   :  { %5020 = vrcp.f32 %v1043_v38  ;;  %v1154_v40 = vpop.xlane.xlu2 %1153 }
 0xa48   :  { %v1048_v39 = vpack.c.bf16 %v1046_v37, %v1046_v37  ;;  %5022 = vrcp.f32 %v1154_v40  ;;  %v5703_v37 = vld [vmem:[%s6528_s1 + $0x8] sm:$0xff] }
 0xa49   :  { %v1634_v38 = vpack.c.bf16 %v5703_v37, %v5698_v35 }
 0xa4a   :  { %4524 = vmatmul.msk.bf16.vlgmr.msra.gmra.mxu2 %vm108_vm1, %v1048_v39 }
 0xa4d   :  { %v5021_v42 = vpop.eup %5020 }
 0xa4e   :  { %v1047_v43 = vmul.f32 %v5021_v42, %v5638_v60  ;;  %v5023_v45 = vpop.eup %5022 }
 0xa4f   :  { %v1160_v46 = vmul.f32 %v5023_v45, %v5640_v61 }
 0xa50   :  { %v1049_v12 = vpack.c.bf16 %v1047_v43, %v1047_v43 }
 0xa51   :  { %v1162_v13 = vpack.c.bf16 %v1160_v46, %v1160_v46 }
 0xa52   :  { %4525 = vmatmul.msk.bf16.vlgmr.msrb.gmra.mxu3 %vm108_vm1, %v1049_v12 }
 0xa56   :  { %v1157_v47 = vpop.xlane.xlu0 %1156 }
 0xa57   :  { %5024 = vrcp.f32 %v1157_v47 }
 0xa5a   :  { %4528 = vmatmul.msk.bf16.vlgmr.msrb.gmra.mxu2 %vm108_vm1, %v1162_v13 }
 0xa5d   :  { %v5025_v48 = vpop.eup %5024 }
 0xa5e   :  { %v1186_v49 = vpop.permute.xlu1 %1185  ;;  %v1161_v50 = vmul.f32 %v5025_v48, %v5647_v5 }
 0xa5f   :  { %v1191_v51 = vsel %vm183_vm2, %v1186_v49, 0 }
 0xa60   :  { %1200 = vmatpush.bf16.msra.mxu3 %v1191_v51  ;;  %v1163_v52 = vpack.c.bf16 %v1161_v50, %v1161_v50 }
 0xa63   :  { %4529 = vmatmul.msk.bf16.vlgmr.msra.gmra.mxu3 %vm108_vm1, %v1163_v52 }
 0xa66   :  { %v1271_v53 = vpop.xlane.xlu2 %1270 }
 0xa67   :  { %5026 = vrcp.f32 %v1271_v53 }
 0xa69   :  { %v1279_v54 = vpop.permute.xlu0 %1278 }
 0xa6a   :  { %v1284_v55 = vsel %vm183_vm2, %v1279_v54, 0 }
 0xa6b   :  { %1293 = vmatpush.bf16.msra.mxu2 %v1284_v55  ;;  %v1351_v55 = vperm.slane %v5553_v31, 1 }
 0xa6d   :  { %v5027_v56 = vpop.eup %5026 }
 0xa6e   :  { %v1275_v57 = vmul.f32 %v5027_v56, %v5011_v16  ;;  %v1300_v58 = vpop.permute.xlu2 %1299 }
 0xa6f   :  { %v1305_v59 = vsel %vm183_vm2, %v1300_v58, 0  ;;  %1504 = vmatpush.bf16.msrb.mxu2 %v4812_v22 }
 0xa70   :  { %v1277_v60 = vpack.c.bf16 %v1275_v57, %v1275_v57  ;;  %1314 = vmatpush.bf16.msrb.mxu3 %v1305_v59 }
 0xa73   :  { %4533 = vmatmul.msk.bf16.vlgmr.msrb.gmra.mxu3 %vm108_vm1, %v1277_v60  ;;  %1505 = vmatpush.bf16.msrb.mxu2 %v4811_v23 }
 0xa74   :  { %1657 = vmatpush.bf16.msra.mxu3 %v4584_v33 }
 0xa77   :  { %1506 = vmatpush.bf16.msrb.mxu2 %v4810_v24 }
 0xa78   :  { %1658 = vmatpush.bf16.msra.mxu3 %v4580_v15 }
 0xa83   :  { %4585 = vmatmul.msk.bf16.vlgmr.msra.gmra.mxu3 %vm83_vm0, %v1634_v38 }
 0xa89   :  { %v1268_v61 = vpop.xlane.xlu1 %1267 }
 0xa8a   :  { %5028 = vrcp.f32 %v1268_v61 }
 0xa90   :  { %v5029_v62 = vpop.eup %5028 }
 0xa91   :  { %v1274_v63 = vmul.f32 %v5029_v62, %v5013_v20 }
 0xa93   :  { %v1276_v0 = vpack.c.bf16 %v1274_v63, %v1274_v63 }
 0xa95   :  { %4532 = vmatmul.msk.bf16.vlgmr.msra.gmra.mxu2 %vm108_vm1, %v1276_v0 }
 0xaa6   :  { %v953_v1 = vpop.f32.mrf.mxu2 }
 0xaae   :  { %v955_v2 = vpop.f32.mrf.mxu2 }
 0xac5   :  { %v974_v3 = vpop.f32.mrf.mxu3 }
 0xacd   :  { %v976_v4 = vpop.f32.mrf.mxu3  ;;  %v1067_v5 = vpop.f32.mrf.mxu2 }
 0xad5   :  { %v1069_v6 = vpop.f32.mrf.mxu2  ;;  %v1088_v7 = vpop.f32.mrf.mxu3 }
 0xad6   :  { %v4877_v8 = vpack.i.bf16 %v1088_v7, %v1067_v5 }
 0xad8   :  { %4878 = vrot.lane.b32.xlu0 %v4877_v8, %s5241_s26 }
 0xadd   :  { %v1090_v9 = vpop.f32.mrf.mxu3  ;;  %v1181_v10 = vpop.f32.mrf.mxu2 }
 0xae5   :  { %v1183_v11 = vpop.f32.mrf.mxu2 }
 0xae6   :  { %v1202_v14 = vpop.f32.mrf.mxu3 }
 0xae7   :  { %v4882_v16 = vpack.i.bf16 %v1202_v14, %v1181_v10 }
 0xae9   :  { %4883 = vrot.lane.b32.xlu2 %v4882_v16, %s5242_s27 }
 0xaee   :  { %v1204_v21 = vpop.f32.mrf.mxu3 }
 0xaf6   :  { %v1316_v26 = vpop.f32.mrf.mxu3 }
 0xafe   :  { %v1318_v17 = vpop.f32.mrf.mxu3 }
 0xb06   :  { %v1660_v0 = vpop.f32.mrf.mxu3 }
 0xb18   :  { %v1295_v18 = vpop.f32.mrf.mxu2 }
 0xb19   :  { %v4887_v19 = vpack.i.bf16 %v1316_v26, %v1295_v18 }
 0xb1b   :  { %4888 = vrot.lane.b32.xlu0 %v4887_v19, %s5229_s19 }
 0xb20   :  { %v1297_v20 = vpop.f32.mrf.mxu2 }
 0xb43   :  { %v4884_v43 = vpop.permute.xlu2 %4883 }
 0xb44   :  { %v4886_v46 = vunpack.i.h.bf16 %v4884_v43  ;;  %v4885_v47 = vunpack.i.l.bf16 %v4884_v43 }
 0xb4a   :  { %v4879_v39 = vpop.permute.xlu0 %4878 }
 0xb4b   :  { %v4881_v40 = vunpack.i.h.bf16 %v4879_v39  ;;  %v4880_v42 = vunpack.i.l.bf16 %v4879_v39 }
 0xb4d   :  { %v1345_v12 = vsel %vm108_vm1, %v974_v3, %v4881_v40  ;;  %v1344_v45 = vsel %vm108_vm1, %v953_v1, %v4880_v42  ;;  %v5723_v1 = vld [vmem:[%s6535_s8] sm:$0xff]  ;;  %v1662_v3 = vpop.f32.mrf.mxu3 }
 0xb4e   :  { %v1346_v50 = vsel %vm589_vm3, %v1344_v45, %v4885_v47  ;;  %v1347_v51 = vsel %vm589_vm3, %v1345_v12, %v4886_v46  ;;  %v1635_v2 = vperm.slane %v5723_v1, 0 }
 0xb50   :  { %v1663_v4 = vadd.f32 %v1662_v3, %v1635_v2 }
 0xb52   :  { %v5726_v5 = vpack.c.bf16 %v1663_v4, %v1663_v4 }
 0xb8d   :  { %v4889_v13 = vpop.permute.xlu0 %4888 }
 0xb8e   :  { %v4891_v48 = vunpack.i.h.bf16 %v4889_v13  ;;  %v4890_v49 = vunpack.i.l.bf16 %v4889_v13 }
 0xb90   :  { %v1348_v52 = vsel %vm592_vm4, %v1346_v50, %v4890_v49  ;;  %v1349_v53 = vsel %vm592_vm4, %v1347_v51, %v4891_v48 }
 0xb91   :  { %v1350_v54 = vpack.c.bf16 %v1349_v53, %v1348_v52  ;;  %v1423_v52 = vperm.slane %v5553_v31, 2 }
 0xb93   :  { %4542 = vmatmul.msk.bf16.vlgmr.msrb.gmra.mxu0 %vm83_vm0, %v1350_v54 }
 0xc10   :  { %v1372_v56 = vpop.f32.mrf.mxu0 }
 0xc11   :  { %v1373_v57 = vadd.f32 %v1372_v56, %v1351_v55 }
 0xc13   :  { %v1377_v58 = vadd.f32 %v1373_v57, %v5543_v28  ;;  %v1661_v28 = vadd.f32 %v1660_v0, %v1635_v2 }
 0xc15   :  { %v1379_v59 = vsel %vm83_vm0, %v1377_v58, 0.0  ;;  %v5728_v6 = vpack.c.bf16 %v1661_v28, %v1661_v28 }
 0xc16   :  { %1380 = vadd.xlane.f32.xlu2 %v1379_v59  ;;  %v1426_v59 = vperm.slane %v5553_v31, 3 }
 0xc17   :  { %v1668_v8 = vunpack.c.l.b16 %v5728_v6 }
 0xc18   :  { %v1374_v60 = vpop.f32.mrf.mxu0 }
 0xc19   :  { %v1375_v61 = vadd.f32 %v1374_v60, %v1351_v55  ;;  %v5738_v9 = vpack.c.b16 %v1668_v8, %v1668_v8 }
 0xc1b   :  { %v1378_v62 = vadd.f32 %v1375_v61, %v5545_v29  ;;  %v1692_v29 = vunpack.c.l.b16 %v5726_v5 }
 0xc1d   :  { %v1382_v63 = vsel %vm83_vm0, %v1378_v62, 0.0  ;;  %v5731_v7 = vpack.c.b16 %v1692_v29, %v1692_v29 }
 0xc1e   :  { %1383 = vadd.xlane.f32.xlu0 %v1382_v63 }
 0xc2e   :  { %1694 = vrot.lane.b32.xlu2 %v5731_v7, %s5232_s17 }
 0xc32   :  { %1808 = vrot.lane.b32.xlu0 %v5731_v7, %s5231_s16 }
 0xc36   :  { %1922 = vrot.lane.b32.xlu2 %v5731_v7, %s5234_s20 }
 0xc3a   :  { %1899 = vrot.lane.b32.xlu0 %v5738_v9, %s5234_s20 }
 0xc3e   :  { %2013 = vrot.lane.b32.xlu2 %v5738_v9, %s5235_s21 }
 0xc42   :  { %1920 = vrot.lane.b32.xlu0 %v5731_v7, %s5233_s18 }
 0xc46   :  { %2034 = vrot.lane.b32.xlu2 %v5731_v7, %s5236_s22 }
 0xc4a   :  { %2011 = vrot.lane.b32.xlu0 %v5738_v9, %s5236_s22 }
 0xc89   :  { %v1381_v10 = vpop.xlane.xlu2 %1380 }
 0xc8a   :  { %v1385_v11 = vmul.f32 %v1381_v10, %v5483_v44 }
 0xc8c   :  { %v1387_v14 = vsub.f32 %v1377_v58, %v1385_v11 }
 0xc8e   :  { %v1389_v16 = vmul.f32 %v1387_v14, %v1387_v14 }
 0xc90   :  { %v1391_v21 = vsel %vm83_vm0, %v1389_v16, 0.0 }
 0xc91   :  { %v1384_v26 = vpop.xlane.xlu0 %1383  ;;  %1392 = vadd.xlane.f32.xlu1 %v1391_v21  ;;  %v1695_v36 = vpop.permute.xlu2 %1694 }
 0xc92   :  { %v1386_v17 = vmul.f32 %v1384_v26, %v5483_v44  ;;  %v1700_v32 = vsel %vm108_vm1, %v1695_v36, 0  ;;  %v4809_v36 = vld [vmem:[%s6531_s4 + $0x20] sm:$0xff] }
 0xc93   :  { %1709 = vmatpush.bf16.xpose.msra.mxu1 %v1700_v32  ;;  %1507 = vmatpush.bf16.msrb.mxu2 %v4809_v36  ;;  %v1430_v32 = vperm.slane %v5553_v31, 4 }
 0xc94   :  { %v1388_v18 = vsub.f32 %v1378_v62, %v1386_v17 }
 0xc96   :  { %v1390_v19 = vmul.f32 %v1388_v18, %v1388_v18 }
 0xc98   :  { %v1394_v20 = vsel %vm83_vm0, %v1390_v19, 0.0 }
 0xc99   :  { %1395 = vadd.xlane.f32.xlu1 %v1394_v20  ;;  %v1923_v10 = vpop.permute.xlu2 %1922 }
 0xca1   :  { %v2014_v16 = vpop.permute.xlu2 %2013 }
 0xca2   :  { %v2019_v26 = vsel %vm108_vm1, %v2014_v16, 0 }
 0xca4   :  { %v1809_v57 = vpop.permute.xlu0 %1808 }
 0xca5   :  { %v1814_v3 = vsel %vm108_vm1, %v1809_v57, 0 }
 0xca9   :  { %v2035_v20 = vpop.permute.xlu2 %2034 }
 0xcac   :  { %v1900_v4 = vpop.permute.xlu0 %1899 }
 0xcad   :  { %v1905_v8 = vsel %vm108_vm1, %v1900_v4, 0 }
 0xcb2   :  { %1670 = vrot.lane.b32.xlu1 %v5738_v9, %s5232_s17 }
 0xcb4   :  { %v1921_v19 = vpop.permute.xlu0 %1920 }
 0xcba   :  { %1785 = vrot.lane.b32.xlu1 %v5738_v9, %s5231_s16 }
 0xcc2   :  { %1783 = vrot.lane.b32.xlu1 %v5738_v9, %s5230_s2 }
 0xcca   :  { %1806 = vrot.lane.b32.xlu1 %v5731_v7, %s5230_s2 }
 0xcd2   :  { %1897 = vrot.lane.b32.xlu1 %v5738_v9, %s5233_s18 }
 0xcda   :  { %2036 = vrot.lane.b32.xlu1 %v5731_v7, %s5235_s21 }
 0xd04   :  { %v1393_v41 = vpop.xlane.xlu1 %1392 }
 0xd05   :  { %v1397_v33 = vmul.f32 %v1393_v41, %v5483_v44 }
 0xd07   :  { %v1399_v34 = vadd.f32 1e-05, %v1397_v33 }
 0xd09   :  { %5030 = vrsqrt.f32 %v1399_v34  ;;  %vm1407_vm9 = vweird.f32 %v1399_v34 }
 0xd0c   :  { %v1396_v15 = vpop.xlane.xlu1 %1395 }
 0xd0d   :  { %v1398_v38 = vmul.f32 %v1396_v15, %v5483_v44 }
 0xd0f   :  { %v5031_v39 = vpop.eup %5030  ;;  %v1400_v40 = vadd.f32 1e-05, %v1398_v38 }
 0xd10   :  { %v1402_v42 = vmul.f32 %v5031_v39, %v1399_v34  ;;  %vm1408_vm8 = vweird.f32 %v5031_v39 }
 0xd11   :  { %5032 = vrsqrt.f32 %v1400_v40  ;;  %vm1409_vm10 = vmor %vm1407_vm9, %vm1408_vm8  ;;  %vm1417_vm13 = vweird.f32 %v1400_v40 }
 0xd12   :  { %v1403_v43 = vmul.f32 %v5031_v39, %v1402_v42 }
 0xd14   :  { %v1404_v12 = vmul.f32 0.5, %v1403_v43 }
 0xd16   :  { %v1405_v45 = vsub.f32 1.5, %v1404_v12 }
 0xd17   :  { %v5033_v46 = vpop.eup %5032 }
 0xd18   :  { %v1406_v47 = vmul.f32 %v5031_v39, %v1405_v45  ;;  %v1412_v13 = vmul.f32 %v5033_v46, %v1400_v40  ;;  %vm1418_vm11 = vweird.f32 %v5033_v46 }
 0xd19   :  { %vm1419_vm14 = vmor %vm1417_vm13, %vm1418_vm11 }
 0xd1a   :  { %v1413_v48 = vmul.f32 %v5033_v46, %v1412_v13  ;;  %v1410_v49 = vsel %vm1409_vm10, %v5031_v39, %v1406_v47 }
 0xd1b   :  { %v1421_v53 = vmul.f32 %v1410_v49, %v1387_v14  ;;  %v1928_v14 = vsel %vm108_vm1, %v1923_v10, 0 }
 0xd1c   :  { %v1414_v50 = vmul.f32 0.5, %v1413_v48 }
 0xd1d   :  { %v1424_v56 = vmul.f32 %v1423_v52, %v1421_v53 }
 0xd1e   :  { %v1415_v51 = vsub.f32 1.5, %v1414_v50 }
 0xd1f   :  { %v5786_v63 = vadd.f32 %v1426_v59, %v1424_v56 }
 0xd20   :  { %v1416_v54 = vmul.f32 %v5033_v46, %v1415_v51 }
 0xd22   :  { %v1420_v55 = vsel %vm1419_vm14, %v5033_v46, %v1416_v54 }
 0xd23   :  { %v1422_v58 = vmul.f32 %v1420_v55, %v1388_v18 }
 0xd24   :  { %v1671_v60 = vpop.permute.xlu1 %1670 }
 0xd25   :  { %v1425_v61 = vmul.f32 %v1423_v52, %v1422_v58  ;;  %v1676_v62 = vsel %vm108_vm1, %v1671_v60, 0 }
 0xd26   :  { %1685 = vmatpush.bf16.xpose.msra.mxu0 %v1676_v62 }
 0xd27   :  { %v5788_v0 = vadd.f32 %v1426_v59, %v1425_v61 }
 0xd29   :  { %v1429_v2 = vpack.c.bf16 %v5788_v0, %v5786_v63 }
 0xd2b   :  { %4551 = vmatmul.msk.bf16.vlgmr.msrb.gmra.mxu1 %vm83_vm0, %v1429_v2 }
 0xd2c   :  { %1823 = vmatpush.bf16.xpose.msrb.mxu1 %v1814_v3  ;;  %v1786_v28 = vpop.permute.xlu1 %1785 }
 0xd2d   :  { %v1791_v29 = vsel %vm108_vm1, %v1786_v28, 0  ;;  %4586 = vmatmul.msk.bf16.vlgmr.msra.gmra.mxu0 %vm108_vm1, %v5728_v6 }
 0xd2e   :  { %1800 = vmatpush.bf16.xpose.msrb.mxu0 %v1791_v29 }
 0xd34   :  { %v1784_v11 = vpop.permute.xlu1 %1783 }
 0xd36   :  { %1914 = vmatpush.bf16.xpose.msra.mxu0 %v1905_v8 }
 0xd3b   :  { %4587 = vmatmul.msk.bf16.vlgmr.msra.gmra.mxu1 %vm108_vm1, %v5726_v5  ;;  %v2012_v5 = vpop.permute.xlu0 %2011 }
 0xd3c   :  { %1937 = vmatpush.bf16.xpose.msra.mxu1 %v1928_v14  ;;  %v1807_v21 = vpop.permute.xlu1 %1806 }
 0xd3d   :  { %4590 = vmatmul.msk.bf16.vlgmr.msrb.gmra.mxu0 %vm108_vm1, %v1784_v11 }
 0xd3e   :  { %2028 = vmatpush.bf16.xpose.msrb.mxu0 %v2019_v26 }
 0xd44   :  { %v1898_v6 = vpop.permute.xlu1 %1897 }
 0xd4b   :  { %4591 = vmatmul.msk.bf16.vlgmr.msrb.gmra.mxu1 %vm108_vm1, %v1807_v21 }
 0xd4c   :  { %v2037_v17 = vpop.permute.xlu1 %2036 }
 0xd4d   :  { %v2042_v18 = vsel %vm108_vm1, %v2037_v17, 0  ;;  %4594 = vmatmul.msk.bf16.vlgmr.msra.gmra.mxu0 %vm108_vm1, %v1898_v6 }
 0xd4e   :  { %2051 = vmatpush.bf16.xpose.msrb.mxu1 %v2042_v18 }
 0xd5b   :  { %4595 = vmatmul.msk.bf16.vlgmr.msra.gmra.mxu1 %vm108_vm1, %v1921_v19 }
 0xd5d   :  { %4598 = vmatmul.msk.bf16.vlgmr.msrb.gmra.mxu0 %vm108_vm1, %v2012_v5 }
 0xd6b   :  { %4599 = vmatmul.msk.bf16.vlgmr.msrb.gmra.mxu1 %vm108_vm1, %v2035_v20 }
 0xda8   :  { %v1455_v25 = vpop.f32.mrf.mxu1 }
 0xda9   :  { %v1456_v33 = vadd.f32 %v1455_v25, %v1430_v32 }
 0xdaa   :  { %v1687_v30 = vpop.f32.mrf.mxu0 }
 0xdab   :  { %v1715_v27 = vmul.f32 0.35355338, %v1687_v30  ;;  %v1460_v39 = vmax.f32 %v1456_v33, 0.0 }
 0xdad   :  { %v1717_v41 = vsel %vm108_vm1, %v1715_v27, -inf }
 0xdae   :  { %1718 = vmax.xlane.f32.xlu1 %v1717_v41 }
 0xdb0   :  { %v1457_v34 = vpop.f32.mrf.mxu1 }
 0xdb1   :  { %v1458_v15 = vadd.f32 %v1457_v34, %v1430_v32 }
 0xdb2   :  { %v1689_v38 = vpop.f32.mrf.mxu0 }
 0xdb3   :  { %v1461_v40 = vmax.f32 %v1458_v15, 0.0 }
 0xdb5   :  { %v1471_v42 = vpack.c.bf16 %v1461_v40, %v1460_v39 }
 0xdb7   :  { %4576 = vmatmul.msk.bf16.vlgmr.msrb.gmra.mxu2 %vm748_vm12, %v1471_v42 }
 0xdb8   :  { %v1711_v43 = vpop.f32.mrf.mxu1 }
 0xdb9   :  { %v1716_v2 = vmul.f32 0.35355338, %v1711_v43 }
 0xdba   :  { %v1802_v12 = vpop.f32.mrf.mxu0 }
 0xdbb   :  { %v1829_v45 = vmul.f32 0.35355338, %v1802_v12  ;;  %v1720_v3 = vsel %vm108_vm1, %v1716_v2, -inf }
 0xdbd   :  { %v1831_v46 = vsel %vm108_vm1, %v1829_v45, -inf }
 0xdbe   :  { %1832 = vmax.xlane.f32.xlu2 %v1831_v46 }
 0xdc0   :  { %v1713_v31 = vpop.f32.mrf.mxu1 }
 0xdc2   :  { %v1804_v47 = vpop.f32.mrf.mxu0 }
 0xdc8   :  { %v1825_v13 = vpop.f32.mrf.mxu1 }
 0xdc9   :  { %v1830_v58 = vmul.f32 0.35355338, %v1825_v13 }
 0xdca   :  { %v1916_v48 = vpop.f32.mrf.mxu0 }
 0xdcb   :  { %v1943_v49 = vmul.f32 0.35355338, %v1916_v48  ;;  %v1834_v60 = vsel %vm108_vm1, %v1830_v58, -inf }
 0xdcd   :  { %v1945_v50 = vsel %vm108_vm1, %v1943_v49, -inf }
 0xdce   :  { %1946 = vmax.xlane.f32.xlu0 %v1945_v50 }
 0xdd0   :  { %v1827_v51 = vpop.f32.mrf.mxu1 }
 0xdd2   :  { %v1918_v52 = vpop.f32.mrf.mxu0 }
 0xdd8   :  { %v1939_v53 = vpop.f32.mrf.mxu1 }
 0xdd9   :  { %v1944_v16 = vmul.f32 0.35355338, %v1939_v53 }
 0xdda   :  { %v2030_v54 = vpop.f32.mrf.mxu0 }
 0xddb   :  { %v5826_v55 = vmul.f32 0.35355338, %v2030_v54  ;;  %v1948_v17 = vsel %vm108_vm1, %v1944_v16, -inf }
 0xddd   :  { %v2059_v56 = vsel %vm108_vm1, %v5826_v55, -inf }
 0xdde   :  { %2060 = vmax.xlane.f32.xlu1 %v2059_v56 }
 0xde0   :  { %v1941_v57 = vpop.f32.mrf.mxu1 }
 0xde2   :  { %1741 = vrot.lane.b32.xlu0 %v5738_v9, %s5237_s23  ;;  %v2032_v59 = vpop.f32.mrf.mxu0 }
 0xde6   :  { %1835 = vmax.xlane.f32.xlu1 %v1834_v60 }
 0xde8   :  { %v2053_v61 = vpop.f32.mrf.mxu1 }
 0xde9   :  { %v2058_v28 = vmul.f32 0.35355338, %v2053_v61 }
 0xdeb   :  { %v2062_v4 = vsel %vm108_vm1, %v2058_v28, -inf }
 0xdf0   :  { %v2055_v62 = vpop.f32.mrf.mxu1 }
 0xe0c   :  { %1721 = vmax.xlane.f32.xlu0 %v1720_v3 }
 0xe14   :  { %2063 = vmax.xlane.f32.xlu0 %v2062_v4 }
 0xe21   :  { %v1719_v29 = vpop.xlane.xlu1 %1718 }
 0xe22   :  { %v1723_v8 = vsub.f32 %v1715_v27, %v1719_v29 }
 0xe24   :  { %v1725_v10 = vmul.f32 1.442695, %v1723_v8  ;;  %v5883_v8 = vld [vmem:[%s6532_s5 + $0x8] sm:$0xff] }
 0xe26   :  { %5034 = vpow2.f32 %v1725_v10 }
 0xe28   :  { %1876 = vrot.lane.b32.xlu0 %v5731_v7, %s5238_s24 }
 0xe2c   :  { %v5035_v11 = vpop.eup %5034 }
 0xe2d   :  { %v1729_v14 = vsel %vm108_vm1, %v5035_v11, 0.0 }
 0xe2e   :  { %1730 = vadd.xlane.f32.xlu2 %v1729_v14 }
 0xe31   :  { %v1833_v21 = vpop.xlane.xlu2 %1832 }
 0xe32   :  { %v1837_v26 = vsub.f32 %v1829_v45, %v1833_v21 }
 0xe34   :  { %v1839_v6 = vmul.f32 1.442695, %v1837_v26 }
 0xe36   :  { %5036 = vpow2.f32 %v1839_v6  ;;  %1949 = vmax.xlane.f32.xlu2 %v1948_v17 }
 0xe3a   :  { %v1509_v14 = vpop.f32.mrf.mxu2 }
 0xe3c   :  { %v5839_v18 = vpop.eup %5036 }
 0xe3d   :  { %v1843_v19 = vsel %vm108_vm1, %v5839_v18, 0.0 }
 0xe3e   :  { %1844 = vadd.xlane.f32.xlu1 %v1843_v19 }
 0xe41   :  { %v1947_v5 = vpop.xlane.xlu0 %1946 }
 0xe42   :  { %v1951_v23 = vsub.f32 %v1943_v49, %v1947_v5 }
 0xe44   :  { %v1953_v24 = vmul.f32 1.442695, %v1951_v23 }
 0xe46   :  { %5038 = vpow2.f32 %v1953_v24 }
 0xe4c   :  { %v5850_v36 = vpop.eup %5038 }
 0xe4d   :  { %v1957_v30 = vsel %vm108_vm1, %v5850_v36, 0.0 }
 0xe4e   :  { %1762 = vrot.lane.b32.xlu2 %v5731_v7, %s5237_s23 }
 0xe51   :  { %v2061_v25 = vpop.xlane.xlu1 %2060 }
 0xe54   :  { %v1742_v20 = vpop.permute.xlu0 %1741 }
 0xe55   :  { %v1747_v22 = vsel %vm183_vm2, %v1742_v20, 0 }
 0xe56   :  { %1756 = vmatpush.bf16.msra.mxu2 %v1747_v22 }
 0xe57   :  { %1855 = vrot.lane.b32.xlu1 %v5738_v9, %s5238_s24 }
 0xe59   :  { %v1836_v32 = vpop.xlane.xlu1 %1835 }
 0xe5a   :  { %v1838_v33 = vsub.f32 %v1830_v58, %v1836_v32 }
 0xe5c   :  { %v1841_v15 = vmul.f32 1.442695, %v1838_v33 }
 0xe5f   :  { %1969 = vrot.lane.b32.xlu1 %v5738_v9, %s5239_s6 }
 0xe77   :  { %1958 = vadd.xlane.f32.xlu2 %v1957_v30 }
 0xe7f   :  { %v1722_v27 = vpop.xlane.xlu0 %1721 }
 0xe80   :  { %v1724_v41 = vsub.f32 %v1716_v2, %v1722_v27 }
 0xe82   :  { %v1727_v34 = vmul.f32 1.442695, %v1724_v41 }
 0xe84   :  { %5040 = vpow2.f32 %v1727_v34  ;;  %v1511_v34 = vpop.f32.mrf.mxu2 }
 0xe85   :  { %5042 = vpow2.f32 %v1841_v15 }
 0xe87   :  { %v2064_v38 = vpop.xlane.xlu0 %2063 }
 0xe88   :  { %v2066_v39 = vsub.f32 %v2058_v28, %v2064_v38 }
 0xe8a   :  { %v5854_v40 = vpop.eup %5040  ;;  %v2069_v42 = vmul.f32 1.442695, %v2066_v39 }
 0xe8b   :  { %v1732_v43 = vsel %vm108_vm1, %v5854_v40, 0.0  ;;  %v5858_v12 = vpop.eup %5042 }
 0xe8c   :  { %5044 = vpow2.f32 %v2069_v42  ;;  %1733 = vadd.xlane.f32.xlu1 %v1732_v43  ;;  %v1846_v31 = vsel %vm108_vm1, %v5858_v12, 0.0 }
 0xe92   :  { %v5860_v45 = vpop.eup %5044 }
 0xe93   :  { %v2074_v46 = vsel %vm108_vm1, %v5860_v45, 0.0 }
 0xe94   :  { %2075 = vadd.xlane.f32.xlu2 %v2074_v46  ;;  %1847 = vadd.xlane.f32.xlu1 %v1846_v31 }
 0xe9a   :  { %v1877_v53 = vpop.permute.xlu0 %1876 }
 0xe9b   :  { %v1882_v57 = vsel %vm183_vm2, %v1877_v53, 0 }
 0xea1   :  { %v1731_v47 = vpop.xlane.xlu2 %1730 }
 0xea2   :  { %5046 = vrcp.f32 %v1731_v47 }
 0xea8   :  { %v5047_v13 = vpop.eup %5046 }
 0xea9   :  { %v1737_v48 = vmul.f32 %v5047_v13, %v5035_v11  ;;  %v1950_v49 = vpop.xlane.xlu2 %1949 }
 0xeaa   :  { %v1952_v50 = vsub.f32 %v1944_v16, %v1950_v49 }
 0xeab   :  { %v1739_v51 = vpack.c.bf16 %v1737_v48, %v1737_v48 }
 0xeac   :  { %v1955_v52 = vmul.f32 1.442695, %v1952_v50  ;;  %2104 = vrot.lane.b32.xlu2 %v5731_v7, %s5240_s25 }
 0xead   :  { %1990 = vrot.lane.b32.xlu1 %v5731_v7, %s5239_s6  ;;  %4588 = vmatmul.msk.bf16.vlgmr.msra.gmra.mxu2 %vm108_vm1, %v1739_v51  ;;  %v2065_v7 = vsub.f32 %v5826_v55, %v2061_v25  ;;  %v1472_v55 = vperm.slane %v5883_v8, 5 }
 0xeae   :  { %5048 = vpow2.f32 %v1955_v52 }
 0xeaf   :  { %v2067_v2 = vmul.f32 1.442695, %v2065_v7 }
 0xeb1   :  { %v1763_v54 = vpop.permute.xlu2 %1762  ;;  %v1845_v60 = vpop.xlane.xlu1 %1844 }
 0xeb2   :  { %v1768_v56 = vsel %vm183_vm2, %v1763_v54, 0  ;;  %5050 = vrcp.f32 %v1845_v60 }
 0xeb3   :  { %1777 = vmatpush.bf16.msrb.mxu3 %v1768_v56  ;;  %5052 = vpow2.f32 %v2067_v2 }
 0xeb4   :  { %v5049_v58 = vpop.eup %5048 }
 0xeb5   :  { %v1960_v59 = vsel %vm108_vm1, %v5049_v58, 0.0 }
 0xeb6   :  { %1961 = vadd.xlane.f32.xlu0 %v1960_v59 }
 0xeb7   :  { %1891 = vmatpush.bf16.msra.mxu3 %v1882_v57 }
 0xeb8   :  { %v5051_v61 = vpop.eup %5050 }
 0xeb9   :  { %v1851_v62 = vmul.f32 %v5051_v61, %v5839_v18  ;;  %v5053_v11 = vpop.eup %5052 }
 0xeba   :  { %v2071_v16 = vsel %vm108_vm1, %v5053_v11, 0.0 }
 0xebb   :  { %v1853_v4 = vpack.c.bf16 %v1851_v62, %v1851_v62 }
 0xec9   :  { %v1856_v3 = vpop.permute.xlu1 %1855 }
 0xeca   :  { %v1861_v28 = vsel %vm183_vm2, %v1856_v3, 0  ;;  %2083 = vrot.lane.b32.xlu0 %v5738_v9, %s5240_s25  ;;  %v1510_v9 = vadd.f32 %v1509_v14, %v1472_v55 }
 0xecb   :  { %1870 = vmatpush.bf16.msrb.mxu2 %v1861_v28 }
 0xecc   :  { %v5891_v21 = vadd.f32 %v1510_v9, %v5786_v63 }
 0xece   :  { %4592 = vmatmul.msk.bf16.vlgmr.msrb.gmra.mxu2 %vm108_vm1, %v1853_v4  ;;  %v1516_v26 = vsel %vm83_vm0, %v5891_v21, 0.0 }
 0xed1   :  { %v1970_v29 = vpop.permute.xlu1 %1969 }
 0xed2   :  { %v1975_v10 = vsel %vm183_vm2, %v1970_v29, 0  ;;  %v1512_v29 = vadd.f32 %v1511_v34, %v1472_v55 }
 0xed3   :  { %1984 = vmatpush.bf16.msra.mxu2 %v1975_v10 }
 0xed4   :  { %v1515_v10 = vadd.f32 %v1512_v29, %v5788_v0 }
 0xed6   :  { %v1519_v14 = vsel %vm83_vm0, %v1515_v10, 0.0 }
 0xed7   :  { %2072 = vadd.xlane.f32.xlu1 %v2071_v16 }
 0xedf   :  { %1517 = vadd.xlane.f32.xlu1 %v1516_v26 }
 0xeea   :  { %v1959_v6 = vpop.xlane.xlu2 %1958 }
 0xeeb   :  { %5054 = vrcp.f32 %v1959_v6 }
 0xef1   :  { %v5055_v17 = vpop.eup %5054 }
 0xef2   :  { %v1965_v18 = vmul.f32 %v5055_v17, %v5850_v36 }
 0xef4   :  { %v1967_v19 = vpack.c.bf16 %v1965_v18, %v1965_v18  ;;  %v4819_v18 = vld [vmem:[#allocation2 + $0x34] sm:$0xf] }
 0xef6   :  { %4596 = vmatmul.msk.bf16.vlgmr.msra.gmra.mxu2 %vm108_vm1, %v1967_v19  ;;  %v4606_v19 = vld [vmem:[#allocation2 + $0x48] sm:$0xf0] }
 0xef7   :  { %v4609_v55 = vor.u32 %v4819_v18, %v4606_v19 }
 0xef9   :  { %2174 = vmatpush.bf16.msra.mxu0 %v4609_v55 }
 0xeff   :  { %v1734_v5 = vpop.xlane.xlu1 %1733 }
 0xf00   :  { %5056 = vrcp.f32 %v1734_v5  ;;  %v4813_v5 = vld [vmem:[#allocation2 + $0x4] sm:$0xf] }
 0xf06   :  { %v5057_v20 = vpop.eup %5056 }
 0xf07   :  { %v1738_v22 = vmul.f32 %v5057_v20, %v5854_v40  ;;  %v1848_v63 = vpop.xlane.xlu1 %1847  ;;  %v2076_v25 = vpop.xlane.xlu2 %2075  ;;  %v4602_v20 = vld [vmem:[#allocation2 + $0x18] sm:$0xf0] }
 0xf08   :  { %5058 = vrcp.f32 %v1848_v63  ;;  %v4605_v0 = vor.u32 %v4813_v5, %v4602_v20 }
 0xf09   :  { %v1740_v23 = vpack.c.bf16 %v1738_v22, %v1738_v22 }
 0xf0a   :  { %2175 = vmatpush.bf16.msra.mxu0 %v4605_v0 }
 0xf0b   :  { %4589 = vmatmul.msk.bf16.vlgmr.msrb.gmra.mxu3 %vm108_vm1, %v1740_v23 }
 0xf0e   :  { %v5059_v24 = vpop.eup %5058 }
 0xf0f   :  { %v1852_v30 = vmul.f32 %v5059_v24, %v5858_v12  ;;  %v2105_v36 = vpop.permute.xlu2 %2104 }
 0xf10   :  { %v2110_v33 = vsel %vm183_vm2, %v2105_v36, 0 }
 0xf11   :  { %v1854_v32 = vpack.c.bf16 %v1852_v30, %v1852_v30 }
 0xf1b   :  { %4593 = vmatmul.msk.bf16.vlgmr.msra.gmra.mxu3 %vm108_vm1, %v1854_v32 }
 0xf1f   :  { %v1991_v27 = vpop.permute.xlu1 %1990 }
 0xf20   :  { %v1996_v41 = vsel %vm183_vm2, %v1991_v27, 0 }
 0xf21   :  { %2005 = vmatpush.bf16.msrb.mxu3 %v1996_v41 }
 0xf25   :  { %2119 = vmatpush.bf16.msra.mxu3 %v2110_v33 }
 0xf29   :  { %v1962_v15 = vpop.xlane.xlu0 %1961 }
 0xf2a   :  { %5060 = vrcp.f32 %v1962_v15 }
 0xf2b   :  { %5062 = vrcp.f32 %v2076_v25 }
 0xf30   :  { %v5061_v38 = vpop.eup %5060  ;;  %v5903_v39 = vpop.f32.mrf.mxu2 }
 0xf31   :  { %v1966_v40 = vmul.f32 %v5061_v38, %v5049_v58  ;;  %v5063_v12 = vpop.eup %5062 }
 0xf32   :  { %v2080_v47 = vmul.f32 %v5063_v12, %v5860_v45 }
 0xf33   :  { %v1968_v42 = vpack.c.bf16 %v1966_v40, %v1966_v40 }
 0xf34   :  { %v2082_v13 = vpack.c.bf16 %v2080_v47, %v2080_v47 }
 0xf35   :  { %4597 = vmatmul.msk.bf16.vlgmr.msrb.gmra.mxu3 %vm108_vm1, %v1968_v42 }
 0xf38   :  { %v1760_v43 = vpop.f32.mrf.mxu2 }
 0xf3c   :  { %v2084_v46 = vpop.permute.xlu0 %2083 }
 0xf3d   :  { %v2089_v31 = vsel %vm183_vm2, %v2084_v46, 0 }
 0xf3e   :  { %2098 = vmatpush.bf16.msrb.mxu2 %v2089_v31 }
 0xf45   :  { %4601 = vmatmul.msk.bf16.vlgmr.msra.gmra.mxu3 %vm108_vm1, %v2082_v13 }
 0xf4a   :  { %v2073_v48 = vpop.xlane.xlu1 %2072 }
 0xf4b   :  { %5064 = vrcp.f32 %v2073_v48 }
 0xf51   :  { %v5065_v49 = vpop.eup %5064  ;;  %v1872_v50 = vpop.f32.mrf.mxu2 }
 0xf52   :  { %v2079_v51 = vmul.f32 %v5065_v49, %v5053_v11  ;;  %v1518_v9 = vpop.xlane.xlu1 %1517 }
 0xf53   :  { %v1522_v16 = vmul.f32 %v1518_v9, %v5483_v44  ;;  %v2156_v9 = vperm.slane %v5723_v1, 1 }
 0xf54   :  { %v2081_v52 = vpack.c.bf16 %v2079_v51, %v2079_v51 }
 0xf55   :  { %v1524_v26 = vsub.f32 %v5891_v21, %v1522_v16 }
 0xf56   :  { %4600 = vmatmul.msk.bf16.vlgmr.msrb.gmra.mxu2 %vm108_vm1, %v2081_v52 }
 0xf57   :  { %v1526_v6 = vmul.f32 %v1524_v26, %v1524_v26 }
 0xf59   :  { %v1874_v53 = vpop.f32.mrf.mxu2  ;;  %v1528_v17 = vsel %vm83_vm0, %v1526_v6, 0.0 }
 0xf79   :  { %v1986_v54 = vpop.f32.mrf.mxu2 }
 0xf81   :  { %v1988_v56 = vpop.f32.mrf.mxu2 }
 0xf8e   :  { %v1779_v57 = vpop.f32.mrf.mxu3 }
 0xf96   :  { %v1781_v58 = vpop.f32.mrf.mxu3 }
 0xf97   :  { %v1563_v58 = vperm.slane %v5883_v8, 7 }
 0xf9e   :  { %v1893_v59 = vpop.f32.mrf.mxu3 }
 0xf9f   :  { %v4892_v60 = vpack.i.bf16 %v1893_v59, %v1872_v50 }
 0xfa1   :  { %4893 = vrot.lane.b32.xlu0 %v4892_v60, %s5241_s26 }
 0xfa6   :  { %v1895_v45 = vpop.f32.mrf.mxu3 }
 0xfb8   :  { %v2007_v61 = vpop.f32.mrf.mxu3 }
 0xfb9   :  { %v4897_v7 = vpack.i.bf16 %v2007_v61, %v1986_v54  ;;  %v1560_v54 = vperm.slane %v5883_v8, 6 }
 0xfbb   :  { %4898 = vrot.lane.b32.xlu0 %v4897_v7, %s5242_s27 }
 0xfc0   :  { %v2009_v62 = vpop.f32.mrf.mxu3 }
 0xfc8   :  { %v2121_v2 = vpop.f32.mrf.mxu3 }
 0xfd0   :  { %v2123_v3 = vpop.f32.mrf.mxu3 }
 0xfd9   :  { %v2100_v28 = vpop.f32.mrf.mxu2 }
 0xfda   :  { %v4902_v4 = vpack.i.bf16 %v2121_v2, %v2100_v28 }
 0xfdc   :  { %4903 = vrot.lane.b32.xlu2 %v4902_v4, %s5229_s19 }
 0xfe1   :  { %v2102_v11 = vpop.f32.mrf.mxu2 }
 0xfe5   :  { %1520 = vadd.xlane.f32.xlu0 %v1519_v14 }
0x1005   :  { %1529 = vadd.xlane.f32.xlu2 %v1528_v17 }
0x1013   :  { %v4894_v22 = vpop.permute.xlu0 %4893 }
0x1014   :  { %v4896_v63 = vunpack.i.h.bf16 %v4894_v22  ;;  %v4895_v24 = vunpack.i.l.bf16 %v4894_v22 }
0x1016   :  { %v2150_v21 = vsel %vm108_vm1, %v1779_v57, %v4896_v63  ;;  %v2149_v36 = vsel %vm108_vm1, %v5903_v39, %v4895_v24 }
0x102d   :  { %v4899_v23 = vpop.permute.xlu0 %4898 }
0x102e   :  { %v4901_v25 = vunpack.i.h.bf16 %v4899_v23  ;;  %v4900_v30 = vunpack.i.l.bf16 %v4899_v23 }
0x1030   :  { %v2152_v33 = vsel %vm589_vm3, %v2150_v21, %v4901_v25  ;;  %v2151_v34 = vsel %vm589_vm3, %v2149_v36, %v4900_v30 }
0x1036   :  { %v4904_v32 = vpop.permute.xlu2 %4903 }
0x1037   :  { %v4906_v27 = vunpack.i.h.bf16 %v4904_v32  ;;  %v4905_v41 = vunpack.i.l.bf16 %v4904_v32 }
0x1039   :  { %v2154_v15 = vsel %vm592_vm4, %v2152_v33, %v4906_v27  ;;  %v2153_v38 = vsel %vm592_vm4, %v2151_v34, %v4905_v41 }
0x103a   :  { %v2155_v40 = vpack.c.bf16 %v2154_v15, %v2153_v38 }
0x103c   :  { %4610 = vmatmul.msk.bf16.vlgmr.msra.gmra.mxu0 %vm83_vm0, %v2155_v40 }
0x1058   :  { %v1521_v42 = vpop.xlane.xlu0 %1520 }
0x1059   :  { %v1523_v43 = vmul.f32 %v1521_v42, %v5483_v44 }
0x105b   :  { %v1525_v12 = vsub.f32 %v1515_v10, %v1523_v43 }
0x105d   :  { %v1527_v46 = vmul.f32 %v1525_v12, %v1525_v12 }
0x105f   :  { %v1531_v39 = vsel %vm83_vm0, %v1527_v46, 0.0 }
0x1060   :  { %1532 = vadd.xlane.f32.xlu1 %v1531_v39  ;;  %v4820_v39 = vld [vmem:[#allocation2 + $0x3c] sm:$0xf] }
0x1078   :  { %v1530_v31 = vpop.xlane.xlu2 %1529 }
0x1079   :  { %v1534_v47 = vmul.f32 %v1530_v31, %v5483_v44  ;;  %v4624_v31 = vld [vmem:[#allocation2 + $0x50] sm:$0xf0] }
0x107b   :  { %v1536_v13 = vadd.f32 1e-05, %v1534_v47  ;;  %v4627_v47 = vor.u32 %v4820_v39, %v4624_v31 }
0x107d   :  { %5066 = vrsqrt.f32 %v1536_v13  ;;  %vm1544_vm5 = vweird.f32 %v1536_v13  ;;  %2284 = vmatpush.bf16.msra.mxu2 %v4627_v47 }
0x1083   :  { %v5067_v48 = vpop.eup %5066 }
0x1084   :  { %v1539_v49 = vmul.f32 %v5067_v48, %v1536_v13  ;;  %vm1545_vm15 = vweird.f32 %v5067_v48 }
0x1085   :  { %vm1546_vm6 = vmor %vm1544_vm5, %vm1545_vm15 }
0x1086   :  { %v1540_v50 = vmul.f32 %v5067_v48, %v1539_v49  ;;  %v4620_v49 = vld [vmem:[#allocation2 + $0x20] sm:$0xf0] }
0x1088   :  { %v1541_v51 = vmul.f32 0.5, %v1540_v50 }
0x108a   :  { %v1542_v52 = vsub.f32 1.5, %v1541_v51 }
0x108c   :  { %v1543_v53 = vmul.f32 %v5067_v48, %v1542_v52 }
0x108e   :  { %v1547_v56 = vsel %vm1546_vm6, %v5067_v48, %v1543_v53  ;;  %v4814_v48 = vld [vmem:[#allocation2 + $0xc] sm:$0xf] }
0x108f   :  { %v1558_v57 = vmul.f32 %v1547_v56, %v1524_v26  ;;  %v4623_v50 = vor.u32 %v4814_v48, %v4620_v49 }
0x1091   :  { %v1561_v59 = vmul.f32 %v1560_v54, %v1558_v57  ;;  %2285 = vmatpush.bf16.msra.mxu2 %v4623_v50 }
0x1093   :  { %v1564_v60 = vadd.f32 %v1563_v58, %v1561_v59  ;;  %v4823_v59 = vld [vmem:[#allocation2 + $0x4c] sm:$0xf0] }
0x1095   :  { %v1568_v45 = vsel %vm83_vm0, %v1564_v60, 0.0 }
0x1096   :  { %1569 = vadd.xlane.f32.xlu1 %v1568_v45 }
0x10b9   :  { %v2177_v14 = vpop.f32.mrf.mxu0 }
0x10ba   :  { %v2178_v6 = vadd.f32 %v2177_v14, %v2156_v9 }
0x10bc   :  { %v2182_v18 = vadd.f32 %v2178_v6, %v5698_v35 }
0x10be   :  { %v2184_v5 = vsel %vm83_vm0, %v2182_v18, 0.0 }
0x10c1   :  { %v2179_v19 = vpop.f32.mrf.mxu0 }
0x10c2   :  { %v2180_v55 = vadd.f32 %v2179_v19, %v2156_v9 }
0x10c4   :  { %v2183_v20 = vadd.f32 %v2180_v55, %v5703_v37 }
0x10c6   :  { %v2187_v0 = vsel %vm83_vm0, %v2183_v20, 0.0 }
0x10d3   :  { %v1533_v61 = vpop.xlane.xlu1 %1532 }
0x10d4   :  { %v1535_v7 = vmul.f32 %v1533_v61, %v5483_v44 }
0x10d6   :  { %v1537_v62 = vadd.f32 1e-05, %v1535_v7 }
0x10d8   :  { %5068 = vrsqrt.f32 %v1537_v62  ;;  %vm1554_vm8 = vweird.f32 %v1537_v62 }
0x10de   :  { %v5069_v2 = vpop.eup %5068 }
0x10df   :  { %v1549_v3 = vmul.f32 %v5069_v2, %v1537_v62  ;;  %vm1555_vm7 = vweird.f32 %v5069_v2  ;;  %v4613_v62 = vld [vmem:[#allocation2 + $0x8] sm:$0xf] }
0x10e0   :  { %vm1556_vm9 = vmor %vm1554_vm8, %vm1555_vm7 }
0x10e1   :  { %v1550_v28 = vmul.f32 %v5069_v2, %v1549_v3 }
0x10e3   :  { %v1551_v4 = vmul.f32 0.5, %v1550_v28 }
0x10e5   :  { %v1552_v29 = vsub.f32 1.5, %v1551_v4 }
0x10e7   :  { %v1553_v10 = vmul.f32 %v5069_v2, %v1552_v29 }
0x10e9   :  { %v1557_v8 = vsel %vm1556_vm9, %v5069_v2, %v1553_v10  ;;  %v4817_v2 = vld [vmem:[#allocation2 + $0x1c] sm:$0xf0] }
0x10ea   :  { %v1559_v11 = vmul.f32 %v1557_v8, %v1525_v12  ;;  %v4614_v4 = vor.u32 %v4817_v2, %v4613_v62 }
0x10ec   :  { %v1562_v16 = vmul.f32 %v1560_v54, %v1559_v11 }
0x10ee   :  { %v1565_v26 = vadd.f32 %v1563_v58, %v1562_v16  ;;  %v4617_v58 = vld [vmem:[#allocation2 + $0x38] sm:$0xf] }
0x10f0   :  { %v1571_v17 = vsel %vm83_vm0, %v1565_v26, 0.0 }
0x10f1   :  { %1572 = vadd.xlane.f32.xlu1 %v1571_v17  ;;  %v4952_v17 = vld [vmem:[%s6536_s9] ss:$0 sm:$0xff] }
0x10f9   :  { %2185 = vadd.xlane.f32.xlu1 %v2184_v5 }
0x1101   :  { %2188 = vadd.xlane.f32.xlu1 %v2187_v0 }
0x1109   :  { %v1570_v22 = vpop.xlane.xlu1 %1569 }
0x110a   :  { %v1574_v1 = vmul.f32 %v1570_v22, %v5483_v44  ;;  %v4953_v22 = vld [vmem:[%s6536_s9 + $0x1] ss:$0 sm:$0xff] }
0x110c   :  { %v5942_v23 = vsub.f32 %v1564_v60, %v1574_v1  ;;  %v4618_v60 = vor.u32 %v4823_v59, %v4617_v58 }
0x110e   :  { %v1578_v63 = vmul.f32 %v5942_v23, %v5942_v23  ;;  %2257 = vmatpush.bf16.msra.mxu1 %v4618_v60 }
0x1110   :  { %v1580_v35 = vsel %vm83_vm0, %v1578_v63, 0.0 }
0x1111   :  { %1581 = vadd.xlane.f32.xlu2 %v1580_v35 }
0x1112   :  { %2258 = vmatpush.bf16.msra.mxu1 %v4614_v4 }
0x1164   :  { %v1573_v24 = vpop.xlane.xlu1 %1572 }
0x1165   :  { %v1575_v25 = vmul.f32 %v1573_v24, %v5483_v44 }
0x1167   :  { %v5948_v30 = vsub.f32 %v1565_v26, %v1575_v25 }
0x1169   :  { %v1579_v37 = vmul.f32 %v5948_v30, %v5948_v30 }
0x116b   :  { %v1583_v32 = vsel %vm83_vm0, %v1579_v37, 0.0 }
0x116c   :  { %1584 = vadd.xlane.f32.xlu0 %v1583_v32  ;;  %v2186_v21 = vpop.xlane.xlu1 %2185 }
0x116d   :  { %v2190_v36 = vmul.f32 %v2186_v21, %v5483_v44 }
0x116f   :  { %v5954_v27 = vsub.f32 %v2182_v18, %v2190_v36 }
0x1171   :  { %v2194_v41 = vmul.f32 %v5954_v27, %v5954_v27 }
0x1173   :  { %v2196_v33 = vsel %vm83_vm0, %v2194_v41, 0.0 }
0x1174   :  { %2197 = vadd.xlane.f32.xlu1 %v2196_v33  ;;  %v2189_v34 = vpop.xlane.xlu1 %2188 }
0x1175   :  { %v2191_v15 = vmul.f32 %v2189_v34, %v5483_v44 }
0x1177   :  { %v5960_v38 = vsub.f32 %v2183_v20, %v2191_v15 }
0x1179   :  { %v2195_v40 = vmul.f32 %v5960_v38, %v5960_v38 }
0x117b   :  { %v2199_v42 = vsel %vm83_vm0, %v2195_v40, 0.0  ;;  %v5984_v40 = vld [vmem:[%s6535_s8] sm:$0xff] }
0x117c   :  { %2200 = vadd.xlane.f32.xlu2 %v2199_v42  ;;  %v2228_v42 = vperm.slane %v5984_v40, 2  ;;  %v2231_v39 = vperm.slane %v5984_v40, 3 }
0x1184   :  { %v1582_v43 = vpop.xlane.xlu2 %1581 }
0x1185   :  { %v1586_v12 = vmul.f32 %v1582_v43, %v5483_v44 }
0x1187   :  { %v1588_v46 = vadd.f32 1e-05, %v1586_v12 }
0x1189   :  { %5070 = vrsqrt.f32 %v1588_v46  ;;  %vm1596_vm11 = vweird.f32 %v1588_v46 }
0x118f   :  { %v5071_v13 = vpop.eup %5070 }
0x1190   :  { %v1591_v51 = vmul.f32 %v5071_v13, %v1588_v46  ;;  %vm1597_vm10 = vweird.f32 %v5071_v13 }
0x1191   :  { %vm1598_vm13 = vmor %vm1596_vm11, %vm1597_vm10 }
0x1192   :  { %v1592_v52 = vmul.f32 %v5071_v13, %v1591_v51 }
0x1194   :  { %v1593_v57 = vmul.f32 0.5, %v1592_v52 }
0x1196   :  { %v1594_v45 = vsub.f32 1.5, %v1593_v57  ;;  %v2235_v57 = vperm.slane %v5984_v40, 4 }
0x1198   :  { %v1595_v29 = vmul.f32 %v5071_v13, %v1594_v45 }
0x119a   :  { %v1599_v11 = vsel %vm1598_vm13, %v5071_v13, %v1595_v29 }
0x119b   :  { %v1610_v18 = vmul.f32 %v1599_v11, %v5942_v23 }
0x119d   :  { %v1613_v1 = vmul.f32 %v4952_v17, %v1610_v18 }
0x119f   :  { %v1616_v23 = vadd.f32 %v4953_v22, %v1613_v1 }
0x11df   :  { %v1585_v53 = vpop.xlane.xlu0 %1584 }
0x11e0   :  { %v1587_v54 = vmul.f32 %v1585_v53, %v5483_v44 }
0x11e2   :  { %v1589_v56 = vadd.f32 1e-05, %v1587_v54 }
0x11e4   :  { %5072 = vrsqrt.f32 %v1589_v56  ;;  %vm1606_vm15 = vweird.f32 %v1589_v56 }
0x11e7   :  { %v2198_v61 = vpop.xlane.xlu1 %2197 }
0x11e8   :  { %v2202_v7 = vmul.f32 %v2198_v61, %v5483_v44 }
0x11ea   :  { %v5073_v3 = vpop.eup %5072  ;;  %v2204_v28 = vadd.f32 1e-05, %v2202_v7 }
0x11eb   :  { %v1601_v10 = vmul.f32 %v5073_v3, %v1589_v56  ;;  %vm1607_vm14 = vweird.f32 %v5073_v3 }
0x11ec   :  { %5074 = vrsqrt.f32 %v2204_v28  ;;  %vm1608_vm5 = vmor %vm1606_vm15, %vm1607_vm14  ;;  %vm2212_vm7 = vweird.f32 %v2204_v28 }
0x11ed   :  { %v1602_v8 = vmul.f32 %v5073_v3, %v1601_v10 }
0x11ef   :  { %v1603_v14 = vmul.f32 0.5, %v1602_v8  ;;  %v2201_v9 = vpop.xlane.xlu2 %2200 }
0x11f0   :  { %v2203_v16 = vmul.f32 %v2201_v9, %v5483_v44 }
0x11f1   :  { %v1604_v26 = vsub.f32 1.5, %v1603_v14 }
0x11f2   :  { %v5075_v6 = vpop.eup %5074  ;;  %v2205_v19 = vadd.f32 1e-05, %v2203_v16 }
0x11f3   :  { %v1605_v55 = vmul.f32 %v5073_v3, %v1604_v26  ;;  %v2207_v5 = vmul.f32 %v5075_v6, %v2204_v28  ;;  %vm2213_vm6 = vweird.f32 %v5075_v6 }
0x11f4   :  { %5076 = vrsqrt.f32 %v2205_v19  ;;  %vm2214_vm8 = vmor %vm2212_vm7, %vm2213_vm6  ;;  %vm2222_vm10 = vweird.f32 %v2205_v19 }
0x11f5   :  { %v1609_v20 = vsel %vm1608_vm5, %v5073_v3, %v1605_v55  ;;  %v2208_v0 = vmul.f32 %v5075_v6, %v2207_v5 }
0x11f6   :  { %v1611_v63 = vmul.f32 %v1609_v20, %v5948_v30 }
0x11f7   :  { %v2209_v35 = vmul.f32 0.5, %v2208_v0 }
0x11f8   :  { %v1614_v24 = vmul.f32 %v4952_v17, %v1611_v63 }
0x11f9   :  { %v2210_v25 = vsub.f32 1.5, %v2209_v35 }
0x11fa   :  { %v5077_v37 = vpop.eup %5076  ;;  %v1617_v32 = vadd.f32 %v4953_v22, %v1614_v24 }
0x11fb   :  { %v2211_v21 = vmul.f32 %v5075_v6, %v2210_v25  ;;  %v2217_v36 = vmul.f32 %v5077_v37, %v2205_v19  ;;  %vm2223_vm9 = vweird.f32 %v5077_v37 }
0x11fc   :  { %v5977_v41 = vpack.c.bf16 %v1617_v32, %v1616_v23  ;;  %vm2224_vm11 = vmor %vm2222_vm10, %vm2223_vm9 }
0x11fd   :  { %v2218_v33 = vmul.f32 %v5077_v37, %v2217_v36  ;;  %v2215_v34 = vsel %vm2214_vm8, %v5075_v6, %v2211_v21 }
0x11fe   :  { %4628 = vmatmul.msk.bf16.vlgmr.msra.gmra.mxu2 %vm83_vm0, %v5977_v41  ;;  %v2226_v43 = vmul.f32 %v2215_v34, %v5954_v27  ;;  %v2266_v27 = vperm.slane %v5984_v40, 5 }
0x11ff   :  { %v2219_v15 = vmul.f32 0.5, %v2218_v33 }
0x1200   :  { %v2229_v31 = vmul.f32 %v2228_v42, %v2226_v43 }
0x1201   :  { %v2220_v30 = vsub.f32 1.5, %v2219_v15 }
0x1202   :  { %v5990_v48 = vadd.f32 %v2231_v39, %v2229_v31 }
0x1203   :  { %v2221_v12 = vmul.f32 %v5077_v37, %v2220_v30 }
0x1205   :  { %v2225_v46 = vsel %vm2224_vm11, %v5077_v37, %v2221_v12 }
0x1206   :  { %v2227_v47 = vmul.f32 %v2225_v46, %v5960_v38 }
0x1208   :  { %v2230_v13 = vmul.f32 %v2228_v42, %v2227_v47 }
0x120a   :  { %v5992_v49 = vadd.f32 %v2231_v39, %v2230_v13 }
0x120c   :  { %v2234_v50 = vpack.c.bf16 %v5992_v49, %v5990_v48 }
0x120e   :  { %4619 = vmatmul.msk.bf16.vlgmr.msra.gmra.mxu1 %vm83_vm0, %v2234_v50 }
0x1281   :  { %v2287_v51 = vpop.f32.mrf.mxu2 }
0x1282   :  { %v2288_v52 = vadd.f32 %v2287_v51, %v2266_v27 }
0x1284   :  { %v2294_v53 = vpack.c.bf16 %v2288_v52, %v2288_v52 }
0x1286   :  { %v2300_v54 = vsel %vm108_vm1, %v2294_v53, 0  ;;  %v2361_v56 = vunpack.c.l.b16 %v2294_v53 }
0x1287   :  { %2309 = vmatpush.bf16.xpose.msrb.mxu3 %v2300_v54 }
0x1288   :  { %v5999_v38 = vpack.c.b16 %v2361_v56, %v2361_v56 }
0x1289   :  { %v2289_v58 = vpop.f32.mrf.mxu2 }
0x128a   :  { %v2290_v59 = vadd.f32 %v2289_v58, %v2266_v27  ;;  %2413 = vrot.lane.b32.xlu0 %v5999_v38, %s5230_s2 }
0x128b   :  { %v2260_v60 = vpop.f32.mrf.mxu1 }
0x128c   :  { %v2295_v45 = vpack.c.bf16 %v2290_v59, %v2290_v59  ;;  %v2261_v61 = vadd.f32 %v2260_v60, %v2235_v57 }
0x128e   :  { %v2385_v7 = vunpack.c.l.b16 %v2295_v45  ;;  %v2292_v62 = vpack.c.bf16 %v2261_v61, %v2261_v61  ;;  %v2319_v2 = vsel %vm108_vm1, %v2295_v45, 0 }
0x128f   :  { %2328 = vmatpush.bf16.xpose.msrb.mxu0 %v2319_v2 }
0x1290   :  { %v6005_v3 = vpack.c.b16 %v2385_v7, %v2385_v7  ;;  %v2409_v28 = vunpack.c.l.b16 %v2292_v62  ;;  %4629 = vmatmul.msk.bf16.vlgmr.msrb.gmra.mxu3 %vm108_vm1, %v2292_v62 }
0x1292   :  { %v2410_v4 = vpack.c.b16 %v2409_v28, %v2409_v28  ;;  %2439 = vrot.lane.b32.xlu1 %v6005_v3, %s5230_s2 }
0x1293   :  { %v2262_v29 = vpop.f32.mrf.mxu1 }
0x1294   :  { %v2263_v10 = vadd.f32 %v2262_v29, %v2235_v57  ;;  %2411 = vrot.lane.b32.xlu2 %v2410_v4, %s5230_s2 }
0x1296   :  { %v2293_v8 = vpack.c.bf16 %v2263_v10, %v2263_v10 }
0x1298   :  { %v2435_v11 = vunpack.c.l.b16 %v2293_v8  ;;  %4630 = vmatmul.msk.bf16.vlgmr.msrb.gmra.mxu0 %vm108_vm1, %v2293_v8 }
0x129a   :  { %2530 = vrot.lane.b32.xlu1 %v5999_v38, %s5233_s18  ;;  %v2436_v14 = vpack.c.b16 %v2435_v11, %v2435_v11 }
0x129c   :  { %2437 = vrot.lane.b32.xlu0 %v2436_v14, %s5230_s2  ;;  %2528 = vrot.lane.b32.xlu2 %v2410_v4, %s5233_s18 }
0x12a2   :  { %2551 = vrot.lane.b32.xlu1 %v2436_v14, %s5233_s18 }
0x12a4   :  { %2553 = vrot.lane.b32.xlu0 %v6005_v3, %s5233_s18  ;;  %2667 = vrot.lane.b32.xlu2 %v6005_v3, %s5236_s22 }
0x12aa   :  { %2642 = vrot.lane.b32.xlu1 %v2410_v4, %s5236_s22 }
0x12ac   :  { %2644 = vrot.lane.b32.xlu0 %v5999_v38, %s5236_s22 }
0x12b4   :  { %2665 = vrot.lane.b32.xlu0 %v2436_v14, %s5236_s22 }
0x12ee   :  { %v2412_v26 = vpop.permute.xlu2 %2411 }
0x12f6   :  { %v2529_v18 = vpop.permute.xlu2 %2528 }
0x12fc   :  { %v2414_v9 = vpop.permute.xlu0 %2413 }
0x12fd   :  { %v2419_v16 = vsel %vm108_vm1, %v2414_v9, 0 }
0x12fe   :  { %2428 = vmatpush.bf16.xpose.msra.mxu3 %v2419_v16  ;;  %v2668_v22 = vpop.permute.xlu2 %2667 }
0x12ff   :  { %v2673_v37 = vsel %vm108_vm1, %v2668_v22, 0 }
0x1304   :  { %v2440_v6 = vpop.permute.xlu1 %2439 }
0x1305   :  { %v2445_v17 = vsel %vm108_vm1, %v2440_v6, 0  ;;  %4633 = vmatmul.msk.bf16.vlgmr.msra.gmra.mxu3 %vm108_vm1, %v2412_v26 }
0x1306   :  { %2454 = vmatpush.bf16.xpose.msra.mxu0 %v2445_v17 }
0x130c   :  { %v2531_v19 = vpop.permute.xlu1 %2530 }
0x130d   :  { %v2536_v55 = vsel %vm108_vm1, %v2531_v19, 0 }
0x130e   :  { %v2438_v5 = vpop.permute.xlu0 %2437  ;;  %2545 = vmatpush.bf16.xpose.msrb.mxu3 %v2536_v55 }
0x130f   :  { %4634 = vmatmul.msk.bf16.vlgmr.msra.gmra.mxu0 %vm108_vm1, %v2438_v5 }
0x1313   :  { %v2311_v20 = vpop.f32.mrf.mxu3 }
0x1314   :  { %v2334_v0 = vmul.f32 0.35355338, %v2311_v20  ;;  %v2552_v21 = vpop.permute.xlu1 %2551 }
0x1315   :  { %v2330_v1 = vpop.f32.mrf.mxu0  ;;  %4637 = vmatmul.msk.bf16.vlgmr.msrb.gmra.mxu3 %vm108_vm1, %v2529_v18 }
0x1316   :  { %v2335_v63 = vmul.f32 0.35355338, %v2330_v1  ;;  %v2554_v35 = vpop.permute.xlu0 %2553  ;;  %v2336_v24 = vsel %vm108_vm1, %v2334_v0, -inf }
0x1317   :  { %v2559_v25 = vsel %vm108_vm1, %v2554_v35, 0  ;;  %2337 = vmax.xlane.f32.xlu1 %v2336_v24 }
0x1318   :  { %2568 = vmatpush.bf16.xpose.msrb.mxu0 %v2559_v25  ;;  %v2339_v23 = vsel %vm108_vm1, %v2335_v63, -inf }
0x1319   :  { %2340 = vmax.xlane.f32.xlu2 %v2339_v23 }
0x131b   :  { %v2313_v32 = vpop.f32.mrf.mxu3 }
0x131c   :  { %v2643_v15 = vpop.permute.xlu1 %2642 }
0x131d   :  { %v2332_v36 = vpop.f32.mrf.mxu0 }
0x131e   :  { %v2645_v33 = vpop.permute.xlu0 %2644 }
0x131f   :  { %v2650_v34 = vsel %vm108_vm1, %v2645_v33, 0  ;;  %4638 = vmatmul.msk.bf16.vlgmr.msrb.gmra.mxu0 %vm108_vm1, %v2552_v21 }
0x1320   :  { %2682 = vmatpush.bf16.xpose.msra.mxu0 %v2673_v37  ;;  %2659 = vmatpush.bf16.xpose.msra.mxu3 %v2650_v34 }
0x1326   :  { %v2666_v30 = vpop.permute.xlu0 %2665 }
0x1327   :  { %4641 = vmatmul.msk.bf16.vlgmr.msra.gmra.mxu3 %vm108_vm1, %v2643_v15 }
0x132f   :  { %4642 = vmatmul.msk.bf16.vlgmr.msra.gmra.mxu0 %vm108_vm1, %v2666_v30 }
0x1388   :  { %v2430_v42 = vpop.f32.mrf.mxu3 }
0x1389   :  { %v2460_v43 = vmul.f32 0.35355338, %v2430_v42 }
0x138a   :  { %v2338_v12 = vpop.xlane.xlu1 %2337 }
0x138b   :  { %v2342_v46 = vsub.f32 %v2334_v0, %v2338_v12  ;;  %v2462_v39 = vsel %vm108_vm1, %v2460_v43, -inf }
0x138c   :  { %v2341_v31 = vpop.xlane.xlu2 %2340  ;;  %v2456_v47 = vpop.f32.mrf.mxu0  ;;  %2463 = vmax.xlane.f32.xlu2 %v2462_v39 }
0x138d   :  { %v2344_v13 = vmul.f32 1.442695, %v2342_v46  ;;  %v2343_v50 = vsub.f32 %v2335_v63, %v2341_v31  ;;  %v2461_v27 = vmul.f32 0.35355338, %v2456_v47 }
0x138f   :  { %5078 = vpow2.f32 %v2344_v13  ;;  %v2346_v51 = vmul.f32 1.442695, %v2343_v50  ;;  %v2465_v52 = vsel %vm108_vm1, %v2461_v27, -inf }
0x1390   :  { %2466 = vmax.xlane.f32.xlu0 %v2465_v52  ;;  %v2432_v53 = vpop.f32.mrf.mxu3 }
0x1391   :  { %5080 = vpow2.f32 %v2346_v51 }
0x1394   :  { %v2458_v54 = vpop.f32.mrf.mxu0 }
0x1395   :  { %v5079_v56 = vpop.eup %5078 }
0x1396   :  { %v2348_v57 = vsel %vm108_vm1, %v5079_v56, 0.0 }
0x1397   :  { %v6042_v58 = vpop.eup %5080  ;;  %2349 = vadd.xlane.f32.xlu2 %v2348_v57 }
0x1398   :  { %v2547_v59 = vpop.f32.mrf.mxu3  ;;  %v2351_v60 = vsel %vm108_vm1, %v6042_v58, 0.0 }
0x1399   :  { %v2574_v45 = vmul.f32 0.35355338, %v2547_v59  ;;  %2352 = vadd.xlane.f32.xlu1 %v2351_v60 }
0x139b   :  { %v2576_v61 = vsel %vm108_vm1, %v2574_v45, -inf }
0x139c   :  { %v2570_v7 = vpop.f32.mrf.mxu0  ;;  %2577 = vmax.xlane.f32.xlu0 %v2576_v61 }
0x139d   :  { %v2575_v62 = vmul.f32 0.35355338, %v2570_v7 }
0x139f   :  { %v2579_v2 = vsel %vm108_vm1, %v2575_v62, -inf }
0x13a0   :  { %v2549_v28 = vpop.f32.mrf.mxu3 }
0x13a1   :  { %2580 = vmax.xlane.f32.xlu1 %v2579_v2 }
0x13a4   :  { %v2572_v4 = vpop.f32.mrf.mxu0 }
0x13aa   :  { %v2661_v29 = vpop.f32.mrf.mxu3 }
0x13ab   :  { %v6056_v14 = vmul.f32 0.35355338, %v2661_v29 }
0x13ac   :  { %v2684_v10 = vpop.f32.mrf.mxu0 }
0x13ad   :  { %v2690_v9 = vsel %vm108_vm1, %v6056_v14, -inf  ;;  %v6060_v16 = vmul.f32 0.35355338, %v2684_v10 }
0x13af   :  { %2507 = vrot.lane.b32.xlu2 %v6005_v3, %s5231_s16  ;;  %v2693_v26 = vsel %vm108_vm1, %v6060_v16, -inf }
0x13b0   :  { %2363 = vrot.lane.b32.xlu0 %v5999_v38, %s5232_s17 }
0x13b2   :  { %v2663_v8 = vpop.f32.mrf.mxu3 }
0x13b4   :  { %v2686_v11 = vpop.f32.mrf.mxu0 }
0x13b7   :  { %2621 = vrot.lane.b32.xlu2 %v6005_v3, %s5234_s20 }
0x13ba   :  { %2387 = vrot.lane.b32.xlu1 %v6005_v3, %s5232_s17 }
0x13da   :  { %2691 = vmax.xlane.f32.xlu0 %v2690_v9 }
0x13e0   :  { %2694 = vmax.xlane.f32.xlu2 %v2693_v26 }
0x13ee   :  { %2486 = vrot.lane.b32.xlu0 %v5999_v38, %s5231_s16 }
0x13ff   :  { %v2464_v6 = vpop.xlane.xlu2 %2463 }
0x1400   :  { %v2468_v17 = vsub.f32 %v2460_v43, %v2464_v6 }
0x1402   :  { %v2470_v18 = vmul.f32 1.442695, %v2468_v17 }
0x1403   :  { %v2467_v19 = vpop.xlane.xlu0 %2466 }
0x1404   :  { %5082 = vpow2.f32 %v2470_v18  ;;  %v2469_v55 = vsub.f32 %v2461_v27, %v2467_v19 }
0x1406   :  { %v2472_v5 = vmul.f32 1.442695, %v2469_v55 }
0x1408   :  { %5084 = vpow2.f32 %v2472_v5 }
0x140a   :  { %v6066_v20 = vpop.eup %5082  ;;  %v2350_v23 = vpop.xlane.xlu2 %2349 }
0x140b   :  { %v2474_v0 = vsel %vm108_vm1, %v6066_v20, 0.0 }
0x140c   :  { %v2353_v22 = vpop.xlane.xlu1 %2352  ;;  %2475 = vadd.xlane.f32.xlu2 %v2474_v0 }
0x140e   :  { %v6070_v63 = vpop.eup %5084 }
0x140f   :  { %v2578_v1 = vpop.xlane.xlu0 %2577  ;;  %v2477_v25 = vsel %vm108_vm1, %v6070_v63, 0.0 }
0x1410   :  { %v2582_v35 = vsub.f32 %v2574_v45, %v2578_v1 }
0x1412   :  { %v2584_v24 = vmul.f32 1.442695, %v2582_v35  ;;  %v2508_v46 = vpop.permute.xlu2 %2507 }
0x1413   :  { %v2513_v27 = vsel %vm183_vm2, %v2508_v46, 0 }
0x1414   :  { %5086 = vpow2.f32 %v2584_v24  ;;  %v2581_v37 = vpop.xlane.xlu1 %2580  ;;  %2478 = vadd.xlane.f32.xlu2 %v2477_v25 }
0x1415   :  { %v2583_v32 = vsub.f32 %v2575_v62, %v2581_v37  ;;  %5088 = vrcp.f32 %v2350_v23 }
0x1417   :  { %v2586_v21 = vmul.f32 1.442695, %v2583_v32 }
0x1419   :  { %5090 = vpow2.f32 %v2586_v21 }
0x141a   :  { %v6074_v36 = vpop.eup %5086  ;;  %5092 = vrcp.f32 %v2353_v22  ;;  %v2622_v51 = vpop.permute.xlu2 %2621 }
0x141b   :  { %v2588_v33 = vsel %vm108_vm1, %v6074_v36, 0.0  ;;  %v5089_v34 = vpop.eup %5088  ;;  %v2627_v53 = vsel %vm183_vm2, %v2622_v51, 0 }
0x141c   :  { %2589 = vadd.xlane.f32.xlu0 %v2588_v33  ;;  %v2356_v42 = vmul.f32 %v5089_v34, %v5079_v56 }
0x141e   :  { %v2358_v39 = vpack.c.bf16 %v2356_v42, %v2356_v42 }
0x141f   :  { %v6078_v15 = vpop.eup %5090 }
0x1420   :  { %v2591_v30 = vsel %vm108_vm1, %v6078_v15, 0.0  ;;  %v5093_v31 = vpop.eup %5092 }
0x1421   :  { %2592 = vadd.xlane.f32.xlu1 %v2591_v30  ;;  %v2357_v47 = vmul.f32 %v5093_v31, %v6042_v58 }
0x1422   :  { %v2364_v43 = vpop.permute.xlu0 %2363 }
0x1423   :  { %v2369_v12 = vsel %vm183_vm2, %v2364_v43, 0  ;;  %v2359_v52 = vpack.c.bf16 %v2357_v47, %v2357_v47 }
0x1424   :  { %2378 = vmatpush.bf16.msrb.mxu1 %v2369_v12 }
0x1427   :  { %4631 = vmatmul.msk.bf16.vlgmr.msrb.gmra.mxu1 %vm108_vm1, %v2358_v39 }
0x142c   :  { %v2388_v13 = vpop.permute.xlu1 %2387  ;;  %2600 = vrot.lane.b32.xlu2 %v5999_v38, %s5234_s20 }
0x142d   :  { %v2393_v50 = vsel %vm183_vm2, %v2388_v13, 0 }
0x142e   :  { %2402 = vmatpush.bf16.msrb.mxu2 %v2393_v50 }
0x1430   :  { %2735 = vrot.lane.b32.xlu0 %v6005_v3, %s5235_s21 }
0x1431   :  { %4632 = vmatmul.msk.bf16.vlgmr.msrb.gmra.mxu2 %vm108_vm1, %v2359_v52 }
0x1432   :  { %2522 = vmatpush.bf16.msra.mxu2 %v2513_v27 }
0x1436   :  { %2636 = vmatpush.bf16.msrb.mxu2 %v2627_v53 }
0x144d   :  { %v2692_v54 = vpop.xlane.xlu0 %2691 }
0x144e   :  { %v2696_v56 = vsub.f32 %v6056_v14, %v2692_v54 }
0x1450   :  { %v2698_v57 = vmul.f32 1.442695, %v2696_v56 }
0x1452   :  { %5094 = vpow2.f32 %v2698_v57  ;;  %v4651_v57 = vld [vmem:[#allocation2 + $0x40] sm:$0xf] }
0x1453   :  { %v2695_v58 = vpop.xlane.xlu2 %2694 }
0x1454   :  { %v2697_v59 = vsub.f32 %v6060_v16, %v2695_v58  ;;  %v4824_v58 = vld [vmem:[#allocation2 + $0x54] sm:$0xf0] }
0x1456   :  { %v2700_v60 = vmul.f32 1.442695, %v2697_v59  ;;  %v4652_v59 = vor.u32 %v4824_v58, %v4651_v57 }
0x1458   :  { %v5095_v45 = vpop.eup %5094  ;;  %5096 = vpow2.f32 %v2700_v60  ;;  %2809 = vmatpush.bf16.msrb.mxu3 %v4652_v59  ;;  %v4647_v60 = vld [vmem:[#allocation2 + $0x10] sm:$0xf] }
0x1459   :  { %v2702_v61 = vsel %vm108_vm1, %v5095_v45, 0.0 }
0x145a   :  { %2703 = vadd.xlane.f32.xlu1 %v2702_v61 }
0x145e   :  { %v5097_v3 = vpop.eup %5096 }
0x145f   :  { %v2705_v7 = vsel %vm108_vm1, %v5097_v3, 0.0 }
0x1460   :  { %2706 = vadd.xlane.f32.xlu2 %v2705_v7  ;;  %v2487_v62 = vpop.permute.xlu0 %2486 }
0x1461   :  { %v2492_v2 = vsel %vm183_vm2, %v2487_v62, 0 }
0x1462   :  { %2501 = vmatpush.bf16.msra.mxu1 %v2492_v2 }
0x1473   :  { %2714 = vrot.lane.b32.xlu1 %v5999_v38, %s5235_s21 }
0x147f   :  { %v2476_v28 = vpop.xlane.xlu2 %2475 }
0x1480   :  { %5098 = vrcp.f32 %v2476_v28 }
0x1486   :  { %v5099_v4 = vpop.eup %5098 }
0x1487   :  { %v2482_v29 = vmul.f32 %v5099_v4, %v6066_v20  ;;  %v2479_v10 = vpop.xlane.xlu2 %2478 }
0x1488   :  { %5100 = vrcp.f32 %v2479_v10 }
0x1489   :  { %v2484_v8 = vpack.c.bf16 %v2482_v29, %v2482_v29 }
0x148b   :  { %4635 = vmatmul.msk.bf16.vlgmr.msra.gmra.mxu1 %vm108_vm1, %v2484_v8 }
0x148e   :  { %v5101_v11 = vpop.eup %5100 }
0x148f   :  { %v2483_v14 = vmul.f32 %v5101_v11, %v6070_v63  ;;  %v2601_v9 = vpop.permute.xlu2 %2600  ;;  %v2590_v16 = vpop.xlane.xlu0 %2589 }
0x1490   :  { %v2606_v26 = vsel %vm183_vm2, %v2601_v9, 0  ;;  %5102 = vrcp.f32 %v2590_v16 }
0x1491   :  { %v2485_v6 = vpack.c.bf16 %v2483_v14, %v2483_v14  ;;  %2615 = vmatpush.bf16.msrb.mxu1 %v2606_v26 }
0x1493   :  { %4636 = vmatmul.msk.bf16.vlgmr.msra.gmra.mxu2 %vm108_vm1, %v2485_v6 }
0x1494   :  { %v2593_v38 = vpop.xlane.xlu1 %2592 }
0x1495   :  { %5104 = vrcp.f32 %v2593_v38 }
0x1496   :  { %v5103_v17 = vpop.eup %5102 }
0x1497   :  { %v2596_v18 = vmul.f32 %v5103_v17, %v6074_v36  ;;  %v2787_v17 = vperm.slane %v5984_v40, 6 }
0x1499   :  { %v2598_v19 = vpack.c.bf16 %v2596_v18, %v2596_v18 }
0x149b   :  { %v5105_v55 = vpop.eup %5104  ;;  %4639 = vmatmul.msk.bf16.vlgmr.msrb.gmra.mxu1 %vm108_vm1, %v2598_v19 }
0x149c   :  { %v2597_v5 = vmul.f32 %v5105_v55, %v6078_v15 }
0x149e   :  { %v2599_v20 = vpack.c.bf16 %v2597_v5, %v2597_v5 }
0x14a2   :  { %v2736_v0 = vpop.permute.xlu0 %2735 }
0x14a3   :  { %v2741_v22 = vsel %vm183_vm2, %v2736_v0, 0  ;;  %4640 = vmatmul.msk.bf16.vlgmr.msrb.gmra.mxu2 %vm108_vm1, %v2599_v20 }
0x14a4   :  { %v2380_v1 = vpop.f32.mrf.mxu1  ;;  %2750 = vmatpush.bf16.msra.mxu2 %v2741_v22 }
0x14ac   :  { %v2382_v63 = vpop.f32.mrf.mxu1 }
0x14b4   :  { %v2404_v35 = vpop.f32.mrf.mxu2 }
0x14bc   :  { %v2406_v24 = vpop.f32.mrf.mxu2 }
0x14cd   :  { %v2704_v37 = vpop.xlane.xlu1 %2703 }
0x14d3   :  { %v2707_v25 = vpop.xlane.xlu2 %2706 }
0x14d4   :  { %5106 = vrcp.f32 %v2707_v25 }
0x14d5   :  { %5108 = vrcp.f32 %v2704_v37 }
0x14da   :  { %v5107_v23 = vpop.eup %5106 }
0x14db   :  { %v2711_v32 = vmul.f32 %v5107_v23, %v5097_v3  ;;  %v5109_v36 = vpop.eup %5108 }
0x14dc   :  { %v2710_v33 = vmul.f32 %v5109_v36, %v5095_v45  ;;  %v4818_v45 = vld [vmem:[#allocation2 + $0x24] sm:$0xf0] }
0x14dd   :  { %v2713_v21 = vpack.c.bf16 %v2711_v32, %v2711_v32  ;;  %v4648_v61 = vor.u32 %v4818_v45, %v4647_v60  ;;  %v2863_v45 = vperm.slane %v5984_v40, 7  ;;  %v4828_v40 = vld [vmem:[%s6534_s7 + $0x18] sm:$0xff] }
0x14de   :  { %v2712_v30 = vpack.c.bf16 %v2710_v33, %v2710_v33  ;;  %v4658_v33 = vld [vmem:[#allocation2 + $0x58] sm:$0xf0] }
0x14df   :  { %4644 = vmatmul.msk.bf16.vlgmr.msra.gmra.mxu2 %vm108_vm1, %v2713_v21  ;;  %2810 = vmatpush.bf16.msrb.mxu3 %v4648_v61 }
0x14e5   :  { %v2715_v34 = vpop.permute.xlu1 %2714 }
0x14e6   :  { %v2720_v15 = vsel %vm183_vm2, %v2715_v34, 0 }
0x14e7   :  { %2729 = vmatpush.bf16.msra.mxu1 %v2720_v15 }
0x14ea   :  { %4643 = vmatmul.msk.bf16.vlgmr.msra.gmra.mxu1 %vm108_vm1, %v2712_v30 }
0x14eb   :  { %2939 = vmatpush.bf16.msrb.mxu1 %v4828_v40 }
0x1508   :  { %v2503_v42 = vpop.f32.mrf.mxu1 }
0x1510   :  { %v2505_v43 = vpop.f32.mrf.mxu1 }
0x1511   :  { %v4654_v43 = vld [vmem:[#allocation2 + $0x28] sm:$0xf0] }
0x1516   :  { %v2524_v12 = vpop.f32.mrf.mxu2 }
0x1517   :  { %v4907_v46 = vpack.i.bf16 %v2524_v12, %v2503_v42  ;;  %v4815_v42 = vld [vmem:[#allocation2 + $0x14] sm:$0xf] }
0x1518   :  { %v2617_v39 = vpop.f32.mrf.mxu1 }
0x1519   :  { %4908 = vrot.lane.b32.xlu0 %v4907_v46, %s5241_s26  ;;  %v4657_v46 = vor.u32 %v4815_v42, %v4654_v43  ;;  %v4688_v42 = vld [vmem:[#allocation2 + $0x90] sm:$0xf]  ;;  %v4838_v43 = vld [vmem:[#allocation2 + $0xa4] sm:$0xf0] }
0x151e   :  { %v2526_v31 = vpop.f32.mrf.mxu2 }
0x1520   :  { %v2619_v47 = vpop.f32.mrf.mxu1 }
0x1526   :  { %v2638_v13 = vpop.f32.mrf.mxu2 }
0x1527   :  { %v4912_v50 = vpack.i.bf16 %v2638_v13, %v2617_v39 }
0x1529   :  { %4913 = vrot.lane.b32.xlu0 %v4912_v50, %s5242_s27 }
0x152e   :  { %v2640_v27 = vpop.f32.mrf.mxu2 }
0x1562   :  { %v2752_v51 = vpop.f32.mrf.mxu2 }
0x1567   :  { %v2731_v52 = vpop.f32.mrf.mxu1 }
0x1568   :  { %v4917_v53 = vpack.i.bf16 %v2752_v51, %v2731_v52 }
0x156a   :  { %4918 = vrot.lane.b32.xlu1 %v4917_v53, %s5229_s19  ;;  %v2754_v54 = vpop.f32.mrf.mxu2 }
0x156f   :  { %v2733_v56 = vpop.f32.mrf.mxu1 }
0x158b   :  { %v4909_v3 = vpop.permute.xlu0 %4908 }
0x158c   :  { %v4911_v62 = vunpack.i.h.bf16 %v4909_v3  ;;  %v4910_v2 = vunpack.i.l.bf16 %v4909_v3  ;;  %v6138_v3 = vld [vmem:[%s6535_s8 + $0x8] sm:$0x1f] }
0x158e   :  { %v2781_v10 = vsel %vm108_vm1, %v2404_v35, %v4911_v62  ;;  %v2780_v8 = vsel %vm108_vm1, %v2380_v1, %v4910_v2  ;;  %v2866_v2 = vperm.slane %v6138_v3, 0 }
0x159b   :  { %v4914_v7 = vpop.permute.xlu0 %4913 }
0x159c   :  { %v4916_v28 = vunpack.i.h.bf16 %v4914_v7  ;;  %v4915_v4 = vunpack.i.l.bf16 %v4914_v7 }
0x159e   :  { %v2782_v9 = vsel %vm589_vm3, %v2780_v8, %v4915_v4  ;;  %v2783_v16 = vsel %vm589_vm3, %v2781_v10, %v4916_v28 }
0x15dc   :  { %v4919_v29 = vpop.permute.xlu1 %4918 }
0x15dd   :  { %v4921_v11 = vunpack.i.h.bf16 %v4919_v29  ;;  %v4920_v14 = vunpack.i.l.bf16 %v4919_v29 }
0x15df   :  { %v2784_v26 = vsel %vm592_vm4, %v2782_v9, %v4920_v14  ;;  %v2785_v6 = vsel %vm592_vm4, %v2783_v16, %v4921_v11  ;;  %v4827_v14 = vld [vmem:[%s6534_s7 + $0x10] sm:$0xff]  ;;  %v4826_v9 = vld [vmem:[%s6534_s7 + $0x8] sm:$0xff]  ;;  %v4825_v16 = vld [vmem:[%s6534_s7] sm:$0xff] }
0x15e0   :  { %v2786_v38 = vpack.c.bf16 %v2785_v6, %v2784_v26  ;;  %2940 = vmatpush.bf16.msrb.mxu1 %v4827_v14  ;;  %v2870_v6 = vperm.slane %v6138_v3, 1 }
0x15e2   :  { %4653 = vmatmul.msk.bf16.vlgmr.msrb.gmra.mxu3 %vm83_vm0, %v2786_v38 }
0x15e4   :  { %2941 = vmatpush.bf16.msrb.mxu1 %v4826_v9 }
0x15e8   :  { %2942 = vmatpush.bf16.msrb.mxu1 %v4825_v16 }
0x1665   :  { %v2812_v18 = vpop.f32.mrf.mxu3 }
0x1666   :  { %v2813_v19 = vadd.f32 %v2812_v18, %v2787_v17 }
0x1668   :  { %v2817_v55 = vadd.f32 %v2813_v19, %v5990_v48 }
0x166a   :  { %v2819_v5 = vsel %vm83_vm0, %v2817_v55, 0.0 }
0x166b   :  { %2820 = vadd.xlane.f32.xlu2 %v2819_v5 }
0x166d   :  { %v2814_v20 = vpop.f32.mrf.mxu3 }
0x166e   :  { %v2815_v0 = vadd.f32 %v2814_v20, %v2787_v17  ;;  %v2907_v20 = vperm.slane %v6138_v3, 2 }
0x1670   :  { %v2818_v22 = vadd.f32 %v2815_v0, %v5992_v49  ;;  %v4821_v49 = vld [vmem:[#allocation2 + $0x44] sm:$0xf] }
0x1671   :  { %v4661_v34 = vor.u32 %v4821_v49, %v4658_v33 }
0x1672   :  { %v2822_v1 = vsel %vm83_vm0, %v2818_v22, 0.0 }
0x1673   :  { %2823 = vadd.xlane.f32.xlu0 %v2822_v1  ;;  %2888 = vmatpush.bf16.msrb.mxu0 %v4661_v34 }
0x1677   :  { %2889 = vmatpush.bf16.msrb.mxu0 %v4657_v46 }
0x16de   :  { %v2821_v63 = vpop.xlane.xlu2 %2820 }
0x16df   :  { %v2825_v35 = vmul.f32 %v2821_v63, %v5483_v44 }
0x16e1   :  { %v2827_v24 = vsub.f32 %v2817_v55, %v2825_v35 }
0x16e3   :  { %v2829_v25 = vmul.f32 %v2827_v24, %v2827_v24 }
0x16e5   :  { %v2831_v37 = vsel %vm83_vm0, %v2829_v25, 0.0 }
0x16e6   :  { %v2824_v23 = vpop.xlane.xlu0 %2823  ;;  %2832 = vadd.xlane.f32.xlu1 %v2831_v37 }
0x16e7   :  { %v2826_v48 = vmul.f32 %v2824_v23, %v5483_v44 }
0x16e9   :  { %v2828_v32 = vsub.f32 %v2818_v22, %v2826_v48 }
0x16eb   :  { %v2830_v21 = vmul.f32 %v2828_v32, %v2828_v32 }
0x16ed   :  { %v2834_v36 = vsel %vm83_vm0, %v2830_v21, 0.0 }
0x16ee   :  { %2835 = vadd.xlane.f32.xlu2 %v2834_v36 }
0x1759   :  { %v2833_v15 = vpop.xlane.xlu1 %2832 }
0x175a   :  { %v2837_v30 = vmul.f32 %v2833_v15, %v5483_v44 }
0x175c   :  { %v2839_v12 = vadd.f32 1e-05, %v2837_v30 }
0x175e   :  { %5110 = vrsqrt.f32 %v2839_v12  ;;  %vm2847_vm14 = vweird.f32 %v2839_v12 }
0x1761   :  { %v2836_v39 = vpop.xlane.xlu2 %2835 }
0x1762   :  { %v2838_v31 = vmul.f32 %v2836_v39, %v5483_v44 }
0x1764   :  { %v5111_v47 = vpop.eup %5110  ;;  %v2840_v13 = vadd.f32 1e-05, %v2838_v31  ;;  %v4684_v31 = vld [vmem:[#allocation2 + $0x60] sm:$0xf] }
0x1765   :  { %v2842_v50 = vmul.f32 %v5111_v47, %v2839_v12  ;;  %vm2848_vm13 = vweird.f32 %v5111_v47  ;;  %v4689_v12 = vor.u32 %v4838_v43, %v4688_v42 }
0x1766   :  { %5112 = vrsqrt.f32 %v2840_v13  ;;  %vm2849_vm15 = vmor %vm2847_vm14, %vm2848_vm13  ;;  %vm2857_vm6 = vweird.f32 %v2840_v13 }
0x1767   :  { %v2843_v27 = vmul.f32 %v5111_v47, %v2842_v50  ;;  %3040 = vmatpush.bf16.msrb.mxu2 %v4689_v12 }
0x1769   :  { %v2844_v51 = vmul.f32 0.5, %v2843_v27 }
0x176b   :  { %v2845_v52 = vsub.f32 1.5, %v2844_v51 }
0x176c   :  { %v5113_v53 = vpop.eup %5112 }
0x176d   :  { %v2846_v54 = vmul.f32 %v5111_v47, %v2845_v52  ;;  %v2852_v56 = vmul.f32 %v5113_v53, %v2840_v13  ;;  %vm2858_vm5 = vweird.f32 %v5113_v53 }
0x176e   :  { %vm2859_vm7 = vmor %vm2857_vm6, %vm2858_vm5 }
0x176f   :  { %v2853_v57 = vmul.f32 %v5113_v53, %v2852_v56  ;;  %v2850_v58 = vsel %vm2849_vm15, %v5111_v47, %v2846_v54  ;;  %v4832_v47 = vld [vmem:[#allocation2 + $0x74] sm:$0xf0] }
0x1770   :  { %v2861_v61 = vmul.f32 %v2850_v58, %v2827_v24  ;;  %v4685_v50 = vor.u32 %v4832_v47, %v4684_v31 }
0x1771   :  { %v2854_v59 = vmul.f32 0.5, %v2853_v57 }
0x1772   :  { %v2864_v28 = vmul.f32 %v2863_v45, %v2861_v61  ;;  %3041 = vmatpush.bf16.msrb.mxu2 %v4685_v50 }
0x1773   :  { %v2855_v60 = vsub.f32 1.5, %v2854_v59 }
0x1774   :  { %v2867_v10 = vadd.f32 %v2866_v2, %v2864_v28  ;;  %v2995_v28 = vperm.slane %v6138_v3, 3 }
0x1775   :  { %v2856_v7 = vmul.f32 %v5113_v53, %v2855_v60 }
0x1777   :  { %v2860_v62 = vsel %vm2859_vm7, %v5113_v53, %v2856_v7 }
0x1778   :  { %v2862_v4 = vmul.f32 %v2860_v62, %v2828_v32 }
0x177a   :  { %v2865_v29 = vmul.f32 %v2863_v45, %v2862_v4 }
0x177c   :  { %v2868_v8 = vadd.f32 %v2866_v2, %v2865_v29 }
0x177e   :  { %v2869_v11 = vpack.c.bf16 %v2868_v8, %v2867_v10 }
0x1780   :  { %4662 = vmatmul.msk.bf16.vlgmr.msrb.gmra.mxu0 %vm83_vm0, %v2869_v11 }
0x17fd   :  { %v2891_v26 = vpop.f32.mrf.mxu0 }
0x17fe   :  { %v2892_v38 = vadd.f32 %v2891_v26, %v2870_v6 }
0x1800   :  { %v2896_v19 = vmax.f32 %v2892_v38, 0.0 }
0x1805   :  { %v2893_v17 = vpop.f32.mrf.mxu0 }
0x1806   :  { %v2894_v18 = vadd.f32 %v2893_v17, %v2870_v6  ;;  %v6177_v6 = vld [vmem:[%s6535_s8 + $0x10] sm:$0xff] }
0x1807   :  { %v3018_v38 = vperm.slane %v6177_v6, 0 }
0x1808   :  { %v2897_v55 = vmax.f32 %v2894_v18, 0.0 }
0x180a   :  { %v2906_v5 = vpack.c.bf16 %v2897_v55, %v2896_v19 }
0x180c   :  { %4679 = vmatmul.msk.bf16.vlgmr.msrb.gmra.mxu1 %vm748_vm12, %v2906_v5 }
0x1889   :  { %v2944_v0 = vpop.f32.mrf.mxu1 }
0x188a   :  { %v2945_v22 = vadd.f32 %v2944_v0, %v2907_v20 }
0x188c   :  { %v2949_v1 = vadd.f32 %v2945_v22, %v2867_v10 }
0x188e   :  { %v2951_v63 = vsel %vm83_vm0, %v2949_v1, 0.0 }
0x188f   :  { %2952 = vadd.xlane.f32.xlu2 %v2951_v63 }
0x1891   :  { %v2946_v35 = vpop.f32.mrf.mxu1 }
0x1892   :  { %v2947_v24 = vadd.f32 %v2946_v35, %v2907_v20 }
0x1894   :  { %v2950_v25 = vadd.f32 %v2947_v24, %v2868_v8  ;;  %v2998_v8 = vperm.slane %v6138_v3, 4 }
0x1896   :  { %v2954_v37 = vsel %vm83_vm0, %v2950_v25, 0.0 }
0x1897   :  { %2955 = vadd.xlane.f32.xlu2 %v2954_v37 }
0x1902   :  { %v2953_v23 = vpop.xlane.xlu2 %2952 }
0x1903   :  { %v2957_v48 = vmul.f32 %v2953_v23, %v5483_v44 }
0x1905   :  { %v2959_v32 = vsub.f32 %v2949_v1, %v2957_v48 }
0x1907   :  { %v2961_v21 = vmul.f32 %v2959_v32, %v2959_v32 }
0x1909   :  { %v2963_v36 = vsel %vm83_vm0, %v2961_v21, 0.0 }
0x190a   :  { %2964 = vadd.xlane.f32.xlu2 %v2963_v36  ;;  %v2956_v49 = vpop.xlane.xlu2 %2955 }
0x190b   :  { %v2958_v33 = vmul.f32 %v2956_v49, %v5483_v44 }
0x190d   :  { %v2960_v34 = vsub.f32 %v2950_v25, %v2958_v33 }
0x190f   :  { %v2962_v15 = vmul.f32 %v2960_v34, %v2960_v34 }
0x1911   :  { %v2966_v30 = vsel %vm83_vm0, %v2962_v15, 0.0 }
0x1912   :  { %2967 = vadd.xlane.f32.xlu2 %v2966_v30 }
0x197d   :  { %v2965_v46 = vpop.xlane.xlu2 %2964 }
0x197e   :  { %v2969_v39 = vmul.f32 %v2965_v46, %v5483_v44 }
0x1980   :  { %v2971_v13 = vadd.f32 1e-05, %v2969_v39 }
0x1982   :  { %5114 = vrsqrt.f32 %v2971_v13  ;;  %vm2979_vm9 = vweird.f32 %v2971_v13 }
0x1985   :  { %v2968_v27 = vpop.xlane.xlu2 %2967 }
0x1986   :  { %v2970_v51 = vmul.f32 %v2968_v27, %v5483_v44 }
0x1988   :  { %v5115_v52 = vpop.eup %5114  ;;  %v2972_v53 = vadd.f32 1e-05, %v2970_v51 }
0x1989   :  { %v2974_v54 = vmul.f32 %v5115_v52, %v2971_v13  ;;  %vm2980_vm8 = vweird.f32 %v5115_v52 }
0x198a   :  { %5116 = vrsqrt.f32 %v2972_v53  ;;  %vm2981_vm10 = vmor %vm2979_vm9, %vm2980_vm8  ;;  %vm2989_vm13 = vweird.f32 %v2972_v53 }
0x198b   :  { %v2975_v56 = vmul.f32 %v5115_v52, %v2974_v54 }
0x198d   :  { %v2976_v57 = vmul.f32 0.5, %v2975_v56 }
0x198f   :  { %v2977_v58 = vsub.f32 1.5, %v2976_v57 }
0x1990   :  { %v5117_v59 = vpop.eup %5116 }
0x1991   :  { %v2978_v60 = vmul.f32 %v5115_v52, %v2977_v58  ;;  %v2984_v45 = vmul.f32 %v5117_v59, %v2972_v53  ;;  %vm2990_vm11 = vweird.f32 %v5117_v59 }
0x1992   :  { %vm2991_vm14 = vmor %vm2989_vm13, %vm2990_vm11 }
0x1993   :  { %v2985_v61 = vmul.f32 %v5117_v59, %v2984_v45  ;;  %v2982_v7 = vsel %vm2981_vm10, %v5115_v52, %v2978_v60 }
0x1994   :  { %v2993_v4 = vmul.f32 %v2982_v7, %v2959_v32 }
0x1995   :  { %v2986_v62 = vmul.f32 0.5, %v2985_v61 }
0x1996   :  { %v2996_v11 = vmul.f32 %v2995_v28, %v2993_v4 }
0x1997   :  { %v2987_v2 = vsub.f32 1.5, %v2986_v62 }
0x1998   :  { %v6167_v9 = vadd.f32 %v2998_v8, %v2996_v11 }
0x1999   :  { %v2988_v29 = vmul.f32 %v5117_v59, %v2987_v2 }
0x199b   :  { %v2992_v10 = vsel %vm2991_vm14, %v5117_v59, %v2988_v29 }
0x199c   :  { %v2994_v40 = vmul.f32 %v2992_v10, %v2960_v34 }
0x199e   :  { %v2997_v14 = vmul.f32 %v2995_v28, %v2994_v40 }
0x19a0   :  { %v6169_v16 = vadd.f32 %v2998_v8, %v2997_v14 }
0x19a2   :  { %v3017_v26 = vpack.c.bf16 %v6169_v16, %v6167_v9 }
0x19a4   :  { %4690 = vmatmul.msk.bf16.vlgmr.msrb.gmra.mxu2 %vm83_vm0, %v3017_v26 }
0x1a27   :  { %v3043_v3 = vpop.f32.mrf.mxu2 }
0x1a28   :  { %v3044_v17 = vadd.f32 %v3043_v3, %v3018_v38 }
0x1a2a   :  { %v3048_v18 = vpack.c.bf16 %v3044_v17, %v3044_v17 }
0x1a2c   :  { %v3051_v19 = vunpack.c.l.b16 %v3048_v18 }
0x1a2e   :  { %v6180_v55 = vpack.c.b16 %v3051_v19, %v3051_v19 }
0x1a2f   :  { %v3045_v5 = vpop.f32.mrf.mxu2 }
0x1a30   :  { %v3046_v20 = vadd.f32 %v3045_v5, %v3018_v38  ;;  %3168 = vrot.lane.b32.xlu1 %v6180_v55, %s5231_s16  ;;  %3053 = vrot.lane.b32.xlu2 %v6180_v55, %s5232_s17 }
0x1a32   :  { %v3049_v0 = vpack.c.bf16 %v3046_v20, %v3046_v20 }
0x1a34   :  { %v3075_v22 = vunpack.c.l.b16 %v3049_v0 }
0x1a36   :  { %v6186_v1 = vpack.c.b16 %v3075_v22, %v3075_v22 }
0x1a38   :  { %3077 = vrot.lane.b32.xlu0 %v6186_v1, %s5232_s17  ;;  %3189 = vrot.lane.b32.xlu1 %v6186_v1, %s5230_s2 }
0x1a39   :  { %3166 = vrot.lane.b32.xlu2 %v6180_v55, %s5230_s2 }
0x1a40   :  { %3191 = vrot.lane.b32.xlu0 %v6186_v1, %s5231_s16  ;;  %3280 = vrot.lane.b32.xlu1 %v6180_v55, %s5233_s18 }
0x1a41   :  { %3305 = vrot.lane.b32.xlu2 %v6186_v1, %s5234_s20 }
0x1a48   :  { %3282 = vrot.lane.b32.xlu0 %v6180_v55, %s5234_s20  ;;  %3419 = vrot.lane.b32.xlu1 %v6186_v1, %s5235_s21 }
0x1a49   :  { %3396 = vrot.lane.b32.xlu2 %v6180_v55, %s5235_s21 }
0x1a50   :  { %3303 = vrot.lane.b32.xlu0 %v6186_v1, %s5233_s18 }
0x1a51   :  { %3417 = vrot.lane.b32.xlu2 %v6186_v1, %s5236_s22 }
0x1a58   :  { %3394 = vrot.lane.b32.xlu0 %v6180_v55, %s5236_s22 }
0x1a60   :  { %3145 = vrot.lane.b32.xlu0 %v6186_v1, %s5237_s23 }
0x1a8a   :  { %v3054_v63 = vpop.permute.xlu2 %3053 }
0x1a8b   :  { %v3059_v35 = vsel %vm108_vm1, %v3054_v63, 0 }
0x1a8c   :  { %3068 = vmatpush.bf16.xpose.msra.mxu3 %v3059_v35 }
0x1a93   :  { %4691 = vmatmul.msk.bf16.vlgmr.msra.gmra.mxu3 %vm108_vm1, %v3048_v18  ;;  %v3167_v37 = vpop.permute.xlu2 %3166 }
0x1a9b   :  { %v3306_v21 = vpop.permute.xlu2 %3305 }
0x1a9c   :  { %v3311_v33 = vsel %vm108_vm1, %v3306_v21, 0 }
0x1aa2   :  { %v3169_v24 = vpop.permute.xlu1 %3168 }
0x1aa3   :  { %v3174_v25 = vsel %vm108_vm1, %v3169_v24, 0  ;;  %v3397_v15 = vpop.permute.xlu2 %3396 }
0x1aa4   :  { %3183 = vmatpush.bf16.xpose.msrb.mxu3 %v3174_v25  ;;  %v3402_v43 = vsel %vm108_vm1, %v3397_v15, 0 }
0x1aaa   :  { %v3078_v23 = vpop.permute.xlu0 %3077  ;;  %v3190_v32 = vpop.permute.xlu1 %3189 }
0x1aab   :  { %v3083_v48 = vsel %vm108_vm1, %v3078_v23, 0  ;;  %4695 = vmatmul.msk.bf16.vlgmr.msrb.gmra.mxu3 %vm108_vm1, %v3167_v37  ;;  %v3418_v50 = vpop.permute.xlu2 %3417 }
0x1aac   :  { %3092 = vmatpush.bf16.xpose.msra.mxu0 %v3083_v48 }
0x1ab2   :  { %v3192_v36 = vpop.permute.xlu0 %3191  ;;  %v3281_v34 = vpop.permute.xlu1 %3280 }
0x1ab3   :  { %v3197_v49 = vsel %vm108_vm1, %v3192_v36, 0  ;;  %4692 = vmatmul.msk.bf16.vlgmr.msra.gmra.mxu0 %vm108_vm1, %v3049_v0 }
0x1ab4   :  { %3206 = vmatpush.bf16.xpose.msrb.mxu0 %v3197_v49 }
0x1aba   :  { %v3283_v30 = vpop.permute.xlu0 %3282  ;;  %v3420_v12 = vpop.permute.xlu1 %3419 }
0x1abb   :  { %v3288_v42 = vsel %vm108_vm1, %v3283_v30, 0  ;;  %v3425_v39 = vsel %vm108_vm1, %v3420_v12, 0 }
0x1abc   :  { %3320 = vmatpush.bf16.xpose.msra.mxu0 %v3311_v33  ;;  %3297 = vmatpush.bf16.xpose.msra.mxu3 %v3288_v42 }
0x1ac2   :  { %v3304_v46 = vpop.permute.xlu0 %3303 }
0x1ac3   :  { %4696 = vmatmul.msk.bf16.vlgmr.msrb.gmra.mxu0 %vm108_vm1, %v3190_v32  ;;  %4699 = vmatmul.msk.bf16.vlgmr.msra.gmra.mxu3 %vm108_vm1, %v3281_v34 }
0x1ac4   :  { %3411 = vmatpush.bf16.xpose.msrb.mxu3 %v3402_v43  ;;  %3434 = vmatpush.bf16.xpose.msrb.mxu0 %v3425_v39 }
0x1aca   :  { %v3395_v31 = vpop.permute.xlu0 %3394 }
0x1ad2   :  { %v3146_v47 = vpop.permute.xlu0 %3145 }
0x1ad3   :  { %v3151_v13 = vsel %vm183_vm2, %v3146_v47, 0  ;;  %4700 = vmatmul.msk.bf16.vlgmr.msra.gmra.mxu0 %vm108_vm1, %v3304_v46  ;;  %4703 = vmatmul.msk.bf16.vlgmr.msrb.gmra.mxu3 %vm108_vm1, %v3395_v31 }
0x1ad4   :  { %3160 = vmatpush.bf16.msra.mxu2 %v3151_v13 }
0x1ae3   :  { %4704 = vmatmul.msk.bf16.vlgmr.msrb.gmra.mxu0 %vm108_vm1, %v3418_v50 }
0x1b16   :  { %v3070_v27 = vpop.f32.mrf.mxu3 }
0x1b17   :  { %v3098_v51 = vmul.f32 0.35355338, %v3070_v27 }
0x1b19   :  { %v3100_v52 = vsel %vm108_vm1, %v3098_v51, -inf }
0x1b1a   :  { %3101 = vmax.xlane.f32.xlu0 %v3100_v52 }
0x1b1e   :  { %v3072_v53 = vpop.f32.mrf.mxu3 }
0x1b2e   :  { %v3185_v54 = vpop.f32.mrf.mxu3 }
0x1b2f   :  { %v6233_v60 = vmul.f32 0.35355338, %v3185_v54 }
0x1b30   :  { %v3094_v56 = vpop.f32.mrf.mxu0 }
0x1b31   :  { %v3099_v57 = vmul.f32 0.35355338, %v3094_v56  ;;  %v3214_v61 = vsel %vm108_vm1, %v6233_v60, -inf }
0x1b33   :  { %v3103_v58 = vsel %vm108_vm1, %v3099_v57, -inf }
0x1b34   :  { %3104 = vmax.xlane.f32.xlu1 %v3103_v58 }
0x1b36   :  { %v3187_v59 = vpop.f32.mrf.mxu3 }
0x1b38   :  { %v3096_v45 = vpop.f32.mrf.mxu0 }
0x1b3c   :  { %3215 = vmax.xlane.f32.xlu1 %v3214_v61 }
0x1b40   :  { %v3208_v7 = vpop.f32.mrf.mxu0 }
0x1b41   :  { %v6237_v62 = vmul.f32 0.35355338, %v3208_v7 }
0x1b43   :  { %v3217_v2 = vsel %vm108_vm1, %v6237_v62, -inf }
0x1b44   :  { %3218 = vmax.xlane.f32.xlu2 %v3217_v2 }
0x1b46   :  { %v3299_v28 = vpop.f32.mrf.mxu3 }
0x1b47   :  { %v6241_v4 = vmul.f32 0.35355338, %v3299_v28 }
0x1b48   :  { %v3210_v29 = vpop.f32.mrf.mxu0 }
0x1b49   :  { %v3328_v10 = vsel %vm108_vm1, %v6241_v4, -inf }
0x1b4c   :  { %3329 = vmax.xlane.f32.xlu2 %v3328_v10 }
0x1b4e   :  { %v3301_v8 = vpop.f32.mrf.mxu3 }
0x1b50   :  { %v3322_v11 = vpop.f32.mrf.mxu0 }
0x1b51   :  { %v3327_v40 = vmul.f32 0.35355338, %v3322_v11 }
0x1b53   :  { %v3331_v14 = vsel %vm108_vm1, %v3327_v40, -inf }
0x1b54   :  { %3332 = vmax.xlane.f32.xlu0 %v3331_v14 }
0x1b56   :  { %v3413_v26 = vpop.f32.mrf.mxu3 }
0x1b57   :  { %v3440_v38 = vmul.f32 0.35355338, %v3413_v26 }
0x1b58   :  { %v3324_v3 = vpop.f32.mrf.mxu0 }
0x1b59   :  { %v3442_v17 = vsel %vm108_vm1, %v3440_v38, -inf }
0x1b5a   :  { %3443 = vmax.xlane.f32.xlu2 %v3442_v17 }
0x1b5e   :  { %v3415_v18 = vpop.f32.mrf.mxu3 }
0x1b60   :  { %v3436_v19 = vpop.f32.mrf.mxu0 }
0x1b61   :  { %v6247_v5 = vmul.f32 0.35355338, %v3436_v19 }
0x1b63   :  { %v3445_v20 = vsel %vm108_vm1, %v6247_v5, -inf }
0x1b64   :  { %3446 = vmax.xlane.f32.xlu1 %v3445_v20 }
0x1b68   :  { %v3438_v0 = vpop.f32.mrf.mxu0 }
0x1b72   :  { %3124 = vrot.lane.b32.xlu2 %v6180_v55, %s5237_s23 }
0x1b8d   :  { %v3102_v22 = vpop.xlane.xlu0 %3101 }
0x1b8e   :  { %v3106_v63 = vsub.f32 %v3098_v51, %v3102_v22 }
0x1b90   :  { %v3108_v35 = vmul.f32 1.442695, %v3106_v63 }
0x1b92   :  { %5118 = vpow2.f32 %v3108_v35 }
0x1b98   :  { %v5119_v24 = vpop.eup %5118 }
0x1b99   :  { %v3112_v25 = vsel %vm108_vm1, %v5119_v24, 0.0 }
0x1b9a   :  { %3113 = vadd.xlane.f32.xlu1 %v3112_v25 }
0x1ba7   :  { %v3105_v37 = vpop.xlane.xlu1 %3104 }
0x1ba8   :  { %v3107_v23 = vsub.f32 %v3099_v57, %v3105_v37 }
0x1baa   :  { %v3110_v48 = vmul.f32 1.442695, %v3107_v23 }
0x1bac   :  { %5120 = vpow2.f32 %v3110_v48 }
0x1baf   :  { %v3216_v43 = vpop.xlane.xlu1 %3215 }
0x1bb0   :  { %v3220_v39 = vsub.f32 %v6233_v60, %v3216_v43 }
0x1bb2   :  { %v6254_v32 = vpop.eup %5120  ;;  %v3222_v50 = vmul.f32 1.442695, %v3220_v39 }
0x1bb3   :  { %3238 = vrot.lane.b32.xlu1 %v6180_v55, %s5238_s24  ;;  %v3115_v21 = vsel %vm108_vm1, %v6254_v32, 0.0 }
0x1bb4   :  { %3116 = vadd.xlane.f32.xlu0 %v3115_v21 }
0x1bb7   :  { %v3219_v36 = vpop.xlane.xlu2 %3218 }
0x1bb8   :  { %v3221_v51 = vsub.f32 %v6237_v62, %v3219_v36 }
0x1bba   :  { %v3224_v53 = vmul.f32 1.442695, %v3221_v51 }
0x1bbb   :  { %3373 = vrot.lane.b32.xlu1 %v6186_v1, %s5239_s6 }
0x1bbf   :  { %v3330_v49 = vpop.xlane.xlu2 %3329 }
0x1bc0   :  { %v3334_v54 = vsub.f32 %v6241_v4, %v3330_v49 }
0x1bc2   :  { %v3336_v57 = vmul.f32 1.442695, %v3334_v54 }
0x1bc7   :  { %v3333_v33 = vpop.xlane.xlu0 %3332 }
0x1bc8   :  { %v3335_v34 = vsub.f32 %v3327_v40, %v3333_v33  ;;  %3259 = vrot.lane.b32.xlu0 %v6186_v1, %s5238_s24 }
0x1bca   :  { %v3338_v15 = vmul.f32 1.442695, %v3335_v34  ;;  %v4836_v34 = vld [vmem:[#allocation2 + $0x9c] sm:$0xf] }
0x1bcc   :  { %5122 = vpow2.f32 %v3338_v15  ;;  %v4729_v15 = vld [vmem:[#allocation2 + $0xb0] sm:$0xf0] }
0x1bcd   :  { %v3444_v30 = vpop.xlane.xlu2 %3443 }
0x1bce   :  { %v3448_v42 = vsub.f32 %v3440_v38, %v3444_v30 }
0x1bd0   :  { %v3450_v12 = vmul.f32 1.442695, %v3448_v42 }
0x1bd2   :  { %v6264_v46 = vpop.eup %5122  ;;  %5124 = vpow2.f32 %v3450_v12 }
0x1bd3   :  { %v3343_v31 = vsel %vm108_vm1, %v6264_v46, 0.0  ;;  %5126 = vpow2.f32 %v3222_v50  ;;  %v4830_v50 = vld [vmem:[#allocation2 + $0x6c] sm:$0xf] }
0x1bd4   :  { %3344 = vadd.xlane.f32.xlu2 %v3343_v31  ;;  %5128 = vpow2.f32 %v3224_v53 }
0x1bd5   :  { %v3125_v47 = vpop.permute.xlu2 %3124  ;;  %5130 = vpow2.f32 %v3336_v57 }
0x1bd6   :  { %v3130_v13 = vsel %vm183_vm2, %v3125_v47, 0  ;;  %v4732_v47 = vor.u32 %v4836_v34, %v4729_v15 }
0x1bd7   :  { %3139 = vmatpush.bf16.msra.mxu1 %v3130_v13  ;;  %v3447_v7 = vpop.xlane.xlu1 %3446 }
0x1bd8   :  { %v6270_v27 = vpop.eup %5124  ;;  %v3449_v29 = vsub.f32 %v6247_v5, %v3447_v7 }
0x1bd9   :  { %v3454_v52 = vsel %vm108_vm1, %v6270_v27, 0.0  ;;  %v5127_v56 = vpop.eup %5126 }
0x1bda   :  { %v3226_v58 = vsel %vm108_vm1, %v5127_v56, 0.0  ;;  %v5129_v59 = vpop.eup %5128  ;;  %v3452_v10 = vmul.f32 1.442695, %v3449_v29 }
0x1bdb   :  { %v3229_v60 = vsel %vm108_vm1, %v5129_v59, 0.0  ;;  %v5131_v45 = vpop.eup %5130 }
0x1bdc   :  { %3455 = vadd.xlane.f32.xlu2 %v3454_v52  ;;  %v3340_v61 = vsel %vm108_vm1, %v5131_v45, 0.0 }
0x1be5   :  { %3227 = vadd.xlane.f32.xlu1 %v3226_v58 }
0x1bed   :  { %3230 = vadd.xlane.f32.xlu1 %v3229_v60 }
0x1bf2   :  { %3341 = vadd.xlane.f32.xlu0 %v3340_v61 }
0x1bf4   :  { %3466 = vrot.lane.b32.xlu2 %v6180_v55, %s5240_s25 }
0x1c06   :  { %3352 = vrot.lane.b32.xlu1 %v6180_v55, %s5239_s6  ;;  %3487 = vrot.lane.b32.xlu0 %v6186_v1, %s5240_s25 }
0x1c0d   :  { %v3114_v62 = vpop.xlane.xlu1 %3113 }
0x1c0e   :  { %5132 = vrcp.f32 %v3114_v62 }
0x1c0f   :  { %5134 = vpow2.f32 %v3452_v10 }
0x1c14   :  { %v5133_v2 = vpop.eup %5132 }
0x1c15   :  { %v3120_v28 = vmul.f32 %v5133_v2, %v5119_v24  ;;  %v6288_v55 = vpop.eup %5134 }
0x1c16   :  { %v3457_v26 = vsel %vm108_vm1, %v6288_v55, 0.0 }
0x1c17   :  { %v3122_v4 = vpack.c.bf16 %v3120_v28, %v3120_v28 }
0x1c19   :  { %4693 = vmatmul.msk.bf16.vlgmr.msra.gmra.mxu1 %vm108_vm1, %v3122_v4 }
0x1c25   :  { %v3239_v8 = vpop.permute.xlu1 %3238 }
0x1c26   :  { %v3244_v11 = vsel %vm183_vm2, %v3239_v8, 0  ;;  %v4835_v8 = vld [vmem:[#allocation2 + $0x94] sm:$0xf] }
0x1c27   :  { %v3117_v40 = vpop.xlane.xlu0 %3116  ;;  %3253 = vmatpush.bf16.msrb.mxu1 %v3244_v11  ;;  %v4711_v11 = vld [vmem:[#allocation2 + $0xa8] sm:$0xf0] }
0x1c28   :  { %5136 = vrcp.f32 %v3117_v40 }
0x1c2d   :  { %v3374_v3 = vpop.permute.xlu1 %3373 }
0x1c2e   :  { %v5137_v1 = vpop.eup %5136  ;;  %v3379_v19 = vsel %vm183_vm2, %v3374_v3, 0 }
0x1c2f   :  { %v3121_v14 = vmul.f32 %v5137_v1, %v6254_v32  ;;  %v4829_v1 = vld [vmem:[#allocation2 + $0x64] sm:$0xf] }
0x1c30   :  { %3458 = vadd.xlane.f32.xlu1 %v3457_v26 }
0x1c31   :  { %v3123_v38 = vpack.c.bf16 %v3121_v14, %v3121_v14  ;;  %v4707_v14 = vld [vmem:[#allocation2 + $0x78] sm:$0xf0] }
0x1c32   :  { %v4710_v26 = vor.u32 %v4829_v1, %v4707_v14  ;;  %v4718_v1 = vld [vmem:[#allocation2 + $0x68] sm:$0xf]  ;;  %v4833_v14 = vld [vmem:[#allocation2 + $0x7c] sm:$0xf0] }
0x1c33   :  { %4694 = vmatmul.msk.bf16.vlgmr.msra.gmra.mxu2 %vm108_vm1, %v3123_v38 }
0x1c3a   :  { %v3260_v17 = vpop.permute.xlu0 %3259 }
0x1c3b   :  { %v3265_v18 = vsel %vm183_vm2, %v3260_v17, 0 }
0x1c3c   :  { %3274 = vmatpush.bf16.msrb.mxu2 %v3265_v18  ;;  %v3648_v18 = vperm.slane %v6177_v6, 5 }
0x1c40   :  { %3388 = vmatpush.bf16.msra.mxu2 %v3379_v19 }
0x1c47   :  { %v3345_v35 = vpop.xlane.xlu2 %3344 }
0x1c4f   :  { %v3456_v48 = vpop.xlane.xlu2 %3455 }
0x1c57   :  { %v3467_v49 = vpop.permute.xlu2 %3466 }
0x1c58   :  { %v3228_v5 = vpop.xlane.xlu1 %3227  ;;  %v3472_v31 = vsel %vm183_vm2, %v3467_v49, 0 }
0x1c59   :  { %5138 = vrcp.f32 %v3228_v5 }
0x1c5f   :  { %v5139_v20 = vpop.eup %5138 }
0x1c60   :  { %v3234_v0 = vmul.f32 %v5139_v20, %v5127_v56  ;;  %v3231_v22 = vpop.xlane.xlu1 %3230 }
0x1c61   :  { %5140 = vrcp.f32 %v3231_v22 }
0x1c62   :  { %v3236_v63 = vpack.c.bf16 %v3234_v0, %v3234_v0  ;;  %5142 = vrcp.f32 %v3345_v35 }
0x1c64   :  { %4697 = vmatmul.msk.bf16.vlgmr.msrb.gmra.mxu1 %vm108_vm1, %v3236_v63 }
0x1c65   :  { %v3342_v23 = vpop.xlane.xlu0 %3341 }
0x1c66   :  { %5144 = vrcp.f32 %v3342_v23 }
0x1c67   :  { %v5141_v24 = vpop.eup %5140  ;;  %5146 = vrcp.f32 %v3456_v48 }
0x1c68   :  { %v3235_v25 = vmul.f32 %v5141_v24, %v5129_v59  ;;  %v5143_v32 = vpop.eup %5142 }
0x1c69   :  { %v3349_v36 = vmul.f32 %v5143_v32, %v6264_v46  ;;  %v4725_v46 = vld [vmem:[#allocation2 + $0x80] sm:$0xf0] }
0x1c6a   :  { %v3237_v37 = vpack.c.bf16 %v3235_v25, %v3235_v25  ;;  %v4728_v51 = vor.u32 %v4830_v50, %v4725_v46  ;;  %v3539_v50 = vperm.slane %v6177_v6, 1 }
0x1c6b   :  { %v3351_v39 = vpack.c.bf16 %v3349_v36, %v3349_v36 }
0x1c6c   :  { %4698 = vmatmul.msk.bf16.vlgmr.msrb.gmra.mxu2 %vm108_vm1, %v3237_v37  ;;  %v5145_v21 = vpop.eup %5144 }
0x1c6d   :  { %v3348_v33 = vmul.f32 %v5145_v21, %v5131_v45  ;;  %v5147_v52 = vpop.eup %5146 }
0x1c6e   :  { %v3462_v53 = vmul.f32 %v5147_v52, %v6270_v27 }
0x1c6f   :  { %v3350_v13 = vpack.c.bf16 %v3348_v33, %v3348_v33 }
0x1c70   :  { %v3464_v54 = vpack.c.bf16 %v3462_v53, %v3462_v53 }
0x1c78   :  { %v3353_v30 = vpop.permute.xlu1 %3352  ;;  %v3488_v42 = vpop.permute.xlu0 %3487 }
0x1c79   :  { %v3358_v43 = vsel %vm183_vm2, %v3353_v30, 0  ;;  %v3493_v12 = vsel %vm183_vm2, %v3488_v42, 0 }
0x1c7a   :  { %3367 = vmatpush.bf16.msra.mxu1 %v3358_v43  ;;  %3502 = vmatpush.bf16.msrb.mxu2 %v3493_v12 }
0x1c7c   :  { %4702 = vmatmul.msk.bf16.vlgmr.msra.gmra.mxu2 %vm108_vm1, %v3351_v39 }
0x1c7d   :  { %4701 = vmatmul.msk.bf16.vlgmr.msra.gmra.mxu1 %vm108_vm1, %v3350_v13 }
0x1c7e   :  { %3481 = vmatpush.bf16.msrb.mxu1 %v3472_v31 }
0x1c82   :  { %3663 = vmatpush.bf16.msra.mxu1 %v4732_v47 }
0x1c86   :  { %3664 = vmatpush.bf16.msra.mxu1 %v4728_v51 }
0x1c8d   :  { %4705 = vmatmul.msk.bf16.vlgmr.msrb.gmra.mxu1 %vm108_vm1, %v3464_v54 }
0x1c96   :  { %v3141_v56 = vpop.f32.mrf.mxu1 }
0x1c9d   :  { %4733 = vmatmul.msk.bf16.vlgmr.msra.gmra.mxu1 %vm83_vm0, %v5977_v41 }
0x1c9e   :  { %v3143_v57 = vpop.f32.mrf.mxu1 }
0x1ca3   :  { %v3459_v58 = vpop.xlane.xlu1 %3458 }
0x1ca4   :  { %5148 = vrcp.f32 %v3459_v58 }
0x1caa   :  { %v5149_v59 = vpop.eup %5148 }
0x1cab   :  { %v3463_v60 = vmul.f32 %v5149_v59, %v6288_v55  ;;  %v4714_v55 = vor.u32 %v4835_v8, %v4711_v11  ;;  %v4839_v8 = vld [vmem:[#allocation2 + $0xac] sm:$0xf0] }
0x1cad   :  { %v3465_v45 = vpack.c.bf16 %v3463_v60, %v3463_v60  ;;  %3557 = vmatpush.bf16.msra.mxu3 %v4714_v55 }
0x1caf   :  { %4706 = vmatmul.msk.bf16.vlgmr.msrb.gmra.mxu2 %vm108_vm1, %v3465_v45 }
0x1cb1   :  { %3558 = vmatpush.bf16.msra.mxu3 %v4710_v26 }
0x1cb6   :  { %v3162_v61 = vpop.f32.mrf.mxu2 }
0x1cbe   :  { %v3164_v7 = vpop.f32.mrf.mxu2 }
0x1ce1   :  { %v3255_v62 = vpop.f32.mrf.mxu1 }
0x1ce9   :  { %v3257_v27 = vpop.f32.mrf.mxu1 }
0x1cef   :  { %v3276_v2 = vpop.f32.mrf.mxu2 }
0x1cf0   :  { %v4922_v28 = vpack.i.bf16 %v3276_v2, %v3255_v62 }
0x1cf2   :  { %4923 = vrot.lane.b32.xlu0 %v4922_v28, %s5241_s26 }
0x1cf7   :  { %v3278_v4 = vpop.f32.mrf.mxu2 }
0x1cfa   :  { %v3369_v29 = vpop.f32.mrf.mxu1 }
0x1cff   :  { %v3390_v41 = vpop.f32.mrf.mxu2 }
0x1d00   :  { %v4927_v10 = vpack.i.bf16 %v3390_v41, %v3369_v29 }
0x1d02   :  { %v3371_v40 = vpop.f32.mrf.mxu1  ;;  %4928 = vrot.lane.b32.xlu0 %v4927_v10, %s5242_s27  ;;  %v4722_v10 = vld [vmem:[#allocation2 + $0x98] sm:$0xf] }
0x1d03   :  { %v4723_v11 = vor.u32 %v4839_v8, %v4722_v10 }
0x1d05   :  { %3640 = vmatpush.bf16.msra.mxu0 %v4723_v11 }
0x1d07   :  { %v3392_v38 = vpop.f32.mrf.mxu2 }
0x1d08   :  { %v4719_v38 = vor.u32 %v4833_v14, %v4718_v1 }
0x1d0a   :  { %v3483_v3 = vpop.f32.mrf.mxu1  ;;  %3641 = vmatpush.bf16.msra.mxu0 %v4719_v38 }
0x1d12   :  { %v3485_v17 = vpop.f32.mrf.mxu1 }
0x1d1a   :  { %v3666_v19 = vpop.f32.mrf.mxu1 }
0x1d1b   :  { %v3667_v5 = vadd.f32 %v3666_v19, %v3648_v18 }
0x1d1d   :  { %v3673_v20 = vpack.c.bf16 %v3667_v5, %v3667_v5 }
0x1d1f   :  { %v3679_v0 = vsel %vm108_vm1, %v3673_v20, 0 }
0x1d20   :  { %3688 = vmatpush.bf16.xpose.msra.mxu2 %v3679_v0 }
0x1d22   :  { %v3668_v22 = vpop.f32.mrf.mxu1 }
0x1d23   :  { %v3669_v63 = vadd.f32 %v3668_v22, %v3648_v18 }
0x1d25   :  { %v3674_v35 = vpack.c.bf16 %v3669_v63, %v3669_v63 }
0x1d27   :  { %v3698_v24 = vsel %vm108_vm1, %v3674_v35, 0  ;;  %v3764_v29 = vunpack.c.l.b16 %v3674_v35 }
0x1d28   :  { %3707 = vmatpush.bf16.xpose.msrb.mxu3 %v3698_v24 }
0x1d29   :  { %v6336_v41 = vpack.c.b16 %v3764_v29, %v3764_v29 }
0x1d32   :  { %v3504_v25 = vpop.f32.mrf.mxu2 }
0x1d33   :  { %v4932_v37 = vpack.i.bf16 %v3504_v25, %v3483_v3 }
0x1d35   :  { %4933 = vrot.lane.b32.xlu2 %v4932_v37, %s5229_s19 }
0x1d3a   :  { %v3506_v23 = vpop.f32.mrf.mxu2 }
0x1d64   :  { %v4924_v48 = vpop.permute.xlu0 %4923 }
0x1d65   :  { %v4926_v21 = vunpack.i.h.bf16 %v4924_v48  ;;  %v4925_v36 = vunpack.i.l.bf16 %v4924_v48 }
0x1d67   :  { %v3533_v15 = vsel %vm108_vm1, %v3162_v61, %v4926_v21  ;;  %v3532_v30 = vsel %vm108_vm1, %v3141_v56, %v4925_v36 }
0x1d74   :  { %v4929_v32 = vpop.permute.xlu0 %4928 }
0x1d75   :  { %v4931_v49 = vunpack.i.h.bf16 %v4929_v32  ;;  %v4930_v33 = vunpack.i.l.bf16 %v4929_v32  ;;  %v3611_v32 = vperm.slane %v6177_v6, 2 }
0x1d77   :  { %v3535_v12 = vsel %vm589_vm3, %v3533_v15, %v4931_v49  ;;  %v3534_v39 = vsel %vm589_vm3, %v3532_v30, %v4930_v33  ;;  %v3614_v33 = vperm.slane %v6177_v6, 3 }
0x1d8f   :  { %v4934_v34 = vpop.permute.xlu2 %4933 }
0x1d90   :  { %v4936_v42 = vunpack.i.h.bf16 %v4934_v34  ;;  %v4935_v43 = vunpack.i.l.bf16 %v4934_v34 }
0x1d92   :  { %v3537_v31 = vsel %vm592_vm4, %v3535_v12, %v4936_v42  ;;  %v3536_v47 = vsel %vm592_vm4, %v3534_v39, %v4935_v43 }
0x1d93   :  { %v3538_v13 = vpack.c.bf16 %v3537_v31, %v3536_v47 }
0x1d95   :  { %4715 = vmatmul.msk.bf16.vlgmr.msra.gmra.mxu3 %vm83_vm0, %v3538_v13 }
0x1e18   :  { %v3560_v46 = vpop.f32.mrf.mxu3 }
0x1e19   :  { %v3561_v51 = vadd.f32 %v3560_v46, %v3539_v50 }
0x1e1b   :  { %v3565_v52 = vadd.f32 %v3561_v51, %v6167_v9 }
0x1e1d   :  { %v3567_v53 = vsel %vm83_vm0, %v3565_v52, 0.0 }
0x1e1e   :  { %3568 = vadd.xlane.f32.xlu1 %v3567_v53 }
0x1e20   :  { %v3562_v54 = vpop.f32.mrf.mxu3 }
0x1e21   :  { %v3563_v56 = vadd.f32 %v3562_v54, %v3539_v50  ;;  %v3618_v50 = vperm.slane %v6177_v6, 4 }
0x1e23   :  { %v3566_v57 = vadd.f32 %v3563_v56, %v6169_v16  ;;  %v3740_v16 = vunpack.c.l.b16 %v3673_v20 }
0x1e25   :  { %v3570_v58 = vsel %vm83_vm0, %v3566_v57, 0.0  ;;  %v6332_v4 = vpack.c.b16 %v3740_v16, %v3740_v16 }
0x1e26   :  { %3571 = vadd.xlane.f32.xlu0 %v3570_v58 }
0x1e91   :  { %v3569_v59 = vpop.xlane.xlu1 %3568 }
0x1e92   :  { %v3573_v60 = vmul.f32 %v3569_v59, %v5483_v44 }
0x1e94   :  { %v3575_v45 = vsub.f32 %v3565_v52, %v3573_v60 }
0x1e96   :  { %v3577_v61 = vmul.f32 %v3575_v45, %v3575_v45 }
0x1e98   :  { %v3579_v7 = vsel %vm83_vm0, %v3577_v61, 0.0 }
0x1e99   :  { %v3572_v62 = vpop.xlane.xlu0 %3571  ;;  %3580 = vadd.xlane.f32.xlu2 %v3579_v7 }
0x1e9a   :  { %v3574_v9 = vmul.f32 %v3572_v62, %v5483_v44 }
0x1e9c   :  { %v3576_v27 = vsub.f32 %v3566_v57, %v3574_v9 }
0x1e9e   :  { %v3578_v2 = vmul.f32 %v3576_v27, %v3576_v27 }
0x1ea0   :  { %v3582_v28 = vsel %vm83_vm0, %v3578_v2, 0.0 }
0x1ea1   :  { %3583 = vadd.xlane.f32.xlu1 %v3582_v28 }
0x1eba   :  { %3792 = vrot.lane.b32.xlu1 %v6332_v4, %s5230_s2 }
0x1ec2   :  { %3818 = vrot.lane.b32.xlu1 %v6336_v41, %s5230_s2 }
0x1eca   :  { %3909 = vrot.lane.b32.xlu1 %v6332_v4, %s5233_s18 }
0x1ed2   :  { %3932 = vrot.lane.b32.xlu1 %v6336_v41, %s5233_s18 }
0x1f0c   :  { %v3581_v40 = vpop.xlane.xlu2 %3580 }
0x1f0d   :  { %v3585_v55 = vmul.f32 %v3581_v40, %v5483_v44 }
0x1f0f   :  { %v3587_v26 = vadd.f32 1e-05, %v3585_v55 }
0x1f11   :  { %5150 = vrsqrt.f32 %v3587_v26  ;;  %vm3595_vm5 = vweird.f32 %v3587_v26 }
0x1f14   :  { %v3584_v3 = vpop.xlane.xlu1 %3583 }
0x1f15   :  { %v3586_v17 = vmul.f32 %v3584_v3, %v5483_v44 }
0x1f17   :  { %v5151_v18 = vpop.eup %5150  ;;  %v3588_v19 = vadd.f32 1e-05, %v3586_v17 }
0x1f18   :  { %v3590_v5 = vmul.f32 %v5151_v18, %v3587_v26  ;;  %vm3596_vm15 = vweird.f32 %v5151_v18 }
0x1f19   :  { %5152 = vrsqrt.f32 %v3588_v19  ;;  %vm3597_vm6 = vmor %vm3595_vm5, %vm3596_vm15  ;;  %vm3605_vm8 = vweird.f32 %v3588_v19 }
0x1f1a   :  { %v3591_v20 = vmul.f32 %v5151_v18, %v3590_v5 }
0x1f1c   :  { %v3592_v0 = vmul.f32 0.5, %v3591_v20 }
0x1f1e   :  { %v3593_v22 = vsub.f32 1.5, %v3592_v0 }
0x1f1f   :  { %v5153_v63 = vpop.eup %5152 }
0x1f20   :  { %v3594_v35 = vmul.f32 %v5151_v18, %v3593_v22  ;;  %v3600_v24 = vmul.f32 %v5153_v63, %v3588_v19  ;;  %vm3606_vm7 = vweird.f32 %v5153_v63 }
0x1f21   :  { %vm3607_vm9 = vmor %vm3605_vm8, %vm3606_vm7 }
0x1f22   :  { %v3601_v25 = vmul.f32 %v5153_v63, %v3600_v24  ;;  %v3598_v37 = vsel %vm3597_vm6, %v5151_v18, %v3594_v35 }
0x1f23   :  { %v3609_v21 = vmul.f32 %v3598_v37, %v3575_v45 }
0x1f24   :  { %v3602_v23 = vmul.f32 0.5, %v3601_v25 }
0x1f25   :  { %v3612_v34 = vmul.f32 %v3611_v32, %v3609_v21 }
0x1f26   :  { %v3603_v48 = vsub.f32 1.5, %v3602_v23 }
0x1f27   :  { %v6349_v12 = vadd.f32 %v3614_v33, %v3612_v34 }
0x1f28   :  { %v3604_v36 = vmul.f32 %v5153_v63, %v3603_v48 }
0x1f2a   :  { %v3608_v49 = vsel %vm3607_vm9, %v5153_v63, %v3604_v36 }
0x1f2b   :  { %v3610_v15 = vmul.f32 %v3608_v49, %v3576_v27 }
0x1f2c   :  { %v3793_v30 = vpop.permute.xlu1 %3792 }
0x1f2d   :  { %v3613_v42 = vmul.f32 %v3611_v32, %v3610_v15  ;;  %v3798_v43 = vsel %vm108_vm1, %v3793_v30, 0 }
0x1f2e   :  { %3807 = vmatpush.bf16.xpose.msrb.mxu2 %v3798_v43 }
0x1f2f   :  { %v6351_v39 = vadd.f32 %v3614_v33, %v3613_v42 }
0x1f31   :  { %v3617_v31 = vpack.c.bf16 %v6351_v39, %v6349_v12 }
0x1f33   :  { %4724 = vmatmul.msk.bf16.vlgmr.msra.gmra.mxu0 %vm83_vm0, %v3617_v31 }
0x1f34   :  { %v3819_v47 = vpop.permute.xlu1 %3818 }
0x1f35   :  { %v3824_v13 = vsel %vm108_vm1, %v3819_v47, 0 }
0x1f36   :  { %3833 = vmatpush.bf16.xpose.msra.mxu3 %v3824_v13 }
0x1f3c   :  { %v3910_v46 = vpop.permute.xlu1 %3909 }
0x1f3d   :  { %v3915_v54 = vsel %vm108_vm1, %v3910_v46, 0 }
0x1f44   :  { %v3933_v60 = vpop.permute.xlu1 %3932 }
0x1f45   :  { %v3938_v61 = vsel %vm108_vm1, %v3933_v60, 0 }
0x1fb0   :  { %v3643_v51 = vpop.f32.mrf.mxu0 }
0x1fb1   :  { %v3644_v52 = vadd.f32 %v3643_v51, %v3618_v50 }
0x1fb3   :  { %v3671_v53 = vpack.c.bf16 %v3644_v52, %v3644_v52 }
0x1fb5   :  { %v3788_v56 = vunpack.c.l.b16 %v3671_v53  ;;  %4734 = vmatmul.msk.bf16.vlgmr.msra.gmra.mxu2 %vm108_vm1, %v3671_v53 }
0x1fb6   :  { %3924 = vmatpush.bf16.xpose.msra.mxu2 %v3915_v54 }
0x1fb7   :  { %v3789_v57 = vpack.c.b16 %v3788_v56, %v3788_v56 }
0x1fb8   :  { %v3645_v58 = vpop.f32.mrf.mxu0 }
0x1fb9   :  { %v3646_v59 = vadd.f32 %v3645_v58, %v3618_v50  ;;  %3790 = vrot.lane.b32.xlu0 %v3789_v57, %s5230_s2 }
0x1fbb   :  { %v3672_v45 = vpack.c.bf16 %v3646_v59, %v3646_v59 }
0x1fbd   :  { %v3814_v6 = vunpack.c.l.b16 %v3672_v45  ;;  %4735 = vmatmul.msk.bf16.vlgmr.msrb.gmra.mxu3 %vm108_vm1, %v3672_v45 }
0x1fbe   :  { %3947 = vmatpush.bf16.xpose.msrb.mxu3 %v3938_v61 }
0x1fbf   :  { %v3815_v7 = vpack.c.b16 %v3814_v6, %v3814_v6 }
0x1fc1   :  { %3816 = vrot.lane.b32.xlu2 %v3815_v7, %s5230_s2  ;;  %3907 = vrot.lane.b32.xlu0 %v3789_v57, %s5233_s18 }
0x1fc2   :  { %3930 = vrot.lane.b32.xlu1 %v3815_v7, %s5233_s18 }
0x1fc9   :  { %4046 = vrot.lane.b32.xlu0 %v6336_v41, %s5236_s22  ;;  %4023 = vrot.lane.b32.xlu2 %v6332_v4, %s5236_s22 }
0x1fca   :  { %4021 = vrot.lane.b32.xlu1 %v3789_v57, %s5236_s22 }
0x1fd1   :  { %4044 = vrot.lane.b32.xlu2 %v3815_v7, %s5236_s22 }
0x1fd2   :  { %3742 = vrot.lane.b32.xlu1 %v6332_v4, %s5232_s17 }
0x201b   :  { %v3817_v62 = vpop.permute.xlu2 %3816 }
0x201c   :  { %4739 = vmatmul.msk.bf16.vlgmr.msra.gmra.mxu3 %vm108_vm1, %v3817_v62 }
0x2023   :  { %v4024_v9 = vpop.permute.xlu2 %4023 }
0x2024   :  { %v4029_v2 = vsel %vm108_vm1, %v4024_v9, 0 }
0x202b   :  { %v3791_v27 = vpop.permute.xlu0 %3790  ;;  %v4045_v3 = vpop.permute.xlu2 %4044 }
0x202c   :  { %4738 = vmatmul.msk.bf16.vlgmr.msrb.gmra.mxu2 %vm108_vm1, %v3791_v27 }
0x202d   :  { %4038 = vmatpush.bf16.xpose.msrb.mxu2 %v4029_v2 }
0x2033   :  { %v3908_v28 = vpop.permute.xlu0 %3907 }
0x2034   :  { %v3931_v16 = vpop.permute.xlu1 %3930 }
0x2035   :  { %4743 = vmatmul.msk.bf16.vlgmr.msrb.gmra.mxu3 %vm108_vm1, %v3931_v16 }
0x2038   :  { %v3690_v29 = vpop.f32.mrf.mxu2 }
0x2039   :  { %v3713_v10 = vmul.f32 0.35355338, %v3690_v29 }
0x203b   :  { %v4047_v8 = vpop.permute.xlu0 %4046  ;;  %v3715_v11 = vsel %vm108_vm1, %v3713_v10, -inf }
0x203c   :  { %v4052_v40 = vsel %vm108_vm1, %v4047_v8, 0  ;;  %v4022_v55 = vpop.permute.xlu1 %4021  ;;  %4742 = vmatmul.msk.bf16.vlgmr.msra.gmra.mxu2 %vm108_vm1, %v3908_v28  ;;  %3716 = vmax.xlane.f32.xlu0 %v3715_v11 }
0x203d   :  { %4061 = vmatpush.bf16.xpose.msra.mxu3 %v4052_v40 }
0x2040   :  { %v3692_v1 = vpop.f32.mrf.mxu2  ;;  %v3709_v14 = vpop.f32.mrf.mxu3 }
0x2041   :  { %v3714_v26 = vmul.f32 0.35355338, %v3709_v14 }
0x2043   :  { %v3718_v38 = vsel %vm108_vm1, %v3714_v26, -inf }
0x2044   :  { %v3743_v17 = vpop.permute.xlu1 %3742  ;;  %3719 = vmax.xlane.f32.xlu1 %v3718_v38 }
0x2045   :  { %v3748_v18 = vsel %vm183_vm2, %v3743_v17, 0  ;;  %4747 = vmatmul.msk.bf16.vlgmr.msra.gmra.mxu3 %vm108_vm1, %v4045_v3 }
0x2046   :  { %3757 = vmatpush.bf16.msrb.mxu0 %v3748_v18 }
0x2048   :  { %v3711_v19 = vpop.f32.mrf.mxu3 }
0x204c   :  { %4746 = vmatmul.msk.bf16.vlgmr.msrb.gmra.mxu2 %vm108_vm1, %v4022_v55 }
0x209f   :  { %v3835_v5 = vpop.f32.mrf.mxu3 }
0x20a0   :  { %v6385_v20 = vmul.f32 0.35355338, %v3835_v5 }
0x20a2   :  { %v3844_v0 = vsel %vm108_vm1, %v6385_v20, -inf }
0x20a3   :  { %3845 = vmax.xlane.f32.xlu0 %v3844_v0 }
0x20a7   :  { %v3837_v22 = vpop.f32.mrf.mxu3 }
0x20af   :  { %v3717_v63 = vpop.xlane.xlu0 %3716  ;;  %v3809_v35 = vpop.f32.mrf.mxu2 }
0x20b0   :  { %v3721_v24 = vsub.f32 %v3713_v10, %v3717_v63  ;;  %v3839_v25 = vmul.f32 0.35355338, %v3809_v35 }
0x20b2   :  { %v3723_v37 = vmul.f32 1.442695, %v3721_v24  ;;  %v3841_v23 = vsel %vm108_vm1, %v3839_v25, -inf }
0x20b3   :  { %3842 = vmax.xlane.f32.xlu2 %v3841_v23 }
0x20b4   :  { %5154 = vpow2.f32 %v3723_v37 }
0x20b7   :  { %v3720_v48 = vpop.xlane.xlu1 %3719  ;;  %v3811_v32 = vpop.f32.mrf.mxu2 }
0x20b8   :  { %v3949_v21 = vpop.f32.mrf.mxu3  ;;  %v3722_v36 = vsub.f32 %v3714_v26, %v3720_v48 }
0x20b9   :  { %v3954_v15 = vmul.f32 0.35355338, %v3949_v21 }
0x20ba   :  { %v5155_v49 = vpop.eup %5154  ;;  %v3725_v33 = vmul.f32 1.442695, %v3722_v36 }
0x20bb   :  { %v3727_v34 = vsel %vm108_vm1, %v5155_v49, 0.0  ;;  %v3958_v50 = vsel %vm108_vm1, %v3954_v15, -inf }
0x20bc   :  { %5156 = vpow2.f32 %v3725_v33  ;;  %3728 = vadd.xlane.f32.xlu2 %v3727_v34 }
0x20bf   :  { %v3926_v30 = vpop.f32.mrf.mxu2 }
0x20c0   :  { %v3953_v42 = vmul.f32 0.35355338, %v3926_v30  ;;  %v3951_v43 = vpop.f32.mrf.mxu3 }
0x20c2   :  { %v5157_v31 = vpop.eup %5156  ;;  %v3955_v47 = vsel %vm108_vm1, %v3953_v42, -inf }
0x20c3   :  { %3956 = vmax.xlane.f32.xlu1 %v3955_v47  ;;  %v3730_v13 = vsel %vm108_vm1, %v5157_v31, 0.0 }
0x20c4   :  { %3731 = vadd.xlane.f32.xlu0 %v3730_v13  ;;  %3959 = vmax.xlane.f32.xlu2 %v3958_v50 }
0x20c7   :  { %v3928_v46 = vpop.f32.mrf.mxu2 }
0x20c8   :  { %v4063_v51 = vpop.f32.mrf.mxu3 }
0x20c9   :  { %v4068_v52 = vmul.f32 0.35355338, %v4063_v51 }
0x20cb   :  { %v4072_v53 = vsel %vm108_vm1, %v4068_v52, -inf }
0x20cc   :  { %4073 = vmax.xlane.f32.xlu1 %v4072_v53 }
0x20cf   :  { %v4040_v54 = vpop.f32.mrf.mxu2 }
0x20d0   :  { %v4065_v56 = vpop.f32.mrf.mxu3  ;;  %v6401_v58 = vmul.f32 0.35355338, %v4040_v54 }
0x20d2   :  { %v4069_v59 = vsel %vm108_vm1, %v6401_v58, -inf }
0x20d7   :  { %v4042_v57 = vpop.f32.mrf.mxu2 }
0x20d8   :  { %3865 = vrot.lane.b32.xlu0 %v6332_v4, %s5231_s16 }
0x20dc   :  { %3766 = vrot.lane.b32.xlu2 %v6336_v41, %s5232_s17 }
0x20e5   :  { %3886 = vrot.lane.b32.xlu1 %v6336_v41, %s5231_s16 }
0x2102   :  { %4070 = vmax.xlane.f32.xlu0 %v4069_v59 }
0x2116   :  { %3979 = vrot.lane.b32.xlu0 %v6332_v4, %s5234_s20  ;;  %v3846_v61 = vpop.xlane.xlu0 %3845 }
0x2117   :  { %v3848_v9 = vsub.f32 %v6385_v20, %v3846_v61 }
0x2119   :  { %v3851_v40 = vmul.f32 1.442695, %v3848_v9 }
0x2126   :  { %v3843_v60 = vpop.xlane.xlu2 %3842 }
0x2127   :  { %v3847_v45 = vsub.f32 %v3839_v25, %v3843_v60 }
0x2129   :  { %v3849_v7 = vmul.f32 1.442695, %v3847_v45 }
0x212f   :  { %v3729_v6 = vpop.xlane.xlu2 %3728 }
0x2130   :  { %5158 = vrcp.f32 %v3729_v6 }
0x2131   :  { %5160 = vpow2.f32 %v3849_v7 }
0x2136   :  { %v5159_v62 = vpop.eup %5158  ;;  %v3957_v27 = vpop.xlane.xlu1 %3956 }
0x2137   :  { %v3735_v2 = vmul.f32 %v5159_v62, %v5155_v49  ;;  %v3961_v28 = vsub.f32 %v3953_v42, %v3957_v27  ;;  %v3732_v16 = vpop.xlane.xlu0 %3731  ;;  %v3960_v29 = vpop.xlane.xlu2 %3959 }
0x2138   :  { %5162 = vrcp.f32 %v3732_v16  ;;  %v3962_v10 = vsub.f32 %v3954_v15, %v3960_v29  ;;  %v5161_v1 = vpop.eup %5160 }
0x2139   :  { %v3737_v8 = vpack.c.bf16 %v3735_v2, %v3735_v2  ;;  %v3963_v11 = vmul.f32 1.442695, %v3961_v28  ;;  %v3853_v17 = vsel %vm108_vm1, %v5161_v1, 0.0 }
0x213a   :  { %v3965_v55 = vmul.f32 1.442695, %v3962_v10 }
0x213b   :  { %5164 = vpow2.f32 %v3963_v11  ;;  %4736 = vmatmul.msk.bf16.vlgmr.msrb.gmra.mxu0 %vm108_vm1, %v3737_v8 }
0x213c   :  { %5166 = vpow2.f32 %v3965_v55 }
0x213d   :  { %5168 = vpow2.f32 %v3851_v40 }
0x213e   :  { %v5163_v14 = vpop.eup %5162 }
0x213f   :  { %v3736_v26 = vmul.f32 %v5163_v14, %v5157_v31  ;;  %v4074_v38 = vpop.xlane.xlu1 %4073  ;;  %v3767_v3 = vpop.permute.xlu2 %3766 }
0x2140   :  { %v4076_v18 = vsub.f32 %v4068_v52, %v4074_v38  ;;  %v3772_v19 = vsel %vm183_vm2, %v3767_v3, 0  ;;  %3854 = vadd.xlane.f32.xlu0 %v3853_v17 }
0x2141   :  { %v5165_v5 = vpop.eup %5164  ;;  %v3738_v20 = vpack.c.bf16 %v3736_v26, %v3736_v26  ;;  %3781 = vmatpush.bf16.msrb.mxu1 %v3772_v19 }
0x2142   :  { %v6411_v0 = vpop.eup %5166  ;;  %v4079_v22 = vmul.f32 1.442695, %v4076_v18  ;;  %v3967_v63 = vsel %vm108_vm1, %v5165_v5, 0.0 }
0x2143   :  { %3968 = vadd.xlane.f32.xlu2 %v3967_v63  ;;  %v3970_v35 = vsel %vm108_vm1, %v6411_v0, 0.0  ;;  %v5169_v24 = vpop.eup %5168 }
0x2144   :  { %5170 = vpow2.f32 %v4079_v22  ;;  %4737 = vmatmul.msk.bf16.vlgmr.msrb.gmra.mxu1 %vm108_vm1, %v3738_v20  ;;  %3971 = vadd.xlane.f32.xlu1 %v3970_v35  ;;  %v3856_v25 = vsel %vm108_vm1, %v5169_v24, 0.0 }
0x2148   :  { %3857 = vadd.xlane.f32.xlu0 %v3856_v25 }
0x214a   :  { %v5171_v37 = vpop.eup %5170  ;;  %v3866_v23 = vpop.permute.xlu0 %3865 }
0x214b   :  { %v3871_v48 = vsel %vm183_vm2, %v3866_v23, 0  ;;  %v4084_v32 = vsel %vm108_vm1, %v5171_v37, 0.0  ;;  %v4756_v23 = vld [vmem:[#allocation2 + $0xa0] sm:$0xf] }
0x214c   :  { %4085 = vadd.xlane.f32.xlu2 %v4084_v32  ;;  %3880 = vmatpush.bf16.msra.mxu0 %v3871_v48  ;;  %v4840_v48 = vld [vmem:[#allocation2 + $0xb4] sm:$0xf0] }
0x214d   :  { %v4757_v32 = vor.u32 %v4840_v48, %v4756_v23 }
0x214f   :  { %4188 = vmatpush.bf16.msra.mxu2 %v4757_v32 }
0x2157   :  { %v3887_v21 = vpop.permute.xlu1 %3886 }
0x2158   :  { %v3892_v36 = vsel %vm183_vm2, %v3887_v21, 0  ;;  %v4752_v21 = vld [vmem:[#allocation2 + $0x70] sm:$0xf] }
0x2159   :  { %3901 = vmatpush.bf16.msra.mxu1 %v3892_v36  ;;  %v4834_v36 = vld [vmem:[#allocation2 + $0x84] sm:$0xf0] }
0x215c   :  { %4000 = vrot.lane.b32.xlu0 %v6336_v41, %s5234_s20 }
0x215d   :  { %4114 = vrot.lane.b32.xlu1 %v6336_v41, %s5235_s21 }
0x2164   :  { %4093 = vrot.lane.b32.xlu2 %v6332_v4, %s5235_s21 }
0x2175   :  { %v4071_v49 = vpop.xlane.xlu0 %4070 }
0x2176   :  { %v4075_v33 = vsub.f32 %v6401_v58, %v4071_v49  ;;  %v4753_v49 = vor.u32 %v4834_v36, %v4752_v21 }
0x2178   :  { %v4077_v34 = vmul.f32 1.442695, %v4075_v33  ;;  %4189 = vmatpush.bf16.msra.mxu2 %v4753_v49  ;;  %v6476_v49 = vld [vmem:[%s6535_s8 + $0x18] sm:$0x1f] }
0x217a   :  { %5172 = vpow2.f32 %v4077_v34 }
0x2180   :  { %v5173_v15 = vpop.eup %5172 }
0x2181   :  { %v4081_v30 = vsel %vm108_vm1, %v5173_v15, 0.0 }
0x2186   :  { %4082 = vadd.xlane.f32.xlu0 %v4081_v30 }
0x2188   :  { %v3980_v42 = vpop.permute.xlu0 %3979 }
0x2189   :  { %v3985_v43 = vsel %vm183_vm2, %v3980_v42, 0 }
0x218a   :  { %3994 = vmatpush.bf16.msrb.mxu0 %v3985_v43 }
0x21b3   :  { %v3855_v31 = vpop.xlane.xlu0 %3854 }
0x21b4   :  { %5174 = vrcp.f32 %v3855_v31 }
0x21b6   :  { %v3969_v47 = vpop.xlane.xlu2 %3968 }
0x21b7   :  { %v3972_v57 = vpop.xlane.xlu1 %3971 }
0x21b8   :  { %v6430_v41 = vpop.f32.mrf.mxu0 }
0x21ba   :  { %v5175_v13 = vpop.eup %5174 }
0x21bb   :  { %v3861_v4 = vmul.f32 %v5175_v13, %v5161_v1  ;;  %v3858_v50 = vpop.xlane.xlu0 %3857 }
0x21bc   :  { %5176 = vrcp.f32 %v3858_v50 }
0x21bd   :  { %v3863_v46 = vpack.c.bf16 %v3861_v4, %v3861_v4  ;;  %5178 = vrcp.f32 %v3969_v47 }
0x21be   :  { %5180 = vrcp.f32 %v3972_v57 }
0x21bf   :  { %v4086_v51 = vpop.xlane.xlu2 %4085  ;;  %4740 = vmatmul.msk.bf16.vlgmr.msra.gmra.mxu0 %vm108_vm1, %v3863_v46 }
0x21c0   :  { %v3761_v52 = vpop.f32.mrf.mxu0  ;;  %5182 = vrcp.f32 %v4086_v51 }
0x21c1   :  { %v6433_v53 = vpop.f32.mrf.mxu1 }
0x21c2   :  { %v5177_v54 = vpop.eup %5176 }
0x21c3   :  { %v3862_v56 = vmul.f32 %v5177_v54, %v5169_v24  ;;  %v5179_v59 = vpop.eup %5178 }
0x21c4   :  { %v3975_v61 = vmul.f32 %v5179_v59, %v5165_v5  ;;  %v5181_v62 = vpop.eup %5180 }
0x21c5   :  { %v3864_v58 = vpack.c.bf16 %v3862_v56, %v3862_v56  ;;  %v3976_v16 = vmul.f32 %v5181_v62, %v6411_v0 }
0x21c6   :  { %v3977_v7 = vpack.c.bf16 %v3975_v61, %v3975_v61  ;;  %v5183_v10 = vpop.eup %5182 }
0x21c7   :  { %v4094_v60 = vpop.permute.xlu2 %4093  ;;  %4741 = vmatmul.msk.bf16.vlgmr.msra.gmra.mxu1 %vm108_vm1, %v3864_v58  ;;  %v3978_v29 = vpack.c.bf16 %v3976_v16, %v3976_v16  ;;  %v4090_v8 = vmul.f32 %v5183_v10, %v5171_v37 }
0x21c8   :  { %v4099_v45 = vsel %vm183_vm2, %v4094_v60, 0 }
0x21c9   :  { %4108 = vmatpush.bf16.msra.mxu0 %v4099_v45  ;;  %v3785_v6 = vpop.f32.mrf.mxu1  ;;  %v4092_v11 = vpack.c.bf16 %v4090_v8, %v4090_v8 }
0x21ce   :  { %v4001_v9 = vpop.permute.xlu0 %4000 }
0x21cf   :  { %v4006_v27 = vsel %vm183_vm2, %v4001_v9, 0  ;;  %v4115_v2 = vpop.permute.xlu1 %4114  ;;  %4744 = vmatmul.msk.bf16.vlgmr.msrb.gmra.mxu0 %vm108_vm1, %v3977_v7 }
0x21d0   :  { %v4120_v28 = vsel %vm183_vm2, %v4115_v2, 0  ;;  %4015 = vmatpush.bf16.msrb.mxu1 %v4006_v27 }
0x21d4   :  { %4129 = vmatpush.bf16.msra.mxu1 %v4120_v28 }
0x21d7   :  { %4745 = vmatmul.msk.bf16.vlgmr.msrb.gmra.mxu1 %vm108_vm1, %v3978_v29 }
0x21e7   :  { %4749 = vmatmul.msk.bf16.vlgmr.msra.gmra.mxu1 %vm108_vm1, %v4092_v11  ;;  %v4763_v11 = vld [vmem:[#allocation2 + $0xb8] sm:$0xf0] }
0x21f9   :  { %v4083_v40 = vpop.xlane.xlu0 %4082 }
0x21fa   :  { %5184 = vrcp.f32 %v4083_v40 }
0x2200   :  { %v5185_v55 = vpop.eup %5184 }
0x2201   :  { %v4089_v1 = vmul.f32 %v5185_v55, %v5173_v15 }
0x2203   :  { %v4091_v14 = vpack.c.bf16 %v4089_v1, %v4089_v1 }
0x2205   :  { %4748 = vmatmul.msk.bf16.vlgmr.msra.gmra.mxu0 %vm108_vm1, %v4091_v14  ;;  %v4831_v14 = vld [vmem:[#allocation2 + $0x74] sm:$0xf] }
0x223c   :  { %v3882_v26 = vpop.f32.mrf.mxu0 }
0x2244   :  { %v3884_v38 = vpop.f32.mrf.mxu0  ;;  %v3903_v3 = vpop.f32.mrf.mxu1 }
0x2245   :  { %v4937_v17 = vpack.i.bf16 %v3903_v3, %v3882_v26  ;;  %v4759_v26 = vld [vmem:[#allocation2 + $0x88] sm:$0xf0] }
0x2246   :  { %v4762_v3 = vor.u32 %v4831_v14, %v4759_v26 }
0x2247   :  { %4938 = vrot.lane.b32.xlu2 %v4937_v17, %s5241_s26 }
0x224c   :  { %v3905_v18 = vpop.f32.mrf.mxu1  ;;  %v3996_v19 = vpop.f32.mrf.mxu0 }
0x2254   :  { %v3998_v5 = vpop.f32.mrf.mxu0  ;;  %v4017_v20 = vpop.f32.mrf.mxu1 }
0x2255   :  { %v4942_v0 = vpack.i.bf16 %v4017_v20, %v3996_v19 }
0x2257   :  { %4943 = vrot.lane.b32.xlu0 %v4942_v0, %s5242_s27 }
0x225c   :  { %v4019_v22 = vpop.f32.mrf.mxu1 }
0x2264   :  { %v4131_v63 = vpop.f32.mrf.mxu1 }
0x226c   :  { %v4133_v35 = vpop.f32.mrf.mxu1 }
0x2282   :  { %v4110_v24 = vpop.f32.mrf.mxu0 }
0x2283   :  { %v4947_v25 = vpack.i.bf16 %v4131_v63, %v4110_v24 }
0x2285   :  { %4948 = vrot.lane.b32.xlu1 %v4947_v25, %s5229_s19 }
0x228a   :  { %v4112_v37 = vpop.f32.mrf.mxu0 }
0x22a1   :  { %v4939_v33 = vpop.permute.xlu2 %4938 }
0x22a2   :  { %v4941_v15 = vunpack.i.h.bf16 %v4939_v33  ;;  %v4940_v30 = vunpack.i.l.bf16 %v4939_v33 }
0x22a4   :  { %v4160_v47 = vsel %vm108_vm1, %v6433_v53, %v4941_v15  ;;  %v4159_v13 = vsel %vm108_vm1, %v6430_v41, %v4940_v30  ;;  %v6459_v53 = vld [vmem:[%s6535_s8 + $0x10] sm:$0xff]  ;;  %v4245_v15 = vperm.slane %v6476_v49, 0 }
0x22a5   :  { %v4166_v41 = vperm.slane %v6459_v53, 6  ;;  %v4242_v21 = vperm.slane %v6459_v53, 7 }
0x22c9   :  { %v4944_v34 = vpop.permute.xlu0 %4943 }
0x22ca   :  { %v4946_v42 = vunpack.i.h.bf16 %v4944_v34  ;;  %v4945_v43 = vunpack.i.l.bf16 %v4944_v34 }
0x22cc   :  { %v4162_v46 = vsel %vm589_vm3, %v4160_v47, %v4946_v42  ;;  %v4161_v51 = vsel %vm589_vm3, %v4159_v13, %v4945_v43 }
0x22f7   :  { %v4949_v31 = vpop.permute.xlu1 %4948 }
0x22f8   :  { %v4951_v4 = vunpack.i.h.bf16 %v4949_v31  ;;  %v4950_v50 = vunpack.i.l.bf16 %v4949_v31 }
0x22fa   :  { %v4163_v52 = vsel %vm592_vm4, %v4161_v51, %v4950_v50  ;;  %v4164_v54 = vsel %vm592_vm4, %v4162_v46, %v4951_v4  ;;  %v4844_v4 = vld [vmem:[%s6534_s7 + $0x38] sm:$0xff]  ;;  %v4843_v50 = vld [vmem:[%s6534_s7 + $0x30] sm:$0xff]  ;;  %v4842_v46 = vld [vmem:[%s6534_s7 + $0x28] sm:$0xff] }
0x22fb   :  { %v4165_v56 = vpack.c.bf16 %v4164_v54, %v4163_v52  ;;  %4319 = vmatpush.bf16.msrb.mxu0 %v4844_v4  ;;  %v4841_v51 = vld [vmem:[%s6534_s7 + $0x20] sm:$0xff]  ;;  %v4249_v54 = vperm.slane %v6476_v49, 1 }
0x22fd   :  { %4758 = vmatmul.msk.bf16.vlgmr.msra.gmra.mxu2 %vm83_vm0, %v4165_v56 }
0x22ff   :  { %4320 = vmatpush.bf16.msrb.mxu0 %v4843_v50 }
0x2303   :  { %4321 = vmatpush.bf16.msrb.mxu0 %v4842_v46 }
0x2307   :  { %4322 = vmatpush.bf16.msrb.mxu0 %v4841_v51 }
0x2380   :  { %v4191_v57 = vpop.f32.mrf.mxu2 }
0x2381   :  { %v4192_v58 = vadd.f32 %v4191_v57, %v4166_v41 }
0x2383   :  { %v4196_v59 = vadd.f32 %v4192_v58, %v6349_v12 }
0x2385   :  { %v4198_v60 = vsel %vm83_vm0, %v4196_v59, 0.0 }
0x2386   :  { %4199 = vadd.xlane.f32.xlu2 %v4198_v60  ;;  %v4287_v60 = vperm.slane %v6476_v49, 2 }
0x2388   :  { %v4193_v45 = vpop.f32.mrf.mxu2 }
0x2389   :  { %v4194_v61 = vadd.f32 %v4193_v45, %v4166_v41 }
0x238b   :  { %v4197_v6 = vadd.f32 %v4194_v61, %v6351_v39  ;;  %v4837_v39 = vld [vmem:[#allocation2 + $0xa4] sm:$0xf] }
0x238c   :  { %v4766_v40 = vor.u32 %v4837_v39, %v4763_v11 }
0x238d   :  { %v4201_v7 = vsel %vm83_vm0, %v4197_v6, 0.0 }
0x238e   :  { %4202 = vadd.xlane.f32.xlu1 %v4201_v7  ;;  %4267 = vmatpush.bf16.msrb.mxu3 %v4766_v40 }
0x2392   :  { %4268 = vmatpush.bf16.msrb.mxu3 %v4762_v3 }
0x23f9   :  { %v4200_v62 = vpop.xlane.xlu2 %4199 }
0x23fa   :  { %v4204_v9 = vmul.f32 %v4200_v62, %v5483_v44 }
0x23fc   :  { %v4206_v27 = vsub.f32 %v4196_v59, %v4204_v9 }
0x23fe   :  { %v4208_v2 = vmul.f32 %v4206_v27, %v4206_v27 }
0x2400   :  { %v4210_v28 = vsel %vm83_vm0, %v4208_v2, 0.0 }
0x2401   :  { %v4203_v16 = vpop.xlane.xlu1 %4202  ;;  %4211 = vadd.xlane.f32.xlu0 %v4210_v28 }
0x2402   :  { %v4205_v12 = vmul.f32 %v4203_v16, %v5483_v44 }
0x2404   :  { %v4207_v29 = vsub.f32 %v4197_v6, %v4205_v12 }
0x2406   :  { %v4209_v10 = vmul.f32 %v4207_v29, %v4207_v29 }
0x2408   :  { %v4213_v8 = vsel %vm83_vm0, %v4209_v10, 0.0 }
0x2409   :  { %4214 = vadd.xlane.f32.xlu2 %v4213_v8 }
0x2474   :  { %v4212_v55 = vpop.xlane.xlu0 %4211 }
0x2475   :  { %v4216_v1 = vmul.f32 %v4212_v55, %v5483_v44 }
0x2477   :  { %v4218_v38 = vadd.f32 1e-05, %v4216_v1 }
0x2479   :  { %5186 = vrsqrt.f32 %v4218_v38  ;;  %vm4226_vm2 = vweird.f32 %v4218_v38 }
0x247c   :  { %v4215_v17 = vpop.xlane.xlu2 %4214 }
0x247d   :  { %v4217_v18 = vmul.f32 %v4215_v17, %v5483_v44 }
0x247f   :  { %v5187_v19 = vpop.eup %5186  ;;  %v4219_v5 = vadd.f32 1e-05, %v4217_v18 }
0x2480   :  { %v4221_v20 = vmul.f32 %v5187_v19, %v4218_v38  ;;  %vm4227_vm1 = vweird.f32 %v5187_v19 }
0x2481   :  { %5188 = vrsqrt.f32 %v4219_v5  ;;  %vm4228_vm3 = vmor %vm4226_vm2, %vm4227_vm1  ;;  %vm4236_vm10 = vweird.f32 %v4219_v5 }
0x2482   :  { %v4222_v0 = vmul.f32 %v5187_v19, %v4221_v20 }
0x2484   :  { %v4223_v22 = vmul.f32 0.5, %v4222_v0 }
0x2486   :  { %v4224_v63 = vsub.f32 1.5, %v4223_v22 }
0x2487   :  { %v5189_v35 = vpop.eup %5188 }
0x2488   :  { %v4225_v24 = vmul.f32 %v5187_v19, %v4224_v63  ;;  %v4231_v25 = vmul.f32 %v5189_v35, %v4219_v5  ;;  %vm4237_vm4 = vweird.f32 %v5189_v35 }
0x2489   :  { %vm4238_vm11 = vmor %vm4236_vm10, %vm4237_vm4 }
0x248a   :  { %v4232_v37 = vmul.f32 %v5189_v35, %v4231_v25  ;;  %v4229_v23 = vsel %vm4228_vm3, %v5187_v19, %v4225_v24  ;;  %v4375_v24 = vperm.slane %v6476_v49, 3 }
0x248b   :  { %v4240_v36 = vmul.f32 %v4229_v23, %v4206_v27 }
0x248c   :  { %v4233_v48 = vmul.f32 0.5, %v4232_v37 }
0x248d   :  { %v4243_v30 = vmul.f32 %v4242_v21, %v4240_v36 }
0x248e   :  { %v4234_v32 = vsub.f32 1.5, %v4233_v48  ;;  %v4378_v48 = vperm.slane %v6476_v49, 4 }
0x248f   :  { %v4246_v31 = vadd.f32 %v4245_v15, %v4243_v30 }
0x2490   :  { %v4235_v33 = vmul.f32 %v5189_v35, %v4234_v32 }
0x2492   :  { %v4239_v34 = vsel %vm4238_vm11, %v5189_v35, %v4235_v33 }
0x2493   :  { %v4241_v42 = vmul.f32 %v4239_v34, %v4207_v29 }
0x2495   :  { %v4244_v43 = vmul.f32 %v4242_v21, %v4241_v42 }
0x2497   :  { %v4247_v47 = vadd.f32 %v4245_v15, %v4244_v43 }
0x2499   :  { %v4248_v13 = vpack.c.bf16 %v4247_v47, %v4246_v31 }
0x249b   :  { %4767 = vmatmul.msk.bf16.vlgmr.msrb.gmra.mxu3 %vm83_vm0, %v4248_v13 }
0x251e   :  { %v4270_v52 = vpop.f32.mrf.mxu3 }
0x251f   :  { %v4271_v56 = vadd.f32 %v4270_v52, %v4249_v54 }
0x2521   :  { %v4275_v57 = vmax.f32 %v4271_v56, 0.0 }
0x2526   :  { %v4272_v53 = vpop.f32.mrf.mxu3 }
0x2527   :  { %v4273_v41 = vadd.f32 %v4272_v53, %v4249_v54 }
0x2529   :  { %v4276_v58 = vmax.f32 %v4273_v41, 0.0 }
0x252b   :  { %v4286_v59 = vpack.c.bf16 %v4276_v58, %v4275_v57 }
0x252d   :  { %4792 = vmatmul.msk.bf16.vlgmr.msrb.gmra.mxu0 %vm748_vm12, %v4286_v59 }
0x25aa   :  { %v4324_v45 = vpop.f32.mrf.mxu0 }
0x25ab   :  { %v4325_v61 = vadd.f32 %v4324_v45, %v4287_v60 }
0x25ad   :  { %v4329_v6 = vadd.f32 %v4325_v61, %v4246_v31 }
0x25af   :  { %v4331_v7 = vsel %vm83_vm0, %v4329_v6, 0.0 }
0x25b0   :  { %4332 = vadd.xlane.f32.xlu1 %v4331_v7 }
0x25b2   :  { %v4326_v62 = vpop.f32.mrf.mxu0 }
0x25b3   :  { %v4327_v9 = vadd.f32 %v4326_v62, %v4287_v60 }
0x25b5   :  { %v4330_v27 = vadd.f32 %v4327_v9, %v4247_v47 }
0x25b7   :  { %v4334_v2 = vsel %vm83_vm0, %v4330_v27, 0.0 }
0x25b8   :  { %4335 = vadd.xlane.f32.xlu2 %v4334_v2 }
0x2623   :  { %v4333_v28 = vpop.xlane.xlu1 %4332 }
0x2624   :  { %v4337_v16 = vmul.f32 %v4333_v28, %v5483_v44 }
0x2626   :  { %v4339_v12 = vsub.f32 %v4329_v6, %v4337_v16  ;;  %v4954_v16 = vld [vmem:[%s6536_s9 + $0x2] ss:$0 sm:$0xff] }
0x2628   :  { %v4341_v29 = vmul.f32 %v4339_v12, %v4339_v12 }
0x262a   :  { %v4343_v10 = vsel %vm83_vm0, %v4341_v29, 0.0 }
0x262b   :  { %v4336_v8 = vpop.xlane.xlu2 %4335  ;;  %4344 = vadd.xlane.f32.xlu1 %v4343_v10 }
0x262c   :  { %v4338_v39 = vmul.f32 %v4336_v8, %v5483_v44 }
0x262e   :  { %v4340_v11 = vsub.f32 %v4330_v27, %v4338_v39 }
0x2630   :  { %v4342_v40 = vmul.f32 %v4340_v11, %v4340_v11 }
0x2632   :  { %v4346_v55 = vsel %vm83_vm0, %v4342_v40, 0.0 }
0x2633   :  { %4347 = vadd.xlane.f32.xlu0 %v4346_v55 }
0x269e   :  { %v4345_v1 = vpop.xlane.xlu1 %4344 }
0x269f   :  { %v4349_v14 = vmul.f32 %v4345_v1, %v5483_v44 }
0x26a1   :  { %v4351_v26 = vadd.f32 1e-05, %v4349_v14 }
0x26a3   :  { %5190 = vrsqrt.f32 %v4351_v26  ;;  %vm4359_vm13 = vweird.f32 %v4351_v26 }
0x26a6   :  { %v4348_v38 = vpop.xlane.xlu0 %4347 }
0x26a7   :  { %v4350_v3 = vmul.f32 %v4348_v38, %v5483_v44 }
0x26a9   :  { %v5191_v17 = vpop.eup %5190  ;;  %v4352_v18 = vadd.f32 1e-05, %v4350_v3 }
0x26aa   :  { %v4354_v19 = vmul.f32 %v5191_v17, %v4351_v26  ;;  %vm4360_vm12 = vweird.f32 %v5191_v17 }
0x26ab   :  { %5192 = vrsqrt.f32 %v4352_v18  ;;  %vm4361_vm14 = vmor %vm4359_vm13, %vm4360_vm12  ;;  %vm4369_vm5 = vweird.f32 %v4352_v18 }
0x26ac   :  { %v4355_v5 = vmul.f32 %v5191_v17, %v4354_v19 }
0x26ae   :  { %v4356_v20 = vmul.f32 0.5, %v4355_v5 }
0x26b0   :  { %v4357_v0 = vsub.f32 1.5, %v4356_v20 }
0x26b1   :  { %v5193_v22 = vpop.eup %5192 }
0x26b2   :  { %v4358_v63 = vmul.f32 %v5191_v17, %v4357_v0  ;;  %v4364_v35 = vmul.f32 %v5193_v22, %v4352_v18  ;;  %vm4370_vm15 = vweird.f32 %v5193_v22 }
0x26b3   :  { %vm4371_vm6 = vmor %vm4369_vm5, %vm4370_vm15 }
0x26b4   :  { %v4365_v25 = vmul.f32 %v5193_v22, %v4364_v35  ;;  %v4362_v37 = vsel %vm4361_vm14, %v5191_v17, %v4358_v63 }
0x26b5   :  { %v4373_v23 = vmul.f32 %v4362_v37, %v4339_v12 }
0x26b6   :  { %v4366_v32 = vmul.f32 0.5, %v4365_v25 }
0x26b7   :  { %v4376_v21 = vmul.f32 %v4375_v24, %v4373_v23 }
0x26b8   :  { %v4367_v36 = vsub.f32 1.5, %v4366_v32 }
0x26b9   :  { %v4379_v33 = vadd.f32 %v4378_v48, %v4376_v21 }
0x26ba   :  { %v4368_v34 = vmul.f32 %v5193_v22, %v4367_v36 }
0x26bb   :  { %v4383_v15 = vsel %vm83_vm0, %v4379_v33, 0.0 }
0x26bc   :  { %4384 = vadd.xlane.f32.xlu2 %v4383_v15  ;;  %v4372_v30 = vsel %vm4371_vm6, %v5193_v22, %v4368_v34 }
0x26bd   :  { %v4374_v42 = vmul.f32 %v4372_v30, %v4340_v11 }
0x26bf   :  { %v4377_v43 = vmul.f32 %v4375_v24, %v4374_v42 }
0x26c1   :  { %v4380_v31 = vadd.f32 %v4378_v48, %v4377_v43 }
0x26c3   :  { %v4386_v47 = vsel %vm83_vm0, %v4380_v31, 0.0 }
0x26c4   :  { %4387 = vadd.xlane.f32.xlu1 %v4386_v47 }
0x272f   :  { %v4385_v13 = vpop.xlane.xlu2 %4384 }
0x2730   :  { %v4389_v49 = vmul.f32 %v4385_v13, %v5483_v44 }
0x2732   :  { %v4391_v4 = vsub.f32 %v4379_v33, %v4389_v49 }
0x2734   :  { %v4393_v50 = vmul.f32 %v4391_v4, %v4391_v4 }
0x2736   :  { %v4395_v46 = vsel %vm83_vm0, %v4393_v50, 0.0 }
0x2737   :  { %4396 = vadd.xlane.f32.xlu0 %v4395_v46  ;;  %v4388_v51 = vpop.xlane.xlu1 %4387 }
0x2738   :  { %v4390_v52 = vmul.f32 %v4388_v51, %v5483_v44 }
0x273a   :  { %v4392_v54 = vsub.f32 %v4380_v31, %v4390_v52 }
0x273c   :  { %v4394_v56 = vmul.f32 %v4392_v54, %v4392_v54 }
0x273e   :  { %v4398_v53 = vsel %vm83_vm0, %v4394_v56, 0.0 }
0x273f   :  { %4399 = vadd.xlane.f32.xlu2 %v4398_v53 }
0x27aa   :  { %v4397_v41 = vpop.xlane.xlu0 %4396 }
0x27ab   :  { %v4401_v57 = vmul.f32 %v4397_v41, %v5483_v44 }
0x27ad   :  { %v4403_v58 = vadd.f32 1e-05, %v4401_v57 }
0x27af   :  { %5194 = vrsqrt.f32 %v4403_v58  ;;  %vm4411_vm8 = vweird.f32 %v4403_v58 }
0x27b2   :  { %v4400_v59 = vpop.xlane.xlu2 %4399 }
0x27b3   :  { %v4402_v60 = vmul.f32 %v4400_v59, %v5483_v44  ;;  %v4955_v44 = vld [vmem:[%s6536_s9 + $0x3] ss:$0 sm:$0xff] }
0x27b5   :  { %v5195_v45 = vpop.eup %5194  ;;  %v4404_v61 = vadd.f32 1e-05, %v4402_v60 }
0x27b6   :  { %v4406_v6 = vmul.f32 %v5195_v45, %v4403_v58  ;;  %vm4412_vm7 = vweird.f32 %v5195_v45 }
0x27b7   :  { %5196 = vrsqrt.f32 %v4404_v61  ;;  %vm4413_vm9 = vmor %vm4411_vm8, %vm4412_vm7  ;;  %vm4421_vm2 = vweird.f32 %v4404_v61 }
0x27b8   :  { %v4407_v7 = vmul.f32 %v5195_v45, %v4406_v6 }
0x27ba   :  { %v4408_v62 = vmul.f32 0.5, %v4407_v7 }
0x27bc   :  { %v4409_v9 = vsub.f32 1.5, %v4408_v62 }
0x27bd   :  { %v5197_v27 = vpop.eup %5196 }
0x27be   :  { %v4410_v2 = vmul.f32 %v5195_v45, %v4409_v9  ;;  %v4416_v28 = vmul.f32 %v5197_v27, %v4404_v61  ;;  %vm4422_vm1 = vweird.f32 %v5197_v27 }
0x27bf   :  { %vm4423_vm3 = vmor %vm4421_vm2, %vm4422_vm1 }
0x27c0   :  { %v4414_v12 = vsel %vm4413_vm9, %v5195_v45, %v4410_v2  ;;  %v4417_v29 = vmul.f32 %v5197_v27, %v4416_v28 }
0x27c1   :  { %v4425_v10 = vmul.f32 %v4414_v12, %v4391_v4 }
0x27c2   :  { %v4418_v8 = vmul.f32 0.5, %v4417_v29 }
0x27c3   :  { %v4428_v39 = vmul.f32 %v4954_v16, %v4425_v10 }
0x27c4   :  { %v4419_v11 = vsub.f32 1.5, %v4418_v8 }
0x27c5   :  { %v4431_v40 = vadd.f32 %v4955_v44, %v4428_v39 }
0x27c6   :  { %v4420_v55 = vmul.f32 %v5197_v27, %v4419_v11 }
0x27c7   :  { %4433 = vst.msk [vmem:[%s6537_s10] sm:$0xff] %vm83_vm0, %v4431_v40 }
0x27c8   :  { %v4424_v1 = vsel %vm4423_vm3, %v5197_v27, %v4420_v55 }
0x27c9   :  { %v4426_v14 = vmul.f32 %v4424_v1, %v4392_v54 }
0x27cb   :  { %v4429_v26 = vmul.f32 %v4954_v16, %v4426_v14 }
0x27cd   :  { %v4432_v38 = vadd.f32 %v4955_v44, %v4429_v26 }
0x27cf   :  { %4434 = vst.msk [vmem:[%s6537_s10 + $0x8] sm:$0xff] %vm83_vm0, %v4432_v38 }
0x27d0   :  { %4439 = vsyncpa [#allocation3], 1 }

</bundles_post_ra>
